<compile_context>
chip_gen: v7x
topology: tpu7x:2x2x1
jax: 0.10.0
libtpu: 0.0.40
codegen_flags: <defaults>
</compile_context>

<pallas_src>
import jax
import jax.numpy as jnp
import numpy as np
from jax.experimental import pallas as pl
from jax.experimental.pallas import tpu as pltpu


def _round_up(x, m):
    return (x + m - 1) // m * m


def _vmem_limit_bytes(block_bytes):
    try:
        cap = pltpu.get_tpu_info().vmem_capacity_bytes
    except Exception:
        cap = 64 * 2**20  # smallest per-TC VMEM across v5e/v6e/v7x
    return int(min(int(cap * 0.625), 4 * block_bytes + 8 * 2**20))


# ----------------------------- Pallas kernels --------------------------------

def _matmul_bias_relu_kernel(x_ref, w_ref, b_ref, o_ref):
    # bf16 operands -> MXU, f32 accumulate; bias + ReLU epilogue in f32.
    acc = jnp.dot(x_ref[...], w_ref[...], preferred_element_type=jnp.float32)
    o_ref[...] = jnp.maximum(acc + b_ref[...], 0.0).astype(o_ref.dtype)


def _fused_tail_kernel(p2_ref, w2_ref, b2_ref, sel_ref, w3_ref, b3_ref,
                       wf1_hbm, bf1_ref, wf2_ref, bf2_ref, o_ref,
                       wf1_vmem, r3_ref, dma_sem):
    """conv2 + conv3 + flatten + fc1 + fc2 + outer ReLU, all in VMEM."""
    # Prefetch the fc1 weight (largest HBM transfer) behind conv2/conv3 compute.
    wf1_cp = pltpu.make_async_copy(wf1_hbm, wf1_vmem, dma_sem)
    wf1_cp.start()

    # ---- conv2: one matmul over im2col patches (K = 4*4*32 = 512) ----------
    h2 = jnp.dot(p2_ref[...], w2_ref[...], preferred_element_type=jnp.float32)
    h2 = jnp.maximum(h2 + b2_ref[...], 0.0).astype(jnp.bfloat16)  # [B*64, 64]

    # ---- conv3: stride-1 taps; row gathers as exact 0/1 selection matmuls --
    n_taps = sel_ref.shape[0]           # 9
    rows3 = sel_ref.shape[1]            # 36 * B, rows ordered (pos, b)
    c3 = w3_ref.shape[2]                # 64
    acc3 = jnp.zeros((rows3, c3), jnp.float32)
    for t in range(n_taps):
        g = jnp.dot(sel_ref[t], h2, preferred_element_type=jnp.float32)
        acc3 = acc3 + jnp.dot(g.astype(jnp.bfloat16), w3_ref[t],
                              preferred_element_type=jnp.float32)
    r3_ref[...] = jnp.maximum(acc3 + b3_ref[...], 0.0).astype(jnp.bfloat16)

    # ---- fc1: in-kernel (oh, ow, c) flatten via per-position accumulation --
    wf1_cp.wait()
    nb = o_ref.shape[0]                 # batch
    n_pos = wf1_vmem.shape[0]           # 36
    accf = jnp.zeros((nb, wf1_vmem.shape[2]), jnp.float32)
    for pos in range(n_pos):
        accf = accf + jnp.dot(r3_ref[pl.ds(pos * nb, nb), :], wf1_vmem[pos],
                              preferred_element_type=jnp.float32)
    h = jnp.maximum(accf + bf1_ref[...], 0.0).astype(jnp.bfloat16)

    # ---- fc2 (output padded to 128 lanes; column 0 is real) + outer ReLU ---
    y = jnp.dot(h, wf2_ref[...], preferred_element_type=jnp.float32)
    o_ref[...] = jnp.maximum(y + bf2_ref[...], 0.0)


# ----------------------------- kernel wrappers --------------------------------

def matmul_bias_relu(x, w, b, out_dtype=jnp.bfloat16, tile_m=512):
    """relu(x @ w + b).  x:[M,K], w:[K,N], b:[1,N]."""
    x = x.astype(jnp.bfloat16)
    w = w.astype(jnp.bfloat16)
    b = b.astype(jnp.float32).reshape(1, -1)
    M, K = x.shape
    _, N = w.shape

    if M <= 2 * tile_m:
        tm, Mp = M, M                       # single full-M block (grid = 1)
    else:
        tm = tile_m
        Mp = _round_up(M, tm)
        if Mp != M:
            x = jnp.pad(x, ((0, Mp - M), (0, 0)))

    ob = jnp.dtype(out_dtype).itemsize
    block_bytes = tm * K * 2 + K * N * 2 + N * 4 + tm * N * ob
    cost = pl.CostEstimate(
        flops=2 * Mp * K * N, transcendentals=0,
        bytes_accessed=Mp * K * 2 + K * N * 2 + N * 4 + Mp * N * ob)

    out = pl.pallas_call(
        _matmul_bias_relu_kernel,
        out_shape=jax.ShapeDtypeStruct((Mp, N), out_dtype),
        grid=(Mp // tm,),
        in_specs=[
            pl.BlockSpec((tm, K), lambda i: (i, 0)),
            pl.BlockSpec((K, N), lambda i: (0, 0)),   # weights stay resident
            pl.BlockSpec((1, N), lambda i: (0, 0)),
        ],
        out_specs=pl.BlockSpec((tm, N), lambda i: (i, 0)),
        compiler_params=pltpu.CompilerParams(
            dimension_semantics=("parallel",),
            vmem_limit_bytes=_vmem_limit_bytes(block_bytes)),
        cost_estimate=cost,
    )(x, w, b)
    return out[:M] if Mp != M else out


def fused_conv_fc_tail(p2, w2, b2, sel, w3, b3, wf1, bf1, wf2, bf2, batch):
    """Single fused kernel: conv2 + conv3 + flatten + fc1 + fc2 (+outer ReLU)."""
    M2, K2 = p2.shape
    rows3 = sel.shape[1]
    c3 = w3.shape[2]
    N1 = wf1.shape[2]
    N2 = wf2.shape[1]

    block_bytes = (p2.size * 2 + w2.size * 2 + sel.size * 2 + w3.size * 2
                   + wf1.size * 2 + wf2.size * 2
                   + (b2.size + b3.size + bf1.size + bf2.size) * 4
                   + rows3 * c3 * 2 + batch * N2 * 4)
    flops = 2 * (M2 * K2 * w2.shape[1]
                 + sel.shape[0] * (rows3 * M2 * c3 + rows3 * c3 * c3)
                 + rows3 * c3 * N1 + batch * N1 * N2)
    cost = pl.CostEstimate(flops=flops, transcendentals=0,
                           bytes_accessed=block_bytes)

    return pl.pallas_call(
        _fused_tail_kernel,
        out_shape=jax.ShapeDtypeStruct((batch, N2), jnp.float32),
        grid=(1,),
        in_specs=[
            pl.BlockSpec(p2.shape, lambda i: (0, 0)),
            pl.BlockSpec(w2.shape, lambda i: (0, 0)),
            pl.BlockSpec(b2.shape, lambda i: (0, 0)),
            pl.BlockSpec(sel.shape, lambda i: (0, 0, 0)),
            pl.BlockSpec(w3.shape, lambda i: (0, 0, 0)),
            pl.BlockSpec(b3.shape, lambda i: (0, 0)),
            pl.BlockSpec(memory_space=pl.ANY),        # fc1 weight stays in HBM
            pl.BlockSpec(bf1.shape, lambda i: (0, 0)),
            pl.BlockSpec(wf2.shape, lambda i: (0, 0)),
            pl.BlockSpec(bf2.shape, lambda i: (0, 0)),
        ],
        out_specs=pl.BlockSpec((batch, N2), lambda i: (0, 0)),
        scratch_shapes=[
            pltpu.VMEM(wf1.shape, jnp.bfloat16),      # prefetched fc1 weight
            pltpu.VMEM((rows3, c3), jnp.bfloat16),    # relu(conv3) activations
            pltpu.SemaphoreType.DMA,
        ],
        compiler_params=pltpu.CompilerParams(
            dimension_semantics=("arbitrary",),
            vmem_limit_bytes=_vmem_limit_bytes(block_bytes)),
        cost_estimate=cost,
    )(p2, w2, b2, sel, w3, b3, wf1, bf1, wf2, bf2)


# ----------------------------- conv glue (channel-last) -----------------------

def im2col_nhwc(x, kh, kw, stride):
    """x: [B,H,W,C] -> ([B*OH*OW, KH*KW*C], OH, OW); feature order (kh, kw, c)."""
    B, H, W, C = x.shape
    oh = (H - kh) // stride + 1
    ow = (W - kw) // stride + 1
    cols = []
    for i in range(kh):
        for j in range(kw):
            cols.append(x[:, i:i + stride * oh:stride, j:j + stride * ow:stride, :])
    p = jnp.stack(cols, axis=3)                       # [B, OH, OW, KH*KW, C]
    return p.reshape(B * oh * ow, kh * kw * C), oh, ow


def _conv3_row_selectors(batch):
    """0/1 matrices gathering conv3's 3x3 stride-1 taps from conv2's output.

    conv2-output rows are ordered (b, y, x) with y,x in [0,8); selector
    t = (i,j) maps them to conv3 rows ordered (oy*6+ox, b) so fc1 can be
    accumulated per conv3 position with contiguous row slices (in-kernel
    flatten matching PyTorch's (c, oy, ox) flatten via the wf1 repack).
    """
    sel = np.zeros((9, 36 * batch, 64 * batch), np.float32)
    for i in range(3):
        for j in range(3):
            t = i * 3 + j
            for oy in range(6):
                for ox in range(6):
                    for b in range(batch):
                        sel[t, (oy * 6 + ox) * batch + b,
                            b * 64 + (oy + i) * 8 + (ox + j)] = 1.0
    return jnp.asarray(sel)


def prepare_params(p, batch):
    """One-time repack of PyTorch-layout params for the Pallas kernels."""
    bf16 = lambda a: a.astype(jnp.bfloat16)
    f32 = lambda a: a.astype(jnp.float32)
    # conv weights OIHW -> (kh, kw, cin, cout) matrices / per-tap blocks.
    w1 = jnp.transpose(p["conv1_w"], (2, 3, 1, 0)).reshape(64, 32)     # K = 64
    w2 = jnp.transpose(p["conv2_w"], (2, 3, 1, 0)).reshape(512, 64)    # K = 512
    w3 = jnp.transpose(p["conv3_w"], (2, 3, 1, 0)).reshape(9, 64, 64)  # per-tap
    # fc1: PyTorch flatten order is (c, oy, ox); repack into per-position
    # blocks [pos, c, f] so the kernel accumulates fc1 over conv3 positions.
    wf1 = p["fc1_w"].reshape(512, 64, 36).transpose(2, 1, 0)           # [36,64,512]
    # fc2: output padded 1 -> 128 lanes (column 0 is the real value).
    wf2 = jnp.pad(p["fc2_w"].T, ((0, 0), (0, 127)))                    # [512,128]
    bf2 = jnp.pad(p["fc2_b"], (0, 127))
    return {
        "w1": bf16(w1), "b1": f32(p["conv1_b"]).reshape(1, 32),
        "w2": bf16(w2), "b2": f32(p["conv2_b"]).reshape(1, 64),
        "w3": bf16(w3), "b3": f32(p["conv3_b"]).reshape(1, 64),
        "wf1": bf16(wf1), "bf1": f32(p["fc1_b"]).reshape(1, 512),
        "wf2": bf16(wf2), "bf2": f32(bf2).reshape(1, 128),
        "sel": bf16(_conv3_row_selectors(batch)),
    }


# ----------------------------- CriticNet forward ------------------------------

def critic_net_forward(prep, x):
    """x: [B, 1, 80, 80] float32 (NCHW).  Returns [B, 1] float32."""
    B = x.shape[0]
    h = x.reshape(B, 80, 80, 1).astype(jnp.bfloat16)   # NCHW->NHWC (C=1: reshape)

    # conv1 (8x8 / stride 4): im2col on raw input + one fused matmul kernel.
    p1, oh, ow = im2col_nhwc(h, 8, 8, 4)               # [B*361, 64]
    h1 = matmul_bias_relu(p1, prep["w1"], prep["b1"])  # [B*361, 32] bf16
    h1 = h1.reshape(B, oh, ow, 32)                     # [B, 19, 19, 32]

    # conv2 patches (K = 4*4*32 = 512); conv2+conv3+flatten+fc1+fc2 fused.
    p2, _, _ = im2col_nhwc(h1, 4, 4, 2)                # [B*64, 512]
    out = fused_conv_fc_tail(p2, prep["w2"], prep["b2"], prep["sel"],
                             prep["w3"], prep["b3"], prep["wf1"], prep["bf1"],
                             prep["wf2"], prep["bf2"], B)  # [B, 128] f32
    return out[:, :1]


# ----------------------------- params & reference -----------------------------

def init_params(key):
    ks = jax.random.split(key, 10)

    def uni(k, shape, fan_in):
        bound = 1.0 / jnp.sqrt(jnp.float32(fan_in))
        return jax.random.uniform(k, shape, jnp.float32, -bound, bound)

    # conv output for input [1, 80, 80]: 80 -> 19 -> 8 -> 6; 64*6*6 = 2304.
    return {
        "conv1_w": uni(ks[0], (32, 1, 8, 8), 1 * 8 * 8),
        "conv1_b": uni(ks[1], (32,), 1 * 8 * 8),
        "conv2_w": uni(ks[2], (64, 32, 4, 4), 32 * 4 * 4),
        "conv2_b": uni(ks[3], (64,), 32 * 4 * 4),
        "conv3_w": uni(ks[4], (64, 64, 3, 3), 64 * 3 * 3),
        "conv3_b": uni(ks[5], (64,), 64 * 3 * 3),
        "fc1_w": uni(ks[6], (512, 2304), 2304),
        "fc1_b": uni(ks[7], (512,), 2304),
        "fc2_w": uni(ks[8], (1, 512), 512),
        "fc2_b": uni(ks[9], (1,), 512),
    }


def reference_forward(params, x):
    def conv(x, w, b, stride):
        y = jax.lax.conv_general_dilated(
            x, w, (stride, stride), "VALID",
            dimension_numbers=("NCHW", "OIHW", "NCHW"))
        return jax.nn.relu(y + b.reshape(1, -1, 1, 1))

    x = conv(x, params["conv1_w"], params["conv1_b"], 4)
    x = conv(x, params["conv2_w"], params["conv2_b"], 2)
    x = conv(x, params["conv3_w"], params["conv3_b"], 1)
    x = x.reshape(x.shape[0], -1)
    x = jax.nn.relu(x @ params["fc1_w"].T + params["fc1_b"])
    x = jax.nn.relu(x @ params["fc2_w"].T + params["fc2_b"])
    return x


# ----------------------------- main -------------------------------------------

if __name__ == "__main__":
    key = jax.random.PRNGKey(0)
    k_param, k_x = jax.random.split(key)
    params = init_params(k_param)

    B = 2
    prep = prepare_params(params, B)

    # Spatial size must be 80x80 so the flatten matches fc1's 2304 inputs.
    x = jax.random.normal(k_x, (B, 1, 80, 80), dtype=jnp.float32)

    fwd = jax.jit(critic_net_forward)
    out = jax.block_until_ready(fwd(prep, x))
    assert out.shape == (B, 1), out.shape

    ref = jax.block_until_ready(jax.jit(reference_forward)(params, x))
    assert jnp.allclose(out, ref, rtol=5e-2, atol=5e-2), (out, ref)

    print("KERNEL_OK")
</pallas_src>

<mosaic_0001>
module attributes {stable_mosaic.version = 11 : i64} {
  func.func @_matmul_bias_relu_kernel(%arg0: i32, %arg1: memref<722x64xbf16, #tpu.memory_space<vmem>>, %arg2: memref<64x32xbf16, #tpu.memory_space<vmem>>, %arg3: memref<1x32xf32, #tpu.memory_space<vmem>>, %arg4: memref<722x32xbf16, #tpu.memory_space<vmem>>) attributes {dimension_semantics = [#tpu.dimension_semantics<parallel>], iteration_bounds = array<i64: 1>, scalar_prefetch = 0 : i64, scratch_operands = 0 : i64, tpu.core_type = #tpu.core_type<tc>, window_params = [{transform_indices = @transform_0, window_bounds = array<i64: 722, 64>}, {pipeline_mode = #tpu.pipeline_mode<synchronous>, transform_indices = @transform_1, window_bounds = array<i64: 64, 32>}, {pipeline_mode = #tpu.pipeline_mode<synchronous>, transform_indices = @transform_2, window_bounds = array<i64: 1, 32>}, {transform_indices = @transform_3, window_bounds = array<i64: 722, 32>}]} {
    %c0 = arith.constant 0 : index
    %c0_0 = arith.constant 0 : index
    %0 = vector.load %arg1[%c0, %c0_0] : memref<722x64xbf16, #tpu.memory_space<vmem>>, vector<722x64xbf16>
    %c0_1 = arith.constant 0 : index
    %c0_2 = arith.constant 0 : index
    %1 = vector.load %arg2[%c0_1, %c0_2] : memref<64x32xbf16, #tpu.memory_space<vmem>>, vector<64x32xbf16>
    %cst = arith.constant dense<0.000000e+00> : vector<722x32xf32>
    %2 = tpu.matmul %0, %1, %cst {dimension_numbers = #tpu.dot_dimension_numbers<[1], [0], [0], [1], [0, 0, 1, 1], [], []>} : vector<722x64xbf16>, vector<64x32xbf16>, vector<722x32xf32> -> vector<722x32xf32>
    %c0_3 = arith.constant 0 : index
    %c0_4 = arith.constant 0 : index
    %3 = vector.load %arg3[%c0_3, %c0_4] : memref<1x32xf32, #tpu.memory_space<vmem>>, vector<1x32xf32>
    %4 = vector.broadcast %3 : vector<1x32xf32> to vector<722x32xf32>
    %5 = arith.addf %2, %4 : vector<722x32xf32>
    %cst_5 = arith.constant 0.000000e+00 : f32
    %6 = vector.broadcast %cst_5 : f32 to vector<722x32xf32>
    %7 = arith.maximumf %5, %6 : vector<722x32xf32>
    %8 = arith.truncf %7 : vector<722x32xf32> to vector<722x32xbf16>
    %c0_6 = arith.constant 0 : index
    %c0_7 = arith.constant 0 : index
    %9 = vector.load %arg4[%c0_6, %c0_7] : memref<722x32xbf16, #tpu.memory_space<vmem>>, vector<722x32xbf16>
    tpu.vector_store %arg4[%c0_6, %c0_7], %8 {strides = array<i32>} : memref<722x32xbf16, #tpu.memory_space<vmem>>, vector<722x32xbf16>,
    return
  }
  func.func @transform_0(%arg0: i32) -> (i32, i32) {
    %c0_i32 = arith.constant 0 : i32
    %c0_i32_0 = arith.constant 0 : i32
    return %arg0, %c0_i32 : i32, i32
  }
  func.func @transform_1(%arg0: i32) -> (i32, i32) {
    %c0_i32 = arith.constant 0 : i32
    %c0_i32_0 = arith.constant 0 : i32
    %c0_i32_1 = arith.constant 0 : i32
    return %c0_i32, %c0_i32_0 : i32, i32
  }
  func.func @transform_2(%arg0: i32) -> (i32, i32) {
    %c0_i32 = arith.constant 0 : i32
    %c0_i32_0 = arith.constant 0 : i32
    %c0_i32_1 = arith.constant 0 : i32
    return %c0_i32, %c0_i32_0 : i32, i32
  }
  func.func @transform_3(%arg0: i32) -> (i32, i32) {
    %c0_i32 = arith.constant 0 : i32
    %c0_i32_0 = arith.constant 0 : i32
    return %arg0, %c0_i32 : i32, i32
  }
}

module attributes {stable_mosaic.version = 11 : i64} {
  func.func @_fused_tail_kernel(%arg0: i32, %arg1: memref<128x512xbf16, #tpu.memory_space<vmem>>, %arg2: memref<512x64xbf16, #tpu.memory_space<vmem>>, %arg3: memref<1x64xf32, #tpu.memory_space<vmem>>, %arg4: memref<9x72x128xbf16, #tpu.memory_space<vmem>>, %arg5: memref<9x64x64xbf16, #tpu.memory_space<vmem>>, %arg6: memref<1x64xf32, #tpu.memory_space<vmem>>, %arg7: memref<36x64x512xbf16, #tpu.memory_space<any>>, %arg8: memref<1x512xf32, #tpu.memory_space<vmem>>, %arg9: memref<512x128xbf16, #tpu.memory_space<vmem>>, %arg10: memref<1x128xf32, #tpu.memory_space<vmem>>, %arg11: memref<2x128xf32, #tpu.memory_space<vmem>>, %arg12: memref<36x64x512xbf16, #tpu.memory_space<vmem>>, %arg13: memref<72x64xbf16, #tpu.memory_space<vmem>>, %arg14: memref<!tpu.dma_semaphore, #tpu.memory_space<semaphore_mem>>) attributes {dimension_semantics = [#tpu.dimension_semantics<arbitrary>], iteration_bounds = array<i64: 1>, scalar_prefetch = 0 : i64, scratch_operands = 3 : i64, tpu.core_type = #tpu.core_type<tc>, window_params = [{pipeline_mode = #tpu.pipeline_mode<synchronous>, transform_indices = @transform_0, window_bounds = array<i64: 128, 512>}, {pipeline_mode = #tpu.pipeline_mode<synchronous>, transform_indices = @transform_1, window_bounds = array<i64: 512, 64>}, {pipeline_mode = #tpu.pipeline_mode<synchronous>, transform_indices = @transform_2, window_bounds = array<i64: 1, 64>}, {pipeline_mode = #tpu.pipeline_mode<synchronous>, transform_indices = @transform_3, window_bounds = array<i64: 9, 72, 128>}, {pipeline_mode = #tpu.pipeline_mode<synchronous>, transform_indices = @transform_4, window_bounds = array<i64: 9, 64, 64>}, {pipeline_mode = #tpu.pipeline_mode<synchronous>, transform_indices = @transform_5, window_bounds = array<i64: 1, 64>}, {}, {pipeline_mode = #tpu.pipeline_mode<synchronous>, transform_indices = @transform_7, window_bounds = array<i64: 1, 512>}, {pipeline_mode = #tpu.pipeline_mode<synchronous>, transform_indices = @transform_8, window_bounds = array<i64: 512, 128>}, {pipeline_mode = #tpu.pipeline_mode<synchronous>, transform_indices = @transform_9, window_bounds = array<i64: 1, 128>}, {pipeline_mode = #tpu.pipeline_mode<synchronous>, transform_indices = @transform_10, window_bounds = array<i64: 2, 128>}]} {
    tpu.enqueue_dma source(%arg7 : memref<36x64x512xbf16, #tpu.memory_space<any>>) target(%arg12 : memref<36x64x512xbf16, #tpu.memory_space<vmem>>) target_semaphore(%arg14 : memref<!tpu.dma_semaphore, #tpu.memory_space<semaphore_mem>>)
    %c0 = arith.constant 0 : index
    %c0_0 = arith.constant 0 : index
    %0 = vector.load %arg1[%c0, %c0_0] : memref<128x512xbf16, #tpu.memory_space<vmem>>, vector<128x512xbf16>
    %c0_1 = arith.constant 0 : index
    %c0_2 = arith.constant 0 : index
    %1 = vector.load %arg2[%c0_1, %c0_2] : memref<512x64xbf16, #tpu.memory_space<vmem>>, vector<512x64xbf16>
    %cst = arith.constant dense<0.000000e+00> : vector<128x64xf32>
    %2 = tpu.matmul %0, %1, %cst {dimension_numbers = #tpu.dot_dimension_numbers<[1], [0], [0], [1], [0, 0, 1, 1], [], []>} : vector<128x512xbf16>, vector<512x64xbf16>, vector<128x64xf32> -> vector<128x64xf32>
    %c0_3 = arith.constant 0 : index
    %c0_4 = arith.constant 0 : index
    %3 = vector.load %arg3[%c0_3, %c0_4] : memref<1x64xf32, #tpu.memory_space<vmem>>, vector<1x64xf32>
    %4 = vector.broadcast %3 : vector<1x64xf32> to vector<128x64xf32>
    %5 = arith.addf %2, %4 : vector<128x64xf32>
    %cst_5 = arith.constant 0.000000e+00 : f32
    %6 = vector.broadcast %cst_5 : f32 to vector<128x64xf32>
    %7 = arith.maximumf %5, %6 : vector<128x64xf32>
    %8 = arith.truncf %7 : vector<128x64xf32> to vector<128x64xbf16>
    %cst_6 = arith.constant 0.000000e+00 : f32
    %9 = vector.broadcast %cst_6 : f32 to vector<72x64xf32>
    %c0_7 = arith.constant 0 : index
    %c0_8 = arith.constant 0 : index
    %c0_9 = arith.constant 0 : index
    %10 = vector.load %arg4[%c0_7, %c0_8, %c0_9] : memref<9x72x128xbf16, #tpu.memory_space<vmem>>, vector<1x72x128xbf16>
    %11 = vector.shape_cast %10 : vector<1x72x128xbf16> to vector<72x128xbf16>
    %cst_10 = arith.constant dense<0.000000e+00> : vector<72x64xf32>
    %12 = tpu.matmul %11, %8, %cst_10 {dimension_numbers = #tpu.dot_dimension_numbers<[1], [0], [0], [1], [0, 0, 1, 1], [], []>} : vector<72x128xbf16>, vector<128x64xbf16>, vector<72x64xf32> -> vector<72x64xf32>
    %13 = arith.truncf %12 : vector<72x64xf32> to vector<72x64xbf16>
    %c0_11 = arith.constant 0 : index
    %c0_12 = arith.constant 0 : index
    %c0_13 = arith.constant 0 : index
    %14 = vector.load %arg5[%c0_11, %c0_12, %c0_13] : memref<9x64x64xbf16, #tpu.memory_space<vmem>>, vector<1x64x64xbf16>
    %15 = vector.shape_cast %14 : vector<1x64x64xbf16> to vector<64x64xbf16>
    %cst_14 = arith.constant dense<0.000000e+00> : vector<72x64xf32>
    %16 = tpu.matmul %13, %15, %cst_14 {dimension_numbers = #tpu.dot_dimension_numbers<[1], [0], [0], [1], [0, 0, 1, 1], [], []>} : vector<72x64xbf16>, vector<64x64xbf16>, vector<72x64xf32> -> vector<72x64xf32>
    %17 = arith.addf %9, %16 : vector<72x64xf32>
    %c1 = arith.constant 1 : index
    %c0_15 = arith.constant 0 : index
    %c0_16 = arith.constant 0 : index
    %18 = vector.load %arg4[%c1, %c0_15, %c0_16] : memref<9x72x128xbf16, #tpu.memory_space<vmem>>, vector<1x72x128xbf16>
    %19 = vector.shape_cast %18 : vector<1x72x128xbf16> to vector<72x128xbf16>
    %cst_17 = arith.constant dense<0.000000e+00> : vector<72x64xf32>
    %20 = tpu.matmul %19, %8, %cst_17 {dimension_numbers = #tpu.dot_dimension_numbers<[1], [0], [0], [1], [0, 0, 1, 1], [], []>} : vector<72x128xbf16>, vector<128x64xbf16>, vector<72x64xf32> -> vector<72x64xf32>
    %21 = arith.truncf %20 : vector<72x64xf32> to vector<72x64xbf16>
    %c1_18 = arith.constant 1 : index
    %c0_19 = arith.constant 0 : index
    %c0_20 = arith.constant 0 : index
    %22 = vector.load %arg5[%c1_18, %c0_19, %c0_20] : memref<9x64x64xbf16, #tpu.memory_space<vmem>>, vector<1x64x64xbf16>
    %23 = vector.shape_cast %22 : vector<1x64x64xbf16> to vector<64x64xbf16>
    %cst_21 = arith.constant dense<0.000000e+00> : vector<72x64xf32>
    %24 = tpu.matmul %21, %23, %cst_21 {dimension_numbers = #tpu.dot_dimension_numbers<[1], [0], [0], [1], [0, 0, 1, 1], [], []>} : vector<72x64xbf16>, vector<64x64xbf16>, vector<72x64xf32> -> vector<72x64xf32>
    %25 = arith.addf %17, %24 : vector<72x64xf32>
    %c2 = arith.constant 2 : index
    %c0_22 = arith.constant 0 : index
    %c0_23 = arith.constant 0 : index
    %26 = vector.load %arg4[%c2, %c0_22, %c0_23] : memref<9x72x128xbf16, #tpu.memory_space<vmem>>, vector<1x72x128xbf16>
    %27 = vector.shape_cast %26 : vector<1x72x128xbf16> to vector<72x128xbf16>
    %cst_24 = arith.constant dense<0.000000e+00> : vector<72x64xf32>
    %28 = tpu.matmul %27, %8, %cst_24 {dimension_numbers = #tpu.dot_dimension_numbers<[1], [0], [0], [1], [0, 0, 1, 1], [], []>} : vector<72x128xbf16>, vector<128x64xbf16>, vector<72x64xf32> -> vector<72x64xf32>
    %29 = arith.truncf %28 : vector<72x64xf32> to vector<72x64xbf16>
    %c2_25 = arith.constant 2 : index
    %c0_26 = arith.constant 0 : index
    %c0_27 = arith.constant 0 : index
    %30 = vector.load %arg5[%c2_25, %c0_26, %c0_27] : memref<9x64x64xbf16, #tpu.memory_space<vmem>>, vector<1x64x64xbf16>
    %31 = vector.shape_cast %30 : vector<1x64x64xbf16> to vector<64x64xbf16>
    %cst_28 = arith.constant dense<0.000000e+00> : vector<72x64xf32>
    %32 = tpu.matmul %29, %31, %cst_28 {dimension_numbers = #tpu.dot_dimension_numbers<[1], [0], [0], [1], [0, 0, 1, 1], [], []>} : vector<72x64xbf16>, vector<64x64xbf16>, vector<72x64xf32> -> vector<72x64xf32>
    %33 = arith.addf %25, %32 : vector<72x64xf32>
    %c3 = arith.constant 3 : index
    %c0_29 = arith.constant 0 : index
    %c0_30 = arith.constant 0 : index
    %34 = vector.load %arg4[%c3, %c0_29, %c0_30] : memref<9x72x128xbf16, #tpu.memory_space<vmem>>, vector<1x72x128xbf16>
    %35 = vector.shape_cast %34 : vector<1x72x128xbf16> to vector<72x128xbf16>
    %cst_31 = arith.constant dense<0.000000e+00> : vector<72x64xf32>
    %36 = tpu.matmul %35, %8, %cst_31 {dimension_numbers = #tpu.dot_dimension_numbers<[1], [0], [0], [1], [0, 0, 1, 1], [], []>} : vector<72x128xbf16>, vector<128x64xbf16>, vector<72x64xf32> -> vector<72x64xf32>
    %37 = arith.truncf %36 : vector<72x64xf32> to vector<72x64xbf16>
    %c3_32 = arith.constant 3 : index
    %c0_33 = arith.constant 0 : index
    %c0_34 = arith.constant 0 : index
    %38 = vector.load %arg5[%c3_32, %c0_33, %c0_34] : memref<9x64x64xbf16, #tpu.memory_space<vmem>>, vector<1x64x64xbf16>
    %39 = vector.shape_cast %38 : vector<1x64x64xbf16> to vector<64x64xbf16>
    %cst_35 = arith.constant dense<0.000000e+00> : vector<72x64xf32>
    %40 = tpu.matmul %37, %39, %cst_35 {dimension_numbers = #tpu.dot_dimension_numbers<[1], [0], [0], [1], [0, 0, 1, 1], [], []>} : vector<72x64xbf16>, vector<64x64xbf16>, vector<72x64xf32> -> vector<72x64xf32>
    %41 = arith.addf %33, %40 : vector<72x64xf32>
    %c4 = arith.constant 4 : index
    %c0_36 = arith.constant 0 : index
    %c0_37 = arith.constant 0 : index
    %42 = vector.load %arg4[%c4, %c0_36, %c0_37] : memref<9x72x128xbf16, #tpu.memory_space<vmem>>, vector<1x72x128xbf16>
    %43 = vector.shape_cast %42 : vector<1x72x128xbf16> to vector<72x128xbf16>
    %cst_38 = arith.constant dense<0.000000e+00> : vector<72x64xf32>
    %44 = tpu.matmul %43, %8, %cst_38 {dimension_numbers = #tpu.dot_dimension_numbers<[1], [0], [0], [1], [0, 0, 1, 1], [], []>} : vector<72x128xbf16>, vector<128x64xbf16>, vector<72x64xf32> -> vector<72x64xf32>
    %45 = arith.truncf %44 : vector<72x64xf32> to vector<72x64xbf16>
    %c4_39 = arith.constant 4 : index
    %c0_40 = arith.constant 0 : index
    %c0_41 = arith.constant 0 : index
    %46 = vector.load %arg5[%c4_39, %c0_40, %c0_41] : memref<9x64x64xbf16, #tpu.memory_space<vmem>>, vector<1x64x64xbf16>
    %47 = vector.shape_cast %46 : vector<1x64x64xbf16> to vector<64x64xbf16>
    %cst_42 = arith.constant dense<0.000000e+00> : vector<72x64xf32>
    %48 = tpu.matmul %45, %47, %cst_42 {dimension_numbers = #tpu.dot_dimension_numbers<[1], [0], [0], [1], [0, 0, 1, 1], [], []>} : vector<72x64xbf16>, vector<64x64xbf16>, vector<72x64xf32> -> vector<72x64xf32>
    %49 = arith.addf %41, %48 : vector<72x64xf32>
    %c5 = arith.constant 5 : index
    %c0_43 = arith.constant 0 : index
    %c0_44 = arith.constant 0 : index
    %50 = vector.load %arg4[%c5, %c0_43, %c0_44] : memref<9x72x128xbf16, #tpu.memory_space<vmem>>, vector<1x72x128xbf16>
    %51 = vector.shape_cast %50 : vector<1x72x128xbf16> to vector<72x128xbf16>
    %cst_45 = arith.constant dense<0.000000e+00> : vector<72x64xf32>
    %52 = tpu.matmul %51, %8, %cst_45 {dimension_numbers = #tpu.dot_dimension_numbers<[1], [0], [0], [1], [0, 0, 1, 1], [], []>} : vector<72x128xbf16>, vector<128x64xbf16>, vector<72x64xf32> -> vector<72x64xf32>
    %53 = arith.truncf %52 : vector<72x64xf32> to vector<72x64xbf16>
    %c5_46 = arith.constant 5 : index
    %c0_47 = arith.constant 0 : index
    %c0_48 = arith.constant 0 : index
    %54 = vector.load %arg5[%c5_46, %c0_47, %c0_48] : memref<9x64x64xbf16, #tpu.memory_space<vmem>>, vector<1x64x64xbf16>
    %55 = vector.shape_cast %54 : vector<1x64x64xbf16> to vector<64x64xbf16>
    %cst_49 = arith.constant dense<0.000000e+00> : vector<72x64xf32>
    %56 = tpu.matmul %53, %55, %cst_49 {dimension_numbers = #tpu.dot_dimension_numbers<[1], [0], [0], [1], [0, 0, 1, 1], [], []>} : vector<72x64xbf16>, vector<64x64xbf16>, vector<72x64xf32> -> vector<72x64xf32>
    %57 = arith.addf %49, %56 : vector<72x64xf32>
    %c6 = arith.constant 6 : index
    %c0_50 = arith.constant 0 : index
    %c0_51 = arith.constant 0 : index
    %58 = vector.load %arg4[%c6, %c0_50, %c0_51] : memref<9x72x128xbf16, #tpu.memory_space<vmem>>, vector<1x72x128xbf16>
    %59 = vector.shape_cast %58 : vector<1x72x128xbf16> to vector<72x128xbf16>
    %cst_52 = arith.constant dense<0.000000e+00> : vector<72x64xf32>
    %60 = tpu.matmul %59, %8, %cst_52 {dimension_numbers = #tpu.dot_dimension_numbers<[1], [0], [0], [1], [0, 0, 1, 1], [], []>} : vector<72x128xbf16>, vector<128x64xbf16>, vector<72x64xf32> -> vector<72x64xf32>
    %61 = arith.truncf %60 : vector<72x64xf32> to vector<72x64xbf16>
    %c6_53 = arith.constant 6 : index
    %c0_54 = arith.constant 0 : index
    %c0_55 = arith.constant 0 : index
    %62 = vector.load %arg5[%c6_53, %c0_54, %c0_55] : memref<9x64x64xbf16, #tpu.memory_space<vmem>>, vector<1x64x64xbf16>
    %63 = vector.shape_cast %62 : vector<1x64x64xbf16> to vector<64x64xbf16>
    %cst_56 = arith.constant dense<0.000000e+00> : vector<72x64xf32>
    %64 = tpu.matmul %61, %63, %cst_56 {dimension_numbers = #tpu.dot_dimension_numbers<[1], [0], [0], [1], [0, 0, 1, 1], [], []>} : vector<72x64xbf16>, vector<64x64xbf16>, vector<72x64xf32> -> vector<72x64xf32>
    %65 = arith.addf %57, %64 : vector<72x64xf32>
    %c7 = arith.constant 7 : index
    %c0_57 = arith.constant 0 : index
    %c0_58 = arith.constant 0 : index
    %66 = vector.load %arg4[%c7, %c0_57, %c0_58] : memref<9x72x128xbf16, #tpu.memory_space<vmem>>, vector<1x72x128xbf16>
    %67 = vector.shape_cast %66 : vector<1x72x128xbf16> to vector<72x128xbf16>
    %cst_59 = arith.constant dense<0.000000e+00> : vector<72x64xf32>
    %68 = tpu.matmul %67, %8, %cst_59 {dimension_numbers = #tpu.dot_dimension_numbers<[1], [0], [0], [1], [0, 0, 1, 1], [], []>} : vector<72x128xbf16>, vector<128x64xbf16>, vector<72x64xf32> -> vector<72x64xf32>
    %69 = arith.truncf %68 : vector<72x64xf32> to vector<72x64xbf16>
    %c7_60 = arith.constant 7 : index
    %c0_61 = arith.constant 0 : index
    %c0_62 = arith.constant 0 : index
    %70 = vector.load %arg5[%c7_60, %c0_61, %c0_62] : memref<9x64x64xbf16, #tpu.memory_space<vmem>>, vector<1x64x64xbf16>
    %71 = vector.shape_cast %70 : vector<1x64x64xbf16> to vector<64x64xbf16>
    %cst_63 = arith.constant dense<0.000000e+00> : vector<72x64xf32>
    %72 = tpu.matmul %69, %71, %cst_63 {dimension_numbers = #tpu.dot_dimension_numbers<[1], [0], [0], [1], [0, 0, 1, 1], [], []>} : vector<72x64xbf16>, vector<64x64xbf16>, vector<72x64xf32> -> vector<72x64xf32>
    %73 = arith.addf %65, %72 : vector<72x64xf32>
    %c8 = arith.constant 8 : index
    %c0_64 = arith.constant 0 : index
    %c0_65 = arith.constant 0 : index
    %74 = vector.load %arg4[%c8, %c0_64, %c0_65] : memref<9x72x128xbf16, #tpu.memory_space<vmem>>, vector<1x72x128xbf16>
    %75 = vector.shape_cast %74 : vector<1x72x128xbf16> to vector<72x128xbf16>
    %cst_66 = arith.constant dense<0.000000e+00> : vector<72x64xf32>
    %76 = tpu.matmul %75, %8, %cst_66 {dimension_numbers = #tpu.dot_dimension_numbers<[1], [0], [0], [1], [0, 0, 1, 1], [], []>} : vector<72x128xbf16>, vector<128x64xbf16>, vector<72x64xf32> -> vector<72x64xf32>
    %77 = arith.truncf %76 : vector<72x64xf32> to vector<72x64xbf16>
    %c8_67 = arith.constant 8 : index
    %c0_68 = arith.constant 0 : index
    %c0_69 = arith.constant 0 : index
    %78 = vector.load %arg5[%c8_67, %c0_68, %c0_69] : memref<9x64x64xbf16, #tpu.memory_space<vmem>>, vector<1x64x64xbf16>
    %79 = vector.shape_cast %78 : vector<1x64x64xbf16> to vector<64x64xbf16>
    %cst_70 = arith.constant dense<0.000000e+00> : vector<72x64xf32>
    %80 = tpu.matmul %77, %79, %cst_70 {dimension_numbers = #tpu.dot_dimension_numbers<[1], [0], [0], [1], [0, 0, 1, 1], [], []>} : vector<72x64xbf16>, vector<64x64xbf16>, vector<72x64xf32> -> vector<72x64xf32>
    %81 = arith.addf %73, %80 : vector<72x64xf32>
    %c0_71 = arith.constant 0 : index
    %c0_72 = arith.constant 0 : index
    %82 = vector.load %arg6[%c0_71, %c0_72] : memref<1x64xf32, #tpu.memory_space<vmem>>, vector<1x64xf32>
    %83 = vector.broadcast %82 : vector<1x64xf32> to vector<72x64xf32>
    %84 = arith.addf %81, %83 : vector<72x64xf32>
    %cst_73 = arith.constant 0.000000e+00 : f32
    %85 = vector.broadcast %cst_73 : f32 to vector<72x64xf32>
    %86 = arith.maximumf %84, %85 : vector<72x64xf32>
    %87 = arith.truncf %86 : vector<72x64xf32> to vector<72x64xbf16>
    %c0_74 = arith.constant 0 : index
    %c0_75 = arith.constant 0 : index
    %88 = vector.load %arg13[%c0_74, %c0_75] : memref<72x64xbf16, #tpu.memory_space<vmem>>, vector<72x64xbf16>
    tpu.vector_store %arg13[%c0_74, %c0_75], %87 {strides = array<i32>} : memref<72x64xbf16, #tpu.memory_space<vmem>>, vector<72x64xbf16>,
    tpu.wait_dma2 semaphore(%arg14 : memref<!tpu.dma_semaphore, #tpu.memory_space<semaphore_mem>>) src(%arg7 : memref<36x64x512xbf16, #tpu.memory_space<any>>) dst(%arg12 : memref<36x64x512xbf16, #tpu.memory_space<vmem>>)
    %cst_76 = arith.constant 0.000000e+00 : f32
    %89 = vector.broadcast %cst_76 : f32 to vector<2x512xf32>
    %c0_77 = arith.constant 0 : index
    %c0_78 = arith.constant 0 : index
    %90 = vector.load %arg13[%c0_77, %c0_78] : memref<72x64xbf16, #tpu.memory_space<vmem>>, vector<2x64xbf16>
    %c0_79 = arith.constant 0 : index
    %c0_80 = arith.constant 0 : index
    %c0_81 = arith.constant 0 : index
    %91 = vector.load %arg12[%c0_79, %c0_80, %c0_81] : memref<36x64x512xbf16, #tpu.memory_space<vmem>>, vector<1x64x512xbf16>
    %92 = vector.shape_cast %91 : vector<1x64x512xbf16> to vector<64x512xbf16>
    %cst_82 = arith.constant dense<0.000000e+00> : vector<2x512xf32>
    %93 = tpu.matmul %90, %92, %cst_82 {dimension_numbers = #tpu.dot_dimension_numbers<[1], [0], [0], [1], [0, 0, 1, 1], [], []>} : vector<2x64xbf16>, vector<64x512xbf16>, vector<2x512xf32> -> vector<2x512xf32>
    %94 = arith.addf %89, %93 : vector<2x512xf32>
    %c2_83 = arith.constant 2 : index
    %c0_84 = arith.constant 0 : index
    %95 = vector.load %arg13[%c2_83, %c0_84] : memref<72x64xbf16, #tpu.memory_space<vmem>>, vector<2x64xbf16>
    %c1_85 = arith.constant 1 : index
    %c0_86 = arith.constant 0 : index
    %c0_87 = arith.constant 0 : index
    %96 = vector.load %arg12[%c1_85, %c0_86, %c0_87] : memref<36x64x512xbf16, #tpu.memory_space<vmem>>, vector<1x64x512xbf16>
    %97 = vector.shape_cast %96 : vector<1x64x512xbf16> to vector<64x512xbf16>
    %cst_88 = arith.constant dense<0.000000e+00> : vector<2x512xf32>
    %98 = tpu.matmul %95, %97, %cst_88 {dimension_numbers = #tpu.dot_dimension_numbers<[1], [0], [0], [1], [0, 0, 1, 1], [], []>} : vector<2x64xbf16>, vector<64x512xbf16>, vector<2x512xf32> -> vector<2x512xf32>
    %99 = arith.addf %94, %98 : vector<2x512xf32>
    %c4_89 = arith.constant 4 : index
    %c0_90 = arith.constant 0 : index
    %100 = vector.load %arg13[%c4_89, %c0_90] : memref<72x64xbf16, #tpu.memory_space<vmem>>, vector<2x64xbf16>
    %c2_91 = arith.constant 2 : index
    %c0_92 = arith.constant 0 : index
    %c0_93 = arith.constant 0 : index
    %101 = vector.load %arg12[%c2_91, %c0_92, %c0_93] : memref<36x64x512xbf16, #tpu.memory_space<vmem>>, vector<1x64x512xbf16>
    %102 = vector.shape_cast %101 : vector<1x64x512xbf16> to vector<64x512xbf16>
    %cst_94 = arith.constant dense<0.000000e+00> : vector<2x512xf32>
    %103 = tpu.matmul %100, %102, %cst_94 {dimension_numbers = #tpu.dot_dimension_numbers<[1], [0], [0], [1], [0, 0, 1, 1], [], []>} : vector<2x64xbf16>, vector<64x512xbf16>, vector<2x512xf32> -> vector<2x512xf32>
    %104 = arith.addf %99, %103 : vector<2x512xf32>
    %c6_95 = arith.constant 6 : index
    %c0_96 = arith.constant 0 : index
    %105 = vector.load %arg13[%c6_95, %c0_96] : memref<72x64xbf16, #tpu.memory_space<vmem>>, vector<2x64xbf16>
    %c3_97 = arith.constant 3 : index
    %c0_98 = arith.constant 0 : index
    %c0_99 = arith.constant 0 : index
    %106 = vector.load %arg12[%c3_97, %c0_98, %c0_99] : memref<36x64x512xbf16, #tpu.memory_space<vmem>>, vector<1x64x512xbf16>
    %107 = vector.shape_cast %106 : vector<1x64x512xbf16> to vector<64x512xbf16>
    %cst_100 = arith.constant dense<0.000000e+00> : vector<2x512xf32>
    %108 = tpu.matmul %105, %107, %cst_100 {dimension_numbers = #tpu.dot_dimension_numbers<[1], [0], [0], [1], [0, 0, 1, 1], [], []>} : vector<2x64xbf16>, vector<64x512xbf16>, vector<2x512xf32> -> vector<2x512xf32>
    %109 = arith.addf %104, %108 : vector<2x512xf32>
    %c8_101 = arith.constant 8 : index
    %c0_102 = arith.constant 0 : index
    %110 = vector.load %arg13[%c8_101, %c0_102] : memref<72x64xbf16, #tpu.memory_space<vmem>>, vector<2x64xbf16>
    %c4_103 = arith.constant 4 : index
    %c0_104 = arith.constant 0 : index
    %c0_105 = arith.constant 0 : index
    %111 = vector.load %arg12[%c4_103, %c0_104, %c0_105] : memref<36x64x512xbf16, #tpu.memory_space<vmem>>, vector<1x64x512xbf16>
    %112 = vector.shape_cast %111 : vector<1x64x512xbf16> to vector<64x512xbf16>
    %cst_106 = arith.constant dense<0.000000e+00> : vector<2x512xf32>
    %113 = tpu.matmul %110, %112, %cst_106 {dimension_numbers = #tpu.dot_dimension_numbers<[1], [0], [0], [1], [0, 0, 1, 1], [], []>} : vector<2x64xbf16>, vector<64x512xbf16>, vector<2x512xf32> -> vector<2x512xf32>
    %114 = arith.addf %109, %113 : vector<2x512xf32>
    %c10 = arith.constant 10 : index
    %c0_107 = arith.constant 0 : index
    %115 = vector.load %arg13[%c10, %c0_107] : memref<72x64xbf16, #tpu.memory_space<vmem>>, vector<2x64xbf16>
    %c5_108 = arith.constant 5 : index
    %c0_109 = arith.constant 0 : index
    %c0_110 = arith.constant 0 : index
    %116 = vector.load %arg12[%c5_108, %c0_109, %c0_110] : memref<36x64x512xbf16, #tpu.memory_space<vmem>>, vector<1x64x512xbf16>
    %117 = vector.shape_cast %116 : vector<1x64x512xbf16> to vector<64x512xbf16>
    %cst_111 = arith.constant dense<0.000000e+00> : vector<2x512xf32>
    %118 = tpu.matmul %115, %117, %cst_111 {dimension_numbers = #tpu.dot_dimension_numbers<[1], [0], [0], [1], [0, 0, 1, 1], [], []>} : vector<2x64xbf16>, vector<64x512xbf16>, vector<2x512xf32> -> vector<2x512xf32>
    %119 = arith.addf %114, %118 : vector<2x512xf32>
    %c12 = arith.constant 12 : index
    %c0_112 = arith.constant 0 : index
    %120 = vector.load %arg13[%c12, %c0_112] : memref<72x64xbf16, #tpu.memory_space<vmem>>, vector<2x64xbf16>
    %c6_113 = arith.constant 6 : index
    %c0_114 = arith.constant 0 : index
    %c0_115 = arith.constant 0 : index
    %121 = vector.load %arg12[%c6_113, %c0_114, %c0_115] : memref<36x64x512xbf16, #tpu.memory_space<vmem>>, vector<1x64x512xbf16>
    %122 = vector.shape_cast %121 : vector<1x64x512xbf16> to vector<64x512xbf16>
    %cst_116 = arith.constant dense<0.000000e+00> : vector<2x512xf32>
    %123 = tpu.matmul %120, %122, %cst_116 {dimension_numbers = #tpu.dot_dimension_numbers<[1], [0], [0], [1], [0, 0, 1, 1], [], []>} : vector<2x64xbf16>, vector<64x512xbf16>, vector<2x512xf32> -> vector<2x512xf32>
    %124 = arith.addf %119, %123 : vector<2x512xf32>
    %c14 = arith.constant 14 : index
    %c0_117 = arith.constant 0 : index
    %125 = vector.load %arg13[%c14, %c0_117] : memref<72x64xbf16, #tpu.memory_space<vmem>>, vector<2x64xbf16>
    %c7_118 = arith.constant 7 : index
    %c0_119 = arith.constant 0 : index
    %c0_120 = arith.constant 0 : index
    %126 = vector.load %arg12[%c7_118, %c0_119, %c0_120] : memref<36x64x512xbf16, #tpu.memory_space<vmem>>, vector<1x64x512xbf16>
    %127 = vector.shape_cast %126 : vector<1x64x512xbf16> to vector<64x512xbf16>
    %cst_121 = arith.constant dense<0.000000e+00> : vector<2x512xf32>
    %128 = tpu.matmul %125, %127, %cst_121 {dimension_numbers = #tpu.dot_dimension_numbers<[1], [0], [0], [1], [0, 0, 1, 1], [], []>} : vector<2x64xbf16>, vector<64x512xbf16>, vector<2x512xf32> -> vector<2x512xf32>
    %129 = arith.addf %124, %128 : vector<2x512xf32>
    %c16 = arith.constant 16 : index
    %c0_122 = arith.constant 0 : index
    %130 = vector.load %arg13[%c16, %c0_122] : memref<72x64xbf16, #tpu.memory_space<vmem>>, vector<2x64xbf16>
    %c8_123 = arith.constant 8 : index
    %c0_124 = arith.constant 0 : index
    %c0_125 = arith.constant 0 : index
    %131 = vector.load %arg12[%c8_123, %c0_124, %c0_125] : memref<36x64x512xbf16, #tpu.memory_space<vmem>>, vector<1x64x512xbf16>
    %132 = vector.shape_cast %131 : vector<1x64x512xbf16> to vector<64x512xbf16>
    %cst_126 = arith.constant dense<0.000000e+00> : vector<2x512xf32>
    %133 = tpu.matmul %130, %132, %cst_126 {dimension_numbers = #tpu.dot_dimension_numbers<[1], [0], [0], [1], [0, 0, 1, 1], [], []>} : vector<2x64xbf16>, vector<64x512xbf16>, vector<2x512xf32> -> vector<2x512xf32>
    %134 = arith.addf %129, %133 : vector<2x512xf32>
    %c18 = arith.constant 18 : index
    %c0_127 = arith.constant 0 : index
    %135 = vector.load %arg13[%c18, %c0_127] : memref<72x64xbf16, #tpu.memory_space<vmem>>, vector<2x64xbf16>
    %c9 = arith.constant 9 : index
    %c0_128 = arith.constant 0 : index
    %c0_129 = arith.constant 0 : index
    %136 = vector.load %arg12[%c9, %c0_128, %c0_129] : memref<36x64x512xbf16, #tpu.memory_space<vmem>>, vector<1x64x512xbf16>
    %137 = vector.shape_cast %136 : vector<1x64x512xbf16> to vector<64x512xbf16>
    %cst_130 = arith.constant dense<0.000000e+00> : vector<2x512xf32>
    %138 = tpu.matmul %135, %137, %cst_130 {dimension_numbers = #tpu.dot_dimension_numbers<[1], [0], [0], [1], [0, 0, 1, 1], [], []>} : vector<2x64xbf16>, vector<64x512xbf16>, vector<2x512xf32> -> vector<2x512xf32>
    %139 = arith.addf %134, %138 : vector<2x512xf32>
    %c20 = arith.constant 20 : index
    %c0_131 = arith.constant 0 : index
    %140 = vector.load %arg13[%c20, %c0_131] : memref<72x64xbf16, #tpu.memory_space<vmem>>, vector<2x64xbf16>
    %c10_132 = arith.constant 10 : index
    %c0_133 = arith.constant 0 : index
    %c0_134 = arith.constant 0 : index
    %141 = vector.load %arg12[%c10_132, %c0_133, %c0_134] : memref<36x64x512xbf16, #tpu.memory_space<vmem>>, vector<1x64x512xbf16>
    %142 = vector.shape_cast %141 : vector<1x64x512xbf16> to vector<64x512xbf16>
    %cst_135 = arith.constant dense<0.000000e+00> : vector<2x512xf32>
    %143 = tpu.matmul %140, %142, %cst_135 {dimension_numbers = #tpu.dot_dimension_numbers<[1], [0], [0], [1], [0, 0, 1, 1], [], []>} : vector<2x64xbf16>, vector<64x512xbf16>, vector<2x512xf32> -> vector<2x512xf32>
    %144 = arith.addf %139, %143 : vector<2x512xf32>
    %c22 = arith.constant 22 : index
    %c0_136 = arith.constant 0 : index
    %145 = vector.load %arg13[%c22, %c0_136] : memref<72x64xbf16, #tpu.memory_space<vmem>>, vector<2x64xbf16>
    %c11 = arith.constant 11 : index
    %c0_137 = arith.constant 0 : index
    %c0_138 = arith.constant 0 : index
    %146 = vector.load %arg12[%c11, %c0_137, %c0_138] : memref<36x64x512xbf16, #tpu.memory_space<vmem>>, vector<1x64x512xbf16>
    %147 = vector.shape_cast %146 : vector<1x64x512xbf16> to vector<64x512xbf16>
    %cst_139 = arith.constant dense<0.000000e+00> : vector<2x512xf32>
    %148 = tpu.matmul %145, %147, %cst_139 {dimension_numbers = #tpu.dot_dimension_numbers<[1], [0], [0], [1], [0, 0, 1, 1], [], []>} : vector<2x64xbf16>, vector<64x512xbf16>, vector<2x512xf32> -> vector<2x512xf32>
    %149 = arith.addf %144, %148 : vector<2x512xf32>
    %c24 = arith.constant 24 : index
    %c0_140 = arith.constant 0 : index
    %150 = vector.load %arg13[%c24, %c0_140] : memref<72x64xbf16, #tpu.memory_space<vmem>>, vector<2x64xbf16>
    %c12_141 = arith.constant 12 : index
    %c0_142 = arith.constant 0 : index
    %c0_143 = arith.constant 0 : index
    %151 = vector.load %arg12[%c12_141, %c0_142, %c0_143] : memref<36x64x512xbf16, #tpu.memory_space<vmem>>, vector<1x64x512xbf16>
    %152 = vector.shape_cast %151 : vector<1x64x512xbf16> to vector<64x512xbf16>
    %cst_144 = arith.constant dense<0.000000e+00> : vector<2x512xf32>
    %153 = tpu.matmul %150, %152, %cst_144 {dimension_numbers = #tpu.dot_dimension_numbers<[1], [0], [0], [1], [0, 0, 1, 1], [], []>} : vector<2x64xbf16>, vector<64x512xbf16>, vector<2x512xf32> -> vector<2x512xf32>
    %154 = arith.addf %149, %153 : vector<2x512xf32>
    %c26 = arith.constant 26 : index
    %c0_145 = arith.constant 0 : index
    %155 = vector.load %arg13[%c26, %c0_145] : memref<72x64xbf16, #tpu.memory_space<vmem>>, vector<2x64xbf16>
    %c13 = arith.constant 13 : index
    %c0_146 = arith.constant 0 : index
    %c0_147 = arith.constant 0 : index
    %156 = vector.load %arg12[%c13, %c0_146, %c0_147] : memref<36x64x512xbf16, #tpu.memory_space<vmem>>, vector<1x64x512xbf16>
    %157 = vector.shape_cast %156 : vector<1x64x512xbf16> to vector<64x512xbf16>
    %cst_148 = arith.constant dense<0.000000e+00> : vector<2x512xf32>
    %158 = tpu.matmul %155, %157, %cst_148 {dimension_numbers = #tpu.dot_dimension_numbers<[1], [0], [0], [1], [0, 0, 1, 1], [], []>} : vector<2x64xbf16>, vector<64x512xbf16>, vector<2x512xf32> -> vector<2x512xf32>
    %159 = arith.addf %154, %158 : vector<2x512xf32>
    %c28 = arith.constant 28 : index
    %c0_149 = arith.constant 0 : index
    %160 = vector.load %arg13[%c28, %c0_149] : memref<72x64xbf16, #tpu.memory_space<vmem>>, vector<2x64xbf16>
    %c14_150 = arith.constant 14 : index
    %c0_151 = arith.constant 0 : index
    %c0_152 = arith.constant 0 : index
    %161 = vector.load %arg12[%c14_150, %c0_151, %c0_152] : memref<36x64x512xbf16, #tpu.memory_space<vmem>>, vector<1x64x512xbf16>
    %162 = vector.shape_cast %161 : vector<1x64x512xbf16> to vector<64x512xbf16>
    %cst_153 = arith.constant dense<0.000000e+00> : vector<2x512xf32>
    %163 = tpu.matmul %160, %162, %cst_153 {dimension_numbers = #tpu.dot_dimension_numbers<[1], [0], [0], [1], [0, 0, 1, 1], [], []>} : vector<2x64xbf16>, vector<64x512xbf16>, vector<2x512xf32> -> vector<2x512xf32>
    %164 = arith.addf %159, %163 : vector<2x512xf32>
    %c30 = arith.constant 30 : index
    %c0_154 = arith.constant 0 : index
    %165 = vector.load %arg13[%c30, %c0_154] : memref<72x64xbf16, #tpu.memory_space<vmem>>, vector<2x64xbf16>
    %c15 = arith.constant 15 : index
    %c0_155 = arith.constant 0 : index
    %c0_156 = arith.constant 0 : index
    %166 = vector.load %arg12[%c15, %c0_155, %c0_156] : memref<36x64x512xbf16, #tpu.memory_space<vmem>>, vector<1x64x512xbf16>
    %167 = vector.shape_cast %166 : vector<1x64x512xbf16> to vector<64x512xbf16>
    %cst_157 = arith.constant dense<0.000000e+00> : vector<2x512xf32>
    %168 = tpu.matmul %165, %167, %cst_157 {dimension_numbers = #tpu.dot_dimension_numbers<[1], [0], [0], [1], [0, 0, 1, 1], [], []>} : vector<2x64xbf16>, vector<64x512xbf16>, vector<2x512xf32> -> vector<2x512xf32>
    %169 = arith.addf %164, %168 : vector<2x512xf32>
    %c32 = arith.constant 32 : index
    %c0_158 = arith.constant 0 : index
    %170 = vector.load %arg13[%c32, %c0_158] : memref<72x64xbf16, #tpu.memory_space<vmem>>, vector<2x64xbf16>
    %c16_159 = arith.constant 16 : index
    %c0_160 = arith.constant 0 : index
    %c0_161 = arith.constant 0 : index
    %171 = vector.load %arg12[%c16_159, %c0_160, %c0_161] : memref<36x64x512xbf16, #tpu.memory_space<vmem>>, vector<1x64x512xbf16>
    %172 = vector.shape_cast %171 : vector<1x64x512xbf16> to vector<64x512xbf16>
    %cst_162 = arith.constant dense<0.000000e+00> : vector<2x512xf32>
    %173 = tpu.matmul %170, %172, %cst_162 {dimension_numbers = #tpu.dot_dimension_numbers<[1], [0], [0], [1], [0, 0, 1, 1], [], []>} : vector<2x64xbf16>, vector<64x512xbf16>, vector<2x512xf32> -> vector<2x512xf32>
    %174 = arith.addf %169, %173 : vector<2x512xf32>
    %c34 = arith.constant 34 : index
    %c0_163 = arith.constant 0 : index
    %175 = vector.load %arg13[%c34, %c0_163] : memref<72x64xbf16, #tpu.memory_space<vmem>>, vector<2x64xbf16>
    %c17 = arith.constant 17 : index
    %c0_164 = arith.constant 0 : index
    %c0_165 = arith.constant 0 : index
    %176 = vector.load %arg12[%c17, %c0_164, %c0_165] : memref<36x64x512xbf16, #tpu.memory_space<vmem>>, vector<1x64x512xbf16>
    %177 = vector.shape_cast %176 : vector<1x64x512xbf16> to vector<64x512xbf16>
    %cst_166 = arith.constant dense<0.000000e+00> : vector<2x512xf32>
    %178 = tpu.matmul %175, %177, %cst_166 {dimension_numbers = #tpu.dot_dimension_numbers<[1], [0], [0], [1], [0, 0, 1, 1], [], []>} : vector<2x64xbf16>, vector<64x512xbf16>, vector<2x512xf32> -> vector<2x512xf32>
    %179 = arith.addf %174, %178 : vector<2x512xf32>
    %c36 = arith.constant 36 : index
    %c0_167 = arith.constant 0 : index
    %180 = vector.load %arg13[%c36, %c0_167] : memref<72x64xbf16, #tpu.memory_space<vmem>>, vector<2x64xbf16>
    %c18_168 = arith.constant 18 : index
    %c0_169 = arith.constant 0 : index
    %c0_170 = arith.constant 0 : index
    %181 = vector.load %arg12[%c18_168, %c0_169, %c0_170] : memref<36x64x512xbf16, #tpu.memory_space<vmem>>, vector<1x64x512xbf16>
    %182 = vector.shape_cast %181 : vector<1x64x512xbf16> to vector<64x512xbf16>
    %cst_171 = arith.constant dense<0.000000e+00> : vector<2x512xf32>
    %183 = tpu.matmul %180, %182, %cst_171 {dimension_numbers = #tpu.dot_dimension_numbers<[1], [0], [0], [1], [0, 0, 1, 1], [], []>} : vector<2x64xbf16>, vector<64x512xbf16>, vector<2x512xf32> -> vector<2x512xf32>
    %184 = arith.addf %179, %183 : vector<2x512xf32>
    %c38 = arith.constant 38 : index
    %c0_172 = arith.constant 0 : index
    %185 = vector.load %arg13[%c38, %c0_172] : memref<72x64xbf16, #tpu.memory_space<vmem>>, vector<2x64xbf16>
    %c19 = arith.constant 19 : index
    %c0_173 = arith.constant 0 : index
    %c0_174 = arith.constant 0 : index
    %186 = vector.load %arg12[%c19, %c0_173, %c0_174] : memref<36x64x512xbf16, #tpu.memory_space<vmem>>, vector<1x64x512xbf16>
    %187 = vector.shape_cast %186 : vector<1x64x512xbf16> to vector<64x512xbf16>
    %cst_175 = arith.constant dense<0.000000e+00> : vector<2x512xf32>
    %188 = tpu.matmul %185, %187, %cst_175 {dimension_numbers = #tpu.dot_dimension_numbers<[1], [0], [0], [1], [0, 0, 1, 1], [], []>} : vector<2x64xbf16>, vector<64x512xbf16>, vector<2x512xf32> -> vector<2x512xf32>
    %189 = arith.addf %184, %188 : vector<2x512xf32>
    %c40 = arith.constant 40 : index
    %c0_176 = arith.constant 0 : index
    %190 = vector.load %arg13[%c40, %c0_176] : memref<72x64xbf16, #tpu.memory_space<vmem>>, vector<2x64xbf16>
    %c20_177 = arith.constant 20 : index
    %c0_178 = arith.constant 0 : index
    %c0_179 = arith.constant 0 : index
    %191 = vector.load %arg12[%c20_177, %c0_178, %c0_179] : memref<36x64x512xbf16, #tpu.memory_space<vmem>>, vector<1x64x512xbf16>
    %192 = vector.shape_cast %191 : vector<1x64x512xbf16> to vector<64x512xbf16>
    %cst_180 = arith.constant dense<0.000000e+00> : vector<2x512xf32>
    %193 = tpu.matmul %190, %192, %cst_180 {dimension_numbers = #tpu.dot_dimension_numbers<[1], [0], [0], [1], [0, 0, 1, 1], [], []>} : vector<2x64xbf16>, vector<64x512xbf16>, vector<2x512xf32> -> vector<2x512xf32>
    %194 = arith.addf %189, %193 : vector<2x512xf32>
    %c42 = arith.constant 42 : index
    %c0_181 = arith.constant 0 : index
    %195 = vector.load %arg13[%c42, %c0_181] : memref<72x64xbf16, #tpu.memory_space<vmem>>, vector<2x64xbf16>
    %c21 = arith.constant 21 : index
    %c0_182 = arith.constant 0 : index
    %c0_183 = arith.constant 0 : index
    %196 = vector.load %arg12[%c21, %c0_182, %c0_183] : memref<36x64x512xbf16, #tpu.memory_space<vmem>>, vector<1x64x512xbf16>
    %197 = vector.shape_cast %196 : vector<1x64x512xbf16> to vector<64x512xbf16>
    %cst_184 = arith.constant dense<0.000000e+00> : vector<2x512xf32>
    %198 = tpu.matmul %195, %197, %cst_184 {dimension_numbers = #tpu.dot_dimension_numbers<[1], [0], [0], [1], [0, 0, 1, 1], [], []>} : vector<2x64xbf16>, vector<64x512xbf16>, vector<2x512xf32> -> vector<2x512xf32>
    %199 = arith.addf %194, %198 : vector<2x512xf32>
    %c44 = arith.constant 44 : index
    %c0_185 = arith.constant 0 : index
    %200 = vector.load %arg13[%c44, %c0_185] : memref<72x64xbf16, #tpu.memory_space<vmem>>, vector<2x64xbf16>
    %c22_186 = arith.constant 22 : index
    %c0_187 = arith.constant 0 : index
    %c0_188 = arith.constant 0 : index
    %201 = vector.load %arg12[%c22_186, %c0_187, %c0_188] : memref<36x64x512xbf16, #tpu.memory_space<vmem>>, vector<1x64x512xbf16>
    %202 = vector.shape_cast %201 : vector<1x64x512xbf16> to vector<64x512xbf16>
    %cst_189 = arith.constant dense<0.000000e+00> : vector<2x512xf32>
    %203 = tpu.matmul %200, %202, %cst_189 {dimension_numbers = #tpu.dot_dimension_numbers<[1], [0], [0], [1], [0, 0, 1, 1], [], []>} : vector<2x64xbf16>, vector<64x512xbf16>, vector<2x512xf32> -> vector<2x512xf32>
    %204 = arith.addf %199, %203 : vector<2x512xf32>
    %c46 = arith.constant 46 : index
    %c0_190 = arith.constant 0 : index
    %205 = vector.load %arg13[%c46, %c0_190] : memref<72x64xbf16, #tpu.memory_space<vmem>>, vector<2x64xbf16>
    %c23 = arith.constant 23 : index
    %c0_191 = arith.constant 0 : index
    %c0_192 = arith.constant 0 : index
    %206 = vector.load %arg12[%c23, %c0_191, %c0_192] : memref<36x64x512xbf16, #tpu.memory_space<vmem>>, vector<1x64x512xbf16>
    %207 = vector.shape_cast %206 : vector<1x64x512xbf16> to vector<64x512xbf16>
    %cst_193 = arith.constant dense<0.000000e+00> : vector<2x512xf32>
    %208 = tpu.matmul %205, %207, %cst_193 {dimension_numbers = #tpu.dot_dimension_numbers<[1], [0], [0], [1], [0, 0, 1, 1], [], []>} : vector<2x64xbf16>, vector<64x512xbf16>, vector<2x512xf32> -> vector<2x512xf32>
    %209 = arith.addf %204, %208 : vector<2x512xf32>
    %c48 = arith.constant 48 : index
    %c0_194 = arith.constant 0 : index
    %210 = vector.load %arg13[%c48, %c0_194] : memref<72x64xbf16, #tpu.memory_space<vmem>>, vector<2x64xbf16>
    %c24_195 = arith.constant 24 : index
    %c0_196 = arith.constant 0 : index
    %c0_197 = arith.constant 0 : index
    %211 = vector.load %arg12[%c24_195, %c0_196, %c0_197] : memref<36x64x512xbf16, #tpu.memory_space<vmem>>, vector<1x64x512xbf16>
    %212 = vector.shape_cast %211 : vector<1x64x512xbf16> to vector<64x512xbf16>
    %cst_198 = arith.constant dense<0.000000e+00> : vector<2x512xf32>
    %213 = tpu.matmul %210, %212, %cst_198 {dimension_numbers = #tpu.dot_dimension_numbers<[1], [0], [0], [1], [0, 0, 1, 1], [], []>} : vector<2x64xbf16>, vector<64x512xbf16>, vector<2x512xf32> -> vector<2x512xf32>
    %214 = arith.addf %209, %213 : vector<2x512xf32>
    %c50 = arith.constant 50 : index
    %c0_199 = arith.constant 0 : index
    %215 = vector.load %arg13[%c50, %c0_199] : memref<72x64xbf16, #tpu.memory_space<vmem>>, vector<2x64xbf16>
    %c25 = arith.constant 25 : index
    %c0_200 = arith.constant 0 : index
    %c0_201 = arith.constant 0 : index
    %216 = vector.load %arg12[%c25, %c0_200, %c0_201] : memref<36x64x512xbf16, #tpu.memory_space<vmem>>, vector<1x64x512xbf16>
    %217 = vector.shape_cast %216 : vector<1x64x512xbf16> to vector<64x512xbf16>
    %cst_202 = arith.constant dense<0.000000e+00> : vector<2x512xf32>
    %218 = tpu.matmul %215, %217, %cst_202 {dimension_numbers = #tpu.dot_dimension_numbers<[1], [0], [0], [1], [0, 0, 1, 1], [], []>} : vector<2x64xbf16>, vector<64x512xbf16>, vector<2x512xf32> -> vector<2x512xf32>
    %219 = arith.addf %214, %218 : vector<2x512xf32>
    %c52 = arith.constant 52 : index
    %c0_203 = arith.constant 0 : index
    %220 = vector.load %arg13[%c52, %c0_203] : memref<72x64xbf16, #tpu.memory_space<vmem>>, vector<2x64xbf16>
    %c26_204 = arith.constant 26 : index
    %c0_205 = arith.constant 0 : index
    %c0_206 = arith.constant 0 : index
    %221 = vector.load %arg12[%c26_204, %c0_205, %c0_206] : memref<36x64x512xbf16, #tpu.memory_space<vmem>>, vector<1x64x512xbf16>
    %222 = vector.shape_cast %221 : vector<1x64x512xbf16> to vector<64x512xbf16>
    %cst_207 = arith.constant dense<0.000000e+00> : vector<2x512xf32>
    %223 = tpu.matmul %220, %222, %cst_207 {dimension_numbers = #tpu.dot_dimension_numbers<[1], [0], [0], [1], [0, 0, 1, 1], [], []>} : vector<2x64xbf16>, vector<64x512xbf16>, vector<2x512xf32> -> vector<2x512xf32>
    %224 = arith.addf %219, %223 : vector<2x512xf32>
    %c54 = arith.constant 54 : index
    %c0_208 = arith.constant 0 : index
    %225 = vector.load %arg13[%c54, %c0_208] : memref<72x64xbf16, #tpu.memory_space<vmem>>, vector<2x64xbf16>
    %c27 = arith.constant 27 : index
    %c0_209 = arith.constant 0 : index
    %c0_210 = arith.constant 0 : index
    %226 = vector.load %arg12[%c27, %c0_209, %c0_210] : memref<36x64x512xbf16, #tpu.memory_space<vmem>>, vector<1x64x512xbf16>
    %227 = vector.shape_cast %226 : vector<1x64x512xbf16> to vector<64x512xbf16>
    %cst_211 = arith.constant dense<0.000000e+00> : vector<2x512xf32>
    %228 = tpu.matmul %225, %227, %cst_211 {dimension_numbers = #tpu.dot_dimension_numbers<[1], [0], [0], [1], [0, 0, 1, 1], [], []>} : vector<2x64xbf16>, vector<64x512xbf16>, vector<2x512xf32> -> vector<2x512xf32>
    %229 = arith.addf %224, %228 : vector<2x512xf32>
    %c56 = arith.constant 56 : index
    %c0_212 = arith.constant 0 : index
    %230 = vector.load %arg13[%c56, %c0_212] : memref<72x64xbf16, #tpu.memory_space<vmem>>, vector<2x64xbf16>
    %c28_213 = arith.constant 28 : index
    %c0_214 = arith.constant 0 : index
    %c0_215 = arith.constant 0 : index
    %231 = vector.load %arg12[%c28_213, %c0_214, %c0_215] : memref<36x64x512xbf16, #tpu.memory_space<vmem>>, vector<1x64x512xbf16>
    %232 = vector.shape_cast %231 : vector<1x64x512xbf16> to vector<64x512xbf16>
    %cst_216 = arith.constant dense<0.000000e+00> : vector<2x512xf32>
    %233 = tpu.matmul %230, %232, %cst_216 {dimension_numbers = #tpu.dot_dimension_numbers<[1], [0], [0], [1], [0, 0, 1, 1], [], []>} : vector<2x64xbf16>, vector<64x512xbf16>, vector<2x512xf32> -> vector<2x512xf32>
    %234 = arith.addf %229, %233 : vector<2x512xf32>
    %c58 = arith.constant 58 : index
    %c0_217 = arith.constant 0 : index
    %235 = vector.load %arg13[%c58, %c0_217] : memref<72x64xbf16, #tpu.memory_space<vmem>>, vector<2x64xbf16>
    %c29 = arith.constant 29 : index
    %c0_218 = arith.constant 0 : index
    %c0_219 = arith.constant 0 : index
    %236 = vector.load %arg12[%c29, %c0_218, %c0_219] : memref<36x64x512xbf16, #tpu.memory_space<vmem>>, vector<1x64x512xbf16>
    %237 = vector.shape_cast %236 : vector<1x64x512xbf16> to vector<64x512xbf16>
    %cst_220 = arith.constant dense<0.000000e+00> : vector<2x512xf32>
    %238 = tpu.matmul %235, %237, %cst_220 {dimension_numbers = #tpu.dot_dimension_numbers<[1], [0], [0], [1], [0, 0, 1, 1], [], []>} : vector<2x64xbf16>, vector<64x512xbf16>, vector<2x512xf32> -> vector<2x512xf32>
    %239 = arith.addf %234, %238 : vector<2x512xf32>
    %c60 = arith.constant 60 : index
    %c0_221 = arith.constant 0 : index
    %240 = vector.load %arg13[%c60, %c0_221] : memref<72x64xbf16, #tpu.memory_space<vmem>>, vector<2x64xbf16>
    %c30_222 = arith.constant 30 : index
    %c0_223 = arith.constant 0 : index
    %c0_224 = arith.constant 0 : index
    %241 = vector.load %arg12[%c30_222, %c0_223, %c0_224] : memref<36x64x512xbf16, #tpu.memory_space<vmem>>, vector<1x64x512xbf16>
    %242 = vector.shape_cast %241 : vector<1x64x512xbf16> to vector<64x512xbf16>
    %cst_225 = arith.constant dense<0.000000e+00> : vector<2x512xf32>
    %243 = tpu.matmul %240, %242, %cst_225 {dimension_numbers = #tpu.dot_dimension_numbers<[1], [0], [0], [1], [0, 0, 1, 1], [], []>} : vector<2x64xbf16>, vector<64x512xbf16>, vector<2x512xf32> -> vector<2x512xf32>
    %244 = arith.addf %239, %243 : vector<2x512xf32>
    %c62 = arith.constant 62 : index
    %c0_226 = arith.constant 0 : index
    %245 = vector.load %arg13[%c62, %c0_226] : memref<72x64xbf16, #tpu.memory_space<vmem>>, vector<2x64xbf16>
    %c31 = arith.constant 31 : index
    %c0_227 = arith.constant 0 : index
    %c0_228 = arith.constant 0 : index
    %246 = vector.load %arg12[%c31, %c0_227, %c0_228] : memref<36x64x512xbf16, #tpu.memory_space<vmem>>, vector<1x64x512xbf16>
    %247 = vector.shape_cast %246 : vector<1x64x512xbf16> to vector<64x512xbf16>
    %cst_229 = arith.constant dense<0.000000e+00> : vector<2x512xf32>
    %248 = tpu.matmul %245, %247, %cst_229 {dimension_numbers = #tpu.dot_dimension_numbers<[1], [0], [0], [1], [0, 0, 1, 1], [], []>} : vector<2x64xbf16>, vector<64x512xbf16>, vector<2x512xf32> -> vector<2x512xf32>
    %249 = arith.addf %244, %248 : vector<2x512xf32>
    %c64 = arith.constant 64 : index
    %c0_230 = arith.constant 0 : index
    %250 = vector.load %arg13[%c64, %c0_230] : memref<72x64xbf16, #tpu.memory_space<vmem>>, vector<2x64xbf16>
    %c32_231 = arith.constant 32 : index
    %c0_232 = arith.constant 0 : index
    %c0_233 = arith.constant 0 : index
    %251 = vector.load %arg12[%c32_231, %c0_232, %c0_233] : memref<36x64x512xbf16, #tpu.memory_space<vmem>>, vector<1x64x512xbf16>
    %252 = vector.shape_cast %251 : vector<1x64x512xbf16> to vector<64x512xbf16>
    %cst_234 = arith.constant dense<0.000000e+00> : vector<2x512xf32>
    %253 = tpu.matmul %250, %252, %cst_234 {dimension_numbers = #tpu.dot_dimension_numbers<[1], [0], [0], [1], [0, 0, 1, 1], [], []>} : vector<2x64xbf16>, vector<64x512xbf16>, vector<2x512xf32> -> vector<2x512xf32>
    %254 = arith.addf %249, %253 : vector<2x512xf32>
    %c66 = arith.constant 66 : index
    %c0_235 = arith.constant 0 : index
    %255 = vector.load %arg13[%c66, %c0_235] : memref<72x64xbf16, #tpu.memory_space<vmem>>, vector<2x64xbf16>
    %c33 = arith.constant 33 : index
    %c0_236 = arith.constant 0 : index
    %c0_237 = arith.constant 0 : index
    %256 = vector.load %arg12[%c33, %c0_236, %c0_237] : memref<36x64x512xbf16, #tpu.memory_space<vmem>>, vector<1x64x512xbf16>
    %257 = vector.shape_cast %256 : vector<1x64x512xbf16> to vector<64x512xbf16>
    %cst_238 = arith.constant dense<0.000000e+00> : vector<2x512xf32>
    %258 = tpu.matmul %255, %257, %cst_238 {dimension_numbers = #tpu.dot_dimension_numbers<[1], [0], [0], [1], [0, 0, 1, 1], [], []>} : vector<2x64xbf16>, vector<64x512xbf16>, vector<2x512xf32> -> vector<2x512xf32>
    %259 = arith.addf %254, %258 : vector<2x512xf32>
    %c68 = arith.constant 68 : index
    %c0_239 = arith.constant 0 : index
    %260 = vector.load %arg13[%c68, %c0_239] : memref<72x64xbf16, #tpu.memory_space<vmem>>, vector<2x64xbf16>
    %c34_240 = arith.constant 34 : index
    %c0_241 = arith.constant 0 : index
    %c0_242 = arith.constant 0 : index
    %261 = vector.load %arg12[%c34_240, %c0_241, %c0_242] : memref<36x64x512xbf16, #tpu.memory_space<vmem>>, vector<1x64x512xbf16>
    %262 = vector.shape_cast %261 : vector<1x64x512xbf16> to vector<64x512xbf16>
    %cst_243 = arith.constant dense<0.000000e+00> : vector<2x512xf32>
    %263 = tpu.matmul %260, %262, %cst_243 {dimension_numbers = #tpu.dot_dimension_numbers<[1], [0], [0], [1], [0, 0, 1, 1], [], []>} : vector<2x64xbf16>, vector<64x512xbf16>, vector<2x512xf32> -> vector<2x512xf32>
    %264 = arith.addf %259, %263 : vector<2x512xf32>
    %c70 = arith.constant 70 : index
    %c0_244 = arith.constant 0 : index
    %265 = vector.load %arg13[%c70, %c0_244] : memref<72x64xbf16, #tpu.memory_space<vmem>>, vector<2x64xbf16>
    %c35 = arith.constant 35 : index
    %c0_245 = arith.constant 0 : index
    %c0_246 = arith.constant 0 : index
    %266 = vector.load %arg12[%c35, %c0_245, %c0_246] : memref<36x64x512xbf16, #tpu.memory_space<vmem>>, vector<1x64x512xbf16>
    %267 = vector.shape_cast %266 : vector<1x64x512xbf16> to vector<64x512xbf16>
    %cst_247 = arith.constant dense<0.000000e+00> : vector<2x512xf32>
    %268 = tpu.matmul %265, %267, %cst_247 {dimension_numbers = #tpu.dot_dimension_numbers<[1], [0], [0], [1], [0, 0, 1, 1], [], []>} : vector<2x64xbf16>, vector<64x512xbf16>, vector<2x512xf32> -> vector<2x512xf32>
    %269 = arith.addf %264, %268 : vector<2x512xf32>
    %c0_248 = arith.constant 0 : index
    %c0_249 = arith.constant 0 : index
    %270 = vector.load %arg8[%c0_248, %c0_249] : memref<1x512xf32, #tpu.memory_space<vmem>>, vector<1x512xf32>
    %271 = vector.broadcast %270 : vector<1x512xf32> to vector<2x512xf32>
    %272 = arith.addf %269, %271 : vector<2x512xf32>
    %cst_250 = arith.constant 0.000000e+00 : f32
    %273 = vector.broadcast %cst_250 : f32 to vector<2x512xf32>
    %274 = arith.maximumf %272, %273 : vector<2x512xf32>
    %275 = arith.truncf %274 : vector<2x512xf32> to vector<2x512xbf16>
    %c0_251 = arith.constant 0 : index
    %c0_252 = arith.constant 0 : index
    %276 = vector.load %arg9[%c0_251, %c0_252] : memref<512x128xbf16, #tpu.memory_space<vmem>>, vector<512x128xbf16>
    %cst_253 = arith.constant dense<0.000000e+00> : vector<2x128xf32>
    %277 = tpu.matmul %275, %276, %cst_253 {dimension_numbers = #tpu.dot_dimension_numbers<[1], [0], [0], [1], [0, 0, 1, 1], [], []>} : vector<2x512xbf16>, vector<512x128xbf16>, vector<2x128xf32> -> vector<2x128xf32>
    %c0_254 = arith.constant 0 : index
    %c0_255 = arith.constant 0 : index
    %278 = vector.load %arg10[%c0_254, %c0_255] : memref<1x128xf32, #tpu.memory_space<vmem>>, vector<1x128xf32>
    %279 = vector.broadcast %278 : vector<1x128xf32> to vector<2x128xf32>
    %280 = arith.addf %277, %279 : vector<2x128xf32>
    %cst_256 = arith.constant 0.000000e+00 : f32
    %281 = vector.broadcast %cst_256 : f32 to vector<2x128xf32>
    %282 = arith.maximumf %280, %281 : vector<2x128xf32>
    %c0_257 = arith.constant 0 : index
    %c0_258 = arith.constant 0 : index
    %283 = vector.load %arg11[%c0_257, %c0_258] : memref<2x128xf32, #tpu.memory_space<vmem>>, vector<2x128xf32>
    tpu.vector_store %arg11[%c0_257, %c0_258], %282 {strides = array<i32>} : memref<2x128xf32, #tpu.memory_space<vmem>>, vector<2x128xf32>,
    return
  }
  func.func @transform_0(%arg0: i32) -> (i32, i32) {
    %c0_i32 = arith.constant 0 : i32
    %c0_i32_0 = arith.constant 0 : i32
    %c0_i32_1 = arith.constant 0 : i32
    return %c0_i32, %c0_i32_0 : i32, i32
  }
  func.func @transform_1(%arg0: i32) -> (i32, i32) {
    %c0_i32 = arith.constant 0 : i32
    %c0_i32_0 = arith.constant 0 : i32
    %c0_i32_1 = arith.constant 0 : i32
    return %c0_i32, %c0_i32_0 : i32, i32
  }
  func.func @transform_2(%arg0: i32) -> (i32, i32) {
    %c0_i32 = arith.constant 0 : i32
    %c0_i32_0 = arith.constant 0 : i32
    %c0_i32_1 = arith.constant 0 : i32
    return %c0_i32, %c0_i32_0 : i32, i32
  }
  func.func @transform_3(%arg0: i32) -> (i32, i32, i32) {
    %c0_i32 = arith.constant 0 : i32
    %c0_i32_0 = arith.constant 0 : i32
    %c0_i32_1 = arith.constant 0 : i32
    %c0_i32_2 = arith.constant 0 : i32
    return %c0_i32, %c0_i32_0, %c0_i32_1 : i32, i32, i32
  }
  func.func @transform_4(%arg0: i32) -> (i32, i32, i32) {
    %c0_i32 = arith.constant 0 : i32
    %c0_i32_0 = arith.constant 0 : i32
    %c0_i32_1 = arith.constant 0 : i32
    %c0_i32_2 = arith.constant 0 : i32
    return %c0_i32, %c0_i32_0, %c0_i32_1 : i32, i32, i32
  }
  func.func @transform_5(%arg0: i32) -> (i32, i32) {
    %c0_i32 = arith.constant 0 : i32
    %c0_i32_0 = arith.constant 0 : i32
    %c0_i32_1 = arith.constant 0 : i32
    return %c0_i32, %c0_i32_0 : i32, i32
  }
  func.func @transform_7(%arg0: i32) -> (i32, i32) {
    %c0_i32 = arith.constant 0 : i32
    %c0_i32_0 = arith.constant 0 : i32
    %c0_i32_1 = arith.constant 0 : i32
    return %c0_i32, %c0_i32_0 : i32, i32
  }
  func.func @transform_8(%arg0: i32) -> (i32, i32) {
    %c0_i32 = arith.constant 0 : i32
    %c0_i32_0 = arith.constant 0 : i32
    %c0_i32_1 = arith.constant 0 : i32
    return %c0_i32, %c0_i32_0 : i32, i32
  }
  func.func @transform_9(%arg0: i32) -> (i32, i32) {
    %c0_i32 = arith.constant 0 : i32
    %c0_i32_0 = arith.constant 0 : i32
    %c0_i32_1 = arith.constant 0 : i32
    return %c0_i32, %c0_i32_0 : i32, i32
  }
  func.func @transform_10(%arg0: i32) -> (i32, i32) {
    %c0_i32 = arith.constant 0 : i32
    %c0_i32_0 = arith.constant 0 : i32
    %c0_i32_1 = arith.constant 0 : i32
    return %c0_i32, %c0_i32_0 : i32, i32
  }
}

</mosaic_0001>

<bundles_post_ra>
// kernel: critic_net_forward.2
= control target key start
LH: loop header
LB: loop body
LE: loop exit
PB: predicated region body
PF: predicated region fallthrough
CT: control target
= control target key end

     0   :  { %vm373_vm0 = vcmask 523264   ;;  %vm1368_vm1 = vcmask 257024   ;;  %vm1459_vm2 = vcmask 253952   ;;  %s2627_s1 = inlined_call_operand.vmem [shape: bf16[64,32], index: 1, kind: input, shape index: {}]   ;;  %s2628_s0 = inlined_call_operand.vmem [shape: bf16[722,64], index: 0, kind: input, shape index: {}]   ;;  %s2629_s2 = inlined_call_operand.vmem [shape: f32[1,32], index: 2, kind: input, shape index: {}]   ;;  %s2630_s3 = inlined_call_operand.vmem [shape: bf16[722,32], index: 3, kind: output, shape index: {}]  }
   0x1   :  { %v1902_v0 = vld [vmem:[%s2627_s1] sm:$0xff]   ;;  %v1903_v1 = vld [vmem:[%s2627_s1 + $0x8] sm:$0xff]   ;;  %v1904_v2 = vld [vmem:[%s2627_s1 + $0x10] sm:$0xff]  }
   0x2   :  { %1794 = vmatprep.subr.bf16.mxu0 %v1902_v0  ;;  %1894 = vmatprep.subr.bf16.mxu1 %v1902_v0  ;;  %v1906_v3 = vld [vmem:[%s2628_s0] sm:$0xff]   ;;  %v1905_v5 = vld [vmem:[%s2627_s1 + $0x18] sm:$0xff]   ;;  %v1907_v6 = vld [vmem:[%s2628_s0 + $0x8] sm:$0xff]  }
   0x3   :  { %1795 = vmatpush3.bf16.msra.mxu0 %v1902_v0  ;;  %1898 = vmatpush3.bf16.msra.mxu1 %v1902_v0  ;;  %v1908_v4 = vld [vmem:[%s2628_s0 + $0xc0] sm:$0xff]   ;;  %v1909_v7 = vld [vmem:[%s2628_s0 + $0xc8] sm:$0xff]   ;;  %v1910_v8 = vld [vmem:[%s2628_s0 + $0x10] sm:$0xff]  }
   0x4   :  { %1796 = vmatprep.subr.bf16.mxu0 %v1903_v1  ;;  %1895 = vmatprep.subr.bf16.mxu1 %v1903_v1  ;;  %v1912_v9 = vld [vmem:[%s2628_s0 + $0xd0] sm:$0xff]   ;;  %v1911_v10 = vld [vmem:[%s2628_s0 + $0x18] sm:$0xff]   ;;  %v1914_v12 = vld [vmem:[%s2628_s0 + $0x20] sm:$0xff]  }
   0x5   :  { %1802 = vmatprep.mubr.msk.bf16.mxu0 %vm373_vm0, %v1906_v3  ;;  %1850 = vmatprep.mubr.msk.bf16.mxu1 %vm373_vm0, %v1908_v4  ;;  %v1913_v11 = vld [vmem:[%s2628_s0 + $0xd8] sm:$0xff]   ;;  %v1916_v13 = vld [vmem:[%s2628_s0 + $0xe0] sm:$0xff]   ;;  %v1915_v14 = vld [vmem:[%s2628_s0 + $0x28] sm:$0xff]  }
   0x6   :  { %v1917_v15 = vld [vmem:[%s2628_s0 + $0xe8] sm:$0xff]   ;;  %v1918_v16 = vld [vmem:[%s2628_s0 + $0x30] sm:$0xff]   ;;  %v1919_v18 = vld [vmem:[%s2628_s0 + $0x38] sm:$0xff]  }
   0x7   :  { %1797 = vmatpush3.bf16.msra.mxu0 %v1903_v1  ;;  %1899 = vmatpush3.bf16.msra.mxu1 %v1903_v1  ;;  %v1920_v17 = vld [vmem:[%s2628_s0 + $0xf0] sm:$0xff]   ;;  %v1921_v19 = vld [vmem:[%s2628_s0 + $0xf8] sm:$0xff]   ;;  %v1922_v20 = vld [vmem:[%s2628_s0 + $0x40] sm:$0xff]  }
   0x8   :  { %1798 = vmatprep.subr.bf16.mxu0 %v1904_v2  ;;  %1896 = vmatprep.subr.bf16.mxu1 %v1904_v2  ;;  %v1924_v21 = vld [vmem:[%s2628_s0 + $0x100] sm:$0xff]   ;;  %v1923_v22 = vld [vmem:[%s2628_s0 + $0x48] sm:$0xff]   ;;  %v1926_v24 = vld [vmem:[%s2628_s0 + $0x50] sm:$0xff]  }
   0x9   :  { %v1925_v23 = vld [vmem:[%s2628_s0 + $0x108] sm:$0xff]   ;;  %v1928_v25 = vld [vmem:[%s2628_s0 + $0x110] sm:$0xff]   ;;  %v1927_v26 = vld [vmem:[%s2628_s0 + $0x58] sm:$0xff]  }
   0xa   :  { %v1929_v27 = vld [vmem:[%s2628_s0 + $0x118] sm:$0xff]   ;;  %v1930_v28 = vld [vmem:[%s2628_s0 + $0x60] sm:$0xff]   ;;  %v1931_v30 = vld [vmem:[%s2628_s0 + $0x68] sm:$0xff]  }
   0xb   :  { %1799 = vmatpush3.bf16.msra.mxu0 %v1904_v2  ;;  %1900 = vmatpush3.bf16.msra.mxu1 %v1904_v2  ;;  %v1932_v29 = vld [vmem:[%s2628_s0 + $0x120] sm:$0xff]   ;;  %v1933_v31 = vld [vmem:[%s2628_s0 + $0x128] sm:$0xff]   ;;  %v1934_v32 = vld [vmem:[%s2628_s0 + $0x70] sm:$0xff]  }
   0xc   :  { %1800 = vmatprep.subr.bf16.mxu0 %v1905_v5  ;;  %1897 = vmatprep.subr.bf16.mxu1 %v1905_v5  ;;  %v1936_v33 = vld [vmem:[%s2628_s0 + $0x130] sm:$0xff]   ;;  %v1935_v34 = vld [vmem:[%s2628_s0 + $0x78] sm:$0xff]   ;;  %v1938_v36 = vld [vmem:[%s2628_s0 + $0x80] sm:$0xff]  }
   0xd   :  { %v1937_v35 = vld [vmem:[%s2628_s0 + $0x138] sm:$0xff]   ;;  %v1940_v37 = vld [vmem:[%s2628_s0 + $0x140] sm:$0xff]   ;;  %v1939_v38 = vld [vmem:[%s2628_s0 + $0x88] sm:$0xff]  }
   0xe   :  { %v1941_v39 = vld [vmem:[%s2628_s0 + $0x148] sm:$0xff]   ;;  %v1942_v40 = vld [vmem:[%s2628_s0 + $0x90] sm:$0xff]   ;;  %v1943_v42 = vld [vmem:[%s2628_s0 + $0x98] sm:$0xff]  }
   0xf   :  { %1801 = vmatpush3.bf16.msra.mxu0 %v1905_v5  ;;  %1901 = vmatpush3.bf16.msra.mxu1 %v1905_v5  ;;  %v1944_v41 = vld [vmem:[%s2628_s0 + $0x150] sm:$0xff]   ;;  %v1945_v43 = vld [vmem:[%s2628_s0 + $0x158] sm:$0xff]   ;;  %v1946_v44 = vld [vmem:[%s2628_s0 + $0xa0] sm:$0xff]  }
  0x10   :  { %v1948_v45 = vld [vmem:[%s2628_s0 + $0x160] sm:$0xff]   ;;  %v1947_v46 = vld [vmem:[%s2628_s0 + $0xa8] sm:$0xff]   ;;  %v1950_v48 = vld [vmem:[%s2628_s0 + $0xb0] sm:$0xff]  }
  0x11   :  { %v1949_v47 = vld [vmem:[%s2628_s0 + $0x168] ss:$0 sps:$4 sm:$0x11]   ;;  %v1951_v49 = vld [vmem:[%s2628_s0 + $0xb8] sm:$0xff]   ;;  %v2171_v50 = vld [vmem:[%s2629_s2] ss:$0 sm:$0xff] }
  0x12   :  { %1803 = vmatmul.mubr.msk.bf16.vlgmr.msra.gmra.mrb[0].mxu0 %vm373_vm0, %v1907_v6  ;;  %1851 = vmatmul.mubr.msk.bf16.vlgmr.msra.gmra.mrb[0].mxu1 %vm373_vm0, %v1909_v7 }
  0x13   :  { %1806 = vmatprep.mubr.msk.bf16.mxu0 %vm373_vm0, %v1910_v8  ;;  %1854 = vmatprep.mubr.msk.bf16.mxu1 %vm373_vm0, %v1912_v9 }
  0x1a   :  { %1807 = vmatmul.mubr.msk.bf16.gmra.mrb[4].mxu0 %vm373_vm0, %v1911_v10  ;;  %1855 = vmatmul.mubr.msk.bf16.gmra.mrb[4].mxu1 %vm373_vm0, %v1913_v11 }
  0x1b   :  { %1810 = vmatprep.mubr.msk.bf16.mxu0 %vm373_vm0, %v1914_v12  ;;  %1858 = vmatprep.mubr.msk.bf16.mxu1 %vm373_vm0, %v1916_v13 }
  0x22   :  { %1811 = vmatmul.mubr.msk.bf16.gmra.mrb[8].mxu0 %vm373_vm0, %v1915_v14  ;;  %1859 = vmatmul.mubr.msk.bf16.gmra.mrb[8].mxu1 %vm373_vm0, %v1917_v15 }
  0x23   :  { %1814 = vmatprep.mubr.msk.bf16.mxu0 %vm373_vm0, %v1918_v16  ;;  %1862 = vmatprep.mubr.msk.bf16.mxu1 %vm373_vm0, %v1920_v17 }
  0x2a   :  { %1815 = vmatmul.mubr.msk.bf16.gmra.mrb[12].mxu0 %vm373_vm0, %v1919_v18  ;;  %1863 = vmatmul.mubr.msk.bf16.gmra.mrb[12].mxu1 %vm373_vm0, %v1921_v19 }
  0x2b   :  { %1818 = vmatprep.mubr.msk.bf16.mxu0 %vm373_vm0, %v1922_v20  ;;  %1866 = vmatprep.mubr.msk.bf16.mxu1 %vm373_vm0, %v1924_v21 }
  0x32   :  { %1819 = vmatmul.mubr.msk.bf16.gmra.mrb[16].mxu0 %vm373_vm0, %v1923_v22  ;;  %1867 = vmatmul.mubr.msk.bf16.gmra.mrb[16].mxu1 %vm373_vm0, %v1925_v23 }
  0x33   :  { %1822 = vmatprep.mubr.msk.bf16.mxu0 %vm373_vm0, %v1926_v24  ;;  %1870 = vmatprep.mubr.msk.bf16.mxu1 %vm373_vm0, %v1928_v25 }
  0x3a   :  { %1823 = vmatmul.mubr.msk.bf16.gmra.mrb[20].mxu0 %vm373_vm0, %v1927_v26  ;;  %1871 = vmatmul.mubr.msk.bf16.gmra.mrb[20].mxu1 %vm373_vm0, %v1929_v27 }
  0x3b   :  { %1826 = vmatprep.mubr.msk.bf16.mxu0 %vm373_vm0, %v1930_v28  ;;  %1874 = vmatprep.mubr.msk.bf16.mxu1 %vm373_vm0, %v1932_v29 }
  0x42   :  { %1827 = vmatmul.mubr.msk.bf16.gmra.mrb[24].mxu0 %vm373_vm0, %v1931_v30  ;;  %1875 = vmatmul.mubr.msk.bf16.gmra.mrb[24].mxu1 %vm373_vm0, %v1933_v31 }
  0x43   :  { %1830 = vmatprep.mubr.msk.bf16.mxu0 %vm373_vm0, %v1934_v32  ;;  %1878 = vmatprep.mubr.msk.bf16.mxu1 %vm373_vm0, %v1936_v33 }
  0x4a   :  { %1831 = vmatmul.mubr.msk.bf16.gmra.mrb[28].mxu0 %vm373_vm0, %v1935_v34  ;;  %1879 = vmatmul.mubr.msk.bf16.gmra.mrb[28].mxu1 %vm373_vm0, %v1937_v35 }
  0x4b   :  { %1834 = vmatprep.mubr.msk.bf16.mxu0 %vm373_vm0, %v1938_v36  ;;  %1882 = vmatprep.mubr.msk.bf16.mxu1 %vm373_vm0, %v1940_v37 }
  0x52   :  { %1835 = vmatmul.mubr.msk.bf16.gmra.mrb[32].mxu0 %vm373_vm0, %v1939_v38  ;;  %1883 = vmatmul.mubr.msk.bf16.gmra.mrb[32].mxu1 %vm373_vm0, %v1941_v39 }
  0x53   :  { %1838 = vmatprep.mubr.msk.bf16.mxu0 %vm373_vm0, %v1942_v40  ;;  %1886 = vmatprep.mubr.msk.bf16.mxu1 %vm373_vm0, %v1944_v41 }
  0x5a   :  { %1839 = vmatmul.mubr.msk.bf16.gmra.mrb[36].mxu0 %vm373_vm0, %v1943_v42  ;;  %1887 = vmatmul.mubr.msk.bf16.gmra.mrb[36].mxu1 %vm373_vm0, %v1945_v43 }
  0x5b   :  { %1842 = vmatprep.mubr.msk.bf16.mxu0 %vm373_vm0, %v1946_v44  ;;  %1890 = vmatprep.mubr.msk.bf16.mxu1 %vm373_vm0, %v1948_v45 }
  0x62   :  { %1843 = vmatmul.mubr.msk.bf16.gmra.mrb[40].mxu0 %vm373_vm0, %v1947_v46  ;;  %1891 = vmatmul.mubr.msk.bf16.gmra.mrb[40].mxu1 %vm373_vm0, %v1949_v47 }
  0x63   :  { %1846 = vmatprep.mubr.msk.bf16.mxu0 %vm373_vm0, %v1950_v48 }
  0x6a   :  { %1847 = vmatmul.mubr.msk.bf16.gmra.mrb[44].mxu0 %vm373_vm0, %v1951_v49 }
  0xe5   :  { %v1804_v51 = vpop.f32.mrb[0].mxu0  ;;  %v1852_v52 = vpop.f32.mrb[0].mxu1 }
  0xe6   :  { %v555_v53 = vadd.f32 %v1804_v51, %v2171_v50  ;;  %v546_v54 = vpop.f32.mrb[1].mxu0  ;;  %v747_v55 = vadd.f32 %v1852_v52, %v2171_v50  ;;  %v738_v56 = vpop.f32.mrb[1].mxu1 }
  0xe7   :  { %v547_v57 = vadd.f32 %v2171_v50, %v546_v54  ;;  %v1805_v58 = vpop.f32.mrb[2].mxu0  ;;  %v739_v59 = vadd.f32 %v2171_v50, %v738_v56  ;;  %v1853_v60 = vpop.f32.mrb[2].mxu1 }
  0xe8   :  { %v914_v61 = vmax.f32 %v555_v53, 0.0  ;;  %v558_v62 = vadd.f32 %v1805_v58, %v2171_v50  ;;  %v549_v63 = vpop.f32.mrb[3].mxu0  ;;  %v962_v0 = vmax.f32 %v747_v55, 0.0  ;;  %v750_v1 = vadd.f32 %v1853_v60, %v2171_v50  ;;  %v741_v2 = vpop.f32.mrb[3].mxu1 }
  0xe9   :  { %v912_v3 = vmax.f32 %v547_v57, 0.0  ;;  %v550_v4 = vadd.f32 %v2171_v50, %v549_v63  ;;  %v960_v5 = vmax.f32 %v739_v59, 0.0  ;;  %v742_v6 = vadd.f32 %v2171_v50, %v741_v2 }
  0xea   :  { %v1655_v7 = vpack.c.bf16 %v914_v61, %v914_v61  ;;  %v915_v8 = vmax.f32 %v558_v62, 0.0  ;;  %v1703_v9 = vpack.c.bf16 %v962_v0, %v962_v0  ;;  %v963_v10 = vmax.f32 %v750_v1, 0.0 }
  0xeb   :  { %v1653_v11 = vpack.c.bf16 %v912_v3, %v912_v3  ;;  %v913_v12 = vmax.f32 %v550_v4, 0.0  ;;  %v1701_v13 = vpack.c.bf16 %v960_v5, %v960_v5  ;;  %v961_v14 = vmax.f32 %v742_v6, 0.0 }
  0xec   :  { %1371 = vst.msk [vmem:[%s2630_s3 + $0x8] sm:$0xf] %vm1368_vm1, %v1655_v7  ;;  %v1656_v15 = vpack.c.bf16 %v915_v8, %v915_v8  ;;  %1419 = vst.msk [vmem:[%s2630_s3 + $0xc8] sm:$0xf] %vm1368_vm1, %v1703_v9  ;;  %v1704_v16 = vpack.c.bf16 %v963_v10, %v963_v10 }
  0xed   :  { %1369 = vst.msk [vmem:[%s2630_s3] sm:$0xf] %vm1368_vm1, %v1653_v11  ;;  %v1654_v17 = vpack.c.bf16 %v913_v12, %v913_v12  ;;  %1417 = vst.msk [vmem:[%s2630_s3 + $0xc0] sm:$0xf] %vm1368_vm1, %v1701_v13  ;;  %v1808_v18 = vpop.f32.mrb[4].mxu0  ;;  %v1702_v19 = vpack.c.bf16 %v961_v14, %v961_v14  ;;  %v1856_v20 = vpop.f32.mrb[4].mxu1 }
  0xee   :  { %1372 = vst.msk [vmem:[%s2630_s3 + $0xc] sm:$0xf] %vm1368_vm1, %v1656_v15  ;;  %1420 = vst.msk [vmem:[%s2630_s3 + $0xcc] sm:$0xf] %vm1368_vm1, %v1704_v16  ;;  %v571_v21 = vadd.f32 %v1808_v18, %v2171_v50  ;;  %v562_v22 = vpop.f32.mrb[5].mxu0  ;;  %v763_v23 = vadd.f32 %v1856_v20, %v2171_v50  ;;  %v754_v24 = vpop.f32.mrb[5].mxu1 }
  0xef   :  { %1370 = vst.msk [vmem:[%s2630_s3 + $0x4] sm:$0xf] %vm1368_vm1, %v1654_v17  ;;  %1418 = vst.msk [vmem:[%s2630_s3 + $0xc4] sm:$0xf] %vm1368_vm1, %v1702_v19  ;;  %v563_v25 = vadd.f32 %v2171_v50, %v562_v22  ;;  %v1809_v26 = vpop.f32.mrb[6].mxu0  ;;  %v755_v27 = vadd.f32 %v2171_v50, %v754_v24  ;;  %v1857_v28 = vpop.f32.mrb[6].mxu1 }
  0xf0   :  { %v918_v29 = vmax.f32 %v571_v21, 0.0  ;;  %v574_v30 = vadd.f32 %v1809_v26, %v2171_v50  ;;  %v565_v31 = vpop.f32.mrb[7].mxu0  ;;  %v966_v32 = vmax.f32 %v763_v23, 0.0  ;;  %v766_v33 = vadd.f32 %v1857_v28, %v2171_v50  ;;  %v757_v34 = vpop.f32.mrb[7].mxu1 }
  0xf1   :  { %v916_v35 = vmax.f32 %v563_v25, 0.0  ;;  %v566_v36 = vadd.f32 %v2171_v50, %v565_v31  ;;  %v964_v37 = vmax.f32 %v755_v27, 0.0  ;;  %v758_v38 = vadd.f32 %v2171_v50, %v757_v34 }
  0xf2   :  { %v1659_v39 = vpack.c.bf16 %v918_v29, %v918_v29  ;;  %v919_v40 = vmax.f32 %v574_v30, 0.0  ;;  %v1707_v41 = vpack.c.bf16 %v966_v32, %v966_v32  ;;  %v967_v42 = vmax.f32 %v766_v33, 0.0 }
  0xf3   :  { %v1657_v43 = vpack.c.bf16 %v916_v35, %v916_v35  ;;  %v917_v44 = vmax.f32 %v566_v36, 0.0  ;;  %v1705_v45 = vpack.c.bf16 %v964_v37, %v964_v37  ;;  %v965_v46 = vmax.f32 %v758_v38, 0.0 }
  0xf4   :  { %1375 = vst.msk [vmem:[%s2630_s3 + $0x18] sm:$0xf] %vm1368_vm1, %v1659_v39  ;;  %v1660_v47 = vpack.c.bf16 %v919_v40, %v919_v40  ;;  %1423 = vst.msk [vmem:[%s2630_s3 + $0xd8] sm:$0xf] %vm1368_vm1, %v1707_v41  ;;  %v1708_v48 = vpack.c.bf16 %v967_v42, %v967_v42 }
  0xf5   :  { %1373 = vst.msk [vmem:[%s2630_s3 + $0x10] sm:$0xf] %vm1368_vm1, %v1657_v43  ;;  %v1658_v49 = vpack.c.bf16 %v917_v44, %v917_v44  ;;  %1421 = vst.msk [vmem:[%s2630_s3 + $0xd0] sm:$0xf] %vm1368_vm1, %v1705_v45  ;;  %v1812_v51 = vpop.f32.mrb[8].mxu0  ;;  %v1706_v52 = vpack.c.bf16 %v965_v46, %v965_v46  ;;  %v1860_v53 = vpop.f32.mrb[8].mxu1 }
  0xf6   :  { %1376 = vst.msk [vmem:[%s2630_s3 + $0x1c] sm:$0xf] %vm1368_vm1, %v1660_v47  ;;  %1424 = vst.msk [vmem:[%s2630_s3 + $0xdc] sm:$0xf] %vm1368_vm1, %v1708_v48  ;;  %v587_v54 = vadd.f32 %v1812_v51, %v2171_v50  ;;  %v578_v55 = vpop.f32.mrb[9].mxu0  ;;  %v779_v56 = vadd.f32 %v1860_v53, %v2171_v50  ;;  %v770_v57 = vpop.f32.mrb[9].mxu1 }
  0xf7   :  { %1374 = vst.msk [vmem:[%s2630_s3 + $0x14] sm:$0xf] %vm1368_vm1, %v1658_v49  ;;  %1422 = vst.msk [vmem:[%s2630_s3 + $0xd4] sm:$0xf] %vm1368_vm1, %v1706_v52  ;;  %v579_v58 = vadd.f32 %v2171_v50, %v578_v55  ;;  %v1813_v59 = vpop.f32.mrb[10].mxu0  ;;  %v771_v60 = vadd.f32 %v2171_v50, %v770_v57  ;;  %v1861_v61 = vpop.f32.mrb[10].mxu1 }
  0xf8   :  { %v922_v62 = vmax.f32 %v587_v54, 0.0  ;;  %v590_v63 = vadd.f32 %v1813_v59, %v2171_v50  ;;  %v581_v0 = vpop.f32.mrb[11].mxu0  ;;  %v970_v1 = vmax.f32 %v779_v56, 0.0  ;;  %v782_v2 = vadd.f32 %v1861_v61, %v2171_v50  ;;  %v773_v3 = vpop.f32.mrb[11].mxu1 }
  0xf9   :  { %v920_v4 = vmax.f32 %v579_v58, 0.0  ;;  %v582_v5 = vadd.f32 %v2171_v50, %v581_v0  ;;  %v968_v6 = vmax.f32 %v771_v60, 0.0  ;;  %v774_v7 = vadd.f32 %v2171_v50, %v773_v3 }
  0xfa   :  { %v1663_v8 = vpack.c.bf16 %v922_v62, %v922_v62  ;;  %v923_v9 = vmax.f32 %v590_v63, 0.0  ;;  %v1711_v10 = vpack.c.bf16 %v970_v1, %v970_v1  ;;  %v971_v11 = vmax.f32 %v782_v2, 0.0 }
  0xfb   :  { %v1661_v12 = vpack.c.bf16 %v920_v4, %v920_v4  ;;  %v921_v13 = vmax.f32 %v582_v5, 0.0  ;;  %v1709_v14 = vpack.c.bf16 %v968_v6, %v968_v6  ;;  %v969_v15 = vmax.f32 %v774_v7, 0.0 }
  0xfc   :  { %1379 = vst.msk [vmem:[%s2630_s3 + $0x28] sm:$0xf] %vm1368_vm1, %v1663_v8  ;;  %v1664_v16 = vpack.c.bf16 %v923_v9, %v923_v9  ;;  %1427 = vst.msk [vmem:[%s2630_s3 + $0xe8] sm:$0xf] %vm1368_vm1, %v1711_v10  ;;  %v1712_v17 = vpack.c.bf16 %v971_v11, %v971_v11 }
  0xfd   :  { %1377 = vst.msk [vmem:[%s2630_s3 + $0x20] sm:$0xf] %vm1368_vm1, %v1661_v12  ;;  %v1662_v18 = vpack.c.bf16 %v921_v13, %v921_v13  ;;  %1425 = vst.msk [vmem:[%s2630_s3 + $0xe0] sm:$0xf] %vm1368_vm1, %v1709_v14  ;;  %v1816_v19 = vpop.f32.mrb[12].mxu0  ;;  %v1710_v20 = vpack.c.bf16 %v969_v15, %v969_v15  ;;  %v1864_v21 = vpop.f32.mrb[12].mxu1 }
  0xfe   :  { %1380 = vst.msk [vmem:[%s2630_s3 + $0x2c] sm:$0xf] %vm1368_vm1, %v1664_v16  ;;  %1428 = vst.msk [vmem:[%s2630_s3 + $0xec] sm:$0xf] %vm1368_vm1, %v1712_v17  ;;  %v603_v22 = vadd.f32 %v1816_v19, %v2171_v50  ;;  %v594_v23 = vpop.f32.mrb[13].mxu0  ;;  %v795_v24 = vadd.f32 %v1864_v21, %v2171_v50  ;;  %v786_v25 = vpop.f32.mrb[13].mxu1 }
  0xff   :  { %1378 = vst.msk [vmem:[%s2630_s3 + $0x24] sm:$0xf] %vm1368_vm1, %v1662_v18  ;;  %1426 = vst.msk [vmem:[%s2630_s3 + $0xe4] sm:$0xf] %vm1368_vm1, %v1710_v20  ;;  %v595_v26 = vadd.f32 %v2171_v50, %v594_v23  ;;  %v1817_v27 = vpop.f32.mrb[14].mxu0  ;;  %v787_v28 = vadd.f32 %v2171_v50, %v786_v25  ;;  %v1865_v29 = vpop.f32.mrb[14].mxu1 }
 0x100   :  { %v926_v30 = vmax.f32 %v603_v22, 0.0  ;;  %v606_v31 = vadd.f32 %v1817_v27, %v2171_v50  ;;  %v597_v32 = vpop.f32.mrb[15].mxu0  ;;  %v974_v33 = vmax.f32 %v795_v24, 0.0  ;;  %v798_v34 = vadd.f32 %v1865_v29, %v2171_v50  ;;  %v789_v35 = vpop.f32.mrb[15].mxu1 }
 0x101   :  { %v924_v36 = vmax.f32 %v595_v26, 0.0  ;;  %v598_v37 = vadd.f32 %v2171_v50, %v597_v32  ;;  %v972_v38 = vmax.f32 %v787_v28, 0.0  ;;  %v790_v39 = vadd.f32 %v2171_v50, %v789_v35 }
 0x102   :  { %v1667_v40 = vpack.c.bf16 %v926_v30, %v926_v30  ;;  %v927_v41 = vmax.f32 %v606_v31, 0.0  ;;  %v1715_v42 = vpack.c.bf16 %v974_v33, %v974_v33  ;;  %v975_v43 = vmax.f32 %v798_v34, 0.0 }
 0x103   :  { %v1665_v44 = vpack.c.bf16 %v924_v36, %v924_v36  ;;  %v925_v45 = vmax.f32 %v598_v37, 0.0  ;;  %v1713_v46 = vpack.c.bf16 %v972_v38, %v972_v38  ;;  %v973_v47 = vmax.f32 %v790_v39, 0.0 }
 0x104   :  { %1383 = vst.msk [vmem:[%s2630_s3 + $0x38] sm:$0xf] %vm1368_vm1, %v1667_v40  ;;  %v1668_v48 = vpack.c.bf16 %v927_v41, %v927_v41  ;;  %1431 = vst.msk [vmem:[%s2630_s3 + $0xf8] sm:$0xf] %vm1368_vm1, %v1715_v42  ;;  %v1716_v49 = vpack.c.bf16 %v975_v43, %v975_v43 }
 0x105   :  { %1381 = vst.msk [vmem:[%s2630_s3 + $0x30] sm:$0xf] %vm1368_vm1, %v1665_v44  ;;  %v1666_v51 = vpack.c.bf16 %v925_v45, %v925_v45  ;;  %1429 = vst.msk [vmem:[%s2630_s3 + $0xf0] sm:$0xf] %vm1368_vm1, %v1713_v46  ;;  %v1820_v52 = vpop.f32.mrb[16].mxu0  ;;  %v1714_v53 = vpack.c.bf16 %v973_v47, %v973_v47  ;;  %v1868_v54 = vpop.f32.mrb[16].mxu1 }
 0x106   :  { %1384 = vst.msk [vmem:[%s2630_s3 + $0x3c] sm:$0xf] %vm1368_vm1, %v1668_v48  ;;  %1432 = vst.msk [vmem:[%s2630_s3 + $0xfc] sm:$0xf] %vm1368_vm1, %v1716_v49  ;;  %v619_v55 = vadd.f32 %v1820_v52, %v2171_v50  ;;  %v610_v56 = vpop.f32.mrb[17].mxu0  ;;  %v811_v57 = vadd.f32 %v1868_v54, %v2171_v50  ;;  %v802_v58 = vpop.f32.mrb[17].mxu1 }
 0x107   :  { %1382 = vst.msk [vmem:[%s2630_s3 + $0x34] sm:$0xf] %vm1368_vm1, %v1666_v51  ;;  %1430 = vst.msk [vmem:[%s2630_s3 + $0xf4] sm:$0xf] %vm1368_vm1, %v1714_v53  ;;  %v611_v59 = vadd.f32 %v2171_v50, %v610_v56  ;;  %v1821_v60 = vpop.f32.mrb[18].mxu0  ;;  %v803_v61 = vadd.f32 %v2171_v50, %v802_v58  ;;  %v1869_v62 = vpop.f32.mrb[18].mxu1 }
 0x108   :  { %v930_v63 = vmax.f32 %v619_v55, 0.0  ;;  %v622_v0 = vadd.f32 %v1821_v60, %v2171_v50  ;;  %v613_v1 = vpop.f32.mrb[19].mxu0  ;;  %v978_v2 = vmax.f32 %v811_v57, 0.0  ;;  %v814_v3 = vadd.f32 %v1869_v62, %v2171_v50  ;;  %v805_v4 = vpop.f32.mrb[19].mxu1 }
 0x109   :  { %v928_v5 = vmax.f32 %v611_v59, 0.0  ;;  %v614_v6 = vadd.f32 %v2171_v50, %v613_v1  ;;  %v976_v7 = vmax.f32 %v803_v61, 0.0  ;;  %v806_v8 = vadd.f32 %v2171_v50, %v805_v4 }
 0x10a   :  { %v1671_v9 = vpack.c.bf16 %v930_v63, %v930_v63  ;;  %v931_v10 = vmax.f32 %v622_v0, 0.0  ;;  %v1719_v11 = vpack.c.bf16 %v978_v2, %v978_v2  ;;  %v979_v12 = vmax.f32 %v814_v3, 0.0 }
 0x10b   :  { %v1669_v13 = vpack.c.bf16 %v928_v5, %v928_v5  ;;  %v929_v14 = vmax.f32 %v614_v6, 0.0  ;;  %v1717_v15 = vpack.c.bf16 %v976_v7, %v976_v7  ;;  %v977_v16 = vmax.f32 %v806_v8, 0.0 }
 0x10c   :  { %1387 = vst.msk [vmem:[%s2630_s3 + $0x48] sm:$0xf] %vm1368_vm1, %v1671_v9  ;;  %v1672_v17 = vpack.c.bf16 %v931_v10, %v931_v10  ;;  %1435 = vst.msk [vmem:[%s2630_s3 + $0x108] sm:$0xf] %vm1368_vm1, %v1719_v11  ;;  %v1720_v18 = vpack.c.bf16 %v979_v12, %v979_v12 }
 0x10d   :  { %1385 = vst.msk [vmem:[%s2630_s3 + $0x40] sm:$0xf] %vm1368_vm1, %v1669_v13  ;;  %v1670_v19 = vpack.c.bf16 %v929_v14, %v929_v14  ;;  %1433 = vst.msk [vmem:[%s2630_s3 + $0x100] sm:$0xf] %vm1368_vm1, %v1717_v15  ;;  %v1824_v20 = vpop.f32.mrb[20].mxu0  ;;  %v1718_v21 = vpack.c.bf16 %v977_v16, %v977_v16  ;;  %v1872_v22 = vpop.f32.mrb[20].mxu1 }
 0x10e   :  { %1388 = vst.msk [vmem:[%s2630_s3 + $0x4c] sm:$0xf] %vm1368_vm1, %v1672_v17  ;;  %1436 = vst.msk [vmem:[%s2630_s3 + $0x10c] sm:$0xf] %vm1368_vm1, %v1720_v18  ;;  %v635_v23 = vadd.f32 %v1824_v20, %v2171_v50  ;;  %v626_v24 = vpop.f32.mrb[21].mxu0  ;;  %v827_v25 = vadd.f32 %v1872_v22, %v2171_v50  ;;  %v818_v26 = vpop.f32.mrb[21].mxu1 }
 0x10f   :  { %1386 = vst.msk [vmem:[%s2630_s3 + $0x44] sm:$0xf] %vm1368_vm1, %v1670_v19  ;;  %1434 = vst.msk [vmem:[%s2630_s3 + $0x104] sm:$0xf] %vm1368_vm1, %v1718_v21  ;;  %v627_v27 = vadd.f32 %v2171_v50, %v626_v24  ;;  %v1825_v28 = vpop.f32.mrb[22].mxu0  ;;  %v819_v29 = vadd.f32 %v2171_v50, %v818_v26  ;;  %v1873_v30 = vpop.f32.mrb[22].mxu1 }
 0x110   :  { %v934_v31 = vmax.f32 %v635_v23, 0.0  ;;  %v638_v32 = vadd.f32 %v1825_v28, %v2171_v50  ;;  %v629_v33 = vpop.f32.mrb[23].mxu0  ;;  %v982_v34 = vmax.f32 %v827_v25, 0.0  ;;  %v830_v35 = vadd.f32 %v1873_v30, %v2171_v50  ;;  %v821_v36 = vpop.f32.mrb[23].mxu1 }
 0x111   :  { %v932_v37 = vmax.f32 %v627_v27, 0.0  ;;  %v630_v38 = vadd.f32 %v2171_v50, %v629_v33  ;;  %v980_v39 = vmax.f32 %v819_v29, 0.0  ;;  %v822_v40 = vadd.f32 %v2171_v50, %v821_v36 }
 0x112   :  { %v1675_v41 = vpack.c.bf16 %v934_v31, %v934_v31  ;;  %v935_v42 = vmax.f32 %v638_v32, 0.0  ;;  %v1723_v43 = vpack.c.bf16 %v982_v34, %v982_v34  ;;  %v983_v44 = vmax.f32 %v830_v35, 0.0 }
 0x113   :  { %v1673_v45 = vpack.c.bf16 %v932_v37, %v932_v37  ;;  %v933_v46 = vmax.f32 %v630_v38, 0.0  ;;  %v1721_v47 = vpack.c.bf16 %v980_v39, %v980_v39  ;;  %v981_v48 = vmax.f32 %v822_v40, 0.0 }
 0x114   :  { %1391 = vst.msk [vmem:[%s2630_s3 + $0x58] sm:$0xf] %vm1368_vm1, %v1675_v41  ;;  %v1676_v49 = vpack.c.bf16 %v935_v42, %v935_v42  ;;  %1439 = vst.msk [vmem:[%s2630_s3 + $0x118] sm:$0xf] %vm1368_vm1, %v1723_v43  ;;  %v1724_v51 = vpack.c.bf16 %v983_v44, %v983_v44 }
 0x115   :  { %1389 = vst.msk [vmem:[%s2630_s3 + $0x50] sm:$0xf] %vm1368_vm1, %v1673_v45  ;;  %v1674_v52 = vpack.c.bf16 %v933_v46, %v933_v46  ;;  %1437 = vst.msk [vmem:[%s2630_s3 + $0x110] sm:$0xf] %vm1368_vm1, %v1721_v47  ;;  %v1828_v53 = vpop.f32.mrb[24].mxu0  ;;  %v1722_v54 = vpack.c.bf16 %v981_v48, %v981_v48  ;;  %v1876_v55 = vpop.f32.mrb[24].mxu1 }
 0x116   :  { %1392 = vst.msk [vmem:[%s2630_s3 + $0x5c] sm:$0xf] %vm1368_vm1, %v1676_v49  ;;  %1440 = vst.msk [vmem:[%s2630_s3 + $0x11c] sm:$0xf] %vm1368_vm1, %v1724_v51  ;;  %v651_v56 = vadd.f32 %v1828_v53, %v2171_v50  ;;  %v642_v57 = vpop.f32.mrb[25].mxu0  ;;  %v843_v58 = vadd.f32 %v1876_v55, %v2171_v50  ;;  %v834_v59 = vpop.f32.mrb[25].mxu1 }
 0x117   :  { %1390 = vst.msk [vmem:[%s2630_s3 + $0x54] sm:$0xf] %vm1368_vm1, %v1674_v52  ;;  %1438 = vst.msk [vmem:[%s2630_s3 + $0x114] sm:$0xf] %vm1368_vm1, %v1722_v54  ;;  %v643_v60 = vadd.f32 %v2171_v50, %v642_v57  ;;  %v1829_v61 = vpop.f32.mrb[26].mxu0  ;;  %v835_v62 = vadd.f32 %v2171_v50, %v834_v59  ;;  %v1877_v63 = vpop.f32.mrb[26].mxu1 }
 0x118   :  { %v938_v0 = vmax.f32 %v651_v56, 0.0  ;;  %v654_v1 = vadd.f32 %v1829_v61, %v2171_v50  ;;  %v645_v2 = vpop.f32.mrb[27].mxu0  ;;  %v986_v3 = vmax.f32 %v843_v58, 0.0  ;;  %v846_v4 = vadd.f32 %v1877_v63, %v2171_v50  ;;  %v837_v5 = vpop.f32.mrb[27].mxu1 }
 0x119   :  { %v936_v6 = vmax.f32 %v643_v60, 0.0  ;;  %v646_v7 = vadd.f32 %v2171_v50, %v645_v2  ;;  %v984_v8 = vmax.f32 %v835_v62, 0.0  ;;  %v838_v9 = vadd.f32 %v2171_v50, %v837_v5 }
 0x11a   :  { %v1679_v10 = vpack.c.bf16 %v938_v0, %v938_v0  ;;  %v939_v11 = vmax.f32 %v654_v1, 0.0  ;;  %v1727_v12 = vpack.c.bf16 %v986_v3, %v986_v3  ;;  %v987_v13 = vmax.f32 %v846_v4, 0.0 }
 0x11b   :  { %v1677_v14 = vpack.c.bf16 %v936_v6, %v936_v6  ;;  %v937_v15 = vmax.f32 %v646_v7, 0.0  ;;  %v1725_v16 = vpack.c.bf16 %v984_v8, %v984_v8  ;;  %v985_v17 = vmax.f32 %v838_v9, 0.0 }
 0x11c   :  { %1395 = vst.msk [vmem:[%s2630_s3 + $0x68] sm:$0xf] %vm1368_vm1, %v1679_v10  ;;  %v1680_v18 = vpack.c.bf16 %v939_v11, %v939_v11  ;;  %1443 = vst.msk [vmem:[%s2630_s3 + $0x128] sm:$0xf] %vm1368_vm1, %v1727_v12  ;;  %v1728_v19 = vpack.c.bf16 %v987_v13, %v987_v13 }
 0x11d   :  { %1393 = vst.msk [vmem:[%s2630_s3 + $0x60] sm:$0xf] %vm1368_vm1, %v1677_v14  ;;  %v1678_v20 = vpack.c.bf16 %v937_v15, %v937_v15  ;;  %1441 = vst.msk [vmem:[%s2630_s3 + $0x120] sm:$0xf] %vm1368_vm1, %v1725_v16  ;;  %v1832_v21 = vpop.f32.mrb[28].mxu0  ;;  %v1726_v22 = vpack.c.bf16 %v985_v17, %v985_v17  ;;  %v1880_v23 = vpop.f32.mrb[28].mxu1 }
 0x11e   :  { %1396 = vst.msk [vmem:[%s2630_s3 + $0x6c] sm:$0xf] %vm1368_vm1, %v1680_v18  ;;  %1444 = vst.msk [vmem:[%s2630_s3 + $0x12c] sm:$0xf] %vm1368_vm1, %v1728_v19  ;;  %v667_v24 = vadd.f32 %v1832_v21, %v2171_v50  ;;  %v658_v25 = vpop.f32.mrb[29].mxu0  ;;  %v859_v26 = vadd.f32 %v1880_v23, %v2171_v50  ;;  %v850_v27 = vpop.f32.mrb[29].mxu1 }
 0x11f   :  { %1394 = vst.msk [vmem:[%s2630_s3 + $0x64] sm:$0xf] %vm1368_vm1, %v1678_v20  ;;  %1442 = vst.msk [vmem:[%s2630_s3 + $0x124] sm:$0xf] %vm1368_vm1, %v1726_v22  ;;  %v659_v28 = vadd.f32 %v2171_v50, %v658_v25  ;;  %v1833_v29 = vpop.f32.mrb[30].mxu0  ;;  %v851_v30 = vadd.f32 %v2171_v50, %v850_v27  ;;  %v1881_v31 = vpop.f32.mrb[30].mxu1 }
 0x120   :  { %v942_v32 = vmax.f32 %v667_v24, 0.0  ;;  %v670_v33 = vadd.f32 %v1833_v29, %v2171_v50  ;;  %v661_v34 = vpop.f32.mrb[31].mxu0  ;;  %v990_v35 = vmax.f32 %v859_v26, 0.0  ;;  %v862_v36 = vadd.f32 %v1881_v31, %v2171_v50  ;;  %v853_v37 = vpop.f32.mrb[31].mxu1 }
 0x121   :  { %v940_v38 = vmax.f32 %v659_v28, 0.0  ;;  %v662_v39 = vadd.f32 %v2171_v50, %v661_v34  ;;  %v988_v40 = vmax.f32 %v851_v30, 0.0  ;;  %v854_v41 = vadd.f32 %v2171_v50, %v853_v37 }
 0x122   :  { %v1683_v42 = vpack.c.bf16 %v942_v32, %v942_v32  ;;  %v943_v43 = vmax.f32 %v670_v33, 0.0  ;;  %v1731_v44 = vpack.c.bf16 %v990_v35, %v990_v35  ;;  %v991_v45 = vmax.f32 %v862_v36, 0.0 }
 0x123   :  { %v1681_v46 = vpack.c.bf16 %v940_v38, %v940_v38  ;;  %v941_v47 = vmax.f32 %v662_v39, 0.0  ;;  %v1729_v48 = vpack.c.bf16 %v988_v40, %v988_v40  ;;  %v989_v49 = vmax.f32 %v854_v41, 0.0 }
 0x124   :  { %1399 = vst.msk [vmem:[%s2630_s3 + $0x78] sm:$0xf] %vm1368_vm1, %v1683_v42  ;;  %v1684_v51 = vpack.c.bf16 %v943_v43, %v943_v43  ;;  %1447 = vst.msk [vmem:[%s2630_s3 + $0x138] sm:$0xf] %vm1368_vm1, %v1731_v44  ;;  %v1732_v52 = vpack.c.bf16 %v991_v45, %v991_v45 }
 0x125   :  { %1397 = vst.msk [vmem:[%s2630_s3 + $0x70] sm:$0xf] %vm1368_vm1, %v1681_v46  ;;  %v1682_v53 = vpack.c.bf16 %v941_v47, %v941_v47  ;;  %1445 = vst.msk [vmem:[%s2630_s3 + $0x130] sm:$0xf] %vm1368_vm1, %v1729_v48  ;;  %v1836_v54 = vpop.f32.mrb[32].mxu0  ;;  %v1730_v55 = vpack.c.bf16 %v989_v49, %v989_v49  ;;  %v1884_v56 = vpop.f32.mrb[32].mxu1 }
 0x126   :  { %1400 = vst.msk [vmem:[%s2630_s3 + $0x7c] sm:$0xf] %vm1368_vm1, %v1684_v51  ;;  %1448 = vst.msk [vmem:[%s2630_s3 + $0x13c] sm:$0xf] %vm1368_vm1, %v1732_v52  ;;  %v683_v57 = vadd.f32 %v1836_v54, %v2171_v50  ;;  %v674_v58 = vpop.f32.mrb[33].mxu0  ;;  %v875_v59 = vadd.f32 %v1884_v56, %v2171_v50  ;;  %v866_v60 = vpop.f32.mrb[33].mxu1 }
 0x127   :  { %1398 = vst.msk [vmem:[%s2630_s3 + $0x74] sm:$0xf] %vm1368_vm1, %v1682_v53  ;;  %1446 = vst.msk [vmem:[%s2630_s3 + $0x134] sm:$0xf] %vm1368_vm1, %v1730_v55  ;;  %v675_v61 = vadd.f32 %v2171_v50, %v674_v58  ;;  %v1837_v62 = vpop.f32.mrb[34].mxu0  ;;  %v867_v63 = vadd.f32 %v2171_v50, %v866_v60  ;;  %v1885_v0 = vpop.f32.mrb[34].mxu1 }
 0x128   :  { %v946_v1 = vmax.f32 %v683_v57, 0.0  ;;  %v686_v2 = vadd.f32 %v1837_v62, %v2171_v50  ;;  %v677_v3 = vpop.f32.mrb[35].mxu0  ;;  %v994_v4 = vmax.f32 %v875_v59, 0.0  ;;  %v878_v5 = vadd.f32 %v1885_v0, %v2171_v50  ;;  %v869_v6 = vpop.f32.mrb[35].mxu1 }
 0x129   :  { %v944_v7 = vmax.f32 %v675_v61, 0.0  ;;  %v678_v8 = vadd.f32 %v2171_v50, %v677_v3  ;;  %v992_v9 = vmax.f32 %v867_v63, 0.0  ;;  %v870_v10 = vadd.f32 %v2171_v50, %v869_v6 }
 0x12a   :  { %v1687_v11 = vpack.c.bf16 %v946_v1, %v946_v1  ;;  %v947_v12 = vmax.f32 %v686_v2, 0.0  ;;  %v1735_v13 = vpack.c.bf16 %v994_v4, %v994_v4  ;;  %v995_v14 = vmax.f32 %v878_v5, 0.0 }
 0x12b   :  { %v1685_v15 = vpack.c.bf16 %v944_v7, %v944_v7  ;;  %v945_v16 = vmax.f32 %v678_v8, 0.0  ;;  %v1733_v17 = vpack.c.bf16 %v992_v9, %v992_v9  ;;  %v993_v18 = vmax.f32 %v870_v10, 0.0 }
 0x12c   :  { %1403 = vst.msk [vmem:[%s2630_s3 + $0x88] sm:$0xf] %vm1368_vm1, %v1687_v11  ;;  %v1688_v19 = vpack.c.bf16 %v947_v12, %v947_v12  ;;  %1451 = vst.msk [vmem:[%s2630_s3 + $0x148] sm:$0xf] %vm1368_vm1, %v1735_v13  ;;  %v1736_v20 = vpack.c.bf16 %v995_v14, %v995_v14 }
 0x12d   :  { %1401 = vst.msk [vmem:[%s2630_s3 + $0x80] sm:$0xf] %vm1368_vm1, %v1685_v15  ;;  %v1686_v21 = vpack.c.bf16 %v945_v16, %v945_v16  ;;  %1449 = vst.msk [vmem:[%s2630_s3 + $0x140] sm:$0xf] %vm1368_vm1, %v1733_v17  ;;  %v1840_v22 = vpop.f32.mrb[36].mxu0  ;;  %v1734_v23 = vpack.c.bf16 %v993_v18, %v993_v18  ;;  %v1888_v24 = vpop.f32.mrb[36].mxu1 }
 0x12e   :  { %1404 = vst.msk [vmem:[%s2630_s3 + $0x8c] sm:$0xf] %vm1368_vm1, %v1688_v19  ;;  %1452 = vst.msk [vmem:[%s2630_s3 + $0x14c] sm:$0xf] %vm1368_vm1, %v1736_v20  ;;  %v699_v25 = vadd.f32 %v1840_v22, %v2171_v50  ;;  %v690_v26 = vpop.f32.mrb[37].mxu0  ;;  %v891_v27 = vadd.f32 %v1888_v24, %v2171_v50  ;;  %v882_v28 = vpop.f32.mrb[37].mxu1 }
 0x12f   :  { %1402 = vst.msk [vmem:[%s2630_s3 + $0x84] sm:$0xf] %vm1368_vm1, %v1686_v21  ;;  %1450 = vst.msk [vmem:[%s2630_s3 + $0x144] sm:$0xf] %vm1368_vm1, %v1734_v23  ;;  %v691_v29 = vadd.f32 %v2171_v50, %v690_v26  ;;  %v1841_v30 = vpop.f32.mrb[38].mxu0  ;;  %v883_v31 = vadd.f32 %v2171_v50, %v882_v28  ;;  %v1889_v32 = vpop.f32.mrb[38].mxu1 }
 0x130   :  { %v950_v33 = vmax.f32 %v699_v25, 0.0  ;;  %v702_v34 = vadd.f32 %v1841_v30, %v2171_v50  ;;  %v693_v35 = vpop.f32.mrb[39].mxu0  ;;  %v998_v36 = vmax.f32 %v891_v27, 0.0  ;;  %v894_v37 = vadd.f32 %v1889_v32, %v2171_v50  ;;  %v885_v38 = vpop.f32.mrb[39].mxu1 }
 0x131   :  { %v948_v39 = vmax.f32 %v691_v29, 0.0  ;;  %v694_v40 = vadd.f32 %v2171_v50, %v693_v35  ;;  %v996_v41 = vmax.f32 %v883_v31, 0.0  ;;  %v886_v42 = vadd.f32 %v2171_v50, %v885_v38 }
 0x132   :  { %v1691_v43 = vpack.c.bf16 %v950_v33, %v950_v33  ;;  %v951_v44 = vmax.f32 %v702_v34, 0.0  ;;  %v1739_v45 = vpack.c.bf16 %v998_v36, %v998_v36  ;;  %v999_v46 = vmax.f32 %v894_v37, 0.0 }
 0x133   :  { %v1689_v47 = vpack.c.bf16 %v948_v39, %v948_v39  ;;  %v949_v48 = vmax.f32 %v694_v40, 0.0  ;;  %v1737_v49 = vpack.c.bf16 %v996_v41, %v996_v41  ;;  %v997_v51 = vmax.f32 %v886_v42, 0.0 }
 0x134   :  { %1407 = vst.msk [vmem:[%s2630_s3 + $0x98] sm:$0xf] %vm1368_vm1, %v1691_v43  ;;  %v1692_v52 = vpack.c.bf16 %v951_v44, %v951_v44  ;;  %1455 = vst.msk [vmem:[%s2630_s3 + $0x158] sm:$0xf] %vm1368_vm1, %v1739_v45  ;;  %v1740_v53 = vpack.c.bf16 %v999_v46, %v999_v46 }
 0x135   :  { %1405 = vst.msk [vmem:[%s2630_s3 + $0x90] sm:$0xf] %vm1368_vm1, %v1689_v47  ;;  %v1690_v54 = vpack.c.bf16 %v949_v48, %v949_v48  ;;  %1453 = vst.msk [vmem:[%s2630_s3 + $0x150] sm:$0xf] %vm1368_vm1, %v1737_v49  ;;  %v1844_v55 = vpop.f32.mrb[40].mxu0  ;;  %v1738_v56 = vpack.c.bf16 %v997_v51, %v997_v51  ;;  %v1892_v57 = vpop.f32.mrb[40].mxu1 }
 0x136   :  { %1408 = vst.msk [vmem:[%s2630_s3 + $0x9c] sm:$0xf] %vm1368_vm1, %v1692_v52  ;;  %1456 = vst.msk [vmem:[%s2630_s3 + $0x15c] sm:$0xf] %vm1368_vm1, %v1740_v53  ;;  %v715_v58 = vadd.f32 %v1844_v55, %v2171_v50  ;;  %v706_v59 = vpop.f32.mrb[41].mxu0  ;;  %v907_v60 = vadd.f32 %v1892_v57, %v2171_v50  ;;  %v898_v61 = vpop.f32.mrb[41].mxu1 }
 0x137   :  { %1406 = vst.msk [vmem:[%s2630_s3 + $0x94] sm:$0xf] %vm1368_vm1, %v1690_v54  ;;  %1454 = vst.msk [vmem:[%s2630_s3 + $0x154] sm:$0xf] %vm1368_vm1, %v1738_v56  ;;  %v707_v62 = vadd.f32 %v2171_v50, %v706_v59  ;;  %v1845_v63 = vpop.f32.mrb[42].mxu0  ;;  %v899_v0 = vadd.f32 %v2171_v50, %v898_v61  ;;  %v1893_v1 = vpop.f32.mrb[42].mxu1 }
 0x138   :  { %v954_v2 = vmax.f32 %v715_v58, 0.0  ;;  %v718_v3 = vadd.f32 %v1845_v63, %v2171_v50  ;;  %v709_v4 = vpop.f32.mrb[43].mxu0  ;;  %v1002_v5 = vmax.f32 %v907_v60, 0.0  ;;  %v901_v6 = vpop.f32.mrb[43].mxu1 }
 0x139   :  { %v952_v7 = vmax.f32 %v707_v62, 0.0  ;;  %v710_v8 = vadd.f32 %v2171_v50, %v709_v4  ;;  %v1000_v9 = vmax.f32 %v899_v0, 0.0  ;;  %v902_v10 = vadd.f32 %v2171_v50, %v901_v6 }
 0x13a   :  { %v1695_v11 = vpack.c.bf16 %v954_v2, %v954_v2  ;;  %v955_v12 = vmax.f32 %v718_v3, 0.0  ;;  %v1743_v13 = vpack.c.bf16 %v1002_v5, %v1002_v5 }
 0x13b   :  { %v1693_v14 = vpack.c.bf16 %v952_v7, %v952_v7  ;;  %v953_v15 = vmax.f32 %v710_v8, 0.0  ;;  %v1741_v16 = vpack.c.bf16 %v1000_v9, %v1000_v9  ;;  %v1001_v17 = vmax.f32 %v902_v10, 0.0 }
 0x13c   :  { %1411 = vst.msk [vmem:[%s2630_s3 + $0xa8] sm:$0xf] %vm1368_vm1, %v1695_v11  ;;  %v1696_v18 = vpack.c.bf16 %v955_v12, %v955_v12 }
 0x13d   :  { %1460 = vst.msk [vmem:[%s2630_s3 + $0x168] sm:$0x1] %vm1459_vm2, %v1743_v13  ;;  %v1694_v19 = vpack.c.bf16 %v953_v15, %v953_v15  ;;  %v1848_v20 = vpop.f32.mrb[44].mxu0  ;;  %v1742_v21 = vpack.c.bf16 %v1001_v17, %v1001_v17 }
 0x13e   :  { %1409 = vst.msk [vmem:[%s2630_s3 + $0xa0] sm:$0xf] %vm1368_vm1, %v1693_v14  ;;  %1457 = vst.msk [vmem:[%s2630_s3 + $0x160] sm:$0xf] %vm1368_vm1, %v1741_v16  ;;  %v731_v22 = vadd.f32 %v1848_v20, %v2171_v50  ;;  %v722_v23 = vpop.f32.mrb[45].mxu0 }
 0x13f   :  { %1412 = vst.msk [vmem:[%s2630_s3 + $0xac] sm:$0xf] %vm1368_vm1, %v1696_v18  ;;  %1410 = vst.msk [vmem:[%s2630_s3 + $0xa4] sm:$0xf] %vm1368_vm1, %v1694_v19  ;;  %v723_v24 = vadd.f32 %v2171_v50, %v722_v23  ;;  %v1849_v25 = vpop.f32.mrb[46].mxu0 }
 0x140   :  { %1458 = vst.msk [vmem:[%s2630_s3 + $0x164] sm:$0xf] %vm1368_vm1, %v1742_v21  ;;  %v958_v26 = vmax.f32 %v731_v22, 0.0  ;;  %v734_v27 = vadd.f32 %v1849_v25, %v2171_v50  ;;  %v725_v28 = vpop.f32.mrb[47].mxu0 }
 0x141   :  { %v956_v29 = vmax.f32 %v723_v24, 0.0  ;;  %v726_v30 = vadd.f32 %v2171_v50, %v725_v28 }
 0x142   :  { %v1699_v31 = vpack.c.bf16 %v958_v26, %v958_v26  ;;  %v959_v32 = vmax.f32 %v734_v27, 0.0 }
 0x143   :  { %v1697_v33 = vpack.c.bf16 %v956_v29, %v956_v29  ;;  %v957_v34 = vmax.f32 %v726_v30, 0.0 }
 0x144   :  { %1415 = vst.msk [vmem:[%s2630_s3 + $0xb8] sm:$0xf] %vm1368_vm1, %v1699_v31  ;;  %v1700_v35 = vpack.c.bf16 %v959_v32, %v959_v32 }
 0x145   :  { %1413 = vst.msk [vmem:[%s2630_s3 + $0xb0] sm:$0xf] %vm1368_vm1, %v1697_v33  ;;  %v1698_v36 = vpack.c.bf16 %v957_v34, %v957_v34 }
 0x146   :  { %1416 = vst.msk [vmem:[%s2630_s3 + $0xbc] sm:$0xf] %vm1368_vm1, %v1700_v35 }
 0x147   :  { %1414 = vst.msk [vmem:[%s2630_s3 + $0xb4] sm:$0xf] %vm1368_vm1, %v1698_v36 }

// kernel: critic_net_forward.3
= control target key start
LH: loop header
LB: loop body
LE: loop exit
PB: predicated region body
PF: predicated region fallthrough
CT: control target
= control target key end

     0   :  { %s13906_s13 = smov [#allocation2]   ;;  %s13913_s17 = smov 0   ;;  %s16277_s0 = inlined_call_operand.vmem [shape: bf16[128,512], index: 0, kind: input, shape index: {}]   ;;  %s16278_s1 = inlined_call_operand.vmem [shape: bf16[512,64], index: 1, kind: input, shape index: {}]   ;;  %s16279_s2 = inlined_call_operand.vmem [shape: f32[1,64], index: 2, kind: input, shape index: {}]   ;;  %s16280_s3 = inlined_call_operand.vmem [shape: bf16[9,72,128], index: 3, kind: input, shape index: {}]   ;;  %s16281_s4 = inlined_call_operand.vmem [shape: bf16[9,64,64], index: 4, kind: input, shape index: {}]   ;;  %s16282_s5 = inlined_call_operand.vmem [shape: f32[1,64], index: 5, kind: input, shape index: {}]   ;;  %s16283_s6 = inlined_call_operand.vmem [shape: bf16[36,64,512], index: 6, kind: input, shape index: {}]   ;;  %s16284_s7 = inlined_call_operand.vmem [shape: f32[1,512], index: 7, kind: input, shape index: {}]   ;;  %s16285_s8 = inlined_call_operand.vmem [shape: bf16[512,128], index: 8, kind: input, shape index: {}]   ;;  %s16286_s9 = inlined_call_operand.vmem [shape: f32[1,128], index: 9, kind: input, shape index: {}]   ;;  %s16287_s10 = inlined_call_operand.vmem [shape: f32[2,128], index: 10, kind: output, shape index: {}]  }
   0x1   :  { %s16288_s16 = smov %s16283_s6  ;;  %s13915_s18 = smov 0  }
   0x2 LB: > { %v54_v0 = vld [vmem:[%s13838_s16] sm:$0xf]  ;;  %v56_v1 = vld [vmem:[%s13838_s16 + $0x4] sm:$0xf]  ;;  %v58_v2 = vld [vmem:[%s13838_s16 + $0x8] sm:$0xf]  ;;  %s13846_s18 = sphi %s13915_s18, %s50_s18   ;;  %s13842_s17 = sphi %s13913_s17, %s16289_s17   ;;  %s13838_s16 = sphi %s16288_s16, %s1211_s16   ;;  %s13834_s13 = sphi %s13906_s13, %s1212_s13  }
   0x3   : > { %55 = vst [vmem:[%s13834_s13] sm:$0xf] %v54_v0  ;;  %57 = vst [vmem:[%s13834_s13 + $0x8] sm:$0xf] %v56_v1  ;;  %v60_v3 = vld [vmem:[%s13838_s16 + $0xc] sm:$0xf]  ;;  %s1206_s19 = sadd.s32 1, %s13842_s17 }
   0x4   : > { %59 = vst [vmem:[%s13834_s13 + $0x10] sm:$0xf] %v58_v2  ;;  %v62_v4 = vld [vmem:[%s13838_s16 + $0x20] sm:$0xf]  ;;  %v64_v5 = vld [vmem:[%s13838_s16 + $0x24] sm:$0xf] }
   0x5   : > { %61 = vst [vmem:[%s13834_s13 + $0x18] sm:$0xf] %v60_v3  ;;  %63 = vst [vmem:[%s13834_s13 + $0x20] sm:$0xf] %v62_v4  ;;  %v66_v6 = vld [vmem:[%s13838_s16 + $0x28] sm:$0xf] }
   0x6   : > { %65 = vst [vmem:[%s13834_s13 + $0x28] sm:$0xf] %v64_v5  ;;  %v68_v7 = vld [vmem:[%s13838_s16 + $0x2c] sm:$0xf]  ;;  %v70_v8 = vld [vmem:[%s13838_s16 + $0x40] sm:$0xf] }
   0x7   : > { %67 = vst [vmem:[%s13834_s13 + $0x30] sm:$0xf] %v66_v6  ;;  %69 = vst [vmem:[%s13834_s13 + $0x38] sm:$0xf] %v68_v7  ;;  %v72_v9 = vld [vmem:[%s13838_s16 + $0x44] sm:$0xf] }
   0x8   : > { %71 = vst [vmem:[%s13834_s13 + $0x40] sm:$0xf] %v70_v8  ;;  %v74_v10 = vld [vmem:[%s13838_s16 + $0x48] sm:$0xf]  ;;  %v76_v11 = vld [vmem:[%s13838_s16 + $0x4c] sm:$0xf] }
   0x9   : > { %73 = vst [vmem:[%s13834_s13 + $0x48] sm:$0xf] %v72_v9  ;;  %75 = vst [vmem:[%s13834_s13 + $0x50] sm:$0xf] %v74_v10  ;;  %v78_v12 = vld [vmem:[%s13838_s16 + $0x60] sm:$0xf] }
   0xa   : > { %77 = vst [vmem:[%s13834_s13 + $0x58] sm:$0xf] %v76_v11  ;;  %v80_v13 = vld [vmem:[%s13838_s16 + $0x64] sm:$0xf]  ;;  %v82_v14 = vld [vmem:[%s13838_s16 + $0x68] sm:$0xf] }
   0xb   : > { %79 = vst [vmem:[%s13834_s13 + $0x60] sm:$0xf] %v78_v12  ;;  %81 = vst [vmem:[%s13834_s13 + $0x68] sm:$0xf] %v80_v13  ;;  %v84_v15 = vld [vmem:[%s13838_s16 + $0x6c] sm:$0xf] }
   0xc   : > { %83 = vst [vmem:[%s13834_s13 + $0x70] sm:$0xf] %v82_v14  ;;  %v86_v16 = vld [vmem:[%s13838_s16 + $0x80] sm:$0xf]  ;;  %v88_v17 = vld [vmem:[%s13838_s16 + $0x84] sm:$0xf] }
   0xd   : > { %85 = vst [vmem:[%s13834_s13 + $0x78] sm:$0xf] %v84_v15  ;;  %87 = vst [vmem:[%s13834_s13 + $0x80] sm:$0xf] %v86_v16  ;;  %v90_v18 = vld [vmem:[%s13838_s16 + $0x88] sm:$0xf] }
   0xe   : > { %89 = vst [vmem:[%s13834_s13 + $0x88] sm:$0xf] %v88_v17  ;;  %v92_v19 = vld [vmem:[%s13838_s16 + $0x8c] sm:$0xf]  ;;  %v94_v20 = vld [vmem:[%s13838_s16 + $0xa0] sm:$0xf] }
   0xf   : > { %91 = vst [vmem:[%s13834_s13 + $0x90] sm:$0xf] %v90_v18  ;;  %93 = vst [vmem:[%s13834_s13 + $0x98] sm:$0xf] %v92_v19  ;;  %v96_v21 = vld [vmem:[%s13838_s16 + $0xa4] sm:$0xf] }
  0x10   : > { %95 = vst [vmem:[%s13834_s13 + $0xa0] sm:$0xf] %v94_v20  ;;  %v98_v22 = vld [vmem:[%s13838_s16 + $0xa8] sm:$0xf]  ;;  %v100_v23 = vld [vmem:[%s13838_s16 + $0xac] sm:$0xf] }
  0x11   : > { %97 = vst [vmem:[%s13834_s13 + $0xa8] sm:$0xf] %v96_v21  ;;  %99 = vst [vmem:[%s13834_s13 + $0xb0] sm:$0xf] %v98_v22  ;;  %v102_v24 = vld [vmem:[%s13838_s16 + $0xc0] sm:$0xf] }
  0x12   : > { %101 = vst [vmem:[%s13834_s13 + $0xb8] sm:$0xf] %v100_v23  ;;  %v104_v25 = vld [vmem:[%s13838_s16 + $0xc4] sm:$0xf]  ;;  %v106_v26 = vld [vmem:[%s13838_s16 + $0xc8] sm:$0xf] }
  0x13   : > { %103 = vst [vmem:[%s13834_s13 + $0xc0] sm:$0xf] %v102_v24  ;;  %105 = vst [vmem:[%s13834_s13 + $0xc8] sm:$0xf] %v104_v25  ;;  %v108_v27 = vld [vmem:[%s13838_s16 + $0xcc] sm:$0xf] }
  0x14   : > { %107 = vst [vmem:[%s13834_s13 + $0xd0] sm:$0xf] %v106_v26  ;;  %v110_v28 = vld [vmem:[%s13838_s16 + $0xe0] sm:$0xf]  ;;  %v112_v29 = vld [vmem:[%s13838_s16 + $0xe4] sm:$0xf] }
  0x15   : > { %109 = vst [vmem:[%s13834_s13 + $0xd8] sm:$0xf] %v108_v27  ;;  %111 = vst [vmem:[%s13834_s13 + $0xe0] sm:$0xf] %v110_v28  ;;  %v114_v30 = vld [vmem:[%s13838_s16 + $0xe8] sm:$0xf] }
  0x16   : > { %113 = vst [vmem:[%s13834_s13 + $0xe8] sm:$0xf] %v112_v29  ;;  %v116_v31 = vld [vmem:[%s13838_s16 + $0xec] sm:$0xf]  ;;  %v118_v32 = vld [vmem:[%s13838_s16 + $0x100] sm:$0xf] }
  0x17   : > { %115 = vst [vmem:[%s13834_s13 + $0xf0] sm:$0xf] %v114_v30  ;;  %117 = vst [vmem:[%s13834_s13 + $0xf8] sm:$0xf] %v116_v31  ;;  %v120_v33 = vld [vmem:[%s13838_s16 + $0x104] sm:$0xf] }
  0x18   : > { %119 = vst [vmem:[%s13834_s13 + $0x100] sm:$0xf] %v118_v32  ;;  %v122_v34 = vld [vmem:[%s13838_s16 + $0x108] sm:$0xf]  ;;  %v124_v35 = vld [vmem:[%s13838_s16 + $0x10c] sm:$0xf] }
  0x19   : > { %121 = vst [vmem:[%s13834_s13 + $0x108] sm:$0xf] %v120_v33  ;;  %123 = vst [vmem:[%s13834_s13 + $0x110] sm:$0xf] %v122_v34  ;;  %v126_v36 = vld [vmem:[%s13838_s16 + $0x120] sm:$0xf] }
  0x1a   : > { %125 = vst [vmem:[%s13834_s13 + $0x118] sm:$0xf] %v124_v35  ;;  %v128_v37 = vld [vmem:[%s13838_s16 + $0x124] sm:$0xf]  ;;  %v130_v38 = vld [vmem:[%s13838_s16 + $0x128] sm:$0xf] }
  0x1b   : > { %127 = vst [vmem:[%s13834_s13 + $0x120] sm:$0xf] %v126_v36  ;;  %129 = vst [vmem:[%s13834_s13 + $0x128] sm:$0xf] %v128_v37  ;;  %v132_v39 = vld [vmem:[%s13838_s16 + $0x12c] sm:$0xf] }
  0x1c   : > { %131 = vst [vmem:[%s13834_s13 + $0x130] sm:$0xf] %v130_v38  ;;  %v134_v40 = vld [vmem:[%s13838_s16 + $0x140] sm:$0xf]  ;;  %v136_v41 = vld [vmem:[%s13838_s16 + $0x144] sm:$0xf] }
  0x1d   : > { %133 = vst [vmem:[%s13834_s13 + $0x138] sm:$0xf] %v132_v39  ;;  %135 = vst [vmem:[%s13834_s13 + $0x140] sm:$0xf] %v134_v40  ;;  %v138_v42 = vld [vmem:[%s13838_s16 + $0x148] sm:$0xf] }
  0x1e   : > { %137 = vst [vmem:[%s13834_s13 + $0x148] sm:$0xf] %v136_v41  ;;  %v140_v43 = vld [vmem:[%s13838_s16 + $0x14c] sm:$0xf]  ;;  %v142_v44 = vld [vmem:[%s13838_s16 + $0x160] sm:$0xf] }
  0x1f   : > { %139 = vst [vmem:[%s13834_s13 + $0x150] sm:$0xf] %v138_v42  ;;  %141 = vst [vmem:[%s13834_s13 + $0x158] sm:$0xf] %v140_v43  ;;  %v144_v45 = vld [vmem:[%s13838_s16 + $0x164] sm:$0xf] }
  0x20   : > { %143 = vst [vmem:[%s13834_s13 + $0x160] sm:$0xf] %v142_v44  ;;  %v146_v46 = vld [vmem:[%s13838_s16 + $0x168] sm:$0xf]  ;;  %v148_v47 = vld [vmem:[%s13838_s16 + $0x16c] sm:$0xf] }
  0x21   : > { %145 = vst [vmem:[%s13834_s13 + $0x168] sm:$0xf] %v144_v45  ;;  %147 = vst [vmem:[%s13834_s13 + $0x170] sm:$0xf] %v146_v46  ;;  %v150_v48 = vld [vmem:[%s13838_s16 + $0x180] sm:$0xf] }
  0x22   : > { %149 = vst [vmem:[%s13834_s13 + $0x178] sm:$0xf] %v148_v47  ;;  %v152_v49 = vld [vmem:[%s13838_s16 + $0x184] sm:$0xf]  ;;  %v154_v50 = vld [vmem:[%s13838_s16 + $0x188] sm:$0xf] }
  0x23   : > { %151 = vst [vmem:[%s13834_s13 + $0x180] sm:$0xf] %v150_v48  ;;  %153 = vst [vmem:[%s13834_s13 + $0x188] sm:$0xf] %v152_v49  ;;  %v156_v51 = vld [vmem:[%s13838_s16 + $0x18c] sm:$0xf] }
  0x24   : > { %155 = vst [vmem:[%s13834_s13 + $0x190] sm:$0xf] %v154_v50  ;;  %v158_v52 = vld [vmem:[%s13838_s16 + $0x1a0] sm:$0xf]  ;;  %v160_v53 = vld [vmem:[%s13838_s16 + $0x1a4] sm:$0xf] }
  0x25   : > { %157 = vst [vmem:[%s13834_s13 + $0x198] sm:$0xf] %v156_v51  ;;  %159 = vst [vmem:[%s13834_s13 + $0x1a0] sm:$0xf] %v158_v52  ;;  %v162_v54 = vld [vmem:[%s13838_s16 + $0x1a8] sm:$0xf] }
  0x26   : > { %161 = vst [vmem:[%s13834_s13 + $0x1a8] sm:$0xf] %v160_v53  ;;  %v164_v55 = vld [vmem:[%s13838_s16 + $0x1ac] sm:$0xf]  ;;  %v166_v56 = vld [vmem:[%s13838_s16 + $0x1c0] sm:$0xf] }
  0x27   : > { %163 = vst [vmem:[%s13834_s13 + $0x1b0] sm:$0xf] %v162_v54  ;;  %165 = vst [vmem:[%s13834_s13 + $0x1b8] sm:$0xf] %v164_v55  ;;  %v168_v57 = vld [vmem:[%s13838_s16 + $0x1c4] sm:$0xf] }
  0x28   : > { %167 = vst [vmem:[%s13834_s13 + $0x1c0] sm:$0xf] %v166_v56  ;;  %v170_v58 = vld [vmem:[%s13838_s16 + $0x1c8] sm:$0xf]  ;;  %v172_v59 = vld [vmem:[%s13838_s16 + $0x1cc] sm:$0xf] }
  0x29   : > { %169 = vst [vmem:[%s13834_s13 + $0x1c8] sm:$0xf] %v168_v57  ;;  %171 = vst [vmem:[%s13834_s13 + $0x1d0] sm:$0xf] %v170_v58  ;;  %v174_v60 = vld [vmem:[%s13838_s16 + $0x1e0] sm:$0xf] }
  0x2a   : > { %173 = vst [vmem:[%s13834_s13 + $0x1d8] sm:$0xf] %v172_v59  ;;  %v176_v61 = vld [vmem:[%s13838_s16 + $0x1e4] sm:$0xf]  ;;  %v178_v62 = vld [vmem:[%s13838_s16 + $0x1e8] sm:$0xf] }
  0x2b   : > { %175 = vst [vmem:[%s13834_s13 + $0x1e0] sm:$0xf] %v174_v60  ;;  %177 = vst [vmem:[%s13834_s13 + $0x1e8] sm:$0xf] %v176_v61  ;;  %v180_v63 = vld [vmem:[%s13838_s16 + $0x1ec] sm:$0xf] }
  0x2c   : > { %179 = vst [vmem:[%s13834_s13 + $0x1f0] sm:$0xf] %v178_v62  ;;  %v182_v0 = vld [vmem:[%s13838_s16 + $0x200] sm:$0xf]  ;;  %v184_v1 = vld [vmem:[%s13838_s16 + $0x204] sm:$0xf] }
  0x2d   : > { %181 = vst [vmem:[%s13834_s13 + $0x1f8] sm:$0xf] %v180_v63  ;;  %183 = vst [vmem:[%s13834_s13 + $0x200] sm:$0xf] %v182_v0  ;;  %v186_v2 = vld [vmem:[%s13838_s16 + $0x208] sm:$0xf] }
  0x2e   : > { %185 = vst [vmem:[%s13834_s13 + $0x208] sm:$0xf] %v184_v1  ;;  %v188_v3 = vld [vmem:[%s13838_s16 + $0x20c] sm:$0xf]  ;;  %v190_v4 = vld [vmem:[%s13838_s16 + $0x220] sm:$0xf] }
  0x2f   : > { %187 = vst [vmem:[%s13834_s13 + $0x210] sm:$0xf] %v186_v2  ;;  %189 = vst [vmem:[%s13834_s13 + $0x218] sm:$0xf] %v188_v3  ;;  %v192_v5 = vld [vmem:[%s13838_s16 + $0x224] sm:$0xf] }
  0x30   : > { %191 = vst [vmem:[%s13834_s13 + $0x220] sm:$0xf] %v190_v4  ;;  %v194_v6 = vld [vmem:[%s13838_s16 + $0x228] sm:$0xf]  ;;  %v196_v7 = vld [vmem:[%s13838_s16 + $0x22c] sm:$0xf] }
  0x31   : > { %193 = vst [vmem:[%s13834_s13 + $0x228] sm:$0xf] %v192_v5  ;;  %195 = vst [vmem:[%s13834_s13 + $0x230] sm:$0xf] %v194_v6  ;;  %v198_v8 = vld [vmem:[%s13838_s16 + $0x240] sm:$0xf] }
  0x32   : > { %197 = vst [vmem:[%s13834_s13 + $0x238] sm:$0xf] %v196_v7  ;;  %v200_v9 = vld [vmem:[%s13838_s16 + $0x244] sm:$0xf]  ;;  %v202_v10 = vld [vmem:[%s13838_s16 + $0x248] sm:$0xf] }
  0x33   : > { %199 = vst [vmem:[%s13834_s13 + $0x240] sm:$0xf] %v198_v8  ;;  %201 = vst [vmem:[%s13834_s13 + $0x248] sm:$0xf] %v200_v9  ;;  %v204_v11 = vld [vmem:[%s13838_s16 + $0x24c] sm:$0xf] }
  0x34   : > { %203 = vst [vmem:[%s13834_s13 + $0x250] sm:$0xf] %v202_v10  ;;  %v206_v12 = vld [vmem:[%s13838_s16 + $0x260] sm:$0xf]  ;;  %v208_v13 = vld [vmem:[%s13838_s16 + $0x264] sm:$0xf] }
  0x35   : > { %205 = vst [vmem:[%s13834_s13 + $0x258] sm:$0xf] %v204_v11  ;;  %207 = vst [vmem:[%s13834_s13 + $0x260] sm:$0xf] %v206_v12  ;;  %v210_v14 = vld [vmem:[%s13838_s16 + $0x268] sm:$0xf] }
  0x36   : > { %209 = vst [vmem:[%s13834_s13 + $0x268] sm:$0xf] %v208_v13  ;;  %v212_v15 = vld [vmem:[%s13838_s16 + $0x26c] sm:$0xf]  ;;  %v214_v16 = vld [vmem:[%s13838_s16 + $0x280] sm:$0xf] }
  0x37   : > { %211 = vst [vmem:[%s13834_s13 + $0x270] sm:$0xf] %v210_v14  ;;  %213 = vst [vmem:[%s13834_s13 + $0x278] sm:$0xf] %v212_v15  ;;  %v216_v17 = vld [vmem:[%s13838_s16 + $0x284] sm:$0xf] }
  0x38   : > { %215 = vst [vmem:[%s13834_s13 + $0x280] sm:$0xf] %v214_v16  ;;  %v218_v18 = vld [vmem:[%s13838_s16 + $0x288] sm:$0xf]  ;;  %v220_v19 = vld [vmem:[%s13838_s16 + $0x28c] sm:$0xf] }
  0x39   : > { %217 = vst [vmem:[%s13834_s13 + $0x288] sm:$0xf] %v216_v17  ;;  %219 = vst [vmem:[%s13834_s13 + $0x290] sm:$0xf] %v218_v18  ;;  %v222_v20 = vld [vmem:[%s13838_s16 + $0x2a0] sm:$0xf] }
  0x3a   : > { %221 = vst [vmem:[%s13834_s13 + $0x298] sm:$0xf] %v220_v19  ;;  %v224_v21 = vld [vmem:[%s13838_s16 + $0x2a4] sm:$0xf]  ;;  %v226_v22 = vld [vmem:[%s13838_s16 + $0x2a8] sm:$0xf] }
  0x3b   : > { %223 = vst [vmem:[%s13834_s13 + $0x2a0] sm:$0xf] %v222_v20  ;;  %225 = vst [vmem:[%s13834_s13 + $0x2a8] sm:$0xf] %v224_v21  ;;  %v228_v23 = vld [vmem:[%s13838_s16 + $0x2ac] sm:$0xf] }
  0x3c   : > { %227 = vst [vmem:[%s13834_s13 + $0x2b0] sm:$0xf] %v226_v22  ;;  %v230_v24 = vld [vmem:[%s13838_s16 + $0x2c0] sm:$0xf]  ;;  %v232_v25 = vld [vmem:[%s13838_s16 + $0x2c4] sm:$0xf] }
  0x3d   : > { %229 = vst [vmem:[%s13834_s13 + $0x2b8] sm:$0xf] %v228_v23  ;;  %231 = vst [vmem:[%s13834_s13 + $0x2c0] sm:$0xf] %v230_v24  ;;  %v234_v26 = vld [vmem:[%s13838_s16 + $0x2c8] sm:$0xf] }
  0x3e   : > { %233 = vst [vmem:[%s13834_s13 + $0x2c8] sm:$0xf] %v232_v25  ;;  %v236_v27 = vld [vmem:[%s13838_s16 + $0x2cc] sm:$0xf]  ;;  %v238_v28 = vld [vmem:[%s13838_s16 + $0x2e0] sm:$0xf] }
  0x3f   : > { %235 = vst [vmem:[%s13834_s13 + $0x2d0] sm:$0xf] %v234_v26  ;;  %237 = vst [vmem:[%s13834_s13 + $0x2d8] sm:$0xf] %v236_v27  ;;  %v240_v29 = vld [vmem:[%s13838_s16 + $0x2e4] sm:$0xf] }
  0x40   : > { %239 = vst [vmem:[%s13834_s13 + $0x2e0] sm:$0xf] %v238_v28  ;;  %v242_v30 = vld [vmem:[%s13838_s16 + $0x2e8] sm:$0xf]  ;;  %v244_v31 = vld [vmem:[%s13838_s16 + $0x2ec] sm:$0xf] }
  0x41   : > { %241 = vst [vmem:[%s13834_s13 + $0x2e8] sm:$0xf] %v240_v29  ;;  %243 = vst [vmem:[%s13834_s13 + $0x2f0] sm:$0xf] %v242_v30  ;;  %v246_v32 = vld [vmem:[%s13838_s16 + $0x300] sm:$0xf] }
  0x42   : > { %245 = vst [vmem:[%s13834_s13 + $0x2f8] sm:$0xf] %v244_v31  ;;  %v248_v33 = vld [vmem:[%s13838_s16 + $0x304] sm:$0xf]  ;;  %v250_v34 = vld [vmem:[%s13838_s16 + $0x308] sm:$0xf] }
  0x43   : > { %247 = vst [vmem:[%s13834_s13 + $0x300] sm:$0xf] %v246_v32  ;;  %249 = vst [vmem:[%s13834_s13 + $0x308] sm:$0xf] %v248_v33  ;;  %v252_v35 = vld [vmem:[%s13838_s16 + $0x30c] sm:$0xf] }
  0x44   : > { %251 = vst [vmem:[%s13834_s13 + $0x310] sm:$0xf] %v250_v34  ;;  %v254_v36 = vld [vmem:[%s13838_s16 + $0x320] sm:$0xf]  ;;  %v256_v37 = vld [vmem:[%s13838_s16 + $0x324] sm:$0xf] }
  0x45   : > { %253 = vst [vmem:[%s13834_s13 + $0x318] sm:$0xf] %v252_v35  ;;  %255 = vst [vmem:[%s13834_s13 + $0x320] sm:$0xf] %v254_v36  ;;  %v258_v38 = vld [vmem:[%s13838_s16 + $0x328] sm:$0xf] }
  0x46   : > { %257 = vst [vmem:[%s13834_s13 + $0x328] sm:$0xf] %v256_v37  ;;  %v260_v39 = vld [vmem:[%s13838_s16 + $0x32c] sm:$0xf]  ;;  %v262_v40 = vld [vmem:[%s13838_s16 + $0x340] sm:$0xf] }
  0x47   : > { %259 = vst [vmem:[%s13834_s13 + $0x330] sm:$0xf] %v258_v38  ;;  %261 = vst [vmem:[%s13834_s13 + $0x338] sm:$0xf] %v260_v39  ;;  %v264_v41 = vld [vmem:[%s13838_s16 + $0x344] sm:$0xf] }
  0x48   : > { %263 = vst [vmem:[%s13834_s13 + $0x340] sm:$0xf] %v262_v40  ;;  %v266_v42 = vld [vmem:[%s13838_s16 + $0x348] sm:$0xf]  ;;  %v268_v43 = vld [vmem:[%s13838_s16 + $0x34c] sm:$0xf] }
  0x49   : > { %265 = vst [vmem:[%s13834_s13 + $0x348] sm:$0xf] %v264_v41  ;;  %267 = vst [vmem:[%s13834_s13 + $0x350] sm:$0xf] %v266_v42  ;;  %v270_v44 = vld [vmem:[%s13838_s16 + $0x360] sm:$0xf] }
  0x4a   : > { %269 = vst [vmem:[%s13834_s13 + $0x358] sm:$0xf] %v268_v43  ;;  %v272_v45 = vld [vmem:[%s13838_s16 + $0x364] sm:$0xf]  ;;  %v274_v46 = vld [vmem:[%s13838_s16 + $0x368] sm:$0xf] }
  0x4b   : > { %271 = vst [vmem:[%s13834_s13 + $0x360] sm:$0xf] %v270_v44  ;;  %273 = vst [vmem:[%s13834_s13 + $0x368] sm:$0xf] %v272_v45  ;;  %v276_v47 = vld [vmem:[%s13838_s16 + $0x36c] sm:$0xf] }
  0x4c   : > { %275 = vst [vmem:[%s13834_s13 + $0x370] sm:$0xf] %v274_v46  ;;  %v278_v48 = vld [vmem:[%s13838_s16 + $0x380] sm:$0xf]  ;;  %v280_v49 = vld [vmem:[%s13838_s16 + $0x384] sm:$0xf] }
  0x4d   : > { %277 = vst [vmem:[%s13834_s13 + $0x378] sm:$0xf] %v276_v47  ;;  %279 = vst [vmem:[%s13834_s13 + $0x380] sm:$0xf] %v278_v48  ;;  %v282_v50 = vld [vmem:[%s13838_s16 + $0x388] sm:$0xf] }
  0x4e   : > { %281 = vst [vmem:[%s13834_s13 + $0x388] sm:$0xf] %v280_v49  ;;  %v284_v51 = vld [vmem:[%s13838_s16 + $0x38c] sm:$0xf]  ;;  %v286_v52 = vld [vmem:[%s13838_s16 + $0x3a0] sm:$0xf] }
  0x4f   : > { %283 = vst [vmem:[%s13834_s13 + $0x390] sm:$0xf] %v282_v50  ;;  %285 = vst [vmem:[%s13834_s13 + $0x398] sm:$0xf] %v284_v51  ;;  %v288_v53 = vld [vmem:[%s13838_s16 + $0x3a4] sm:$0xf] }
  0x50   : > { %287 = vst [vmem:[%s13834_s13 + $0x3a0] sm:$0xf] %v286_v52  ;;  %v290_v54 = vld [vmem:[%s13838_s16 + $0x3a8] sm:$0xf]  ;;  %v292_v55 = vld [vmem:[%s13838_s16 + $0x3ac] sm:$0xf] }
  0x51   : > { %289 = vst [vmem:[%s13834_s13 + $0x3a8] sm:$0xf] %v288_v53  ;;  %291 = vst [vmem:[%s13834_s13 + $0x3b0] sm:$0xf] %v290_v54  ;;  %v294_v56 = vld [vmem:[%s13838_s16 + $0x3c0] sm:$0xf] }
  0x52   : > { %293 = vst [vmem:[%s13834_s13 + $0x3b8] sm:$0xf] %v292_v55  ;;  %v296_v57 = vld [vmem:[%s13838_s16 + $0x3c4] sm:$0xf]  ;;  %v298_v58 = vld [vmem:[%s13838_s16 + $0x3c8] sm:$0xf] }
  0x53   : > { %295 = vst [vmem:[%s13834_s13 + $0x3c0] sm:$0xf] %v294_v56  ;;  %297 = vst [vmem:[%s13834_s13 + $0x3c8] sm:$0xf] %v296_v57  ;;  %v300_v59 = vld [vmem:[%s13838_s16 + $0x3cc] sm:$0xf] }
  0x54   : > { %299 = vst [vmem:[%s13834_s13 + $0x3d0] sm:$0xf] %v298_v58  ;;  %v302_v60 = vld [vmem:[%s13838_s16 + $0x3e0] sm:$0xf]  ;;  %v304_v61 = vld [vmem:[%s13838_s16 + $0x3e4] sm:$0xf] }
  0x55   : > { %301 = vst [vmem:[%s13834_s13 + $0x3d8] sm:$0xf] %v300_v59  ;;  %303 = vst [vmem:[%s13834_s13 + $0x3e0] sm:$0xf] %v302_v60  ;;  %v306_v62 = vld [vmem:[%s13838_s16 + $0x3e8] sm:$0xf] }
  0x56   : > { %305 = vst [vmem:[%s13834_s13 + $0x3e8] sm:$0xf] %v304_v61  ;;  %v308_v63 = vld [vmem:[%s13838_s16 + $0x3ec] sm:$0xf]  ;;  %v310_v0 = vld [vmem:[%s13838_s16 + $0x400] sm:$0xf] }
  0x57   : > { %307 = vst [vmem:[%s13834_s13 + $0x3f0] sm:$0xf] %v306_v62  ;;  %309 = vst [vmem:[%s13834_s13 + $0x3f8] sm:$0xf] %v308_v63  ;;  %v312_v1 = vld [vmem:[%s13838_s16 + $0x404] sm:$0xf] }
  0x58   : > { %311 = vst [vmem:[%s13834_s13 + $0x400] sm:$0xf] %v310_v0  ;;  %v314_v2 = vld [vmem:[%s13838_s16 + $0x408] sm:$0xf]  ;;  %v316_v3 = vld [vmem:[%s13838_s16 + $0x40c] sm:$0xf] }
  0x59   : > { %313 = vst [vmem:[%s13834_s13 + $0x408] sm:$0xf] %v312_v1  ;;  %315 = vst [vmem:[%s13834_s13 + $0x410] sm:$0xf] %v314_v2  ;;  %v318_v4 = vld [vmem:[%s13838_s16 + $0x420] sm:$0xf] }
  0x5a   : > { %317 = vst [vmem:[%s13834_s13 + $0x418] sm:$0xf] %v316_v3  ;;  %v320_v5 = vld [vmem:[%s13838_s16 + $0x424] sm:$0xf]  ;;  %v322_v6 = vld [vmem:[%s13838_s16 + $0x428] sm:$0xf] }
  0x5b   : > { %319 = vst [vmem:[%s13834_s13 + $0x420] sm:$0xf] %v318_v4  ;;  %321 = vst [vmem:[%s13834_s13 + $0x428] sm:$0xf] %v320_v5  ;;  %v324_v7 = vld [vmem:[%s13838_s16 + $0x42c] sm:$0xf] }
  0x5c   : > { %323 = vst [vmem:[%s13834_s13 + $0x430] sm:$0xf] %v322_v6  ;;  %v326_v8 = vld [vmem:[%s13838_s16 + $0x440] sm:$0xf]  ;;  %v328_v9 = vld [vmem:[%s13838_s16 + $0x444] sm:$0xf] }
  0x5d   : > { %325 = vst [vmem:[%s13834_s13 + $0x438] sm:$0xf] %v324_v7  ;;  %327 = vst [vmem:[%s13834_s13 + $0x440] sm:$0xf] %v326_v8  ;;  %v330_v10 = vld [vmem:[%s13838_s16 + $0x448] sm:$0xf] }
  0x5e   : > { %329 = vst [vmem:[%s13834_s13 + $0x448] sm:$0xf] %v328_v9  ;;  %v332_v11 = vld [vmem:[%s13838_s16 + $0x44c] sm:$0xf]  ;;  %v334_v12 = vld [vmem:[%s13838_s16 + $0x460] sm:$0xf] }
  0x5f   : > { %331 = vst [vmem:[%s13834_s13 + $0x450] sm:$0xf] %v330_v10  ;;  %333 = vst [vmem:[%s13834_s13 + $0x458] sm:$0xf] %v332_v11  ;;  %v336_v13 = vld [vmem:[%s13838_s16 + $0x464] sm:$0xf] }
  0x60   : > { %335 = vst [vmem:[%s13834_s13 + $0x460] sm:$0xf] %v334_v12  ;;  %v338_v14 = vld [vmem:[%s13838_s16 + $0x468] sm:$0xf]  ;;  %v340_v15 = vld [vmem:[%s13838_s16 + $0x46c] sm:$0xf] }
  0x61   : > { %337 = vst [vmem:[%s13834_s13 + $0x468] sm:$0xf] %v336_v13  ;;  %339 = vst [vmem:[%s13834_s13 + $0x470] sm:$0xf] %v338_v14  ;;  %v342_v16 = vld [vmem:[%s13838_s16 + $0x480] sm:$0xf] }
  0x62   : > { %341 = vst [vmem:[%s13834_s13 + $0x478] sm:$0xf] %v340_v15  ;;  %v344_v17 = vld [vmem:[%s13838_s16 + $0x484] sm:$0xf]  ;;  %v346_v18 = vld [vmem:[%s13838_s16 + $0x488] sm:$0xf] }
  0x63   : > { %343 = vst [vmem:[%s13834_s13 + $0x480] sm:$0xf] %v342_v16  ;;  %345 = vst [vmem:[%s13834_s13 + $0x488] sm:$0xf] %v344_v17  ;;  %v348_v19 = vld [vmem:[%s13838_s16 + $0x48c] sm:$0xf] }
  0x64   : > { %347 = vst [vmem:[%s13834_s13 + $0x490] sm:$0xf] %v346_v18  ;;  %v350_v20 = vld [vmem:[%s13838_s16 + $0x4a0] sm:$0xf]  ;;  %v352_v21 = vld [vmem:[%s13838_s16 + $0x4a4] sm:$0xf] }
  0x65   : > { %349 = vst [vmem:[%s13834_s13 + $0x498] sm:$0xf] %v348_v19  ;;  %351 = vst [vmem:[%s13834_s13 + $0x4a0] sm:$0xf] %v350_v20  ;;  %v354_v22 = vld [vmem:[%s13838_s16 + $0x4a8] sm:$0xf] }
  0x66   : > { %353 = vst [vmem:[%s13834_s13 + $0x4a8] sm:$0xf] %v352_v21  ;;  %v356_v23 = vld [vmem:[%s13838_s16 + $0x4ac] sm:$0xf]  ;;  %v358_v24 = vld [vmem:[%s13838_s16 + $0x4c0] sm:$0xf] }
  0x67   : > { %355 = vst [vmem:[%s13834_s13 + $0x4b0] sm:$0xf] %v354_v22  ;;  %357 = vst [vmem:[%s13834_s13 + $0x4b8] sm:$0xf] %v356_v23  ;;  %v360_v25 = vld [vmem:[%s13838_s16 + $0x4c4] sm:$0xf] }
  0x68   : > { %359 = vst [vmem:[%s13834_s13 + $0x4c0] sm:$0xf] %v358_v24  ;;  %v362_v26 = vld [vmem:[%s13838_s16 + $0x4c8] sm:$0xf]  ;;  %v364_v27 = vld [vmem:[%s13838_s16 + $0x4cc] sm:$0xf] }
  0x69   : > { %361 = vst [vmem:[%s13834_s13 + $0x4c8] sm:$0xf] %v360_v25  ;;  %363 = vst [vmem:[%s13834_s13 + $0x4d0] sm:$0xf] %v362_v26  ;;  %v366_v28 = vld [vmem:[%s13838_s16 + $0x4e0] sm:$0xf] }
  0x6a   : > { %365 = vst [vmem:[%s13834_s13 + $0x4d8] sm:$0xf] %v364_v27  ;;  %v368_v29 = vld [vmem:[%s13838_s16 + $0x4e4] sm:$0xf]  ;;  %v370_v30 = vld [vmem:[%s13838_s16 + $0x4e8] sm:$0xf] }
  0x6b   : > { %367 = vst [vmem:[%s13834_s13 + $0x4e0] sm:$0xf] %v366_v28  ;;  %369 = vst [vmem:[%s13834_s13 + $0x4e8] sm:$0xf] %v368_v29  ;;  %v372_v31 = vld [vmem:[%s13838_s16 + $0x4ec] sm:$0xf] }
  0x6c   : > { %371 = vst [vmem:[%s13834_s13 + $0x4f0] sm:$0xf] %v370_v30  ;;  %v374_v32 = vld [vmem:[%s13838_s16 + $0x500] sm:$0xf]  ;;  %v376_v33 = vld [vmem:[%s13838_s16 + $0x504] sm:$0xf] }
  0x6d   : > { %373 = vst [vmem:[%s13834_s13 + $0x4f8] sm:$0xf] %v372_v31  ;;  %375 = vst [vmem:[%s13834_s13 + $0x500] sm:$0xf] %v374_v32  ;;  %v378_v34 = vld [vmem:[%s13838_s16 + $0x508] sm:$0xf] }
  0x6e   : > { %377 = vst [vmem:[%s13834_s13 + $0x508] sm:$0xf] %v376_v33  ;;  %v380_v35 = vld [vmem:[%s13838_s16 + $0x50c] sm:$0xf]  ;;  %v382_v36 = vld [vmem:[%s13838_s16 + $0x520] sm:$0xf] }
  0x6f   : > { %379 = vst [vmem:[%s13834_s13 + $0x510] sm:$0xf] %v378_v34  ;;  %381 = vst [vmem:[%s13834_s13 + $0x518] sm:$0xf] %v380_v35  ;;  %v384_v37 = vld [vmem:[%s13838_s16 + $0x524] sm:$0xf] }
  0x70   : > { %383 = vst [vmem:[%s13834_s13 + $0x520] sm:$0xf] %v382_v36  ;;  %v386_v38 = vld [vmem:[%s13838_s16 + $0x528] sm:$0xf]  ;;  %v388_v39 = vld [vmem:[%s13838_s16 + $0x52c] sm:$0xf] }
  0x71   : > { %385 = vst [vmem:[%s13834_s13 + $0x528] sm:$0xf] %v384_v37  ;;  %387 = vst [vmem:[%s13834_s13 + $0x530] sm:$0xf] %v386_v38  ;;  %v390_v40 = vld [vmem:[%s13838_s16 + $0x540] sm:$0xf] }
  0x72   : > { %389 = vst [vmem:[%s13834_s13 + $0x538] sm:$0xf] %v388_v39  ;;  %v392_v41 = vld [vmem:[%s13838_s16 + $0x544] sm:$0xf]  ;;  %v394_v42 = vld [vmem:[%s13838_s16 + $0x548] sm:$0xf] }
  0x73   : > { %391 = vst [vmem:[%s13834_s13 + $0x540] sm:$0xf] %v390_v40  ;;  %393 = vst [vmem:[%s13834_s13 + $0x548] sm:$0xf] %v392_v41  ;;  %v396_v43 = vld [vmem:[%s13838_s16 + $0x54c] sm:$0xf] }
  0x74   : > { %395 = vst [vmem:[%s13834_s13 + $0x550] sm:$0xf] %v394_v42  ;;  %v398_v44 = vld [vmem:[%s13838_s16 + $0x560] sm:$0xf]  ;;  %v400_v45 = vld [vmem:[%s13838_s16 + $0x564] sm:$0xf] }
  0x75   : > { %397 = vst [vmem:[%s13834_s13 + $0x558] sm:$0xf] %v396_v43  ;;  %399 = vst [vmem:[%s13834_s13 + $0x560] sm:$0xf] %v398_v44  ;;  %v402_v46 = vld [vmem:[%s13838_s16 + $0x568] sm:$0xf] }
  0x76   : > { %401 = vst [vmem:[%s13834_s13 + $0x568] sm:$0xf] %v400_v45  ;;  %v404_v47 = vld [vmem:[%s13838_s16 + $0x56c] sm:$0xf]  ;;  %v406_v48 = vld [vmem:[%s13838_s16 + $0x580] sm:$0xf] }
  0x77   : > { %403 = vst [vmem:[%s13834_s13 + $0x570] sm:$0xf] %v402_v46  ;;  %405 = vst [vmem:[%s13834_s13 + $0x578] sm:$0xf] %v404_v47  ;;  %v408_v49 = vld [vmem:[%s13838_s16 + $0x584] sm:$0xf] }
  0x78   : > { %407 = vst [vmem:[%s13834_s13 + $0x580] sm:$0xf] %v406_v48  ;;  %v410_v50 = vld [vmem:[%s13838_s16 + $0x588] sm:$0xf]  ;;  %v412_v51 = vld [vmem:[%s13838_s16 + $0x58c] sm:$0xf] }
  0x79   : > { %409 = vst [vmem:[%s13834_s13 + $0x588] sm:$0xf] %v408_v49  ;;  %411 = vst [vmem:[%s13834_s13 + $0x590] sm:$0xf] %v410_v50  ;;  %v414_v52 = vld [vmem:[%s13838_s16 + $0x5a0] sm:$0xf] }
  0x7a   : > { %413 = vst [vmem:[%s13834_s13 + $0x598] sm:$0xf] %v412_v51  ;;  %v416_v53 = vld [vmem:[%s13838_s16 + $0x5a4] sm:$0xf]  ;;  %v418_v54 = vld [vmem:[%s13838_s16 + $0x5a8] sm:$0xf] }
  0x7b   : > { %415 = vst [vmem:[%s13834_s13 + $0x5a0] sm:$0xf] %v414_v52  ;;  %417 = vst [vmem:[%s13834_s13 + $0x5a8] sm:$0xf] %v416_v53  ;;  %v420_v55 = vld [vmem:[%s13838_s16 + $0x5ac] sm:$0xf] }
  0x7c   : > { %419 = vst [vmem:[%s13834_s13 + $0x5b0] sm:$0xf] %v418_v54  ;;  %v422_v56 = vld [vmem:[%s13838_s16 + $0x5c0] sm:$0xf]  ;;  %v424_v57 = vld [vmem:[%s13838_s16 + $0x5c4] sm:$0xf] }
  0x7d   : > { %421 = vst [vmem:[%s13834_s13 + $0x5b8] sm:$0xf] %v420_v55  ;;  %423 = vst [vmem:[%s13834_s13 + $0x5c0] sm:$0xf] %v422_v56  ;;  %v426_v58 = vld [vmem:[%s13838_s16 + $0x5c8] sm:$0xf] }
  0x7e   : > { %425 = vst [vmem:[%s13834_s13 + $0x5c8] sm:$0xf] %v424_v57  ;;  %v428_v59 = vld [vmem:[%s13838_s16 + $0x5cc] sm:$0xf]  ;;  %v430_v60 = vld [vmem:[%s13838_s16 + $0x5e0] sm:$0xf] }
  0x7f   : > { %427 = vst [vmem:[%s13834_s13 + $0x5d0] sm:$0xf] %v426_v58  ;;  %429 = vst [vmem:[%s13834_s13 + $0x5d8] sm:$0xf] %v428_v59  ;;  %v432_v61 = vld [vmem:[%s13838_s16 + $0x5e4] sm:$0xf] }
  0x80   : > { %431 = vst [vmem:[%s13834_s13 + $0x5e0] sm:$0xf] %v430_v60  ;;  %v434_v62 = vld [vmem:[%s13838_s16 + $0x5e8] sm:$0xf]  ;;  %v436_v63 = vld [vmem:[%s13838_s16 + $0x5ec] sm:$0xf] }
  0x81   : > { %433 = vst [vmem:[%s13834_s13 + $0x5e8] sm:$0xf] %v432_v61  ;;  %435 = vst [vmem:[%s13834_s13 + $0x5f0] sm:$0xf] %v434_v62  ;;  %v438_v0 = vld [vmem:[%s13838_s16 + $0x600] sm:$0xf] }
  0x82   : > { %437 = vst [vmem:[%s13834_s13 + $0x5f8] sm:$0xf] %v436_v63  ;;  %v440_v1 = vld [vmem:[%s13838_s16 + $0x604] sm:$0xf]  ;;  %v442_v2 = vld [vmem:[%s13838_s16 + $0x608] sm:$0xf] }
  0x83   : > { %439 = vst [vmem:[%s13834_s13 + $0x600] sm:$0xf] %v438_v0  ;;  %441 = vst [vmem:[%s13834_s13 + $0x608] sm:$0xf] %v440_v1  ;;  %v444_v3 = vld [vmem:[%s13838_s16 + $0x60c] sm:$0xf] }
  0x84   : > { %443 = vst [vmem:[%s13834_s13 + $0x610] sm:$0xf] %v442_v2  ;;  %v446_v4 = vld [vmem:[%s13838_s16 + $0x620] sm:$0xf]  ;;  %v448_v5 = vld [vmem:[%s13838_s16 + $0x624] sm:$0xf] }
  0x85   : > { %445 = vst [vmem:[%s13834_s13 + $0x618] sm:$0xf] %v444_v3  ;;  %447 = vst [vmem:[%s13834_s13 + $0x620] sm:$0xf] %v446_v4  ;;  %v450_v6 = vld [vmem:[%s13838_s16 + $0x628] sm:$0xf] }
  0x86   : > { %449 = vst [vmem:[%s13834_s13 + $0x628] sm:$0xf] %v448_v5  ;;  %v452_v7 = vld [vmem:[%s13838_s16 + $0x62c] sm:$0xf]  ;;  %v454_v8 = vld [vmem:[%s13838_s16 + $0x640] sm:$0xf] }
  0x87   : > { %451 = vst [vmem:[%s13834_s13 + $0x630] sm:$0xf] %v450_v6  ;;  %453 = vst [vmem:[%s13834_s13 + $0x638] sm:$0xf] %v452_v7  ;;  %v456_v9 = vld [vmem:[%s13838_s16 + $0x644] sm:$0xf] }
  0x88   : > { %455 = vst [vmem:[%s13834_s13 + $0x640] sm:$0xf] %v454_v8  ;;  %v458_v10 = vld [vmem:[%s13838_s16 + $0x648] sm:$0xf]  ;;  %v460_v11 = vld [vmem:[%s13838_s16 + $0x64c] sm:$0xf] }
  0x89   : > { %457 = vst [vmem:[%s13834_s13 + $0x648] sm:$0xf] %v456_v9  ;;  %459 = vst [vmem:[%s13834_s13 + $0x650] sm:$0xf] %v458_v10  ;;  %v462_v12 = vld [vmem:[%s13838_s16 + $0x660] sm:$0xf] }
  0x8a   : > { %461 = vst [vmem:[%s13834_s13 + $0x658] sm:$0xf] %v460_v11  ;;  %v464_v13 = vld [vmem:[%s13838_s16 + $0x664] sm:$0xf]  ;;  %v466_v14 = vld [vmem:[%s13838_s16 + $0x668] sm:$0xf] }
  0x8b   : > { %463 = vst [vmem:[%s13834_s13 + $0x660] sm:$0xf] %v462_v12  ;;  %465 = vst [vmem:[%s13834_s13 + $0x668] sm:$0xf] %v464_v13  ;;  %v468_v15 = vld [vmem:[%s13838_s16 + $0x66c] sm:$0xf] }
  0x8c   : > { %467 = vst [vmem:[%s13834_s13 + $0x670] sm:$0xf] %v466_v14  ;;  %v470_v16 = vld [vmem:[%s13838_s16 + $0x680] sm:$0xf]  ;;  %v472_v17 = vld [vmem:[%s13838_s16 + $0x684] sm:$0xf] }
  0x8d   : > { %469 = vst [vmem:[%s13834_s13 + $0x678] sm:$0xf] %v468_v15  ;;  %471 = vst [vmem:[%s13834_s13 + $0x680] sm:$0xf] %v470_v16  ;;  %v474_v18 = vld [vmem:[%s13838_s16 + $0x688] sm:$0xf] }
  0x8e   : > { %473 = vst [vmem:[%s13834_s13 + $0x688] sm:$0xf] %v472_v17  ;;  %v476_v19 = vld [vmem:[%s13838_s16 + $0x68c] sm:$0xf]  ;;  %v478_v20 = vld [vmem:[%s13838_s16 + $0x6a0] sm:$0xf] }
  0x8f   : > { %475 = vst [vmem:[%s13834_s13 + $0x690] sm:$0xf] %v474_v18  ;;  %477 = vst [vmem:[%s13834_s13 + $0x698] sm:$0xf] %v476_v19  ;;  %v480_v21 = vld [vmem:[%s13838_s16 + $0x6a4] sm:$0xf] }
  0x90   : > { %479 = vst [vmem:[%s13834_s13 + $0x6a0] sm:$0xf] %v478_v20  ;;  %v482_v22 = vld [vmem:[%s13838_s16 + $0x6a8] sm:$0xf]  ;;  %v484_v23 = vld [vmem:[%s13838_s16 + $0x6ac] sm:$0xf] }
  0x91   : > { %481 = vst [vmem:[%s13834_s13 + $0x6a8] sm:$0xf] %v480_v21  ;;  %483 = vst [vmem:[%s13834_s13 + $0x6b0] sm:$0xf] %v482_v22  ;;  %v486_v24 = vld [vmem:[%s13838_s16 + $0x6c0] sm:$0xf] }
  0x92   : > { %485 = vst [vmem:[%s13834_s13 + $0x6b8] sm:$0xf] %v484_v23  ;;  %v488_v25 = vld [vmem:[%s13838_s16 + $0x6c4] sm:$0xf]  ;;  %v490_v26 = vld [vmem:[%s13838_s16 + $0x6c8] sm:$0xf] }
  0x93   : > { %487 = vst [vmem:[%s13834_s13 + $0x6c0] sm:$0xf] %v486_v24  ;;  %489 = vst [vmem:[%s13834_s13 + $0x6c8] sm:$0xf] %v488_v25  ;;  %v492_v27 = vld [vmem:[%s13838_s16 + $0x6cc] sm:$0xf] }
  0x94   : > { %491 = vst [vmem:[%s13834_s13 + $0x6d0] sm:$0xf] %v490_v26  ;;  %v494_v28 = vld [vmem:[%s13838_s16 + $0x6e0] sm:$0xf]  ;;  %v496_v29 = vld [vmem:[%s13838_s16 + $0x6e4] sm:$0xf] }
  0x95   : > { %493 = vst [vmem:[%s13834_s13 + $0x6d8] sm:$0xf] %v492_v27  ;;  %495 = vst [vmem:[%s13834_s13 + $0x6e0] sm:$0xf] %v494_v28  ;;  %v498_v30 = vld [vmem:[%s13838_s16 + $0x6e8] sm:$0xf] }
  0x96   : > { %497 = vst [vmem:[%s13834_s13 + $0x6e8] sm:$0xf] %v496_v29  ;;  %v500_v31 = vld [vmem:[%s13838_s16 + $0x6ec] sm:$0xf]  ;;  %v502_v32 = vld [vmem:[%s13838_s16 + $0x700] sm:$0xf] }
  0x97   : > { %499 = vst [vmem:[%s13834_s13 + $0x6f0] sm:$0xf] %v498_v30  ;;  %501 = vst [vmem:[%s13834_s13 + $0x6f8] sm:$0xf] %v500_v31  ;;  %v504_v33 = vld [vmem:[%s13838_s16 + $0x704] sm:$0xf] }
  0x98   : > { %503 = vst [vmem:[%s13834_s13 + $0x700] sm:$0xf] %v502_v32  ;;  %v506_v34 = vld [vmem:[%s13838_s16 + $0x708] sm:$0xf]  ;;  %v508_v35 = vld [vmem:[%s13838_s16 + $0x70c] sm:$0xf] }
  0x99   : > { %505 = vst [vmem:[%s13834_s13 + $0x708] sm:$0xf] %v504_v33  ;;  %507 = vst [vmem:[%s13834_s13 + $0x710] sm:$0xf] %v506_v34  ;;  %v510_v36 = vld [vmem:[%s13838_s16 + $0x720] sm:$0xf] }
  0x9a   : > { %509 = vst [vmem:[%s13834_s13 + $0x718] sm:$0xf] %v508_v35  ;;  %v512_v37 = vld [vmem:[%s13838_s16 + $0x724] sm:$0xf]  ;;  %v514_v38 = vld [vmem:[%s13838_s16 + $0x728] sm:$0xf] }
  0x9b   : > { %511 = vst [vmem:[%s13834_s13 + $0x720] sm:$0xf] %v510_v36  ;;  %513 = vst [vmem:[%s13834_s13 + $0x728] sm:$0xf] %v512_v37  ;;  %v516_v39 = vld [vmem:[%s13838_s16 + $0x72c] sm:$0xf] }
  0x9c   : > { %515 = vst [vmem:[%s13834_s13 + $0x730] sm:$0xf] %v514_v38  ;;  %v518_v40 = vld [vmem:[%s13838_s16 + $0x740] sm:$0xf]  ;;  %v520_v41 = vld [vmem:[%s13838_s16 + $0x744] sm:$0xf] }
  0x9d   : > { %517 = vst [vmem:[%s13834_s13 + $0x738] sm:$0xf] %v516_v39  ;;  %519 = vst [vmem:[%s13834_s13 + $0x740] sm:$0xf] %v518_v40  ;;  %v522_v42 = vld [vmem:[%s13838_s16 + $0x748] sm:$0xf] }
  0x9e   : > { %521 = vst [vmem:[%s13834_s13 + $0x748] sm:$0xf] %v520_v41  ;;  %v524_v43 = vld [vmem:[%s13838_s16 + $0x74c] sm:$0xf]  ;;  %v526_v44 = vld [vmem:[%s13838_s16 + $0x760] sm:$0xf] }
  0x9f   : > { %523 = vst [vmem:[%s13834_s13 + $0x750] sm:$0xf] %v522_v42  ;;  %525 = vst [vmem:[%s13834_s13 + $0x758] sm:$0xf] %v524_v43  ;;  %v528_v45 = vld [vmem:[%s13838_s16 + $0x764] sm:$0xf] }
  0xa0   : > { %527 = vst [vmem:[%s13834_s13 + $0x760] sm:$0xf] %v526_v44  ;;  %v530_v46 = vld [vmem:[%s13838_s16 + $0x768] sm:$0xf]  ;;  %v532_v47 = vld [vmem:[%s13838_s16 + $0x76c] sm:$0xf] }
  0xa1   : > { %529 = vst [vmem:[%s13834_s13 + $0x768] sm:$0xf] %v528_v45  ;;  %531 = vst [vmem:[%s13834_s13 + $0x770] sm:$0xf] %v530_v46  ;;  %v534_v48 = vld [vmem:[%s13838_s16 + $0x780] sm:$0xf] }
  0xa2   : > { %533 = vst [vmem:[%s13834_s13 + $0x778] sm:$0xf] %v532_v47  ;;  %v536_v49 = vld [vmem:[%s13838_s16 + $0x784] sm:$0xf]  ;;  %v538_v50 = vld [vmem:[%s13838_s16 + $0x788] sm:$0xf] }
  0xa3   : > { %535 = vst [vmem:[%s13834_s13 + $0x780] sm:$0xf] %v534_v48  ;;  %537 = vst [vmem:[%s13834_s13 + $0x788] sm:$0xf] %v536_v49  ;;  %v540_v51 = vld [vmem:[%s13838_s16 + $0x78c] sm:$0xf] }
  0xa4   : > { %539 = vst [vmem:[%s13834_s13 + $0x790] sm:$0xf] %v538_v50  ;;  %v542_v52 = vld [vmem:[%s13838_s16 + $0x7a0] sm:$0xf]  ;;  %v544_v53 = vld [vmem:[%s13838_s16 + $0x7a4] sm:$0xf] }
  0xa5   : > { %541 = vst [vmem:[%s13834_s13 + $0x798] sm:$0xf] %v540_v51  ;;  %543 = vst [vmem:[%s13834_s13 + $0x7a0] sm:$0xf] %v542_v52  ;;  %v546_v54 = vld [vmem:[%s13838_s16 + $0x7a8] sm:$0xf] }
  0xa6   : > { %545 = vst [vmem:[%s13834_s13 + $0x7a8] sm:$0xf] %v544_v53  ;;  %v548_v55 = vld [vmem:[%s13838_s16 + $0x7ac] sm:$0xf]  ;;  %v550_v56 = vld [vmem:[%s13838_s16 + $0x7c0] sm:$0xf] }
  0xa7   : > { %547 = vst [vmem:[%s13834_s13 + $0x7b0] sm:$0xf] %v546_v54  ;;  %549 = vst [vmem:[%s13834_s13 + $0x7b8] sm:$0xf] %v548_v55  ;;  %v552_v57 = vld [vmem:[%s13838_s16 + $0x7c4] sm:$0xf] }
  0xa8   : > { %551 = vst [vmem:[%s13834_s13 + $0x7c0] sm:$0xf] %v550_v56  ;;  %v554_v58 = vld [vmem:[%s13838_s16 + $0x7c8] sm:$0xf]  ;;  %v556_v59 = vld [vmem:[%s13838_s16 + $0x7cc] sm:$0xf] }
  0xa9   : > { %553 = vst [vmem:[%s13834_s13 + $0x7c8] sm:$0xf] %v552_v57  ;;  %555 = vst [vmem:[%s13834_s13 + $0x7d0] sm:$0xf] %v554_v58  ;;  %v558_v60 = vld [vmem:[%s13838_s16 + $0x7e0] sm:$0xf] }
  0xaa   : > { %557 = vst [vmem:[%s13834_s13 + $0x7d8] sm:$0xf] %v556_v59  ;;  %v560_v61 = vld [vmem:[%s13838_s16 + $0x7e4] sm:$0xf]  ;;  %v562_v62 = vld [vmem:[%s13838_s16 + $0x7e8] sm:$0xf] }
  0xab   : > { %559 = vst [vmem:[%s13834_s13 + $0x7e0] sm:$0xf] %v558_v60  ;;  %561 = vst [vmem:[%s13834_s13 + $0x7e8] sm:$0xf] %v560_v61  ;;  %v564_v63 = vld [vmem:[%s13838_s16 + $0x7ec] sm:$0xf] }
  0xac   : > { %563 = vst [vmem:[%s13834_s13 + $0x7f0] sm:$0xf] %v562_v62  ;;  %v566_v0 = vld [vmem:[%s13838_s16 + $0x800] sm:$0xf]  ;;  %v568_v1 = vld [vmem:[%s13838_s16 + $0x804] sm:$0xf] }
  0xad   : > { %565 = vst [vmem:[%s13834_s13 + $0x7f8] sm:$0xf] %v564_v63  ;;  %567 = vst [vmem:[%s13834_s13 + $0x800] sm:$0xf] %v566_v0  ;;  %v570_v2 = vld [vmem:[%s13838_s16 + $0x808] sm:$0xf] }
  0xae   : > { %569 = vst [vmem:[%s13834_s13 + $0x808] sm:$0xf] %v568_v1  ;;  %v572_v3 = vld [vmem:[%s13838_s16 + $0x80c] sm:$0xf]  ;;  %v574_v4 = vld [vmem:[%s13838_s16 + $0x820] sm:$0xf] }
  0xaf   : > { %571 = vst [vmem:[%s13834_s13 + $0x810] sm:$0xf] %v570_v2  ;;  %573 = vst [vmem:[%s13834_s13 + $0x818] sm:$0xf] %v572_v3  ;;  %v576_v5 = vld [vmem:[%s13838_s16 + $0x824] sm:$0xf] }
  0xb0   : > { %575 = vst [vmem:[%s13834_s13 + $0x820] sm:$0xf] %v574_v4  ;;  %v578_v6 = vld [vmem:[%s13838_s16 + $0x828] sm:$0xf]  ;;  %v580_v7 = vld [vmem:[%s13838_s16 + $0x82c] sm:$0xf] }
  0xb1   : > { %577 = vst [vmem:[%s13834_s13 + $0x828] sm:$0xf] %v576_v5  ;;  %579 = vst [vmem:[%s13834_s13 + $0x830] sm:$0xf] %v578_v6  ;;  %v582_v8 = vld [vmem:[%s13838_s16 + $0x840] sm:$0xf] }
  0xb2   : > { %581 = vst [vmem:[%s13834_s13 + $0x838] sm:$0xf] %v580_v7  ;;  %v584_v9 = vld [vmem:[%s13838_s16 + $0x844] sm:$0xf]  ;;  %v586_v10 = vld [vmem:[%s13838_s16 + $0x848] sm:$0xf] }
  0xb3   : > { %583 = vst [vmem:[%s13834_s13 + $0x840] sm:$0xf] %v582_v8  ;;  %585 = vst [vmem:[%s13834_s13 + $0x848] sm:$0xf] %v584_v9  ;;  %v588_v11 = vld [vmem:[%s13838_s16 + $0x84c] sm:$0xf] }
  0xb4   : > { %587 = vst [vmem:[%s13834_s13 + $0x850] sm:$0xf] %v586_v10  ;;  %v590_v12 = vld [vmem:[%s13838_s16 + $0x860] sm:$0xf]  ;;  %v592_v13 = vld [vmem:[%s13838_s16 + $0x864] sm:$0xf] }
  0xb5   : > { %589 = vst [vmem:[%s13834_s13 + $0x858] sm:$0xf] %v588_v11  ;;  %591 = vst [vmem:[%s13834_s13 + $0x860] sm:$0xf] %v590_v12  ;;  %v594_v14 = vld [vmem:[%s13838_s16 + $0x868] sm:$0xf] }
  0xb6   : > { %593 = vst [vmem:[%s13834_s13 + $0x868] sm:$0xf] %v592_v13  ;;  %v596_v15 = vld [vmem:[%s13838_s16 + $0x86c] sm:$0xf]  ;;  %v598_v16 = vld [vmem:[%s13838_s16 + $0x880] sm:$0xf] }
  0xb7   : > { %595 = vst [vmem:[%s13834_s13 + $0x870] sm:$0xf] %v594_v14  ;;  %597 = vst [vmem:[%s13834_s13 + $0x878] sm:$0xf] %v596_v15  ;;  %v600_v17 = vld [vmem:[%s13838_s16 + $0x884] sm:$0xf] }
  0xb8   : > { %599 = vst [vmem:[%s13834_s13 + $0x880] sm:$0xf] %v598_v16  ;;  %v602_v18 = vld [vmem:[%s13838_s16 + $0x888] sm:$0xf]  ;;  %v604_v19 = vld [vmem:[%s13838_s16 + $0x88c] sm:$0xf] }
  0xb9   : > { %601 = vst [vmem:[%s13834_s13 + $0x888] sm:$0xf] %v600_v17  ;;  %603 = vst [vmem:[%s13834_s13 + $0x890] sm:$0xf] %v602_v18  ;;  %v606_v20 = vld [vmem:[%s13838_s16 + $0x8a0] sm:$0xf] }
  0xba   : > { %605 = vst [vmem:[%s13834_s13 + $0x898] sm:$0xf] %v604_v19  ;;  %v608_v21 = vld [vmem:[%s13838_s16 + $0x8a4] sm:$0xf]  ;;  %v610_v22 = vld [vmem:[%s13838_s16 + $0x8a8] sm:$0xf] }
  0xbb   : > { %607 = vst [vmem:[%s13834_s13 + $0x8a0] sm:$0xf] %v606_v20  ;;  %609 = vst [vmem:[%s13834_s13 + $0x8a8] sm:$0xf] %v608_v21  ;;  %v612_v23 = vld [vmem:[%s13838_s16 + $0x8ac] sm:$0xf] }
  0xbc   : > { %611 = vst [vmem:[%s13834_s13 + $0x8b0] sm:$0xf] %v610_v22  ;;  %v614_v24 = vld [vmem:[%s13838_s16 + $0x8c0] sm:$0xf]  ;;  %v616_v25 = vld [vmem:[%s13838_s16 + $0x8c4] sm:$0xf] }
  0xbd   : > { %613 = vst [vmem:[%s13834_s13 + $0x8b8] sm:$0xf] %v612_v23  ;;  %615 = vst [vmem:[%s13834_s13 + $0x8c0] sm:$0xf] %v614_v24  ;;  %v618_v26 = vld [vmem:[%s13838_s16 + $0x8c8] sm:$0xf] }
  0xbe   : > { %617 = vst [vmem:[%s13834_s13 + $0x8c8] sm:$0xf] %v616_v25  ;;  %v620_v27 = vld [vmem:[%s13838_s16 + $0x8cc] sm:$0xf]  ;;  %v622_v28 = vld [vmem:[%s13838_s16 + $0x8e0] sm:$0xf] }
  0xbf   : > { %619 = vst [vmem:[%s13834_s13 + $0x8d0] sm:$0xf] %v618_v26  ;;  %621 = vst [vmem:[%s13834_s13 + $0x8d8] sm:$0xf] %v620_v27  ;;  %v624_v29 = vld [vmem:[%s13838_s16 + $0x8e4] sm:$0xf] }
  0xc0   : > { %623 = vst [vmem:[%s13834_s13 + $0x8e0] sm:$0xf] %v622_v28  ;;  %v626_v30 = vld [vmem:[%s13838_s16 + $0x8e8] sm:$0xf]  ;;  %v628_v31 = vld [vmem:[%s13838_s16 + $0x8ec] sm:$0xf] }
  0xc1   : > { %625 = vst [vmem:[%s13834_s13 + $0x8e8] sm:$0xf] %v624_v29  ;;  %627 = vst [vmem:[%s13834_s13 + $0x8f0] sm:$0xf] %v626_v30  ;;  %v630_v32 = vld [vmem:[%s13838_s16 + $0x900] sm:$0xf] }
  0xc2   : > { %629 = vst [vmem:[%s13834_s13 + $0x8f8] sm:$0xf] %v628_v31  ;;  %v632_v33 = vld [vmem:[%s13838_s16 + $0x904] sm:$0xf]  ;;  %v634_v34 = vld [vmem:[%s13838_s16 + $0x908] sm:$0xf] }
  0xc3   : > { %631 = vst [vmem:[%s13834_s13 + $0x900] sm:$0xf] %v630_v32  ;;  %633 = vst [vmem:[%s13834_s13 + $0x908] sm:$0xf] %v632_v33  ;;  %v636_v35 = vld [vmem:[%s13838_s16 + $0x90c] sm:$0xf] }
  0xc4   : > { %635 = vst [vmem:[%s13834_s13 + $0x910] sm:$0xf] %v634_v34  ;;  %v638_v36 = vld [vmem:[%s13838_s16 + $0x920] sm:$0xf]  ;;  %v640_v37 = vld [vmem:[%s13838_s16 + $0x924] sm:$0xf] }
  0xc5   : > { %637 = vst [vmem:[%s13834_s13 + $0x918] sm:$0xf] %v636_v35  ;;  %639 = vst [vmem:[%s13834_s13 + $0x920] sm:$0xf] %v638_v36  ;;  %v642_v38 = vld [vmem:[%s13838_s16 + $0x928] sm:$0xf] }
  0xc6   : > { %641 = vst [vmem:[%s13834_s13 + $0x928] sm:$0xf] %v640_v37  ;;  %v644_v39 = vld [vmem:[%s13838_s16 + $0x92c] sm:$0xf]  ;;  %v646_v40 = vld [vmem:[%s13838_s16 + $0x940] sm:$0xf] }
  0xc7   : > { %643 = vst [vmem:[%s13834_s13 + $0x930] sm:$0xf] %v642_v38  ;;  %645 = vst [vmem:[%s13834_s13 + $0x938] sm:$0xf] %v644_v39  ;;  %v648_v41 = vld [vmem:[%s13838_s16 + $0x944] sm:$0xf] }
  0xc8   : > { %647 = vst [vmem:[%s13834_s13 + $0x940] sm:$0xf] %v646_v40  ;;  %v650_v42 = vld [vmem:[%s13838_s16 + $0x948] sm:$0xf]  ;;  %v652_v43 = vld [vmem:[%s13838_s16 + $0x94c] sm:$0xf] }
  0xc9   : > { %649 = vst [vmem:[%s13834_s13 + $0x948] sm:$0xf] %v648_v41  ;;  %651 = vst [vmem:[%s13834_s13 + $0x950] sm:$0xf] %v650_v42  ;;  %v654_v44 = vld [vmem:[%s13838_s16 + $0x960] sm:$0xf] }
  0xca   : > { %653 = vst [vmem:[%s13834_s13 + $0x958] sm:$0xf] %v652_v43  ;;  %v656_v45 = vld [vmem:[%s13838_s16 + $0x964] sm:$0xf]  ;;  %v658_v46 = vld [vmem:[%s13838_s16 + $0x968] sm:$0xf] }
  0xcb   : > { %655 = vst [vmem:[%s13834_s13 + $0x960] sm:$0xf] %v654_v44  ;;  %657 = vst [vmem:[%s13834_s13 + $0x968] sm:$0xf] %v656_v45  ;;  %v660_v47 = vld [vmem:[%s13838_s16 + $0x96c] sm:$0xf] }
  0xcc   : > { %659 = vst [vmem:[%s13834_s13 + $0x970] sm:$0xf] %v658_v46  ;;  %v662_v48 = vld [vmem:[%s13838_s16 + $0x980] sm:$0xf]  ;;  %v664_v49 = vld [vmem:[%s13838_s16 + $0x984] sm:$0xf] }
  0xcd   : > { %661 = vst [vmem:[%s13834_s13 + $0x978] sm:$0xf] %v660_v47  ;;  %663 = vst [vmem:[%s13834_s13 + $0x980] sm:$0xf] %v662_v48  ;;  %v666_v50 = vld [vmem:[%s13838_s16 + $0x988] sm:$0xf] }
  0xce   : > { %665 = vst [vmem:[%s13834_s13 + $0x988] sm:$0xf] %v664_v49  ;;  %v668_v51 = vld [vmem:[%s13838_s16 + $0x98c] sm:$0xf]  ;;  %v670_v52 = vld [vmem:[%s13838_s16 + $0x9a0] sm:$0xf] }
  0xcf   : > { %667 = vst [vmem:[%s13834_s13 + $0x990] sm:$0xf] %v666_v50  ;;  %669 = vst [vmem:[%s13834_s13 + $0x998] sm:$0xf] %v668_v51  ;;  %v672_v53 = vld [vmem:[%s13838_s16 + $0x9a4] sm:$0xf] }
  0xd0   : > { %671 = vst [vmem:[%s13834_s13 + $0x9a0] sm:$0xf] %v670_v52  ;;  %v674_v54 = vld [vmem:[%s13838_s16 + $0x9a8] sm:$0xf]  ;;  %v676_v55 = vld [vmem:[%s13838_s16 + $0x9ac] sm:$0xf] }
  0xd1   : > { %673 = vst [vmem:[%s13834_s13 + $0x9a8] sm:$0xf] %v672_v53  ;;  %675 = vst [vmem:[%s13834_s13 + $0x9b0] sm:$0xf] %v674_v54  ;;  %v678_v56 = vld [vmem:[%s13838_s16 + $0x9c0] sm:$0xf] }
  0xd2   : > { %677 = vst [vmem:[%s13834_s13 + $0x9b8] sm:$0xf] %v676_v55  ;;  %v680_v57 = vld [vmem:[%s13838_s16 + $0x9c4] sm:$0xf]  ;;  %v682_v58 = vld [vmem:[%s13838_s16 + $0x9c8] sm:$0xf] }
  0xd3   : > { %679 = vst [vmem:[%s13834_s13 + $0x9c0] sm:$0xf] %v678_v56  ;;  %681 = vst [vmem:[%s13834_s13 + $0x9c8] sm:$0xf] %v680_v57  ;;  %v684_v59 = vld [vmem:[%s13838_s16 + $0x9cc] sm:$0xf] }
  0xd4   : > { %683 = vst [vmem:[%s13834_s13 + $0x9d0] sm:$0xf] %v682_v58  ;;  %v686_v60 = vld [vmem:[%s13838_s16 + $0x9e0] sm:$0xf]  ;;  %v688_v61 = vld [vmem:[%s13838_s16 + $0x9e4] sm:$0xf] }
  0xd5   : > { %685 = vst [vmem:[%s13834_s13 + $0x9d8] sm:$0xf] %v684_v59  ;;  %687 = vst [vmem:[%s13834_s13 + $0x9e0] sm:$0xf] %v686_v60  ;;  %v690_v62 = vld [vmem:[%s13838_s16 + $0x9e8] sm:$0xf] }
  0xd6   : > { %689 = vst [vmem:[%s13834_s13 + $0x9e8] sm:$0xf] %v688_v61  ;;  %v692_v63 = vld [vmem:[%s13838_s16 + $0x9ec] sm:$0xf]  ;;  %v694_v0 = vld [vmem:[%s13838_s16 + $0xa00] sm:$0xf] }
  0xd7   : > { %691 = vst [vmem:[%s13834_s13 + $0x9f0] sm:$0xf] %v690_v62  ;;  %693 = vst [vmem:[%s13834_s13 + $0x9f8] sm:$0xf] %v692_v63  ;;  %v696_v1 = vld [vmem:[%s13838_s16 + $0xa04] sm:$0xf] }
  0xd8   : > { %695 = vst [vmem:[%s13834_s13 + $0xa00] sm:$0xf] %v694_v0  ;;  %v698_v2 = vld [vmem:[%s13838_s16 + $0xa08] sm:$0xf]  ;;  %v700_v3 = vld [vmem:[%s13838_s16 + $0xa0c] sm:$0xf] }
  0xd9   : > { %697 = vst [vmem:[%s13834_s13 + $0xa08] sm:$0xf] %v696_v1  ;;  %699 = vst [vmem:[%s13834_s13 + $0xa10] sm:$0xf] %v698_v2  ;;  %v702_v4 = vld [vmem:[%s13838_s16 + $0xa20] sm:$0xf] }
  0xda   : > { %701 = vst [vmem:[%s13834_s13 + $0xa18] sm:$0xf] %v700_v3  ;;  %v704_v5 = vld [vmem:[%s13838_s16 + $0xa24] sm:$0xf]  ;;  %v706_v6 = vld [vmem:[%s13838_s16 + $0xa28] sm:$0xf] }
  0xdb   : > { %703 = vst [vmem:[%s13834_s13 + $0xa20] sm:$0xf] %v702_v4  ;;  %705 = vst [vmem:[%s13834_s13 + $0xa28] sm:$0xf] %v704_v5  ;;  %v708_v7 = vld [vmem:[%s13838_s16 + $0xa2c] sm:$0xf] }
  0xdc   : > { %707 = vst [vmem:[%s13834_s13 + $0xa30] sm:$0xf] %v706_v6  ;;  %v710_v8 = vld [vmem:[%s13838_s16 + $0xa40] sm:$0xf]  ;;  %v712_v9 = vld [vmem:[%s13838_s16 + $0xa44] sm:$0xf] }
  0xdd   : > { %709 = vst [vmem:[%s13834_s13 + $0xa38] sm:$0xf] %v708_v7  ;;  %711 = vst [vmem:[%s13834_s13 + $0xa40] sm:$0xf] %v710_v8  ;;  %v714_v10 = vld [vmem:[%s13838_s16 + $0xa48] sm:$0xf] }
  0xde   : > { %713 = vst [vmem:[%s13834_s13 + $0xa48] sm:$0xf] %v712_v9  ;;  %v716_v11 = vld [vmem:[%s13838_s16 + $0xa4c] sm:$0xf]  ;;  %v718_v12 = vld [vmem:[%s13838_s16 + $0xa60] sm:$0xf] }
  0xdf   : > { %715 = vst [vmem:[%s13834_s13 + $0xa50] sm:$0xf] %v714_v10  ;;  %717 = vst [vmem:[%s13834_s13 + $0xa58] sm:$0xf] %v716_v11  ;;  %v720_v13 = vld [vmem:[%s13838_s16 + $0xa64] sm:$0xf] }
  0xe0   : > { %719 = vst [vmem:[%s13834_s13 + $0xa60] sm:$0xf] %v718_v12  ;;  %v722_v14 = vld [vmem:[%s13838_s16 + $0xa68] sm:$0xf]  ;;  %v724_v15 = vld [vmem:[%s13838_s16 + $0xa6c] sm:$0xf] }
  0xe1   : > { %721 = vst [vmem:[%s13834_s13 + $0xa68] sm:$0xf] %v720_v13  ;;  %723 = vst [vmem:[%s13834_s13 + $0xa70] sm:$0xf] %v722_v14  ;;  %v726_v16 = vld [vmem:[%s13838_s16 + $0xa80] sm:$0xf] }
  0xe2   : > { %725 = vst [vmem:[%s13834_s13 + $0xa78] sm:$0xf] %v724_v15  ;;  %v728_v17 = vld [vmem:[%s13838_s16 + $0xa84] sm:$0xf]  ;;  %v730_v18 = vld [vmem:[%s13838_s16 + $0xa88] sm:$0xf] }
  0xe3   : > { %727 = vst [vmem:[%s13834_s13 + $0xa80] sm:$0xf] %v726_v16  ;;  %729 = vst [vmem:[%s13834_s13 + $0xa88] sm:$0xf] %v728_v17  ;;  %v732_v19 = vld [vmem:[%s13838_s16 + $0xa8c] sm:$0xf] }
  0xe4   : > { %731 = vst [vmem:[%s13834_s13 + $0xa90] sm:$0xf] %v730_v18  ;;  %v734_v20 = vld [vmem:[%s13838_s16 + $0xaa0] sm:$0xf]  ;;  %v736_v21 = vld [vmem:[%s13838_s16 + $0xaa4] sm:$0xf] }
  0xe5   : > { %733 = vst [vmem:[%s13834_s13 + $0xa98] sm:$0xf] %v732_v19  ;;  %735 = vst [vmem:[%s13834_s13 + $0xaa0] sm:$0xf] %v734_v20  ;;  %v738_v22 = vld [vmem:[%s13838_s16 + $0xaa8] sm:$0xf] }
  0xe6   : > { %737 = vst [vmem:[%s13834_s13 + $0xaa8] sm:$0xf] %v736_v21  ;;  %v740_v23 = vld [vmem:[%s13838_s16 + $0xaac] sm:$0xf]  ;;  %v742_v24 = vld [vmem:[%s13838_s16 + $0xac0] sm:$0xf] }
  0xe7   : > { %739 = vst [vmem:[%s13834_s13 + $0xab0] sm:$0xf] %v738_v22  ;;  %741 = vst [vmem:[%s13834_s13 + $0xab8] sm:$0xf] %v740_v23  ;;  %v744_v25 = vld [vmem:[%s13838_s16 + $0xac4] sm:$0xf] }
  0xe8   : > { %743 = vst [vmem:[%s13834_s13 + $0xac0] sm:$0xf] %v742_v24  ;;  %v746_v26 = vld [vmem:[%s13838_s16 + $0xac8] sm:$0xf]  ;;  %v748_v27 = vld [vmem:[%s13838_s16 + $0xacc] sm:$0xf] }
  0xe9   : > { %745 = vst [vmem:[%s13834_s13 + $0xac8] sm:$0xf] %v744_v25  ;;  %747 = vst [vmem:[%s13834_s13 + $0xad0] sm:$0xf] %v746_v26  ;;  %v750_v28 = vld [vmem:[%s13838_s16 + $0xae0] sm:$0xf] }
  0xea   : > { %749 = vst [vmem:[%s13834_s13 + $0xad8] sm:$0xf] %v748_v27  ;;  %v752_v29 = vld [vmem:[%s13838_s16 + $0xae4] sm:$0xf]  ;;  %v754_v30 = vld [vmem:[%s13838_s16 + $0xae8] sm:$0xf] }
  0xeb   : > { %751 = vst [vmem:[%s13834_s13 + $0xae0] sm:$0xf] %v750_v28  ;;  %753 = vst [vmem:[%s13834_s13 + $0xae8] sm:$0xf] %v752_v29  ;;  %v756_v31 = vld [vmem:[%s13838_s16 + $0xaec] sm:$0xf] }
  0xec   : > { %755 = vst [vmem:[%s13834_s13 + $0xaf0] sm:$0xf] %v754_v30  ;;  %v758_v32 = vld [vmem:[%s13838_s16 + $0xb00] sm:$0xf]  ;;  %v760_v33 = vld [vmem:[%s13838_s16 + $0xb04] sm:$0xf] }
  0xed   : > { %757 = vst [vmem:[%s13834_s13 + $0xaf8] sm:$0xf] %v756_v31  ;;  %759 = vst [vmem:[%s13834_s13 + $0xb00] sm:$0xf] %v758_v32  ;;  %v762_v34 = vld [vmem:[%s13838_s16 + $0xb08] sm:$0xf] }
  0xee   : > { %761 = vst [vmem:[%s13834_s13 + $0xb08] sm:$0xf] %v760_v33  ;;  %v764_v35 = vld [vmem:[%s13838_s16 + $0xb0c] sm:$0xf]  ;;  %v766_v36 = vld [vmem:[%s13838_s16 + $0xb20] sm:$0xf] }
  0xef   : > { %763 = vst [vmem:[%s13834_s13 + $0xb10] sm:$0xf] %v762_v34  ;;  %765 = vst [vmem:[%s13834_s13 + $0xb18] sm:$0xf] %v764_v35  ;;  %v768_v37 = vld [vmem:[%s13838_s16 + $0xb24] sm:$0xf] }
  0xf0   : > { %767 = vst [vmem:[%s13834_s13 + $0xb20] sm:$0xf] %v766_v36  ;;  %v770_v38 = vld [vmem:[%s13838_s16 + $0xb28] sm:$0xf]  ;;  %v772_v39 = vld [vmem:[%s13838_s16 + $0xb2c] sm:$0xf] }
  0xf1   : > { %769 = vst [vmem:[%s13834_s13 + $0xb28] sm:$0xf] %v768_v37  ;;  %771 = vst [vmem:[%s13834_s13 + $0xb30] sm:$0xf] %v770_v38  ;;  %v774_v40 = vld [vmem:[%s13838_s16 + $0xb40] sm:$0xf] }
  0xf2   : > { %773 = vst [vmem:[%s13834_s13 + $0xb38] sm:$0xf] %v772_v39  ;;  %v776_v41 = vld [vmem:[%s13838_s16 + $0xb44] sm:$0xf]  ;;  %v778_v42 = vld [vmem:[%s13838_s16 + $0xb48] sm:$0xf] }
  0xf3   : > { %775 = vst [vmem:[%s13834_s13 + $0xb40] sm:$0xf] %v774_v40  ;;  %777 = vst [vmem:[%s13834_s13 + $0xb48] sm:$0xf] %v776_v41  ;;  %v780_v43 = vld [vmem:[%s13838_s16 + $0xb4c] sm:$0xf] }
  0xf4   : > { %779 = vst [vmem:[%s13834_s13 + $0xb50] sm:$0xf] %v778_v42  ;;  %v782_v44 = vld [vmem:[%s13838_s16 + $0xb60] sm:$0xf]  ;;  %v784_v45 = vld [vmem:[%s13838_s16 + $0xb64] sm:$0xf] }
  0xf5   : > { %781 = vst [vmem:[%s13834_s13 + $0xb58] sm:$0xf] %v780_v43  ;;  %783 = vst [vmem:[%s13834_s13 + $0xb60] sm:$0xf] %v782_v44  ;;  %v786_v46 = vld [vmem:[%s13838_s16 + $0xb68] sm:$0xf] }
  0xf6   : > { %785 = vst [vmem:[%s13834_s13 + $0xb68] sm:$0xf] %v784_v45  ;;  %v788_v47 = vld [vmem:[%s13838_s16 + $0xb6c] sm:$0xf]  ;;  %v790_v48 = vld [vmem:[%s13838_s16 + $0xb80] sm:$0xf] }
  0xf7   : > { %787 = vst [vmem:[%s13834_s13 + $0xb70] sm:$0xf] %v786_v46  ;;  %789 = vst [vmem:[%s13834_s13 + $0xb78] sm:$0xf] %v788_v47  ;;  %v792_v49 = vld [vmem:[%s13838_s16 + $0xb84] sm:$0xf] }
  0xf8   : > { %791 = vst [vmem:[%s13834_s13 + $0xb80] sm:$0xf] %v790_v48  ;;  %v794_v50 = vld [vmem:[%s13838_s16 + $0xb88] sm:$0xf]  ;;  %v796_v51 = vld [vmem:[%s13838_s16 + $0xb8c] sm:$0xf] }
  0xf9   : > { %793 = vst [vmem:[%s13834_s13 + $0xb88] sm:$0xf] %v792_v49  ;;  %795 = vst [vmem:[%s13834_s13 + $0xb90] sm:$0xf] %v794_v50  ;;  %v798_v52 = vld [vmem:[%s13838_s16 + $0xba0] sm:$0xf] }
  0xfa   : > { %797 = vst [vmem:[%s13834_s13 + $0xb98] sm:$0xf] %v796_v51  ;;  %v800_v53 = vld [vmem:[%s13838_s16 + $0xba4] sm:$0xf]  ;;  %v802_v54 = vld [vmem:[%s13838_s16 + $0xba8] sm:$0xf] }
  0xfb   : > { %799 = vst [vmem:[%s13834_s13 + $0xba0] sm:$0xf] %v798_v52  ;;  %801 = vst [vmem:[%s13834_s13 + $0xba8] sm:$0xf] %v800_v53  ;;  %v804_v55 = vld [vmem:[%s13838_s16 + $0xbac] sm:$0xf] }
  0xfc   : > { %803 = vst [vmem:[%s13834_s13 + $0xbb0] sm:$0xf] %v802_v54  ;;  %v806_v56 = vld [vmem:[%s13838_s16 + $0xbc0] sm:$0xf]  ;;  %v808_v57 = vld [vmem:[%s13838_s16 + $0xbc4] sm:$0xf] }
  0xfd   : > { %805 = vst [vmem:[%s13834_s13 + $0xbb8] sm:$0xf] %v804_v55  ;;  %807 = vst [vmem:[%s13834_s13 + $0xbc0] sm:$0xf] %v806_v56  ;;  %v810_v58 = vld [vmem:[%s13838_s16 + $0xbc8] sm:$0xf] }
  0xfe   : > { %809 = vst [vmem:[%s13834_s13 + $0xbc8] sm:$0xf] %v808_v57  ;;  %v812_v59 = vld [vmem:[%s13838_s16 + $0xbcc] sm:$0xf]  ;;  %v814_v60 = vld [vmem:[%s13838_s16 + $0xbe0] sm:$0xf] }
  0xff   : > { %811 = vst [vmem:[%s13834_s13 + $0xbd0] sm:$0xf] %v810_v58  ;;  %813 = vst [vmem:[%s13834_s13 + $0xbd8] sm:$0xf] %v812_v59  ;;  %v816_v61 = vld [vmem:[%s13838_s16 + $0xbe4] sm:$0xf] }
 0x100   : > { %815 = vst [vmem:[%s13834_s13 + $0xbe0] sm:$0xf] %v814_v60  ;;  %v818_v62 = vld [vmem:[%s13838_s16 + $0xbe8] sm:$0xf]  ;;  %v820_v63 = vld [vmem:[%s13838_s16 + $0xbec] sm:$0xf] }
 0x101   : > { %817 = vst [vmem:[%s13834_s13 + $0xbe8] sm:$0xf] %v816_v61  ;;  %819 = vst [vmem:[%s13834_s13 + $0xbf0] sm:$0xf] %v818_v62  ;;  %v822_v0 = vld [vmem:[%s13838_s16 + $0xc00] sm:$0xf] }
 0x102   : > { %821 = vst [vmem:[%s13834_s13 + $0xbf8] sm:$0xf] %v820_v63  ;;  %v824_v1 = vld [vmem:[%s13838_s16 + $0xc04] sm:$0xf]  ;;  %v826_v2 = vld [vmem:[%s13838_s16 + $0xc08] sm:$0xf] }
 0x103   : > { %823 = vst [vmem:[%s13834_s13 + $0xc00] sm:$0xf] %v822_v0  ;;  %825 = vst [vmem:[%s13834_s13 + $0xc08] sm:$0xf] %v824_v1  ;;  %v828_v3 = vld [vmem:[%s13838_s16 + $0xc0c] sm:$0xf] }
 0x104   : > { %827 = vst [vmem:[%s13834_s13 + $0xc10] sm:$0xf] %v826_v2  ;;  %v830_v4 = vld [vmem:[%s13838_s16 + $0xc20] sm:$0xf]  ;;  %v832_v5 = vld [vmem:[%s13838_s16 + $0xc24] sm:$0xf] }
 0x105   : > { %829 = vst [vmem:[%s13834_s13 + $0xc18] sm:$0xf] %v828_v3  ;;  %831 = vst [vmem:[%s13834_s13 + $0xc20] sm:$0xf] %v830_v4  ;;  %v834_v6 = vld [vmem:[%s13838_s16 + $0xc28] sm:$0xf] }
 0x106   : > { %833 = vst [vmem:[%s13834_s13 + $0xc28] sm:$0xf] %v832_v5  ;;  %v836_v7 = vld [vmem:[%s13838_s16 + $0xc2c] sm:$0xf]  ;;  %v838_v8 = vld [vmem:[%s13838_s16 + $0xc40] sm:$0xf] }
 0x107   : > { %835 = vst [vmem:[%s13834_s13 + $0xc30] sm:$0xf] %v834_v6  ;;  %837 = vst [vmem:[%s13834_s13 + $0xc38] sm:$0xf] %v836_v7  ;;  %v840_v9 = vld [vmem:[%s13838_s16 + $0xc44] sm:$0xf] }
 0x108   : > { %839 = vst [vmem:[%s13834_s13 + $0xc40] sm:$0xf] %v838_v8  ;;  %v842_v10 = vld [vmem:[%s13838_s16 + $0xc48] sm:$0xf]  ;;  %v844_v11 = vld [vmem:[%s13838_s16 + $0xc4c] sm:$0xf] }
 0x109   : > { %841 = vst [vmem:[%s13834_s13 + $0xc48] sm:$0xf] %v840_v9  ;;  %843 = vst [vmem:[%s13834_s13 + $0xc50] sm:$0xf] %v842_v10  ;;  %v846_v12 = vld [vmem:[%s13838_s16 + $0xc60] sm:$0xf] }
 0x10a   : > { %845 = vst [vmem:[%s13834_s13 + $0xc58] sm:$0xf] %v844_v11  ;;  %v848_v13 = vld [vmem:[%s13838_s16 + $0xc64] sm:$0xf]  ;;  %v850_v14 = vld [vmem:[%s13838_s16 + $0xc68] sm:$0xf] }
 0x10b   : > { %847 = vst [vmem:[%s13834_s13 + $0xc60] sm:$0xf] %v846_v12  ;;  %849 = vst [vmem:[%s13834_s13 + $0xc68] sm:$0xf] %v848_v13  ;;  %v852_v15 = vld [vmem:[%s13838_s16 + $0xc6c] sm:$0xf] }
 0x10c   : > { %851 = vst [vmem:[%s13834_s13 + $0xc70] sm:$0xf] %v850_v14  ;;  %v854_v16 = vld [vmem:[%s13838_s16 + $0xc80] sm:$0xf]  ;;  %v856_v17 = vld [vmem:[%s13838_s16 + $0xc84] sm:$0xf] }
 0x10d   : > { %853 = vst [vmem:[%s13834_s13 + $0xc78] sm:$0xf] %v852_v15  ;;  %855 = vst [vmem:[%s13834_s13 + $0xc80] sm:$0xf] %v854_v16  ;;  %v858_v18 = vld [vmem:[%s13838_s16 + $0xc88] sm:$0xf] }
 0x10e   : > { %857 = vst [vmem:[%s13834_s13 + $0xc88] sm:$0xf] %v856_v17  ;;  %v860_v19 = vld [vmem:[%s13838_s16 + $0xc8c] sm:$0xf]  ;;  %v862_v20 = vld [vmem:[%s13838_s16 + $0xca0] sm:$0xf] }
 0x10f   : > { %859 = vst [vmem:[%s13834_s13 + $0xc90] sm:$0xf] %v858_v18  ;;  %861 = vst [vmem:[%s13834_s13 + $0xc98] sm:$0xf] %v860_v19  ;;  %v864_v21 = vld [vmem:[%s13838_s16 + $0xca4] sm:$0xf] }
 0x110   : > { %863 = vst [vmem:[%s13834_s13 + $0xca0] sm:$0xf] %v862_v20  ;;  %v866_v22 = vld [vmem:[%s13838_s16 + $0xca8] sm:$0xf]  ;;  %v868_v23 = vld [vmem:[%s13838_s16 + $0xcac] sm:$0xf] }
 0x111   : > { %865 = vst [vmem:[%s13834_s13 + $0xca8] sm:$0xf] %v864_v21  ;;  %867 = vst [vmem:[%s13834_s13 + $0xcb0] sm:$0xf] %v866_v22  ;;  %v870_v24 = vld [vmem:[%s13838_s16 + $0xcc0] sm:$0xf] }
 0x112   : > { %869 = vst [vmem:[%s13834_s13 + $0xcb8] sm:$0xf] %v868_v23  ;;  %v872_v25 = vld [vmem:[%s13838_s16 + $0xcc4] sm:$0xf]  ;;  %v874_v26 = vld [vmem:[%s13838_s16 + $0xcc8] sm:$0xf] }
 0x113   : > { %871 = vst [vmem:[%s13834_s13 + $0xcc0] sm:$0xf] %v870_v24  ;;  %873 = vst [vmem:[%s13834_s13 + $0xcc8] sm:$0xf] %v872_v25  ;;  %v876_v27 = vld [vmem:[%s13838_s16 + $0xccc] sm:$0xf] }
 0x114   : > { %875 = vst [vmem:[%s13834_s13 + $0xcd0] sm:$0xf] %v874_v26  ;;  %v878_v28 = vld [vmem:[%s13838_s16 + $0xce0] sm:$0xf]  ;;  %v880_v29 = vld [vmem:[%s13838_s16 + $0xce4] sm:$0xf] }
 0x115   : > { %877 = vst [vmem:[%s13834_s13 + $0xcd8] sm:$0xf] %v876_v27  ;;  %879 = vst [vmem:[%s13834_s13 + $0xce0] sm:$0xf] %v878_v28  ;;  %v882_v30 = vld [vmem:[%s13838_s16 + $0xce8] sm:$0xf] }
 0x116   : > { %881 = vst [vmem:[%s13834_s13 + $0xce8] sm:$0xf] %v880_v29  ;;  %v884_v31 = vld [vmem:[%s13838_s16 + $0xcec] sm:$0xf]  ;;  %v886_v32 = vld [vmem:[%s13838_s16 + $0xd00] sm:$0xf] }
 0x117   : > { %883 = vst [vmem:[%s13834_s13 + $0xcf0] sm:$0xf] %v882_v30  ;;  %885 = vst [vmem:[%s13834_s13 + $0xcf8] sm:$0xf] %v884_v31  ;;  %v888_v33 = vld [vmem:[%s13838_s16 + $0xd04] sm:$0xf] }
 0x118   : > { %887 = vst [vmem:[%s13834_s13 + $0xd00] sm:$0xf] %v886_v32  ;;  %v890_v34 = vld [vmem:[%s13838_s16 + $0xd08] sm:$0xf]  ;;  %v892_v35 = vld [vmem:[%s13838_s16 + $0xd0c] sm:$0xf] }
 0x119   : > { %889 = vst [vmem:[%s13834_s13 + $0xd08] sm:$0xf] %v888_v33  ;;  %891 = vst [vmem:[%s13834_s13 + $0xd10] sm:$0xf] %v890_v34  ;;  %v894_v36 = vld [vmem:[%s13838_s16 + $0xd20] sm:$0xf] }
 0x11a   : > { %893 = vst [vmem:[%s13834_s13 + $0xd18] sm:$0xf] %v892_v35  ;;  %v896_v37 = vld [vmem:[%s13838_s16 + $0xd24] sm:$0xf]  ;;  %v898_v38 = vld [vmem:[%s13838_s16 + $0xd28] sm:$0xf] }
 0x11b   : > { %895 = vst [vmem:[%s13834_s13 + $0xd20] sm:$0xf] %v894_v36  ;;  %897 = vst [vmem:[%s13834_s13 + $0xd28] sm:$0xf] %v896_v37  ;;  %v900_v39 = vld [vmem:[%s13838_s16 + $0xd2c] sm:$0xf] }
 0x11c   : > { %899 = vst [vmem:[%s13834_s13 + $0xd30] sm:$0xf] %v898_v38  ;;  %v902_v40 = vld [vmem:[%s13838_s16 + $0xd40] sm:$0xf]  ;;  %v904_v41 = vld [vmem:[%s13838_s16 + $0xd44] sm:$0xf] }
 0x11d   : > { %901 = vst [vmem:[%s13834_s13 + $0xd38] sm:$0xf] %v900_v39  ;;  %903 = vst [vmem:[%s13834_s13 + $0xd40] sm:$0xf] %v902_v40  ;;  %v906_v42 = vld [vmem:[%s13838_s16 + $0xd48] sm:$0xf] }
 0x11e   : > { %905 = vst [vmem:[%s13834_s13 + $0xd48] sm:$0xf] %v904_v41  ;;  %v908_v43 = vld [vmem:[%s13838_s16 + $0xd4c] sm:$0xf]  ;;  %v910_v44 = vld [vmem:[%s13838_s16 + $0xd60] sm:$0xf] }
 0x11f   : > { %907 = vst [vmem:[%s13834_s13 + $0xd50] sm:$0xf] %v906_v42  ;;  %909 = vst [vmem:[%s13834_s13 + $0xd58] sm:$0xf] %v908_v43  ;;  %v912_v45 = vld [vmem:[%s13838_s16 + $0xd64] sm:$0xf] }
 0x120   : > { %911 = vst [vmem:[%s13834_s13 + $0xd60] sm:$0xf] %v910_v44  ;;  %v914_v46 = vld [vmem:[%s13838_s16 + $0xd68] sm:$0xf]  ;;  %v916_v47 = vld [vmem:[%s13838_s16 + $0xd6c] sm:$0xf] }
 0x121   : > { %913 = vst [vmem:[%s13834_s13 + $0xd68] sm:$0xf] %v912_v45  ;;  %915 = vst [vmem:[%s13834_s13 + $0xd70] sm:$0xf] %v914_v46  ;;  %v918_v48 = vld [vmem:[%s13838_s16 + $0xd80] sm:$0xf] }
 0x122   : > { %917 = vst [vmem:[%s13834_s13 + $0xd78] sm:$0xf] %v916_v47  ;;  %v920_v49 = vld [vmem:[%s13838_s16 + $0xd84] sm:$0xf]  ;;  %v922_v50 = vld [vmem:[%s13838_s16 + $0xd88] sm:$0xf] }
 0x123   : > { %919 = vst [vmem:[%s13834_s13 + $0xd80] sm:$0xf] %v918_v48  ;;  %921 = vst [vmem:[%s13834_s13 + $0xd88] sm:$0xf] %v920_v49  ;;  %v924_v51 = vld [vmem:[%s13838_s16 + $0xd8c] sm:$0xf] }
 0x124   : > { %923 = vst [vmem:[%s13834_s13 + $0xd90] sm:$0xf] %v922_v50  ;;  %v926_v52 = vld [vmem:[%s13838_s16 + $0xda0] sm:$0xf]  ;;  %v928_v53 = vld [vmem:[%s13838_s16 + $0xda4] sm:$0xf] }
 0x125   : > { %925 = vst [vmem:[%s13834_s13 + $0xd98] sm:$0xf] %v924_v51  ;;  %927 = vst [vmem:[%s13834_s13 + $0xda0] sm:$0xf] %v926_v52  ;;  %v930_v54 = vld [vmem:[%s13838_s16 + $0xda8] sm:$0xf] }
 0x126   : > { %929 = vst [vmem:[%s13834_s13 + $0xda8] sm:$0xf] %v928_v53  ;;  %v932_v55 = vld [vmem:[%s13838_s16 + $0xdac] sm:$0xf]  ;;  %v934_v56 = vld [vmem:[%s13838_s16 + $0xdc0] sm:$0xf] }
 0x127   : > { %931 = vst [vmem:[%s13834_s13 + $0xdb0] sm:$0xf] %v930_v54  ;;  %933 = vst [vmem:[%s13834_s13 + $0xdb8] sm:$0xf] %v932_v55  ;;  %v936_v57 = vld [vmem:[%s13838_s16 + $0xdc4] sm:$0xf] }
 0x128   : > { %935 = vst [vmem:[%s13834_s13 + $0xdc0] sm:$0xf] %v934_v56  ;;  %v938_v58 = vld [vmem:[%s13838_s16 + $0xdc8] sm:$0xf]  ;;  %v940_v59 = vld [vmem:[%s13838_s16 + $0xdcc] sm:$0xf] }
 0x129   : > { %937 = vst [vmem:[%s13834_s13 + $0xdc8] sm:$0xf] %v936_v57  ;;  %939 = vst [vmem:[%s13834_s13 + $0xdd0] sm:$0xf] %v938_v58  ;;  %v942_v60 = vld [vmem:[%s13838_s16 + $0xde0] sm:$0xf] }
 0x12a   : > { %941 = vst [vmem:[%s13834_s13 + $0xdd8] sm:$0xf] %v940_v59  ;;  %v944_v61 = vld [vmem:[%s13838_s16 + $0xde4] sm:$0xf]  ;;  %v946_v62 = vld [vmem:[%s13838_s16 + $0xde8] sm:$0xf] }
 0x12b   : > { %943 = vst [vmem:[%s13834_s13 + $0xde0] sm:$0xf] %v942_v60  ;;  %945 = vst [vmem:[%s13834_s13 + $0xde8] sm:$0xf] %v944_v61  ;;  %v948_v63 = vld [vmem:[%s13838_s16 + $0xdec] sm:$0xf] }
 0x12c   : > { %947 = vst [vmem:[%s13834_s13 + $0xdf0] sm:$0xf] %v946_v62  ;;  %v950_v0 = vld [vmem:[%s13838_s16 + $0xe00] sm:$0xf]  ;;  %v952_v1 = vld [vmem:[%s13838_s16 + $0xe04] sm:$0xf] }
 0x12d   : > { %949 = vst [vmem:[%s13834_s13 + $0xdf8] sm:$0xf] %v948_v63  ;;  %951 = vst [vmem:[%s13834_s13 + $0xe00] sm:$0xf] %v950_v0  ;;  %v954_v2 = vld [vmem:[%s13838_s16 + $0xe08] sm:$0xf] }
 0x12e   : > { %953 = vst [vmem:[%s13834_s13 + $0xe08] sm:$0xf] %v952_v1  ;;  %v956_v3 = vld [vmem:[%s13838_s16 + $0xe0c] sm:$0xf]  ;;  %v958_v4 = vld [vmem:[%s13838_s16 + $0xe20] sm:$0xf] }
 0x12f   : > { %955 = vst [vmem:[%s13834_s13 + $0xe10] sm:$0xf] %v954_v2  ;;  %957 = vst [vmem:[%s13834_s13 + $0xe18] sm:$0xf] %v956_v3  ;;  %v960_v5 = vld [vmem:[%s13838_s16 + $0xe24] sm:$0xf] }
 0x130   : > { %959 = vst [vmem:[%s13834_s13 + $0xe20] sm:$0xf] %v958_v4  ;;  %v962_v6 = vld [vmem:[%s13838_s16 + $0xe28] sm:$0xf]  ;;  %v964_v7 = vld [vmem:[%s13838_s16 + $0xe2c] sm:$0xf] }
 0x131   : > { %961 = vst [vmem:[%s13834_s13 + $0xe28] sm:$0xf] %v960_v5  ;;  %963 = vst [vmem:[%s13834_s13 + $0xe30] sm:$0xf] %v962_v6  ;;  %v966_v8 = vld [vmem:[%s13838_s16 + $0xe40] sm:$0xf] }
 0x132   : > { %965 = vst [vmem:[%s13834_s13 + $0xe38] sm:$0xf] %v964_v7  ;;  %v968_v9 = vld [vmem:[%s13838_s16 + $0xe44] sm:$0xf]  ;;  %v970_v10 = vld [vmem:[%s13838_s16 + $0xe48] sm:$0xf] }
 0x133   : > { %967 = vst [vmem:[%s13834_s13 + $0xe40] sm:$0xf] %v966_v8  ;;  %969 = vst [vmem:[%s13834_s13 + $0xe48] sm:$0xf] %v968_v9  ;;  %v972_v11 = vld [vmem:[%s13838_s16 + $0xe4c] sm:$0xf] }
 0x134   : > { %971 = vst [vmem:[%s13834_s13 + $0xe50] sm:$0xf] %v970_v10  ;;  %v974_v12 = vld [vmem:[%s13838_s16 + $0xe60] sm:$0xf]  ;;  %v976_v13 = vld [vmem:[%s13838_s16 + $0xe64] sm:$0xf] }
 0x135   : > { %973 = vst [vmem:[%s13834_s13 + $0xe58] sm:$0xf] %v972_v11  ;;  %975 = vst [vmem:[%s13834_s13 + $0xe60] sm:$0xf] %v974_v12  ;;  %v978_v14 = vld [vmem:[%s13838_s16 + $0xe68] sm:$0xf] }
 0x136   : > { %977 = vst [vmem:[%s13834_s13 + $0xe68] sm:$0xf] %v976_v13  ;;  %v980_v15 = vld [vmem:[%s13838_s16 + $0xe6c] sm:$0xf]  ;;  %v982_v16 = vld [vmem:[%s13838_s16 + $0xe80] sm:$0xf] }
 0x137   : > { %979 = vst [vmem:[%s13834_s13 + $0xe70] sm:$0xf] %v978_v14  ;;  %981 = vst [vmem:[%s13834_s13 + $0xe78] sm:$0xf] %v980_v15  ;;  %v984_v17 = vld [vmem:[%s13838_s16 + $0xe84] sm:$0xf] }
 0x138   : > { %983 = vst [vmem:[%s13834_s13 + $0xe80] sm:$0xf] %v982_v16  ;;  %v986_v18 = vld [vmem:[%s13838_s16 + $0xe88] sm:$0xf]  ;;  %v988_v19 = vld [vmem:[%s13838_s16 + $0xe8c] sm:$0xf] }
 0x139   : > { %985 = vst [vmem:[%s13834_s13 + $0xe88] sm:$0xf] %v984_v17  ;;  %987 = vst [vmem:[%s13834_s13 + $0xe90] sm:$0xf] %v986_v18  ;;  %v990_v20 = vld [vmem:[%s13838_s16 + $0xea0] sm:$0xf] }
 0x13a   : > { %989 = vst [vmem:[%s13834_s13 + $0xe98] sm:$0xf] %v988_v19  ;;  %v992_v21 = vld [vmem:[%s13838_s16 + $0xea4] sm:$0xf]  ;;  %v994_v22 = vld [vmem:[%s13838_s16 + $0xea8] sm:$0xf] }
 0x13b   : > { %991 = vst [vmem:[%s13834_s13 + $0xea0] sm:$0xf] %v990_v20  ;;  %993 = vst [vmem:[%s13834_s13 + $0xea8] sm:$0xf] %v992_v21  ;;  %v996_v23 = vld [vmem:[%s13838_s16 + $0xeac] sm:$0xf] }
 0x13c   : > { %995 = vst [vmem:[%s13834_s13 + $0xeb0] sm:$0xf] %v994_v22  ;;  %v998_v24 = vld [vmem:[%s13838_s16 + $0xec0] sm:$0xf]  ;;  %v1000_v25 = vld [vmem:[%s13838_s16 + $0xec4] sm:$0xf] }
 0x13d   : > { %997 = vst [vmem:[%s13834_s13 + $0xeb8] sm:$0xf] %v996_v23  ;;  %999 = vst [vmem:[%s13834_s13 + $0xec0] sm:$0xf] %v998_v24  ;;  %v1002_v26 = vld [vmem:[%s13838_s16 + $0xec8] sm:$0xf] }
 0x13e   : > { %1001 = vst [vmem:[%s13834_s13 + $0xec8] sm:$0xf] %v1000_v25  ;;  %v1004_v27 = vld [vmem:[%s13838_s16 + $0xecc] sm:$0xf]  ;;  %v1006_v28 = vld [vmem:[%s13838_s16 + $0xee0] sm:$0xf] }
 0x13f   : > { %1003 = vst [vmem:[%s13834_s13 + $0xed0] sm:$0xf] %v1002_v26  ;;  %1005 = vst [vmem:[%s13834_s13 + $0xed8] sm:$0xf] %v1004_v27  ;;  %v1008_v29 = vld [vmem:[%s13838_s16 + $0xee4] sm:$0xf] }
 0x140   : > { %1007 = vst [vmem:[%s13834_s13 + $0xee0] sm:$0xf] %v1006_v28  ;;  %v1010_v30 = vld [vmem:[%s13838_s16 + $0xee8] sm:$0xf]  ;;  %v1012_v31 = vld [vmem:[%s13838_s16 + $0xeec] sm:$0xf] }
 0x141   : > { %1009 = vst [vmem:[%s13834_s13 + $0xee8] sm:$0xf] %v1008_v29  ;;  %1011 = vst [vmem:[%s13834_s13 + $0xef0] sm:$0xf] %v1010_v30  ;;  %v1014_v32 = vld [vmem:[%s13838_s16 + $0xf00] sm:$0xf] }
 0x142   : > { %1013 = vst [vmem:[%s13834_s13 + $0xef8] sm:$0xf] %v1012_v31  ;;  %v1016_v33 = vld [vmem:[%s13838_s16 + $0xf04] sm:$0xf]  ;;  %v1018_v34 = vld [vmem:[%s13838_s16 + $0xf08] sm:$0xf] }
 0x143   : > { %1015 = vst [vmem:[%s13834_s13 + $0xf00] sm:$0xf] %v1014_v32  ;;  %1017 = vst [vmem:[%s13834_s13 + $0xf08] sm:$0xf] %v1016_v33  ;;  %v1020_v35 = vld [vmem:[%s13838_s16 + $0xf0c] sm:$0xf] }
 0x144   : > { %1019 = vst [vmem:[%s13834_s13 + $0xf10] sm:$0xf] %v1018_v34  ;;  %v1022_v36 = vld [vmem:[%s13838_s16 + $0xf20] sm:$0xf]  ;;  %v1024_v37 = vld [vmem:[%s13838_s16 + $0xf24] sm:$0xf] }
 0x145   : > { %1021 = vst [vmem:[%s13834_s13 + $0xf18] sm:$0xf] %v1020_v35  ;;  %1023 = vst [vmem:[%s13834_s13 + $0xf20] sm:$0xf] %v1022_v36  ;;  %v1026_v38 = vld [vmem:[%s13838_s16 + $0xf28] sm:$0xf] }
 0x146   : > { %1025 = vst [vmem:[%s13834_s13 + $0xf28] sm:$0xf] %v1024_v37  ;;  %v1028_v39 = vld [vmem:[%s13838_s16 + $0xf2c] sm:$0xf]  ;;  %v1030_v40 = vld [vmem:[%s13838_s16 + $0xf40] sm:$0xf] }
 0x147   : > { %1027 = vst [vmem:[%s13834_s13 + $0xf30] sm:$0xf] %v1026_v38  ;;  %1029 = vst [vmem:[%s13834_s13 + $0xf38] sm:$0xf] %v1028_v39  ;;  %v1032_v41 = vld [vmem:[%s13838_s16 + $0xf44] sm:$0xf] }
 0x148   : > { %1031 = vst [vmem:[%s13834_s13 + $0xf40] sm:$0xf] %v1030_v40  ;;  %v1034_v42 = vld [vmem:[%s13838_s16 + $0xf48] sm:$0xf]  ;;  %v1036_v43 = vld [vmem:[%s13838_s16 + $0xf4c] sm:$0xf] }
 0x149   : > { %1033 = vst [vmem:[%s13834_s13 + $0xf48] sm:$0xf] %v1032_v41  ;;  %1035 = vst [vmem:[%s13834_s13 + $0xf50] sm:$0xf] %v1034_v42  ;;  %v1038_v44 = vld [vmem:[%s13838_s16 + $0xf60] sm:$0xf] }
 0x14a   : > { %1037 = vst [vmem:[%s13834_s13 + $0xf58] sm:$0xf] %v1036_v43  ;;  %v1040_v45 = vld [vmem:[%s13838_s16 + $0xf64] sm:$0xf]  ;;  %v1042_v46 = vld [vmem:[%s13838_s16 + $0xf68] sm:$0xf] }
 0x14b   : > { %1039 = vst [vmem:[%s13834_s13 + $0xf60] sm:$0xf] %v1038_v44  ;;  %1041 = vst [vmem:[%s13834_s13 + $0xf68] sm:$0xf] %v1040_v45  ;;  %v1044_v47 = vld [vmem:[%s13838_s16 + $0xf6c] sm:$0xf] }
 0x14c   : > { %1043 = vst [vmem:[%s13834_s13 + $0xf70] sm:$0xf] %v1042_v46  ;;  %v1046_v48 = vld [vmem:[%s13838_s16 + $0xf80] sm:$0xf]  ;;  %v1048_v49 = vld [vmem:[%s13838_s16 + $0xf84] sm:$0xf] }
 0x14d   : > { %1045 = vst [vmem:[%s13834_s13 + $0xf78] sm:$0xf] %v1044_v47  ;;  %1047 = vst [vmem:[%s13834_s13 + $0xf80] sm:$0xf] %v1046_v48  ;;  %v1050_v50 = vld [vmem:[%s13838_s16 + $0xf88] sm:$0xf] }
 0x14e   : > { %1049 = vst [vmem:[%s13834_s13 + $0xf88] sm:$0xf] %v1048_v49  ;;  %v1052_v51 = vld [vmem:[%s13838_s16 + $0xf8c] sm:$0xf]  ;;  %v1054_v52 = vld [vmem:[%s13838_s16 + $0xfa0] sm:$0xf] }
 0x14f   : > { %1051 = vst [vmem:[%s13834_s13 + $0xf90] sm:$0xf] %v1050_v50  ;;  %1053 = vst [vmem:[%s13834_s13 + $0xf98] sm:$0xf] %v1052_v51  ;;  %v1056_v53 = vld [vmem:[%s13838_s16 + $0xfa4] sm:$0xf] }
 0x150   : > { %1055 = vst [vmem:[%s13834_s13 + $0xfa0] sm:$0xf] %v1054_v52  ;;  %v1058_v54 = vld [vmem:[%s13838_s16 + $0xfa8] sm:$0xf]  ;;  %v1060_v55 = vld [vmem:[%s13838_s16 + $0xfac] sm:$0xf] }
 0x151   : > { %1057 = vst [vmem:[%s13834_s13 + $0xfa8] sm:$0xf] %v1056_v53  ;;  %1059 = vst [vmem:[%s13834_s13 + $0xfb0] sm:$0xf] %v1058_v54  ;;  %v1062_v56 = vld [vmem:[%s13838_s16 + $0xfc0] sm:$0xf] }
 0x152   : > { %1061 = vst [vmem:[%s13834_s13 + $0xfb8] sm:$0xf] %v1060_v55  ;;  %v1064_v57 = vld [vmem:[%s13838_s16 + $0xfc4] sm:$0xf]  ;;  %v1066_v58 = vld [vmem:[%s13838_s16 + $0xfc8] sm:$0xf] }
 0x153   : > { %1063 = vst [vmem:[%s13834_s13 + $0xfc0] sm:$0xf] %v1062_v56  ;;  %1065 = vst [vmem:[%s13834_s13 + $0xfc8] sm:$0xf] %v1064_v57  ;;  %v1068_v59 = vld [vmem:[%s13838_s16 + $0xfcc] sm:$0xf] }
 0x154   : > { %1067 = vst [vmem:[%s13834_s13 + $0xfd0] sm:$0xf] %v1066_v58  ;;  %v1070_v60 = vld [vmem:[%s13838_s16 + $0xfe0] sm:$0xf]  ;;  %v1072_v61 = vld [vmem:[%s13838_s16 + $0xfe4] sm:$0xf] }
 0x155   : > { %1069 = vst [vmem:[%s13834_s13 + $0xfd8] sm:$0xf] %v1068_v59  ;;  %1071 = vst [vmem:[%s13834_s13 + $0xfe0] sm:$0xf] %v1070_v60  ;;  %v1074_v62 = vld [vmem:[%s13838_s16 + $0xfe8] sm:$0xf] }
 0x156   : > { %1073 = vst [vmem:[%s13834_s13 + $0xfe8] sm:$0xf] %v1072_v61  ;;  %v1076_v63 = vld [vmem:[%s13838_s16 + $0xfec] sm:$0xf]  ;;  %v1078_v0 = vld [vmem:[%s13838_s16 + $0x1000] sm:$0xf] }
 0x157   : > { %1075 = vst [vmem:[%s13834_s13 + $0xff0] sm:$0xf] %v1074_v62  ;;  %1077 = vst [vmem:[%s13834_s13 + $0xff8] sm:$0xf] %v1076_v63  ;;  %v1080_v1 = vld [vmem:[%s13838_s16 + $0x1004] sm:$0xf] }
 0x158   : > { %1079 = vst [vmem:[%s13834_s13 + $0x1000] sm:$0xf] %v1078_v0  ;;  %v1082_v2 = vld [vmem:[%s13838_s16 + $0x1008] sm:$0xf]  ;;  %v1084_v3 = vld [vmem:[%s13838_s16 + $0x100c] sm:$0xf] }
 0x159   : > { %1081 = vst [vmem:[%s13834_s13 + $0x1008] sm:$0xf] %v1080_v1  ;;  %1083 = vst [vmem:[%s13834_s13 + $0x1010] sm:$0xf] %v1082_v2  ;;  %v1086_v4 = vld [vmem:[%s13838_s16 + $0x1020] sm:$0xf] }
 0x15a   : > { %1085 = vst [vmem:[%s13834_s13 + $0x1018] sm:$0xf] %v1084_v3  ;;  %v1088_v5 = vld [vmem:[%s13838_s16 + $0x1024] sm:$0xf]  ;;  %v1090_v6 = vld [vmem:[%s13838_s16 + $0x1028] sm:$0xf] }
 0x15b   : > { %1087 = vst [vmem:[%s13834_s13 + $0x1020] sm:$0xf] %v1086_v4  ;;  %1089 = vst [vmem:[%s13834_s13 + $0x1028] sm:$0xf] %v1088_v5  ;;  %v1092_v7 = vld [vmem:[%s13838_s16 + $0x102c] sm:$0xf] }
 0x15c   : > { %1091 = vst [vmem:[%s13834_s13 + $0x1030] sm:$0xf] %v1090_v6  ;;  %v1094_v8 = vld [vmem:[%s13838_s16 + $0x1040] sm:$0xf]  ;;  %v1096_v9 = vld [vmem:[%s13838_s16 + $0x1044] sm:$0xf] }
 0x15d   : > { %1093 = vst [vmem:[%s13834_s13 + $0x1038] sm:$0xf] %v1092_v7  ;;  %1095 = vst [vmem:[%s13834_s13 + $0x1040] sm:$0xf] %v1094_v8  ;;  %v1098_v10 = vld [vmem:[%s13838_s16 + $0x1048] sm:$0xf] }
 0x15e   : > { %1097 = vst [vmem:[%s13834_s13 + $0x1048] sm:$0xf] %v1096_v9  ;;  %v1100_v11 = vld [vmem:[%s13838_s16 + $0x104c] sm:$0xf]  ;;  %v1102_v12 = vld [vmem:[%s13838_s16 + $0x1060] sm:$0xf] }
 0x15f   : > { %1099 = vst [vmem:[%s13834_s13 + $0x1050] sm:$0xf] %v1098_v10  ;;  %1101 = vst [vmem:[%s13834_s13 + $0x1058] sm:$0xf] %v1100_v11  ;;  %v1104_v13 = vld [vmem:[%s13838_s16 + $0x1064] sm:$0xf] }
 0x160   : > { %1103 = vst [vmem:[%s13834_s13 + $0x1060] sm:$0xf] %v1102_v12  ;;  %v1106_v14 = vld [vmem:[%s13838_s16 + $0x1068] sm:$0xf]  ;;  %v1108_v15 = vld [vmem:[%s13838_s16 + $0x106c] sm:$0xf] }
 0x161   : > { %1105 = vst [vmem:[%s13834_s13 + $0x1068] sm:$0xf] %v1104_v13  ;;  %1107 = vst [vmem:[%s13834_s13 + $0x1070] sm:$0xf] %v1106_v14  ;;  %v1110_v16 = vld [vmem:[%s13838_s16 + $0x1080] sm:$0xf] }
 0x162   : > { %1109 = vst [vmem:[%s13834_s13 + $0x1078] sm:$0xf] %v1108_v15  ;;  %v1112_v17 = vld [vmem:[%s13838_s16 + $0x1084] sm:$0xf]  ;;  %v1114_v18 = vld [vmem:[%s13838_s16 + $0x1088] sm:$0xf] }
 0x163   : > { %1111 = vst [vmem:[%s13834_s13 + $0x1080] sm:$0xf] %v1110_v16  ;;  %1113 = vst [vmem:[%s13834_s13 + $0x1088] sm:$0xf] %v1112_v17  ;;  %v1116_v19 = vld [vmem:[%s13838_s16 + $0x108c] sm:$0xf] }
 0x164   : > { %1115 = vst [vmem:[%s13834_s13 + $0x1090] sm:$0xf] %v1114_v18  ;;  %v1118_v20 = vld [vmem:[%s13838_s16 + $0x10a0] sm:$0xf]  ;;  %v1120_v21 = vld [vmem:[%s13838_s16 + $0x10a4] sm:$0xf] }
 0x165   : > { %1117 = vst [vmem:[%s13834_s13 + $0x1098] sm:$0xf] %v1116_v19  ;;  %1119 = vst [vmem:[%s13834_s13 + $0x10a0] sm:$0xf] %v1118_v20  ;;  %v1122_v22 = vld [vmem:[%s13838_s16 + $0x10a8] sm:$0xf] }
 0x166   : > { %1121 = vst [vmem:[%s13834_s13 + $0x10a8] sm:$0xf] %v1120_v21  ;;  %v1124_v23 = vld [vmem:[%s13838_s16 + $0x10ac] sm:$0xf]  ;;  %v1126_v24 = vld [vmem:[%s13838_s16 + $0x10c0] sm:$0xf] }
 0x167   : > { %1123 = vst [vmem:[%s13834_s13 + $0x10b0] sm:$0xf] %v1122_v22  ;;  %1125 = vst [vmem:[%s13834_s13 + $0x10b8] sm:$0xf] %v1124_v23  ;;  %v1128_v25 = vld [vmem:[%s13838_s16 + $0x10c4] sm:$0xf] }
 0x168   : > { %1127 = vst [vmem:[%s13834_s13 + $0x10c0] sm:$0xf] %v1126_v24  ;;  %v1130_v26 = vld [vmem:[%s13838_s16 + $0x10c8] sm:$0xf]  ;;  %v1132_v27 = vld [vmem:[%s13838_s16 + $0x10cc] sm:$0xf] }
 0x169   : > { %1129 = vst [vmem:[%s13834_s13 + $0x10c8] sm:$0xf] %v1128_v25  ;;  %1131 = vst [vmem:[%s13834_s13 + $0x10d0] sm:$0xf] %v1130_v26  ;;  %v1134_v28 = vld [vmem:[%s13838_s16 + $0x10e0] sm:$0xf] }
 0x16a   : > { %1133 = vst [vmem:[%s13834_s13 + $0x10d8] sm:$0xf] %v1132_v27  ;;  %v1136_v29 = vld [vmem:[%s13838_s16 + $0x10e4] sm:$0xf]  ;;  %v1138_v30 = vld [vmem:[%s13838_s16 + $0x10e8] sm:$0xf] }
 0x16b   : > { %1135 = vst [vmem:[%s13834_s13 + $0x10e0] sm:$0xf] %v1134_v28  ;;  %1137 = vst [vmem:[%s13834_s13 + $0x10e8] sm:$0xf] %v1136_v29  ;;  %v1140_v31 = vld [vmem:[%s13838_s16 + $0x10ec] sm:$0xf] }
 0x16c   : > { %1139 = vst [vmem:[%s13834_s13 + $0x10f0] sm:$0xf] %v1138_v30  ;;  %v1142_v32 = vld [vmem:[%s13838_s16 + $0x1100] sm:$0xf]  ;;  %v1144_v33 = vld [vmem:[%s13838_s16 + $0x1104] sm:$0xf] }
 0x16d   : > { %1141 = vst [vmem:[%s13834_s13 + $0x10f8] sm:$0xf] %v1140_v31  ;;  %1143 = vst [vmem:[%s13834_s13 + $0x1100] sm:$0xf] %v1142_v32  ;;  %v1146_v34 = vld [vmem:[%s13838_s16 + $0x1108] sm:$0xf] }
 0x16e   : > { %1145 = vst [vmem:[%s13834_s13 + $0x1108] sm:$0xf] %v1144_v33  ;;  %v1148_v35 = vld [vmem:[%s13838_s16 + $0x110c] sm:$0xf]  ;;  %v1150_v36 = vld [vmem:[%s13838_s16 + $0x1120] sm:$0xf] }
 0x16f   : > { %1147 = vst [vmem:[%s13834_s13 + $0x1110] sm:$0xf] %v1146_v34  ;;  %1149 = vst [vmem:[%s13834_s13 + $0x1118] sm:$0xf] %v1148_v35  ;;  %v1152_v37 = vld [vmem:[%s13838_s16 + $0x1124] sm:$0xf] }
 0x170   : > { %1151 = vst [vmem:[%s13834_s13 + $0x1120] sm:$0xf] %v1150_v36  ;;  %v1154_v38 = vld [vmem:[%s13838_s16 + $0x1128] sm:$0xf]  ;;  %v1156_v39 = vld [vmem:[%s13838_s16 + $0x112c] sm:$0xf] }
 0x171   : > { %1153 = vst [vmem:[%s13834_s13 + $0x1128] sm:$0xf] %v1152_v37  ;;  %1155 = vst [vmem:[%s13834_s13 + $0x1130] sm:$0xf] %v1154_v38  ;;  %v1158_v40 = vld [vmem:[%s13838_s16 + $0x1140] sm:$0xf] }
 0x172   : > { %1157 = vst [vmem:[%s13834_s13 + $0x1138] sm:$0xf] %v1156_v39  ;;  %v1160_v41 = vld [vmem:[%s13838_s16 + $0x1144] sm:$0xf]  ;;  %v1162_v42 = vld [vmem:[%s13838_s16 + $0x1148] sm:$0xf] }
 0x173   : > { %1159 = vst [vmem:[%s13834_s13 + $0x1140] sm:$0xf] %v1158_v40  ;;  %1161 = vst [vmem:[%s13834_s13 + $0x1148] sm:$0xf] %v1160_v41  ;;  %v1164_v43 = vld [vmem:[%s13838_s16 + $0x114c] sm:$0xf] }
 0x174   : > { %1163 = vst [vmem:[%s13834_s13 + $0x1150] sm:$0xf] %v1162_v42  ;;  %v1166_v44 = vld [vmem:[%s13838_s16 + $0x1160] sm:$0xf]  ;;  %v1168_v45 = vld [vmem:[%s13838_s16 + $0x1164] sm:$0xf] }
 0x175   : > { %1165 = vst [vmem:[%s13834_s13 + $0x1158] sm:$0xf] %v1164_v43  ;;  %1167 = vst [vmem:[%s13834_s13 + $0x1160] sm:$0xf] %v1166_v44  ;;  %v1170_v46 = vld [vmem:[%s13838_s16 + $0x1168] sm:$0xf] }
 0x176   : > { %1169 = vst [vmem:[%s13834_s13 + $0x1168] sm:$0xf] %v1168_v45  ;;  %v1172_v47 = vld [vmem:[%s13838_s16 + $0x116c] sm:$0xf]  ;;  %v1174_v48 = vld [vmem:[%s13838_s16 + $0x1180] sm:$0xf] }
 0x177   : > { %1171 = vst [vmem:[%s13834_s13 + $0x1170] sm:$0xf] %v1170_v46  ;;  %1173 = vst [vmem:[%s13834_s13 + $0x1178] sm:$0xf] %v1172_v47  ;;  %v1176_v49 = vld [vmem:[%s13838_s16 + $0x1184] sm:$0xf] }
 0x178   : > { %1175 = vst [vmem:[%s13834_s13 + $0x1180] sm:$0xf] %v1174_v48  ;;  %v1178_v50 = vld [vmem:[%s13838_s16 + $0x1188] sm:$0xf]  ;;  %v1180_v51 = vld [vmem:[%s13838_s16 + $0x118c] sm:$0xf] }
 0x179   : > { %1177 = vst [vmem:[%s13834_s13 + $0x1188] sm:$0xf] %v1176_v49  ;;  %1179 = vst [vmem:[%s13834_s13 + $0x1190] sm:$0xf] %v1178_v50  ;;  %v1182_v52 = vld [vmem:[%s13838_s16 + $0x11a0] sm:$0xf] }
 0x17a   : > { %1181 = vst [vmem:[%s13834_s13 + $0x1198] sm:$0xf] %v1180_v51  ;;  %v1184_v53 = vld [vmem:[%s13838_s16 + $0x11a4] sm:$0xf]  ;;  %v1186_v54 = vld [vmem:[%s13838_s16 + $0x11a8] sm:$0xf] }
 0x17b   : > { %1183 = vst [vmem:[%s13834_s13 + $0x11a0] sm:$0xf] %v1182_v52  ;;  %1185 = vst [vmem:[%s13834_s13 + $0x11a8] sm:$0xf] %v1184_v53  ;;  %v1188_v55 = vld [vmem:[%s13838_s16 + $0x11ac] sm:$0xf] }
 0x17c   : > { %1187 = vst [vmem:[%s13834_s13 + $0x11b0] sm:$0xf] %v1186_v54  ;;  %v1190_v56 = vld [vmem:[%s13838_s16 + $0x11c0] sm:$0xf]  ;;  %v1192_v57 = vld [vmem:[%s13838_s16 + $0x11c4] sm:$0xf] }
 0x17d   : > { %1189 = vst [vmem:[%s13834_s13 + $0x11b8] sm:$0xf] %v1188_v55  ;;  %1191 = vst [vmem:[%s13834_s13 + $0x11c0] sm:$0xf] %v1190_v56  ;;  %v1194_v58 = vld [vmem:[%s13838_s16 + $0x11c8] sm:$0xf] }
 0x17e   : > { %1193 = vst [vmem:[%s13834_s13 + $0x11c8] sm:$0xf] %v1192_v57  ;;  %v1196_v59 = vld [vmem:[%s13838_s16 + $0x11cc] sm:$0xf]  ;;  %v1198_v60 = vld [vmem:[%s13838_s16 + $0x11e0] sm:$0xf] }
 0x17f   : > { %1195 = vst [vmem:[%s13834_s13 + $0x11d0] sm:$0xf] %v1194_v58  ;;  %1197 = vst [vmem:[%s13834_s13 + $0x11d8] sm:$0xf] %v1196_v59  ;;  %v1200_v61 = vld [vmem:[%s13838_s16 + $0x11e4] sm:$0xf] }
 0x180   : > { %1199 = vst [vmem:[%s13834_s13 + $0x11e0] sm:$0xf] %v1198_v60  ;;  %v1202_v62 = vld [vmem:[%s13838_s16 + $0x11e8] sm:$0xf]  ;;  %v1204_v63 = vld [vmem:[%s13838_s16 + $0x11ec] sm:$0xf] }
 0x181   : > { %1201 = vst [vmem:[%s13834_s13 + $0x11e8] sm:$0xf] %v1200_v61  ;;  %1203 = vst [vmem:[%s13834_s13 + $0x11f0] sm:$0xf] %v1202_v62  ;;  %p1207_p0 = scmp.ge.s32.totalorder %s1206_s19, 2  ;;  %s50_s18 = sadd.s32 1, %s13846_s18  }
 0x182   : > { %1205 = vst [vmem:[%s13834_s13 + $0x11f8] sm:$0xf] %v1204_v63  ;;  %p47_p1 = scmp.ge.s32.totalorder %s50_s18, 2  }
 0x183   : > { %s16291_s19 = smov (%p1207_p0, %s1206_s19), 0 }
 0x184   : > { %s12132_s20 = sshll.u32 %s16291_s19, 4  ;;  %s12133_s21 = sshll.u32 %s16291_s19, 2 }
 0x185   : > { %s1211_s16 = scalar_lea.vmem %s16283_s6, %s12132_s20   ;;  %s1212_s13 = scalar_lea.vmem [#allocation2], %s12133_s21  }
 0x186   : > { %s16289_s17 = smov %s16291_s19  ;;  %49 = sbr.rel (!%p47_p1) target bundleno = 2 (0x2), region = 198 }
 0x18d   :  { %4766 = vsyncadd [#allocation4], 73728  ;;  %v13594_v0 = vld [vmem:[%s16278_s1 + $0x40] sm:$0xff]   ;;  %v13598_v4 = vld [vmem:[%s16278_s1 + $0x48] sm:$0xff]   ;;  %vm13849_vm0 = vmmov 0   ;;  %vm5710_vm1 = vcmask 523264  }
 0x18e   :  { %v13595_v1 = vld [vmem:[%s16278_s1 + $0xc0] sm:$0xff]   ;;  %12613 = vmatprep.subr.bf16.mxu0 %v13594_v0  ;;  %v13599_v5 = vld [vmem:[%s16278_s1 + $0xc8] sm:$0xff]   ;;  %v13602_v8 = vld [vmem:[%s16278_s1 + $0x50] sm:$0xff]   ;;  %v13848_v0 = vmov 0.0   ;;  %vm7679_vm2 = vcmask 519168  }
 0x18f   :  { %v13596_v2 = vld [vmem:[%s16278_s1] sm:$0xff]   ;;  %12677 = vmatprep.subr.bf16.mxu1 %v13595_v1  ;;  %v13600_v6 = vld [vmem:[%s16278_s1 + $0x8] sm:$0xff]   ;;  %v13603_v9 = vld [vmem:[%s16278_s1 + $0xd0] sm:$0xff]  }
 0x190   :  { %v13597_v3 = vld [vmem:[%s16278_s1 + $0x80] sm:$0xff]   ;;  %12614 = vmatpush3.bf16.msra.mxu0 %v13596_v2  ;;  %v13601_v7 = vld [vmem:[%s16278_s1 + $0x88] sm:$0xff]   ;;  %v13604_v10 = vld [vmem:[%s16278_s1 + $0x10] sm:$0xff]  }
 0x191   :  { %12678 = vmatpush3.bf16.msra.mxu1 %v13597_v3  ;;  %12615 = vmatprep.subr.bf16.mxu0 %v13598_v4  ;;  %v13605_v11 = vld [vmem:[%s16278_s1 + $0x90] sm:$0xff]   ;;  %v13606_v12 = vld [vmem:[%s16278_s1 + $0x58] sm:$0xff]   ;;  %v13610_v16 = vld [vmem:[%s16278_s1 + $0x60] sm:$0xff]  }
 0x192   :  { %12679 = vmatprep.subr.bf16.mxu1 %v13599_v5  ;;  %v13607_v13 = vld [vmem:[%s16278_s1 + $0xd8] sm:$0xff]   ;;  %v13611_v17 = vld [vmem:[%s16278_s1 + $0xe0] sm:$0xff]   ;;  %v13614_v20 = vld [vmem:[%s16278_s1 + $0x68] sm:$0xff]  }
 0x193   :  { %v13608_v14 = vld [vmem:[%s16278_s1 + $0x18] sm:$0xff]   ;;  %v13612_v18 = vld [vmem:[%s16278_s1 + $0x20] sm:$0xff]   ;;  %v13615_v21 = vld [vmem:[%s16278_s1 + $0xe8] sm:$0xff]  }
 0x194   :  { %12616 = vmatpush3.bf16.msra.mxu0 %v13600_v6  ;;  %v13609_v15 = vld [vmem:[%s16278_s1 + $0x98] sm:$0xff]   ;;  %v13613_v19 = vld [vmem:[%s16278_s1 + $0xa0] sm:$0xff]   ;;  %v13616_v22 = vld [vmem:[%s16278_s1 + $0x28] sm:$0xff]  }
 0x195   :  { %12680 = vmatpush3.bf16.msra.mxu1 %v13601_v7  ;;  %12617 = vmatprep.subr.bf16.mxu0 %v13602_v8  ;;  %v13617_v23 = vld [vmem:[%s16278_s1 + $0xa8] sm:$0xff]   ;;  %v13618_v24 = vld [vmem:[%s16278_s1 + $0x70] sm:$0xff]   ;;  %v13622_v28 = vld [vmem:[%s16278_s1 + $0x78] sm:$0xff]  }
 0x196   :  { %12681 = vmatprep.subr.bf16.mxu1 %v13603_v9  ;;  %v13619_v25 = vld [vmem:[%s16278_s1 + $0xf0] sm:$0xff]   ;;  %v13623_v29 = vld [vmem:[%s16278_s1 + $0xf8] sm:$0xff]   ;;  %v15295_v3 = vld [vmem:[%s16279_s2] ss:$0 sm:$0xff] }
 0x197   :  { %v13620_v26 = vld [vmem:[%s16278_s1 + $0x30] sm:$0xff]   ;;  %v13624_v30 = vld [vmem:[%s16278_s1 + $0x38] sm:$0xff]  }
 0x198   :  { %12618 = vmatpush3.bf16.msra.mxu0 %v13604_v10  ;;  %v13621_v27 = vld [vmem:[%s16278_s1 + $0xb0] sm:$0xff]   ;;  %v13625_v31 = vld [vmem:[%s16278_s1 + $0xb8] sm:$0xff]  }
 0x199   :  { %12682 = vmatpush3.bf16.msra.mxu1 %v13605_v11  ;;  %12619 = vmatprep.subr.bf16.mxu0 %v13606_v12  ;;  %v13626_v32 = vld [vmem:[%s16277_s0] ss:$16 sps:$4 sm:$0xff]   ;;  %v13628_v33 = vld [vmem:[%s16277_s0 + $0x4] ss:$16 sps:$4 sm:$0xff]   ;;  %v13629_v34 = vld [vmem:[%s16277_s0 + $0x8] ss:$16 sps:$4 sm:$0xff]  }
 0x19a   :  { %12683 = vmatprep.subr.bf16.mxu1 %v13607_v13  ;;  %v13631_v35 = vld [vmem:[%s16277_s0 + $0xc] ss:$16 sps:$4 sm:$0xff]   ;;  %5254 = vmatprep.mubr.bf16.mxu0 %v13628_v33  ;;  %v13632_v36 = vld [vmem:[%s16277_s0 + $0x24] ss:$16 sps:$4 sm:$0xff]   ;;  %v13636_v38 = vld [vmem:[%s16277_s0 + $0x20] ss:$16 sps:$4 sm:$0xff]  }
 0x19b   :  { %5351 = vmatprep.mubr.bf16.mxu1 %v13631_v35  ;;  %v13634_v37 = vld [vmem:[%s16277_s0 + $0x2c] ss:$16 sps:$4 sm:$0xff]   ;;  %v13637_v39 = vld [vmem:[%s16277_s0 + $0x28] ss:$16 sps:$4 sm:$0xff]   ;;  %v13638_v40 = vld [vmem:[%s16277_s0 + $0x44] ss:$16 sps:$4 sm:$0xff]  }
 0x19c   :  { %12620 = vmatpush3.bf16.msra.mxu0 %v13608_v14  ;;  %v13640_v41 = vld [vmem:[%s16277_s0 + $0x4c] ss:$16 sps:$4 sm:$0xff]   ;;  %v13642_v42 = vld [vmem:[%s16277_s0 + $0x40] ss:$16 sps:$4 sm:$0xff]   ;;  %v13643_v43 = vld [vmem:[%s16277_s0 + $0x48] ss:$16 sps:$4 sm:$0xff]  }
 0x19d   :  { %12684 = vmatpush3.bf16.msra.mxu1 %v13609_v15  ;;  %12621 = vmatprep.subr.bf16.mxu0 %v13610_v16  ;;  %v13644_v44 = vld [vmem:[%s16277_s0 + $0x64] ss:$16 sps:$4 sm:$0xff]   ;;  %v13646_v45 = vld [vmem:[%s16277_s0 + $0x6c] ss:$16 sps:$4 sm:$0xff]   ;;  %v13648_v46 = vld [vmem:[%s16277_s0 + $0x60] ss:$16 sps:$4 sm:$0xff]  }
 0x19e   :  { %12685 = vmatprep.subr.bf16.mxu1 %v13611_v17  ;;  %v13649_v47 = vld [vmem:[%s16277_s0 + $0x68] ss:$16 sps:$4 sm:$0xff]   ;;  %v13650_v48 = vld [vmem:[%s16277_s0 + $0x84] ss:$16 sps:$4 sm:$0xff]   ;;  %v13652_v49 = vld [vmem:[%s16277_s0 + $0x8c] ss:$16 sps:$4 sm:$0xff]  }
 0x19f   :  { %v13654_v50 = vld [vmem:[%s16277_s0 + $0x80] ss:$16 sps:$4 sm:$0xff]   ;;  %v13655_v51 = vld [vmem:[%s16277_s0 + $0x88] ss:$16 sps:$4 sm:$0xff]   ;;  %v13656_v52 = vld [vmem:[%s16277_s0 + $0xa4] ss:$16 sps:$4 sm:$0xff]  }
 0x1a0   :  { %12622 = vmatpush3.bf16.msra.mxu0 %v13612_v18  ;;  %v13658_v53 = vld [vmem:[%s16277_s0 + $0xac] ss:$16 sps:$4 sm:$0xff]   ;;  %v13660_v54 = vld [vmem:[%s16277_s0 + $0xa0] ss:$16 sps:$4 sm:$0xff]   ;;  %v13661_v55 = vld [vmem:[%s16277_s0 + $0xa8] ss:$16 sps:$4 sm:$0xff]  }
 0x1a1   :  { %12686 = vmatpush3.bf16.msra.mxu1 %v13613_v19  ;;  %12623 = vmatprep.subr.bf16.mxu0 %v13614_v20  ;;  %v13662_v56 = vld [vmem:[%s16277_s0 + $0xc4] ss:$16 sps:$4 sm:$0xff]   ;;  %v13664_v57 = vld [vmem:[%s16277_s0 + $0xcc] ss:$16 sps:$4 sm:$0xff]   ;;  %v13666_v58 = vld [vmem:[%s16277_s0 + $0xc0] ss:$16 sps:$4 sm:$0xff]  }
 0x1a2   :  { %12687 = vmatprep.subr.bf16.mxu1 %v13615_v21  ;;  %v13667_v59 = vld [vmem:[%s16277_s0 + $0xc8] ss:$16 sps:$4 sm:$0xff]   ;;  %v13668_v60 = vld [vmem:[%s16277_s0 + $0xe4] ss:$16 sps:$4 sm:$0xff]   ;;  %v13670_v61 = vld [vmem:[%s16277_s0 + $0xec] ss:$16 sps:$4 sm:$0xff]  }
 0x1a3   :  { %v13672_v62 = vld [vmem:[%s16277_s0 + $0xe0] ss:$16 sps:$4 sm:$0xff]   ;;  %v13673_v63 = vld [vmem:[%s16277_s0 + $0xe8] ss:$16 sps:$4 sm:$0xff]  }
 0x1a4   :  { %12624 = vmatpush3.bf16.msra.mxu0 %v13616_v22 }
 0x1a5   :  { %12688 = vmatpush3.bf16.msra.mxu1 %v13617_v23  ;;  %12625 = vmatprep.subr.bf16.mxu0 %v13618_v24 }
 0x1a6   :  { %12689 = vmatprep.subr.bf16.mxu1 %v13619_v25 }
 0x1a8   :  { %12626 = vmatpush3.bf16.msra.mxu0 %v13620_v26 }
 0x1a9   :  { %12690 = vmatpush3.bf16.msra.mxu1 %v13621_v27  ;;  %12627 = vmatprep.subr.bf16.mxu0 %v13622_v28 }
 0x1aa   :  { %12691 = vmatprep.subr.bf16.mxu1 %v13623_v29 }
 0x1ac   :  { %12628 = vmatpush3.bf16.msra.mxu0 %v13624_v30 }
 0x1ad   :  { %12692 = vmatpush3.bf16.msra.mxu1 %v13625_v31  ;;  %12983 = vmatprep.subr.bf16.mxu0 %v13848_v0 }
 0x1ae   :  { %13019 = vmatprep.subr.bf16.mxu1 %v13848_v0 }
 0x1af   :  { %5255 = vmatmul.mubr.bf16.vlgmr.msra.gmra.mrb[0].mxu0 %v13626_v32 }
 0x1b0   :  { %5352 = vmatmul.mubr.bf16.vlgmr.msra.gmra.mrb[0].mxu1 %v13629_v34  ;;  %5262 = vmatprep.mubr.bf16.mxu0 %v13632_v36 }
 0x1b1   :  { %5359 = vmatprep.mubr.bf16.mxu1 %v13634_v37 }
 0x1b7   :  { %5263 = vmatmul.mubr.bf16.gmra.mrb[4].mxu0 %v13636_v38 }
 0x1b8   :  { %5360 = vmatmul.mubr.bf16.gmra.mrb[4].mxu1 %v13637_v39  ;;  %5270 = vmatprep.mubr.bf16.mxu0 %v13638_v40 }
 0x1b9   :  { %5367 = vmatprep.mubr.bf16.mxu1 %v13640_v41 }
 0x1bf   :  { %5271 = vmatmul.mubr.bf16.gmra.mrb[8].mxu0 %v13642_v42 }
 0x1c0   :  { %5368 = vmatmul.mubr.bf16.gmra.mrb[8].mxu1 %v13643_v43  ;;  %5278 = vmatprep.mubr.bf16.mxu0 %v13644_v44 }
 0x1c1   :  { %5375 = vmatprep.mubr.bf16.mxu1 %v13646_v45 }
 0x1c7   :  { %5279 = vmatmul.mubr.bf16.gmra.mrb[12].mxu0 %v13648_v46 }
 0x1c8   :  { %5376 = vmatmul.mubr.bf16.gmra.mrb[12].mxu1 %v13649_v47  ;;  %5286 = vmatprep.mubr.bf16.mxu0 %v13650_v48 }
 0x1c9   :  { %5383 = vmatprep.mubr.bf16.mxu1 %v13652_v49 }
 0x1cf   :  { %5287 = vmatmul.mubr.bf16.gmra.mrb[16].mxu0 %v13654_v50 }
 0x1d0   :  { %5384 = vmatmul.mubr.bf16.gmra.mrb[16].mxu1 %v13655_v51  ;;  %5294 = vmatprep.mubr.bf16.mxu0 %v13656_v52 }
 0x1d1   :  { %5391 = vmatprep.mubr.bf16.mxu1 %v13658_v53 }
 0x1d7   :  { %5295 = vmatmul.mubr.bf16.gmra.mrb[20].mxu0 %v13660_v54 }
 0x1d8   :  { %5392 = vmatmul.mubr.bf16.gmra.mrb[20].mxu1 %v13661_v55  ;;  %5302 = vmatprep.mubr.bf16.mxu0 %v13662_v56 }
 0x1d9   :  { %5399 = vmatprep.mubr.bf16.mxu1 %v13664_v57 }
 0x1df   :  { %5303 = vmatmul.mubr.bf16.gmra.mrb[24].mxu0 %v13666_v58 }
 0x1e0   :  { %5400 = vmatmul.mubr.bf16.gmra.mrb[24].mxu1 %v13667_v59  ;;  %5310 = vmatprep.mubr.bf16.mxu0 %v13668_v60 }
 0x1e1   :  { %5407 = vmatprep.mubr.bf16.mxu1 %v13670_v61 }
 0x1e7   :  { %5311 = vmatmul.mubr.bf16.gmra.mrb[28].mxu0 %v13672_v62 }
 0x1e8   :  { %5408 = vmatmul.mubr.bf16.gmra.mrb[28].mxu1 %v13673_v63  ;;  %12999 = vmatprep.mubr.msk.bf16.mxu0 %vm13849_vm0, %v13848_v0 }
 0x1e9   :  { %13035 = vmatprep.mubr.msk.bf16.mxu1 %vm13849_vm0, %v13848_v0 }
 0x282   :  { %v12629_v1 = vpop.f32.mrb[0].mxu0 }
 0x283   :  { %v12693_v2 = vpop.f32.mrb[0].mxu1  ;;  %v12630_v4 = vpop.f32.mrb[1].mxu0 }
 0x284   :  { %v12631_v5 = vadd.f32 %v12630_v4, %v12629_v1  ;;  %v12694_v6 = vpop.f32.mrb[1].mxu1  ;;  %v12632_v7 = vpop.f32.mrb[2].mxu0 }
 0x285   :  { %v12695_v8 = vadd.f32 %v12694_v6, %v12693_v2  ;;  %v12696_v9 = vpop.f32.mrb[2].mxu1  ;;  %v12633_v10 = vpop.f32.mrb[3].mxu0 }
 0x286   :  { %v5257_v11 = vadd.f32 %v12631_v5, %v15295_v3  ;;  %v12634_v12 = vadd.f32 %v12633_v10, %v12632_v7  ;;  %v12697_v13 = vpop.f32.mrb[3].mxu1 }
 0x287   :  { %v12698_v14 = vadd.f32 %v12697_v13, %v12696_v9 }
 0x288   :  { %v5354_v15 = vadd.f32 %v12695_v8, %v5257_v11  ;;  %v5260_v16 = vadd.f32 %v12634_v12, %v15295_v3 }
 0x28a   :  { %v5357_v17 = vadd.f32 %v12698_v14, %v5260_v16  ;;  %v12635_v18 = vpop.f32.mrb[4].mxu0  ;;  %v5416_v21 = vmax.f32 %v5354_v15, 0.0 }
 0x28b   :  { %v12699_v19 = vpop.f32.mrb[4].mxu1  ;;  %v12636_v20 = vpop.f32.mrb[5].mxu0 }
 0x28c   :  { %v5417_v22 = vmax.f32 %v5357_v17, 0.0  ;;  %v12637_v23 = vadd.f32 %v12636_v20, %v12635_v18  ;;  %v12700_v24 = vpop.f32.mrb[5].mxu1  ;;  %v12638_v25 = vpop.f32.mrb[6].mxu0 }
 0x28d   :  { %v12701_v26 = vadd.f32 %v12700_v24, %v12699_v19  ;;  %v12702_v27 = vpop.f32.mrb[6].mxu1  ;;  %v12639_v28 = vpop.f32.mrb[7].mxu0 }
 0x28e   :  { %v15299_v29 = vpack.c.bf16 %v5417_v22, %v5416_v21  ;;  %v5265_v30 = vadd.f32 %v12637_v23, %v15295_v3  ;;  %v12640_v31 = vadd.f32 %v12639_v28, %v12638_v25  ;;  %v12703_v32 = vpop.f32.mrb[7].mxu1 }
 0x28f   :  { %v12704_v33 = vadd.f32 %v12703_v32, %v12702_v27 }
 0x290   :  { %v5362_v34 = vadd.f32 %v12701_v26, %v5265_v30  ;;  %v5268_v35 = vadd.f32 %v12640_v31, %v15295_v3  ;;  %12984 = vmatpush3.bf16.msra.mxu0 %v15299_v29  ;;  %13020 = vmatpush3.bf16.msra.mxu1 %v15299_v29 }
 0x291   :  { %12985 = vmatprep.subr.bf16.mxu0 %v13848_v0  ;;  %13021 = vmatprep.subr.bf16.mxu1 %v13848_v0 }
 0x292   :  { %v5365_v36 = vadd.f32 %v12704_v33, %v5268_v35  ;;  %v12641_v37 = vpop.f32.mrb[8].mxu0  ;;  %v5418_v40 = vmax.f32 %v5362_v34, 0.0 }
 0x293   :  { %v12705_v38 = vpop.f32.mrb[8].mxu1  ;;  %v12642_v39 = vpop.f32.mrb[9].mxu0 }
 0x294   :  { %v5419_v41 = vmax.f32 %v5365_v36, 0.0  ;;  %v12643_v42 = vadd.f32 %v12642_v39, %v12641_v37  ;;  %v12706_v43 = vpop.f32.mrb[9].mxu1  ;;  %v12644_v44 = vpop.f32.mrb[10].mxu0 }
 0x295   :  { %v12707_v45 = vadd.f32 %v12706_v43, %v12705_v38  ;;  %v12708_v46 = vpop.f32.mrb[10].mxu1  ;;  %v12645_v47 = vpop.f32.mrb[11].mxu0 }
 0x296   :  { %v15307_v48 = vpack.c.bf16 %v5419_v41, %v5418_v40  ;;  %v5273_v49 = vadd.f32 %v12643_v42, %v15295_v3  ;;  %v12646_v50 = vadd.f32 %v12645_v47, %v12644_v44  ;;  %v12709_v51 = vpop.f32.mrb[11].mxu1 }
 0x297   :  { %v12710_v52 = vadd.f32 %v12709_v51, %v12708_v46 }
 0x298   :  { %v5370_v53 = vadd.f32 %v12707_v45, %v5273_v49  ;;  %v5276_v54 = vadd.f32 %v12646_v50, %v15295_v3  ;;  %12986 = vmatpush3.bf16.msra.mxu0 %v15307_v48  ;;  %13022 = vmatpush3.bf16.msra.mxu1 %v15307_v48 }
 0x299   :  { %12987 = vmatprep.subr.bf16.mxu0 %v13848_v0  ;;  %13023 = vmatprep.subr.bf16.mxu1 %v13848_v0 }
 0x29a   :  { %v5373_v55 = vadd.f32 %v12710_v52, %v5276_v54  ;;  %v12647_v56 = vpop.f32.mrb[12].mxu0  ;;  %v5420_v59 = vmax.f32 %v5370_v53, 0.0 }
 0x29b   :  { %v12711_v57 = vpop.f32.mrb[12].mxu1  ;;  %v12648_v58 = vpop.f32.mrb[13].mxu0 }
 0x29c   :  { %v5421_v60 = vmax.f32 %v5373_v55, 0.0  ;;  %v12649_v61 = vadd.f32 %v12648_v58, %v12647_v56  ;;  %v12712_v62 = vpop.f32.mrb[13].mxu1  ;;  %v12650_v63 = vpop.f32.mrb[14].mxu0 }
 0x29d   :  { %v12713_v1 = vadd.f32 %v12712_v62, %v12711_v57  ;;  %v12714_v2 = vpop.f32.mrb[14].mxu1  ;;  %v12651_v4 = vpop.f32.mrb[15].mxu0 }
 0x29e   :  { %v15315_v5 = vpack.c.bf16 %v5421_v60, %v5420_v59  ;;  %v5281_v6 = vadd.f32 %v12649_v61, %v15295_v3  ;;  %v12652_v7 = vadd.f32 %v12651_v4, %v12650_v63  ;;  %v12715_v8 = vpop.f32.mrb[15].mxu1 }
 0x29f   :  { %v12716_v9 = vadd.f32 %v12715_v8, %v12714_v2 }
 0x2a0   :  { %v5378_v10 = vadd.f32 %v12713_v1, %v5281_v6  ;;  %v5284_v11 = vadd.f32 %v12652_v7, %v15295_v3  ;;  %12988 = vmatpush3.bf16.msra.mxu0 %v15315_v5  ;;  %13024 = vmatpush3.bf16.msra.mxu1 %v15315_v5 }
 0x2a1   :  { %12989 = vmatprep.subr.bf16.mxu0 %v13848_v0  ;;  %13025 = vmatprep.subr.bf16.mxu1 %v13848_v0 }
 0x2a2   :  { %v5381_v12 = vadd.f32 %v12716_v9, %v5284_v11  ;;  %v12653_v13 = vpop.f32.mrb[16].mxu0  ;;  %v5422_v16 = vmax.f32 %v5378_v10, 0.0 }
 0x2a3   :  { %v12717_v14 = vpop.f32.mrb[16].mxu1  ;;  %v12654_v15 = vpop.f32.mrb[17].mxu0 }
 0x2a4   :  { %v5423_v17 = vmax.f32 %v5381_v12, 0.0  ;;  %v12655_v18 = vadd.f32 %v12654_v15, %v12653_v13  ;;  %v12718_v19 = vpop.f32.mrb[17].mxu1  ;;  %v12656_v20 = vpop.f32.mrb[18].mxu0 }
 0x2a5   :  { %v12719_v21 = vadd.f32 %v12718_v19, %v12717_v14  ;;  %v12720_v22 = vpop.f32.mrb[18].mxu1  ;;  %v12657_v23 = vpop.f32.mrb[19].mxu0 }
 0x2a6   :  { %v15323_v24 = vpack.c.bf16 %v5423_v17, %v5422_v16  ;;  %v5289_v25 = vadd.f32 %v12655_v18, %v15295_v3  ;;  %v12658_v26 = vadd.f32 %v12657_v23, %v12656_v20  ;;  %v12721_v27 = vpop.f32.mrb[19].mxu1 }
 0x2a7   :  { %v12722_v28 = vadd.f32 %v12721_v27, %v12720_v22 }
 0x2a8   :  { %v5386_v30 = vadd.f32 %v12719_v21, %v5289_v25  ;;  %v5292_v31 = vadd.f32 %v12658_v26, %v15295_v3  ;;  %12990 = vmatpush3.bf16.msra.mxu0 %v15323_v24  ;;  %13026 = vmatpush3.bf16.msra.mxu1 %v15323_v24 }
 0x2a9   :  { %12991 = vmatprep.subr.bf16.mxu0 %v13848_v0  ;;  %13027 = vmatprep.subr.bf16.mxu1 %v13848_v0 }
 0x2aa   :  { %v5389_v32 = vadd.f32 %v12722_v28, %v5292_v31  ;;  %v12659_v33 = vpop.f32.mrb[20].mxu0  ;;  %v5424_v36 = vmax.f32 %v5386_v30, 0.0 }
 0x2ab   :  { %v12723_v34 = vpop.f32.mrb[20].mxu1  ;;  %v12660_v35 = vpop.f32.mrb[21].mxu0 }
 0x2ac   :  { %v5425_v37 = vmax.f32 %v5389_v32, 0.0  ;;  %v12661_v38 = vadd.f32 %v12660_v35, %v12659_v33  ;;  %v12724_v39 = vpop.f32.mrb[21].mxu1  ;;  %v12662_v40 = vpop.f32.mrb[22].mxu0  ;;  %v13674_v35 = vld [vmem:[%s16280_s3 + $0x24] sm:$0xff]  }
 0x2ad   :  { %v12725_v41 = vadd.f32 %v12724_v39, %v12723_v34  ;;  %v12726_v42 = vpop.f32.mrb[22].mxu1  ;;  %v12663_v43 = vpop.f32.mrb[23].mxu0  ;;  %v13688_v39 = vld [vmem:[%s16281_s4 + $0x8] sm:$0xff]  }
 0x2ae   :  { %v15331_v44 = vpack.c.bf16 %v5425_v37, %v5424_v36  ;;  %v5297_v45 = vadd.f32 %v12661_v38, %v15295_v3  ;;  %v12664_v46 = vadd.f32 %v12663_v43, %v12662_v40  ;;  %v12727_v47 = vpop.f32.mrb[23].mxu1  ;;  %v13684_v36 = vld [vmem:[%s16281_s4 + $0x20] sm:$0xff]   ;;  %v13685_v38 = vld [vmem:[%s16281_s4 + $0x28] sm:$0xff]   ;;  %v13689_v43 = vld [vmem:[%s16281_s4 + $0x10] sm:$0xff]  }
 0x2af   :  { %v12728_v49 = vadd.f32 %v12727_v47, %v12726_v42  ;;  %v13687_v37 = vld [vmem:[%s16281_s4] sm:$0xff]   ;;  %v13676_v40 = vld [vmem:[%s16280_s3 + $0x2c] sm:$0xff]  }
 0x2b0   :  { %v5394_v50 = vadd.f32 %v12725_v41, %v5297_v45  ;;  %v5300_v51 = vadd.f32 %v12664_v46, %v15295_v3  ;;  %12992 = vmatpush3.bf16.msra.mxu0 %v15331_v44  ;;  %13028 = vmatpush3.bf16.msra.mxu1 %v15331_v44  ;;  %v13677_v41 = vld [vmem:[%s16280_s3 + $0x8] sm:$0xff]   ;;  %v13686_v42 = vld [vmem:[%s16281_s4 + $0x30] sm:$0xff]   ;;  %v13680_v47 = vld [vmem:[%s16280_s3 + $0x3c] sm:$0xff]  }
 0x2b1   :  { %12993 = vmatprep.subr.bf16.mxu0 %v13848_v0  ;;  %13029 = vmatprep.subr.bf16.mxu1 %v13848_v0  ;;  %v13678_v45 = vld [vmem:[%s16280_s3 + $0x34] sm:$0xff]  }
 0x2b2   :  { %v5397_v52 = vadd.f32 %v12728_v49, %v5300_v51  ;;  %v12665_v53 = vpop.f32.mrb[24].mxu0  ;;  %v5426_v56 = vmax.f32 %v5394_v50, 0.0  ;;  %v13679_v46 = vld [vmem:[%s16280_s3 + $0x10] sm:$0xff]   ;;  %v13681_v49 = vld [vmem:[%s16280_s3 + $0x18] sm:$0xff]   ;;  %v13682_v50 = vld [vmem:[%s16280_s3 + $0x44] ss:$0 sps:$4 sm:$0xff]  }
 0x2b3   :  { %v12729_v54 = vpop.f32.mrb[24].mxu1  ;;  %v12666_v55 = vpop.f32.mrb[25].mxu0  ;;  %v13683_v51 = vld [vmem:[%s16280_s3 + $0x20] ss:$0 sps:$4 sm:$0xff]  }
 0x2b4   :  { %v5427_v57 = vmax.f32 %v5397_v52, 0.0  ;;  %v12667_v58 = vadd.f32 %v12666_v55, %v12665_v53  ;;  %v12730_v59 = vpop.f32.mrb[25].mxu1  ;;  %v12668_v60 = vpop.f32.mrb[26].mxu0  ;;  %v13690_v52 = vld [vmem:[%s16281_s4 + $0x38] sm:$0xff]  }
 0x2b5   :  { %v12731_v61 = vadd.f32 %v12730_v59, %v12729_v54  ;;  %v12732_v62 = vpop.f32.mrb[26].mxu1  ;;  %v12669_v63 = vpop.f32.mrb[27].mxu0  ;;  %v13691_v53 = vld [vmem:[%s16281_s4 + $0x18] sm:$0xff]  }
 0x2b6   :  { %v15339_v1 = vpack.c.bf16 %v5427_v57, %v5426_v56  ;;  %v5305_v2 = vadd.f32 %v12667_v58, %v15295_v3  ;;  %v12670_v4 = vadd.f32 %v12669_v63, %v12668_v60  ;;  %v12733_v6 = vpop.f32.mrb[27].mxu1 }
 0x2b7   :  { %v12734_v7 = vadd.f32 %v12733_v6, %v12732_v62 }
 0x2b8   :  { %v5402_v8 = vadd.f32 %v12731_v61, %v5305_v2  ;;  %v5308_v9 = vadd.f32 %v12670_v4, %v15295_v3  ;;  %12994 = vmatpush3.bf16.msra.mxu0 %v15339_v1  ;;  %13030 = vmatpush3.bf16.msra.mxu1 %v15339_v1 }
 0x2b9   :  { %12995 = vmatprep.subr.bf16.mxu0 %v13848_v0  ;;  %13031 = vmatprep.subr.bf16.mxu1 %v13848_v0 }
 0x2ba   :  { %v5405_v10 = vadd.f32 %v12734_v7, %v5308_v9  ;;  %v12671_v11 = vpop.f32.mrb[28].mxu0  ;;  %v5428_v14 = vmax.f32 %v5402_v8, 0.0 }
 0x2bb   :  { %v12735_v12 = vpop.f32.mrb[28].mxu1  ;;  %v12672_v13 = vpop.f32.mrb[29].mxu0 }
 0x2bc   :  { %v5429_v15 = vmax.f32 %v5405_v10, 0.0  ;;  %v12673_v16 = vadd.f32 %v12672_v13, %v12671_v11  ;;  %v12736_v17 = vpop.f32.mrb[29].mxu1  ;;  %v12674_v18 = vpop.f32.mrb[30].mxu0 }
 0x2bd   :  { %v12737_v19 = vadd.f32 %v12736_v17, %v12735_v12  ;;  %v12738_v20 = vpop.f32.mrb[30].mxu1  ;;  %v12675_v21 = vpop.f32.mrb[31].mxu0 }
 0x2be   :  { %v15347_v22 = vpack.c.bf16 %v5429_v15, %v5428_v14  ;;  %v5313_v23 = vadd.f32 %v12673_v16, %v15295_v3  ;;  %v12676_v25 = vadd.f32 %v12675_v21, %v12674_v18  ;;  %v12739_v26 = vpop.f32.mrb[31].mxu1 }
 0x2bf   :  { %v12740_v27 = vadd.f32 %v12739_v26, %v12738_v20 }
 0x2c0   :  { %v5410_v28 = vadd.f32 %v12737_v19, %v5313_v23  ;;  %v5316_v30 = vadd.f32 %v12676_v25, %v15295_v3  ;;  %12996 = vmatpush3.bf16.msra.mxu0 %v15347_v22  ;;  %13032 = vmatpush3.bf16.msra.mxu1 %v15347_v22  ;;  %v13675_v3 = vld [vmem:[%s16280_s3] sm:$0xff]  }
 0x2c1   :  { %12997 = vmatprep.subr.bf16.mxu0 %v13848_v0  ;;  %13033 = vmatprep.subr.bf16.mxu1 %v13848_v0 }
 0x2c2   :  { %v5413_v31 = vadd.f32 %v12740_v27, %v5316_v30  ;;  %v5430_v32 = vmax.f32 %v5410_v28, 0.0 }
 0x2c4   :  { %v5431_v33 = vmax.f32 %v5413_v31, 0.0 }
 0x2c6   :  { %v15355_v34 = vpack.c.bf16 %v5431_v33, %v5430_v32 }
 0x2c8   :  { %12998 = vmatpush3.bf16.msra.mxu0 %v15355_v34  ;;  %13034 = vmatpush3.bf16.msra.mxu1 %v15355_v34 }
 0x2c9   :  { %13055 = vmatprep.subr.bf16.mxu0 %v13848_v0  ;;  %13083 = vmatprep.subr.bf16.mxu1 %v13848_v0 }
 0x2cb   :  { %13036 = vmatmul.mubr.bf16.vlgmr.msra.gmra.mrb[32].mxu1 %v13674_v35  ;;  %13000 = vmatmul.mubr.bf16.vlgmr.msra.gmra.mrb[32].mxu0 %v13675_v3 }
 0x2cc   :  { %13039 = vmatprep.mubr.msk.bf16.mxu1 %vm13849_vm0, %v13848_v0  ;;  %13003 = vmatprep.mubr.msk.bf16.mxu0 %vm13849_vm0, %v13848_v0 }
 0x2cd   :  { %13056 = vmatpush3.bf16.msra.mxu0 %v13684_v36  ;;  %13084 = vmatpush3.bf16.msra.mxu1 %v13687_v37 }
 0x2ce   :  { %13057 = vmatprep.subr.bf16.mxu0 %v13848_v0  ;;  %13085 = vmatprep.subr.bf16.mxu1 %v13848_v0 }
 0x2d1   :  { %13058 = vmatpush3.bf16.msra.mxu0 %v13685_v38  ;;  %13086 = vmatpush3.bf16.msra.mxu1 %v13688_v39 }
 0x2d2   :  { %13059 = vmatprep.subr.bf16.mxu0 %v13848_v0  ;;  %13087 = vmatprep.subr.bf16.mxu1 %v13848_v0 }
 0x2d3   :  { %13040 = vmatmul.mubr.bf16.gmra.mrb[36].mxu1 %v13676_v40  ;;  %13004 = vmatmul.mubr.bf16.gmra.mrb[36].mxu0 %v13677_v41 }
 0x2d4   :  { %13043 = vmatprep.mubr.msk.bf16.mxu1 %vm13849_vm0, %v13848_v0  ;;  %13007 = vmatprep.mubr.msk.bf16.mxu0 %vm13849_vm0, %v13848_v0 }
 0x2d5   :  { %13060 = vmatpush3.bf16.msra.mxu0 %v13686_v42  ;;  %13088 = vmatpush3.bf16.msra.mxu1 %v13689_v43 }
 0x2d6   :  { %13061 = vmatprep.subr.bf16.mxu0 %v13848_v0  ;;  %13089 = vmatprep.subr.bf16.mxu1 %v13848_v0 }
 0x2d9   :  { %13062 = vmatpush3.bf16.msra.mxu0 %v13690_v52  ;;  %13090 = vmatpush3.bf16.msra.mxu1 %v13691_v53  ;;  %v13695_v52 = vld [vmem:[%s16280_s3 + $0x60] sm:$0xff]   ;;  %v13696_v53 = vld [vmem:[%s16280_s3 + $0x68] ss:$0 sps:$4 sm:$0xff]  }
 0x2da   :  { %13111 = vmatprep.subr.bf16.mxu0 %v13848_v0  ;;  %13147 = vmatprep.subr.bf16.mxu1 %v13848_v0 }
 0x2db   :  { %13044 = vmatmul.mubr.bf16.gmra.mrb[40].mxu1 %v13678_v45  ;;  %13008 = vmatmul.mubr.bf16.gmra.mrb[40].mxu0 %v13679_v46 }
 0x2dc   :  { %13047 = vmatprep.mubr.msk.bf16.mxu1 %vm13849_vm0, %v13848_v0  ;;  %13011 = vmatprep.mubr.msk.bf16.mxu0 %vm13849_vm0, %v13848_v0 }
 0x2e3   :  { %13048 = vmatmul.mubr.bf16.gmra.mrb[44].mxu1 %v13680_v47  ;;  %13012 = vmatmul.mubr.bf16.gmra.mrb[44].mxu0 %v13681_v49  ;;  %v13692_v49 = vld [vmem:[%s16280_s3 + $0x48] sm:$0xff]  }
 0x2e4   :  { %13051 = vmatprep.mubr.msk.bf16.mxu1 %vm13849_vm0, %v13848_v0  ;;  %13015 = vmatprep.mubr.msk.bf16.mxu0 %vm13849_vm0, %v13848_v0 }
 0x2eb   :  { %13052 = vmatmul.mubr.bf16.gmra.mrb[48].mxu1 %v13682_v50  ;;  %13016 = vmatmul.mubr.bf16.gmra.mrb[48].mxu0 %v13683_v51  ;;  %v13693_v50 = vld [vmem:[%s16280_s3 + $0x50] sm:$0xff]   ;;  %v13694_v51 = vld [vmem:[%s16280_s3 + $0x58] sm:$0xff]  }
 0x2ec   :  { %13063 = vmatprep.mubr.msk.bf16.mxu0 %vm13849_vm0, %v13848_v0  ;;  %13091 = vmatprep.mubr.msk.bf16.mxu1 %vm13849_vm0, %v13848_v0 }
 0x39e   :  { %v5634_v54 = vpop.f32.mrb[32].mxu1  ;;  %v5511_v55 = vpop.f32.mrb[32].mxu0 }
 0x39f   :  { %v13037_v56 = vpop.f32.mrb[33].mxu1  ;;  %v13001_v57 = vpop.f32.mrb[33].mxu0 }
 0x3a0   :  { %v5637_v58 = vpop.f32.mrb[34].mxu1  ;;  %v5514_v59 = vpop.f32.mrb[34].mxu0  ;;  %v13699_v56 = vld [vmem:[%s16280_s3 + $0x7c] sm:$0xff]  }
 0x3a1   :  { %v5672_v60 = vpack.c.bf16 %v5637_v58, %v5634_v54  ;;  %v5549_v61 = vpack.c.bf16 %v5514_v59, %v5511_v55  ;;  %v13038_v62 = vpop.f32.mrb[35].mxu1  ;;  %v13002_v63 = vpop.f32.mrb[35].mxu0  ;;  %v13697_v54 = vld [vmem:[%s16280_s3 + $0x6c] sm:$0xff]   ;;  %v13698_v55 = vld [vmem:[%s16280_s3 + $0x74] sm:$0xff]   ;;  %v13715_v57 = vld [vmem:[%s16281_s4 + $0x40] sm:$0xff]  }
 0x3a2   :  { %v13700_v58 = vld [vmem:[%s16280_s3 + $0x84] sm:$0xff]   ;;  %v13702_v62 = vld [vmem:[%s16280_s3 + $0x90] sm:$0xff]   ;;  %v13722_v63 = vld [vmem:[%s16281_s4 + $0x58] sm:$0xff]  }
 0x3a3   :  { %13064 = vmatmul.mubr.msk.bf16.vlgmr.msra.gmra.mrb[52].mxu0 %vm5710_vm1, %v5672_v60  ;;  %13092 = vmatmul.mubr.msk.bf16.vlgmr.msra.gmra.mrb[52].mxu1 %vm5710_vm1, %v5549_v61  ;;  %v13717_v59 = vld [vmem:[%s16281_s4 + $0x48] sm:$0xff]   ;;  %v13720_v61 = vld [vmem:[%s16281_s4 + $0x50] sm:$0xff]  }
 0x3a4   :  { %13112 = vmatpush3.bf16.msra.mxu0 %v15299_v29  ;;  %13067 = vmatprep.mubr.msk.bf16.mxu0 %vm13849_vm0, %v13848_v0  ;;  %v13701_v60 = vld [vmem:[%s16280_s3 + $0x8c] ss:$0 sps:$4 sm:$0xff]  }
 0x3a5   :  { %13113 = vmatprep.subr.bf16.mxu0 %v13848_v0  ;;  %13095 = vmatprep.mubr.msk.bf16.mxu1 %vm13849_vm0, %v13848_v0 }
 0x3a6   :  { %v5642_v2 = vpop.f32.mrb[36].mxu1  ;;  %v5519_v4 = vpop.f32.mrb[36].mxu0  ;;  %13148 = vmatpush3.bf16.msra.mxu1 %v13715_v57 }
 0x3a7   :  { %v13041_v6 = vpop.f32.mrb[37].mxu1  ;;  %v13005_v7 = vpop.f32.mrb[37].mxu0  ;;  %13149 = vmatprep.subr.bf16.mxu1 %v13848_v0 }
 0x3a8   :  { %13114 = vmatpush3.bf16.msra.mxu0 %v15307_v48  ;;  %v5645_v8 = vpop.f32.mrb[38].mxu1  ;;  %v5522_v9 = vpop.f32.mrb[38].mxu0  ;;  %v13705_v6 = vld [vmem:[%s16280_s3 + $0xa8] sm:$0xff]   ;;  %v13706_v7 = vld [vmem:[%s16280_s3 + $0xb0] ss:$0 sps:$4 sm:$0xff]  }
 0x3a9   :  { %v5673_v10 = vpack.c.bf16 %v5645_v8, %v5642_v2  ;;  %v5550_v11 = vpack.c.bf16 %v5522_v9, %v5519_v4  ;;  %13115 = vmatprep.subr.bf16.mxu0 %v13848_v0  ;;  %v13042_v12 = vpop.f32.mrb[39].mxu1  ;;  %v13006_v13 = vpop.f32.mrb[39].mxu0  ;;  %v13703_v2 = vld [vmem:[%s16280_s3 + $0x98] sm:$0xff]   ;;  %v13704_v4 = vld [vmem:[%s16280_s3 + $0xa0] sm:$0xff]  }
 0x3aa   :  { %13150 = vmatpush3.bf16.msra.mxu1 %v13717_v59  ;;  %v13707_v8 = vld [vmem:[%s16280_s3 + $0xb4] sm:$0xff]   ;;  %v13708_v9 = vld [vmem:[%s16280_s3 + $0xbc] sm:$0xff]  }
 0x3ab   :  { %13068 = vmatmul.mubr.msk.bf16.gmra.mrb[56].mxu0 %vm5710_vm1, %v5673_v10  ;;  %13096 = vmatmul.mubr.msk.bf16.gmra.mrb[56].mxu1 %vm5710_vm1, %v5550_v11  ;;  %v13709_v10 = vld [vmem:[%s16280_s3 + $0xc4] sm:$0xff]   ;;  %v13710_v11 = vld [vmem:[%s16280_s3 + $0xcc] sm:$0xff]   ;;  %v13711_v12 = vld [vmem:[%s16280_s3 + $0xd4] ss:$0 sps:$4 sm:$0xff]  }
 0x3ac   :  { %13116 = vmatpush3.bf16.msra.mxu0 %v15315_v5  ;;  %13071 = vmatprep.mubr.msk.bf16.mxu0 %vm13849_vm0, %v13848_v0  ;;  %v13712_v13 = vld [vmem:[%s16280_s3 + $0xd8] sm:$0xff]  }
 0x3ad   :  { %13117 = vmatprep.subr.bf16.mxu0 %v13848_v0  ;;  %13099 = vmatprep.mubr.msk.bf16.mxu1 %vm13849_vm0, %v13848_v0 }
 0x3ae   :  { %v5650_v14 = vpop.f32.mrb[40].mxu1  ;;  %v5527_v15 = vpop.f32.mrb[40].mxu0  ;;  %13151 = vmatprep.subr.bf16.mxu1 %v13848_v0 }
 0x3af   :  { %v13045_v16 = vpop.f32.mrb[41].mxu1  ;;  %v13009_v17 = vpop.f32.mrb[41].mxu0  ;;  %13152 = vmatpush3.bf16.msra.mxu1 %v13720_v61 }
 0x3b0   :  { %13118 = vmatpush3.bf16.msra.mxu0 %v15323_v24  ;;  %v5653_v18 = vpop.f32.mrb[42].mxu1  ;;  %v5530_v19 = vpop.f32.mrb[42].mxu0  ;;  %13153 = vmatprep.subr.bf16.mxu1 %v13848_v0 }
 0x3b1   :  { %v5674_v20 = vpack.c.bf16 %v5653_v18, %v5650_v14  ;;  %v5551_v21 = vpack.c.bf16 %v5530_v19, %v5527_v15  ;;  %13119 = vmatprep.subr.bf16.mxu0 %v13848_v0  ;;  %v13046_v23 = vpop.f32.mrb[43].mxu1  ;;  %v13010_v25 = vpop.f32.mrb[43].mxu0  ;;  %v13713_v14 = vld [vmem:[%s16280_s3 + $0xe0] sm:$0xff]  }
 0x3b3   :  { %13072 = vmatmul.mubr.msk.bf16.gmra.mrb[60].mxu0 %vm5710_vm1, %v5674_v20  ;;  %13100 = vmatmul.mubr.msk.bf16.gmra.mrb[60].mxu1 %vm5710_vm1, %v5551_v21  ;;  %v13714_v20 = vld [vmem:[%s16280_s3 + $0xe8] sm:$0xff]  }
 0x3b4   :  { %13120 = vmatpush3.bf16.msra.mxu0 %v15331_v44  ;;  %13075 = vmatprep.mubr.msk.bf16.mxu0 %vm13849_vm0, %v13848_v0 }
 0x3b5   :  { %13121 = vmatprep.subr.bf16.mxu0 %v13848_v0  ;;  %13103 = vmatprep.mubr.msk.bf16.mxu1 %vm13849_vm0, %v13848_v0 }
 0x3b6   :  { %v5658_v26 = vpop.f32.mrb[44].mxu1  ;;  %v5535_v27 = vpop.f32.mrb[44].mxu0  ;;  %13154 = vmatpush3.bf16.msra.mxu1 %v13722_v63 }
 0x3b7   :  { %v13049_v28 = vpop.f32.mrb[45].mxu1  ;;  %v13013_v30 = vpop.f32.mrb[45].mxu0  ;;  %13211 = vmatprep.subr.bf16.mxu1 %v13848_v0 }
 0x3b8   :  { %13122 = vmatpush3.bf16.msra.mxu0 %v15339_v1  ;;  %v5661_v31 = vpop.f32.mrb[46].mxu1  ;;  %v5538_v32 = vpop.f32.mrb[46].mxu0 }
 0x3b9   :  { %v5675_v33 = vpack.c.bf16 %v5661_v31, %v5658_v26  ;;  %v5552_v35 = vpack.c.bf16 %v5538_v32, %v5535_v27  ;;  %13123 = vmatprep.subr.bf16.mxu0 %v13848_v0  ;;  %v13050_v3 = vpop.f32.mrb[47].mxu1  ;;  %v13014_v36 = vpop.f32.mrb[47].mxu0 }
 0x3bb   :  { %13076 = vmatmul.mubr.msk.bf16.gmra.mrb[64].mxu0 %vm5710_vm1, %v5675_v33  ;;  %13104 = vmatmul.mubr.msk.bf16.gmra.mrb[64].mxu1 %vm5710_vm1, %v5552_v35  ;;  %v13716_v35 = vld [vmem:[%s16280_s3 + $0xf0] sm:$0xff]  }
 0x3bc   :  { %13124 = vmatpush3.bf16.msra.mxu0 %v15347_v22  ;;  %13079 = vmatprep.mubr.msk.bf16.mxu0 %vm13849_vm0, %v13848_v0 }
 0x3bd   :  { %13125 = vmatprep.subr.bf16.mxu0 %v13848_v0  ;;  %13107 = vmatprep.mubr.msk.bf16.mxu1 %vm13849_vm0, %v13848_v0 }
 0x3be   :  { %v5666_v37 = vpop.f32.mrb[48].mxu1  ;;  %v5543_v38 = vpop.f32.mrb[48].mxu0 }
 0x3bf   :  { %v5676_v39 = vpack.c.bf16 %v5666_v37, %v5666_v37  ;;  %v13053_v40 = vpop.f32.mrb[49].mxu1  ;;  %v5553_v41 = vpack.c.bf16 %v5543_v38, %v5543_v38  ;;  %v13017_v42 = vpop.f32.mrb[49].mxu0 }
 0x3c0   :  { %13126 = vmatpush3.bf16.msra.mxu0 %v15355_v34  ;;  %v5669_v43 = vpop.f32.mrb[50].mxu1  ;;  %v5546_v45 = vpop.f32.mrb[50].mxu0 }
 0x3c1   :  { %v13054_v46 = vpop.f32.mrb[51].mxu1  ;;  %13175 = vmatprep.subr.bf16.mxu0 %v13848_v0  ;;  %v13018_v47 = vpop.f32.mrb[51].mxu0 }
 0x3c2   :  { %v13718_v46 = vld [vmem:[%s16280_s3 + $0xf8] ss:$0 sps:$4 sm:$0xff]  }
 0x3c3   :  { %13080 = vmatmul.mubr.msk.bf16.gmra.mrb[68].mxu0 %vm5710_vm1, %v5676_v39  ;;  %13108 = vmatmul.mubr.msk.bf16.gmra.mrb[68].mxu1 %vm5710_vm1, %v5553_v41 }
 0x3c4   :  { %13127 = vmatprep.mubr.msk.bf16.mxu0 %vm13849_vm0, %v13848_v0  ;;  %13155 = vmatprep.mubr.msk.bf16.mxu1 %vm13849_vm0, %v13848_v0 }
 0x3cb   :  { %13128 = vmatmul.mubr.bf16.vlgmr.msra.gmra.mrb[72].mxu0 %v13692_v49 }
 0x3cc   :  { %13176 = vmatpush3.bf16.msra.mxu0 %v15299_v29  ;;  %13131 = vmatprep.mubr.msk.bf16.mxu0 %vm13849_vm0, %v13848_v0 }
 0x3cd   :  { %13177 = vmatprep.subr.bf16.mxu0 %v13848_v0 }
 0x3d0   :  { %13178 = vmatpush3.bf16.msra.mxu0 %v15307_v48 }
 0x3d1   :  { %13179 = vmatprep.subr.bf16.mxu0 %v13848_v0 }
 0x3d3   :  { %13132 = vmatmul.mubr.bf16.gmra.mrb[76].mxu0 %v13693_v50 }
 0x3d4   :  { %13180 = vmatpush3.bf16.msra.mxu0 %v15315_v5  ;;  %13135 = vmatprep.mubr.msk.bf16.mxu0 %vm13849_vm0, %v13848_v0 }
 0x3d5   :  { %13181 = vmatprep.subr.bf16.mxu0 %v13848_v0 }
 0x3d8   :  { %13182 = vmatpush3.bf16.msra.mxu0 %v15323_v24 }
 0x3d9   :  { %13183 = vmatprep.subr.bf16.mxu0 %v13848_v0 }
 0x3db   :  { %13136 = vmatmul.mubr.bf16.gmra.mrb[80].mxu0 %v13694_v51 }
 0x3dc   :  { %13184 = vmatpush3.bf16.msra.mxu0 %v15331_v44  ;;  %13139 = vmatprep.mubr.msk.bf16.mxu0 %vm13849_vm0, %v13848_v0 }
 0x3dd   :  { %13185 = vmatprep.subr.bf16.mxu0 %v13848_v0 }
 0x3e0   :  { %13186 = vmatpush3.bf16.msra.mxu0 %v15339_v1 }
 0x3e1   :  { %13187 = vmatprep.subr.bf16.mxu0 %v13848_v0 }
 0x3e3   :  { %13140 = vmatmul.mubr.bf16.gmra.mrb[84].mxu0 %v13695_v52 }
 0x3e4   :  { %13188 = vmatpush3.bf16.msra.mxu0 %v15347_v22  ;;  %13143 = vmatprep.mubr.msk.bf16.mxu0 %vm13849_vm0, %v13848_v0 }
 0x3e5   :  { %13189 = vmatprep.subr.bf16.mxu0 %v13848_v0 }
 0x3e8   :  { %13190 = vmatpush3.bf16.msra.mxu0 %v15355_v34 }
 0x3e9   :  { %13239 = vmatprep.subr.bf16.mxu0 %v13848_v0 }
 0x3eb   :  { %13144 = vmatmul.mubr.bf16.gmra.mrb[88].mxu0 %v13696_v53 }
 0x3ec   :  { %13191 = vmatprep.mubr.msk.bf16.mxu0 %vm13849_vm0, %v13848_v0 }
 0x3f3   :  { %13192 = vmatmul.mubr.bf16.vlgmr.msra.gmra.mrb[92].mxu0 %v13697_v54 }
 0x3f4   :  { %13240 = vmatpush3.bf16.msra.mxu0 %v15299_v29  ;;  %13195 = vmatprep.mubr.msk.bf16.mxu0 %vm13849_vm0, %v13848_v0 }
 0x3f5   :  { %13241 = vmatprep.subr.bf16.mxu0 %v13848_v0 }
 0x3f8   :  { %13242 = vmatpush3.bf16.msra.mxu0 %v15307_v48 }
 0x3f9   :  { %13243 = vmatprep.subr.bf16.mxu0 %v13848_v0 }
 0x3fb   :  { %13196 = vmatmul.mubr.bf16.gmra.mrb[96].mxu0 %v13698_v55 }
 0x3fc   :  { %13244 = vmatpush3.bf16.msra.mxu0 %v15315_v5  ;;  %13199 = vmatprep.mubr.msk.bf16.mxu0 %vm13849_vm0, %v13848_v0 }
 0x3fd   :  { %13245 = vmatprep.subr.bf16.mxu0 %v13848_v0 }
 0x400   :  { %13246 = vmatpush3.bf16.msra.mxu0 %v15323_v24 }
 0x401   :  { %13247 = vmatprep.subr.bf16.mxu0 %v13848_v0 }
 0x403   :  { %13200 = vmatmul.mubr.bf16.gmra.mrb[100].mxu0 %v13699_v56 }
 0x404   :  { %13248 = vmatpush3.bf16.msra.mxu0 %v15331_v44  ;;  %13203 = vmatprep.mubr.msk.bf16.mxu0 %vm13849_vm0, %v13848_v0 }
 0x405   :  { %13249 = vmatprep.subr.bf16.mxu0 %v13848_v0 }
 0x408   :  { %13250 = vmatpush3.bf16.msra.mxu0 %v15339_v1 }
 0x409   :  { %13251 = vmatprep.subr.bf16.mxu0 %v13848_v0 }
 0x40b   :  { %13204 = vmatmul.mubr.bf16.gmra.mrb[104].mxu0 %v13700_v58  ;;  %v13719_v58 = vld [vmem:[%s16280_s3 + $0xfc] sm:$0xff]  }
 0x40c   :  { %13252 = vmatpush3.bf16.msra.mxu0 %v15347_v22  ;;  %13207 = vmatprep.mubr.msk.bf16.mxu0 %vm13849_vm0, %v13848_v0 }
 0x40d   :  { %13253 = vmatprep.subr.bf16.mxu0 %v13848_v0 }
 0x410   :  { %13254 = vmatpush3.bf16.msra.mxu0 %v15355_v34 }
 0x411   :  { %13303 = vmatprep.subr.bf16.mxu0 %v13848_v0 }
 0x413   :  { %13208 = vmatmul.mubr.bf16.gmra.mrb[108].mxu0 %v13701_v60 }
 0x414   :  { %13255 = vmatprep.mubr.msk.bf16.mxu0 %vm13849_vm0, %v13848_v0 }
 0x41b   :  { %13256 = vmatmul.mubr.bf16.vlgmr.msra.gmra.mrb[112].mxu0 %v13702_v62 }
 0x41c   :  { %13304 = vmatpush3.bf16.msra.mxu0 %v15299_v29  ;;  %13259 = vmatprep.mubr.msk.bf16.mxu0 %vm13849_vm0, %v13848_v0 }
 0x41d   :  { %13305 = vmatprep.subr.bf16.mxu0 %v13848_v0 }
 0x420   :  { %13306 = vmatpush3.bf16.msra.mxu0 %v15307_v48 }
 0x421   :  { %13307 = vmatprep.subr.bf16.mxu0 %v13848_v0 }
 0x423   :  { %13260 = vmatmul.mubr.bf16.gmra.mrb[116].mxu0 %v13703_v2 }
 0x424   :  { %13308 = vmatpush3.bf16.msra.mxu0 %v15315_v5  ;;  %13263 = vmatprep.mubr.msk.bf16.mxu0 %vm13849_vm0, %v13848_v0 }
 0x425   :  { %13309 = vmatprep.subr.bf16.mxu0 %v13848_v0 }
 0x428   :  { %13310 = vmatpush3.bf16.msra.mxu0 %v15323_v24 }
 0x429   :  { %13311 = vmatprep.subr.bf16.mxu0 %v13848_v0 }
 0x42b   :  { %13264 = vmatmul.mubr.bf16.gmra.mrb[120].mxu0 %v13704_v4 }
 0x42c   :  { %13312 = vmatpush3.bf16.msra.mxu0 %v15331_v44  ;;  %13267 = vmatprep.mubr.msk.bf16.mxu0 %vm13849_vm0, %v13848_v0 }
 0x42d   :  { %13313 = vmatprep.subr.bf16.mxu0 %v13848_v0 }
 0x430   :  { %13314 = vmatpush3.bf16.msra.mxu0 %v15339_v1 }
 0x431   :  { %13315 = vmatprep.subr.bf16.mxu0 %v13848_v0 }
 0x433   :  { %13268 = vmatmul.mubr.bf16.gmra.mrb[124].mxu0 %v13705_v6 }
 0x434   :  { %13316 = vmatpush3.bf16.msra.mxu0 %v15347_v22  ;;  %13271 = vmatprep.mubr.msk.bf16.mxu0 %vm13849_vm0, %v13848_v0 }
 0x435   :  { %13317 = vmatprep.subr.bf16.mxu0 %v13848_v0 }
 0x438   :  { %13318 = vmatpush3.bf16.msra.mxu0 %v15355_v34 }
 0x439   :  { %13367 = vmatprep.subr.bf16.mxu0 %v13848_v0 }
 0x43b   :  { %13272 = vmatmul.mubr.bf16.gmra.mrb[128].mxu0 %v13706_v7 }
 0x43c   :  { %13319 = vmatprep.mubr.msk.bf16.mxu0 %vm13849_vm0, %v13848_v0 }
 0x443   :  { %13320 = vmatmul.mubr.bf16.vlgmr.msra.gmra.mrb[132].mxu0 %v13707_v8  ;;  %v13721_v8 = vld [vmem:[%s16280_s3 + $0x104] sm:$0xff]  }
 0x444   :  { %13368 = vmatpush3.bf16.msra.mxu0 %v15299_v29  ;;  %13323 = vmatprep.mubr.msk.bf16.mxu0 %vm13849_vm0, %v13848_v0 }
 0x445   :  { %13369 = vmatprep.subr.bf16.mxu0 %v13848_v0 }
 0x448   :  { %13370 = vmatpush3.bf16.msra.mxu0 %v15307_v48 }
 0x449   :  { %13371 = vmatprep.subr.bf16.mxu0 %v13848_v0 }
 0x44b   :  { %13324 = vmatmul.mubr.bf16.gmra.mrb[136].mxu0 %v13708_v9 }
 0x44c   :  { %13372 = vmatpush3.bf16.msra.mxu0 %v15315_v5  ;;  %13327 = vmatprep.mubr.msk.bf16.mxu0 %vm13849_vm0, %v13848_v0 }
 0x44d   :  { %13373 = vmatprep.subr.bf16.mxu0 %v13848_v0 }
 0x450   :  { %13374 = vmatpush3.bf16.msra.mxu0 %v15323_v24 }
 0x451   :  { %13375 = vmatprep.subr.bf16.mxu0 %v13848_v0 }
 0x453   :  { %13328 = vmatmul.mubr.bf16.gmra.mrb[140].mxu0 %v13709_v10 }
 0x454   :  { %13376 = vmatpush3.bf16.msra.mxu0 %v15331_v44  ;;  %13331 = vmatprep.mubr.msk.bf16.mxu0 %vm13849_vm0, %v13848_v0 }
 0x455   :  { %13377 = vmatprep.subr.bf16.mxu0 %v13848_v0 }
 0x458   :  { %13378 = vmatpush3.bf16.msra.mxu0 %v15339_v1 }
 0x459   :  { %13379 = vmatprep.subr.bf16.mxu0 %v13848_v0 }
 0x45b   :  { %13332 = vmatmul.mubr.bf16.gmra.mrb[144].mxu0 %v13710_v11 }
 0x45c   :  { %13380 = vmatpush3.bf16.msra.mxu0 %v15347_v22  ;;  %13335 = vmatprep.mubr.msk.bf16.mxu0 %vm13849_vm0, %v13848_v0 }
 0x45d   :  { %13381 = vmatprep.subr.bf16.mxu0 %v13848_v0 }
 0x460   :  { %13382 = vmatpush3.bf16.msra.mxu0 %v15355_v34 }
 0x461   :  { %13431 = vmatprep.subr.bf16.mxu0 %v13848_v0 }
 0x463   :  { %13336 = vmatmul.mubr.bf16.gmra.mrb[148].mxu0 %v13711_v12 }
 0x464   :  { %13383 = vmatprep.mubr.msk.bf16.mxu0 %vm13849_vm0, %v13848_v0 }
 0x46b   :  { %13384 = vmatmul.mubr.bf16.vlgmr.msra.gmra.mrb[152].mxu0 %v13712_v13 }
 0x46c   :  { %13432 = vmatpush3.bf16.msra.mxu0 %v15299_v29  ;;  %13387 = vmatprep.mubr.msk.bf16.mxu0 %vm13849_vm0, %v13848_v0 }
 0x46d   :  { %13433 = vmatprep.subr.bf16.mxu0 %v13848_v0 }
 0x470   :  { %13434 = vmatpush3.bf16.msra.mxu0 %v15307_v48 }
 0x471   :  { %13435 = vmatprep.subr.bf16.mxu0 %v13848_v0 }
 0x473   :  { %13388 = vmatmul.mubr.bf16.gmra.mrb[156].mxu0 %v13713_v14 }
 0x474   :  { %13436 = vmatpush3.bf16.msra.mxu0 %v15315_v5  ;;  %13391 = vmatprep.mubr.msk.bf16.mxu0 %vm13849_vm0, %v13848_v0 }
 0x475   :  { %13437 = vmatprep.subr.bf16.mxu0 %v13848_v0 }
 0x476   :  { %v5760_v15 = vpop.f32.mrb[52].mxu0  ;;  %v5871_v16 = vpop.f32.mrb[52].mxu1 }
 0x477   :  { %v13065_v17 = vpop.f32.mrb[53].mxu0  ;;  %v15685_v18 = vadd.f32 %v5871_v16, %v5760_v15  ;;  %v13093_v19 = vpop.f32.mrb[53].mxu1  ;;  %v13724_v16 = vld [vmem:[%s16281_s4 + $0x60] sm:$0xff]  }
 0x478   :  { %13438 = vmatpush3.bf16.msra.mxu0 %v15323_v24  ;;  %v5763_v21 = vpop.f32.mrb[54].mxu0  ;;  %v5874_v23 = vpop.f32.mrb[54].mxu1  ;;  %v13726_v19 = vld [vmem:[%s16281_s4 + $0x68] sm:$0xff]  }
 0x479   :  { %v13066_v25 = vpop.f32.mrb[55].mxu0  ;;  %v15691_v26 = vadd.f32 %v5874_v23, %v5763_v21  ;;  %13439 = vmatprep.subr.bf16.mxu0 %v13848_v0  ;;  %v13094_v27 = vpop.f32.mrb[55].mxu1 }
 0x47a   :  { %v13729_v27 = vld [vmem:[%s16281_s4 + $0x70] sm:$0xff]  }
 0x47b   :  { %13392 = vmatmul.mubr.bf16.gmra.mrb[160].mxu0 %v13714_v20 }
 0x47c   :  { %13440 = vmatpush3.bf16.msra.mxu0 %v15331_v44  ;;  %13395 = vmatprep.mubr.msk.bf16.mxu0 %vm13849_vm0, %v13848_v0 }
 0x47d   :  { %13441 = vmatprep.subr.bf16.mxu0 %v13848_v0 }
 0x47e   :  { %v5768_v28 = vpop.f32.mrb[56].mxu0  ;;  %v5879_v30 = vpop.f32.mrb[56].mxu1 }
 0x47f   :  { %v13069_v31 = vpop.f32.mrb[57].mxu0  ;;  %v15698_v32 = vadd.f32 %v5879_v30, %v5768_v28  ;;  %v13097_v33 = vpop.f32.mrb[57].mxu1  ;;  %v13731_v28 = vld [vmem:[%s16281_s4 + $0x78] sm:$0xff]  }
 0x480   :  { %13442 = vmatpush3.bf16.msra.mxu0 %v15339_v1  ;;  %v5771_v3 = vpop.f32.mrb[58].mxu0  ;;  %v5882_v36 = vpop.f32.mrb[58].mxu1  ;;  %v13727_v31 = vld [vmem:[%s16280_s3 + $0x11c] ss:$0 sps:$4 sm:$0xff]  }
 0x481   :  { %v13070_v37 = vpop.f32.mrb[59].mxu0  ;;  %v15704_v38 = vadd.f32 %v5882_v36, %v5771_v3  ;;  %13443 = vmatprep.subr.bf16.mxu0 %v13848_v0  ;;  %v13098_v39 = vpop.f32.mrb[59].mxu1 }
 0x483   :  { %13396 = vmatmul.mubr.bf16.gmra.mrb[164].mxu0 %v13716_v35 }
 0x484   :  { %13444 = vmatpush3.bf16.msra.mxu0 %v15347_v22  ;;  %13399 = vmatprep.mubr.msk.bf16.mxu0 %vm13849_vm0, %v13848_v0 }
 0x485   :  { %13445 = vmatprep.subr.bf16.mxu0 %v13848_v0 }
 0x486   :  { %v5776_v40 = vpop.f32.mrb[60].mxu0  ;;  %v5887_v41 = vpop.f32.mrb[60].mxu1 }
 0x487   :  { %v13073_v42 = vpop.f32.mrb[61].mxu0  ;;  %v15711_v43 = vadd.f32 %v5887_v41, %v5776_v40  ;;  %v13101_v45 = vpop.f32.mrb[61].mxu1 }
 0x488   :  { %13446 = vmatpush3.bf16.msra.mxu0 %v15355_v34  ;;  %v5779_v47 = vpop.f32.mrb[62].mxu0  ;;  %v5890_v49 = vpop.f32.mrb[62].mxu1  ;;  %v13730_v45 = vld [vmem:[%s16280_s3 + $0x128] sm:$0xff]  }
 0x489   :  { %v13074_v50 = vpop.f32.mrb[63].mxu0  ;;  %v15717_v51 = vadd.f32 %v5890_v49, %v5779_v47  ;;  %v13102_v52 = vpop.f32.mrb[63].mxu1  ;;  %13495 = vmatprep.subr.bf16.mxu0 %v13848_v0 }
 0x48b   :  { %13400 = vmatmul.mubr.bf16.gmra.mrb[168].mxu0 %v13718_v46 }
 0x48c   :  { %13447 = vmatprep.mubr.msk.bf16.mxu0 %vm13849_vm0, %v13848_v0 }
 0x48e   :  { %v5784_v53 = vpop.f32.mrb[64].mxu0  ;;  %v5895_v54 = vpop.f32.mrb[64].mxu1 }
 0x48f   :  { %v13077_v55 = vpop.f32.mrb[65].mxu0  ;;  %v15722_v56 = vadd.f32 %v5895_v54, %v5784_v53  ;;  %v13105_v57 = vpop.f32.mrb[65].mxu1  ;;  %v13732_v53 = vld [vmem:[%s16280_s3 + $0x130] sm:$0xff]  }
 0x490   :  { %v5787_v59 = vpop.f32.mrb[66].mxu0  ;;  %v5898_v60 = vpop.f32.mrb[66].mxu1  ;;  %v13733_v55 = vld [vmem:[%s16281_s4 + $0x80] sm:$0xff]  }
 0x491   :  { %v13078_v61 = vpop.f32.mrb[67].mxu0  ;;  %v15727_v62 = vadd.f32 %v5898_v60, %v5787_v59  ;;  %v13106_v63 = vpop.f32.mrb[67].mxu1  ;;  %v13735_v59 = vld [vmem:[%s16281_s4 + $0x88] sm:$0xff]  }
 0x492   :  { %v13734_v63 = vld [vmem:[%s16280_s3 + $0x138] sm:$0xff]  }
 0x493   :  { %13448 = vmatmul.mubr.bf16.vlgmr.msra.gmra.mrb[172].mxu0 %v13719_v58 }
 0x494   :  { %13496 = vmatpush3.bf16.msra.mxu0 %v15299_v29  ;;  %13451 = vmatprep.mubr.msk.bf16.mxu0 %vm13849_vm0, %v13848_v0 }
 0x495   :  { %13497 = vmatprep.subr.bf16.mxu0 %v13848_v0 }
 0x496   :  { %v5792_v2 = vpop.f32.mrb[68].mxu0  ;;  %v5903_v4 = vpop.f32.mrb[68].mxu1 }
 0x497   :  { %v13081_v6 = vpop.f32.mrb[69].mxu0  ;;  %v15733_v7 = vadd.f32 %v5903_v4, %v5792_v2  ;;  %v13109_v9 = vpop.f32.mrb[69].mxu1 }
 0x498   :  { %13498 = vmatpush3.bf16.msra.mxu0 %v15307_v48  ;;  %v5795_v10 = vpop.f32.mrb[70].mxu0  ;;  %v5906_v11 = vpop.f32.mrb[70].mxu1  ;;  %v13723_v48 = vld [vmem:[%s16280_s3 + $0x10c] sm:$0xff]   ;;  %v13738_v9 = vld [vmem:[%s16281_s4 + $0x98] sm:$0xff]  }
 0x499   :  { %13499 = vmatprep.subr.bf16.mxu0 %v13848_v0  ;;  %v13082_v29 = vpop.f32.mrb[71].mxu0  ;;  %v13110_v12 = vpop.f32.mrb[71].mxu1 }
 0x49a   :  { %v13736_v29 = vld [vmem:[%s16280_s3 + $0x140] ss:$0 sps:$4 sm:$0xff]  }
 0x49b   :  { %13452 = vmatmul.mubr.bf16.gmra.mrb[176].mxu0 %v13721_v8  ;;  %v13737_v8 = vld [vmem:[%s16281_s4 + $0x90] sm:$0xff]  }
 0x49c   :  { %13500 = vmatpush3.bf16.msra.mxu0 %v15315_v5  ;;  %13455 = vmatprep.mubr.msk.bf16.mxu0 %vm13849_vm0, %v13848_v0 }
 0x49d   :  { %13501 = vmatprep.subr.bf16.mxu0 %v13848_v0 }
 0x49e   :  { %v5981_v13 = vpop.f32.mrb[72].mxu0 }
 0x49f   :  { %v13129_v14 = vpop.f32.mrb[73].mxu0 }
 0x4a0   :  { %13502 = vmatpush3.bf16.msra.mxu0 %v15323_v24  ;;  %v5984_v15 = vpop.f32.mrb[74].mxu0 }
 0x4a1   :  { %v6019_v17 = vpack.c.bf16 %v5984_v15, %v5981_v13  ;;  %13503 = vmatprep.subr.bf16.mxu0 %v13848_v0  ;;  %v13130_v5 = vpop.f32.mrb[75].mxu0 }
 0x4a3   :  { %13156 = vmatmul.mubr.msk.bf16.vlgmr.msra.gmra.mrb[72].mxu1 %vm5710_vm1, %v6019_v17  ;;  %13456 = vmatmul.mubr.bf16.gmra.mrb[180].mxu0 %v13723_v48 }
 0x4a4   :  { %13504 = vmatpush3.bf16.msra.mxu0 %v15331_v44  ;;  %13212 = vmatpush3.bf16.msra.mxu1 %v13724_v16  ;;  %v13725_v44 = vld [vmem:[%s16280_s3 + $0x114] sm:$0xff]  }
 0x4a5   :  { %13505 = vmatprep.subr.bf16.mxu0 %v13848_v0  ;;  %13159 = vmatprep.mubr.msk.bf16.mxu1 %vm13849_vm0, %v13848_v0 }
 0x4a6   :  { %v5989_v24 = vpop.f32.mrb[76].mxu0  ;;  %13459 = vmatprep.mubr.msk.bf16.mxu0 %vm13849_vm0, %v13848_v0  ;;  %13213 = vmatprep.subr.bf16.mxu1 %v13848_v0 }
 0x4a7   :  { %v13133_v20 = vpop.f32.mrb[77].mxu0 }
 0x4a8   :  { %13506 = vmatpush3.bf16.msra.mxu0 %v15339_v1  ;;  %v5992_v21 = vpop.f32.mrb[78].mxu0  ;;  %13214 = vmatpush3.bf16.msra.mxu1 %v13726_v19 }
 0x4a9   :  { %v6020_v23 = vpack.c.bf16 %v5992_v21, %v5989_v24  ;;  %13507 = vmatprep.subr.bf16.mxu0 %v13848_v0  ;;  %v13134_v25 = vpop.f32.mrb[79].mxu0  ;;  %13215 = vmatprep.subr.bf16.mxu1 %v13848_v0 }
 0x4ab   :  { %13160 = vmatmul.mubr.msk.bf16.gmra.mrb[76].mxu1 %vm5710_vm1, %v6020_v23  ;;  %13460 = vmatmul.mubr.bf16.gmra.mrb[184].mxu0 %v13725_v44 }
 0x4ac   :  { %13508 = vmatpush3.bf16.msra.mxu0 %v15347_v22  ;;  %13163 = vmatprep.mubr.msk.bf16.mxu1 %vm13849_vm0, %v13848_v0 }
 0x4ad   :  { %13509 = vmatprep.subr.bf16.mxu0 %v13848_v0  ;;  %13463 = vmatprep.mubr.msk.bf16.mxu0 %vm13849_vm0, %v13848_v0 }
 0x4ae   :  { %v5997_v1 = vpop.f32.mrb[80].mxu0  ;;  %13216 = vmatpush3.bf16.msra.mxu1 %v13729_v27 }
 0x4af   :  { %v13137_v30 = vpop.f32.mrb[81].mxu0  ;;  %13217 = vmatprep.subr.bf16.mxu1 %v13848_v0 }
 0x4b0   :  { %13510 = vmatpush3.bf16.msra.mxu0 %v15355_v34  ;;  %v6000_v22 = vpop.f32.mrb[82].mxu0  ;;  %v13728_v34 = vld [vmem:[%s16280_s3 + $0x120] sm:$0xff]  }
 0x4b1   :  { %v6021_v33 = vpack.c.bf16 %v6000_v22, %v5997_v1  ;;  %v13138_v35 = vpop.f32.mrb[83].mxu0  ;;  %v13739_v1 = vld [vmem:[%s16281_s4 + $0xa0] sm:$0xff]  }
 0x4b2   :  { %13218 = vmatpush3.bf16.msra.mxu1 %v13731_v28 }
 0x4b3   :  { %13164 = vmatmul.mubr.msk.bf16.gmra.mrb[80].mxu1 %vm5710_vm1, %v6021_v33  ;;  %13464 = vmatmul.mubr.bf16.gmra.mrb[188].mxu0 %v13727_v31  ;;  %v13740_v31 = vld [vmem:[%s16281_s4 + $0xa8] sm:$0xff]  }
 0x4b4   :  { %13167 = vmatprep.mubr.msk.bf16.mxu1 %vm13849_vm0, %v13848_v0  ;;  %13511 = vmatprep.mubr.msk.bf16.mxu0 %vm13849_vm0, %v13848_v0 }
 0x4b5   :  { %13275 = vmatprep.subr.bf16.mxu1 %v13848_v0 }
 0x4b6   :  { %v6005_v3 = vpop.f32.mrb[84].mxu0 }
 0x4b7   :  { %v13141_v36 = vpop.f32.mrb[85].mxu0 }
 0x4b8   :  { %v6008_v37 = vpop.f32.mrb[86].mxu0 }
 0x4b9   :  { %v6022_v39 = vpack.c.bf16 %v6008_v37, %v6005_v3  ;;  %v13142_v40 = vpop.f32.mrb[87].mxu0  ;;  %v13741_v3 = vld [vmem:[%s16281_s4 + $0xb0] sm:$0xff]   ;;  %v13742_v37 = vld [vmem:[%s16281_s4 + $0xb8] sm:$0xff]  }
 0x4bb   :  { %13168 = vmatmul.mubr.msk.bf16.gmra.mrb[84].mxu1 %vm5710_vm1, %v6022_v39  ;;  %13512 = vmatmul.mubr.bf16.vlgmr.msra.gmra.mrb[192].mxu0 %v13728_v34 }
 0x4bc   :  { %13171 = vmatprep.mubr.msk.bf16.mxu1 %vm13849_vm0, %v13848_v0  ;;  %13515 = vmatprep.mubr.msk.bf16.mxu0 %vm13849_vm0, %v13848_v0 }
 0x4be   :  { %v6013_v41 = vpop.f32.mrb[88].mxu0 }
 0x4bf   :  { %v13145_v42 = vpop.f32.mrb[89].mxu0  ;;  %v6023_v47 = vpack.c.bf16 %v6013_v41, %v6013_v41 }
 0x4c0   :  { %v6016_v46 = vpop.f32.mrb[90].mxu0 }
 0x4c1   :  { %v13146_v49 = vpop.f32.mrb[91].mxu0 }
 0x4c3   :  { %13172 = vmatmul.mubr.msk.bf16.gmra.mrb[88].mxu1 %vm5710_vm1, %v6023_v47  ;;  %13516 = vmatmul.mubr.bf16.gmra.mrb[196].mxu0 %v13730_v45 }
 0x4c4   :  { %13219 = vmatprep.mubr.msk.bf16.mxu1 %vm13849_vm0, %v13848_v0  ;;  %13519 = vmatprep.mubr.msk.bf16.mxu0 %vm13849_vm0, %v13848_v0 }
 0x4c6   :  { %v6225_v50 = vpop.f32.mrb[92].mxu0 }
 0x4c7   :  { %v13193_v52 = vpop.f32.mrb[93].mxu0 }
 0x4c8   :  { %v6228_v54 = vpop.f32.mrb[94].mxu0 }
 0x4c9   :  { %v6263_v57 = vpack.c.bf16 %v6228_v54, %v6225_v50  ;;  %v13194_v58 = vpop.f32.mrb[95].mxu0 }
 0x4cb   :  { %13220 = vmatmul.mubr.msk.bf16.vlgmr.msra.gmra.mrb[92].mxu1 %vm5710_vm1, %v6263_v57  ;;  %13520 = vmatmul.mubr.bf16.gmra.mrb[200].mxu0 %v13732_v53 }
 0x4cc   :  { %13276 = vmatpush3.bf16.msra.mxu1 %v13733_v55  ;;  %13223 = vmatprep.mubr.msk.bf16.mxu1 %vm13849_vm0, %v13848_v0 }
 0x4cd   :  { %13523 = vmatprep.mubr.msk.bf16.mxu0 %vm13849_vm0, %v13848_v0  ;;  %13277 = vmatprep.subr.bf16.mxu1 %v13848_v0 }
 0x4ce   :  { %v6233_v60 = vpop.f32.mrb[96].mxu0 }
 0x4cf   :  { %v13197_v61 = vpop.f32.mrb[97].mxu0 }
 0x4d0   :  { %v6236_v2 = vpop.f32.mrb[98].mxu0  ;;  %13278 = vmatpush3.bf16.msra.mxu1 %v13735_v59 }
 0x4d1   :  { %v6264_v4 = vpack.c.bf16 %v6236_v2, %v6233_v60  ;;  %v13198_v6 = vpop.f32.mrb[99].mxu0  ;;  %13279 = vmatprep.subr.bf16.mxu1 %v13848_v0 }
 0x4d2   :  { %v13744_v6 = vld [vmem:[%s16281_s4 + $0xc8] sm:$0xff]  }
 0x4d3   :  { %13224 = vmatmul.mubr.msk.bf16.gmra.mrb[96].mxu1 %vm5710_vm1, %v6264_v4  ;;  %13524 = vmatmul.mubr.bf16.gmra.mrb[204].mxu0 %v13734_v63  ;;  %v13743_v63 = vld [vmem:[%s16281_s4 + $0xc0] sm:$0xff]  }
 0x4d4   :  { %13227 = vmatprep.mubr.msk.bf16.mxu1 %vm13849_vm0, %v13848_v0  ;;  %13527 = vmatprep.mubr.msk.bf16.mxu0 %vm13849_vm0, %v13848_v0 }
 0x4d5   :  { %13280 = vmatpush3.bf16.msra.mxu1 %v13737_v8 }
 0x4d6   :  { %v6241_v10 = vpop.f32.mrb[100].mxu0  ;;  %13281 = vmatprep.subr.bf16.mxu1 %v13848_v0 }
 0x4d7   :  { %v13201_v11 = vpop.f32.mrb[101].mxu0 }
 0x4d8   :  { %v6244_v12 = vpop.f32.mrb[102].mxu0  ;;  %v13745_v11 = vld [vmem:[%s16281_s4 + $0xd0] sm:$0xff]  }
 0x4d9   :  { %v6265_v13 = vpack.c.bf16 %v6244_v12, %v6241_v10  ;;  %v13202_v14 = vpop.f32.mrb[103].mxu0  ;;  %13282 = vmatpush3.bf16.msra.mxu1 %v13738_v9 }
 0x4da   :  { %13339 = vmatprep.subr.bf16.mxu1 %v13848_v0 }
 0x4db   :  { %13228 = vmatmul.mubr.msk.bf16.gmra.mrb[100].mxu1 %vm5710_vm1, %v6265_v13  ;;  %13528 = vmatmul.mubr.bf16.gmra.mrb[208].mxu0 %v13736_v29  ;;  %v13746_v13 = vld [vmem:[%s16281_s4 + $0xd8] sm:$0xff]  }
 0x4dc   :  { %13231 = vmatprep.mubr.msk.bf16.mxu1 %vm13849_vm0, %v13848_v0 }
 0x4de   :  { %v6249_v48 = vpop.f32.mrb[104].mxu0 }
 0x4df   :  { %v13205_v15 = vpop.f32.mrb[105].mxu0 }
 0x4e0   :  { %v6252_v16 = vpop.f32.mrb[106].mxu0 }
 0x4e1   :  { %v6266_v17 = vpack.c.bf16 %v6252_v16, %v6249_v48  ;;  %v13206_v5 = vpop.f32.mrb[107].mxu0 }
 0x4e3   :  { %13232 = vmatmul.mubr.msk.bf16.gmra.mrb[104].mxu1 %vm5710_vm1, %v6266_v17 }
 0x4e4   :  { %13235 = vmatprep.mubr.msk.bf16.mxu1 %vm13849_vm0, %v13848_v0 }
 0x4e6   :  { %v6257_v19 = vpop.f32.mrb[108].mxu0 }
 0x4e7   :  { %v13209_v24 = vpop.f32.mrb[109].mxu0  ;;  %v6267_v44 = vpack.c.bf16 %v6257_v19, %v6257_v19 }
 0x4e8   :  { %v6260_v20 = vpop.f32.mrb[110].mxu0 }
 0x4e9   :  { %v13210_v21 = vpop.f32.mrb[111].mxu0 }
 0x4eb   :  { %13236 = vmatmul.mubr.msk.bf16.gmra.mrb[108].mxu1 %vm5710_vm1, %v6267_v44 }
 0x4ec   :  { %13283 = vmatprep.mubr.msk.bf16.mxu1 %vm13849_vm0, %v13848_v0 }
 0x4ee   :  { %v6469_v23 = vpop.f32.mrb[112].mxu0 }
 0x4ef   :  { %v13257_v25 = vpop.f32.mrb[113].mxu0 }
 0x4f0   :  { %v6472_v27 = vpop.f32.mrb[114].mxu0 }
 0x4f1   :  { %v6507_v28 = vpack.c.bf16 %v6472_v27, %v6469_v23  ;;  %v13258_v30 = vpop.f32.mrb[115].mxu0 }
 0x4f3   :  { %13284 = vmatmul.mubr.msk.bf16.vlgmr.msra.gmra.mrb[112].mxu1 %vm5710_vm1, %v6507_v28 }
 0x4f4   :  { %13340 = vmatpush3.bf16.msra.mxu1 %v13739_v1  ;;  %13287 = vmatprep.mubr.msk.bf16.mxu1 %vm13849_vm0, %v13848_v0 }
 0x4f5   :  { %13341 = vmatprep.subr.bf16.mxu1 %v13848_v0 }
 0x4f6   :  { %v6477_v22 = vpop.f32.mrb[116].mxu0 }
 0x4f7   :  { %v13261_v33 = vpop.f32.mrb[117].mxu0 }
 0x4f8   :  { %v6480_v35 = vpop.f32.mrb[118].mxu0  ;;  %13342 = vmatpush3.bf16.msra.mxu1 %v13740_v31 }
 0x4f9   :  { %v6508_v36 = vpack.c.bf16 %v6480_v35, %v6477_v22  ;;  %v13262_v34 = vpop.f32.mrb[119].mxu0  ;;  %13343 = vmatprep.subr.bf16.mxu1 %v13848_v0  ;;  %v13747_v22 = vld [vmem:[%s16281_s4 + $0xe0] sm:$0xff]  }
 0x4fb   :  { %13288 = vmatmul.mubr.msk.bf16.gmra.mrb[116].mxu1 %vm5710_vm1, %v6508_v36 }
 0x4fc   :  { %13291 = vmatprep.mubr.msk.bf16.mxu1 %vm13849_vm0, %v13848_v0  ;;  %13344 = vmatpush3.bf16.msra.mxu1 %v13741_v3  ;;  %v13748_v3 = vld [vmem:[%s16281_s4 + $0xe8] sm:$0xff]  }
 0x4fd   :  { %13345 = vmatprep.subr.bf16.mxu1 %v13848_v0 }
 0x4fe   :  { %v6485_v39 = vpop.f32.mrb[120].mxu0 }
 0x4ff   :  { %v13265_v40 = vpop.f32.mrb[121].mxu0 }
 0x500   :  { %v6488_v41 = vpop.f32.mrb[122].mxu0  ;;  %13346 = vmatpush3.bf16.msra.mxu1 %v13742_v37 }
 0x501   :  { %v6509_v42 = vpack.c.bf16 %v6488_v41, %v6485_v39  ;;  %v13266_v45 = vpop.f32.mrb[123].mxu0  ;;  %13403 = vmatprep.subr.bf16.mxu1 %v13848_v0  ;;  %v13749_v39 = vld [vmem:[%s16281_s4 + $0xf0] sm:$0xff]  }
 0x503   :  { %13292 = vmatmul.mubr.msk.bf16.gmra.mrb[120].mxu1 %vm5710_vm1, %v6509_v42  ;;  %v13750_v42 = vld [vmem:[%s16281_s4 + $0xf8] sm:$0xff]  }
 0x504   :  { %13295 = vmatprep.mubr.msk.bf16.mxu1 %vm13849_vm0, %v13848_v0 }
 0x506   :  { %v6493_v46 = vpop.f32.mrb[124].mxu0 }
 0x507   :  { %v13269_v47 = vpop.f32.mrb[125].mxu0 }
 0x508   :  { %v6496_v49 = vpop.f32.mrb[126].mxu0 }
 0x509   :  { %v6510_v50 = vpack.c.bf16 %v6496_v49, %v6493_v46  ;;  %v13270_v52 = vpop.f32.mrb[127].mxu0 }
 0x50b   :  { %13296 = vmatmul.mubr.msk.bf16.gmra.mrb[124].mxu1 %vm5710_vm1, %v6510_v50 }
 0x50c   :  { %13299 = vmatprep.mubr.msk.bf16.mxu1 %vm13849_vm0, %v13848_v0 }
 0x50e   :  { %v6501_v53 = vpop.f32.mrb[128].mxu0 }
 0x50f   :  { %v13273_v54 = vpop.f32.mrb[129].mxu0  ;;  %v6511_v57 = vpack.c.bf16 %v6501_v53, %v6501_v53 }
 0x510   :  { %v6504_v55 = vpop.f32.mrb[130].mxu0 }
 0x511   :  { %v13274_v58 = vpop.f32.mrb[131].mxu0 }
 0x513   :  { %13300 = vmatmul.mubr.msk.bf16.gmra.mrb[128].mxu1 %vm5710_vm1, %v6511_v57 }
 0x514   :  { %13347 = vmatprep.mubr.msk.bf16.mxu1 %vm13849_vm0, %v13848_v0 }
 0x516   :  { %v6713_v59 = vpop.f32.mrb[132].mxu0 }
 0x517   :  { %v13321_v60 = vpop.f32.mrb[133].mxu0 }
 0x518   :  { %v6716_v61 = vpop.f32.mrb[134].mxu0 }
 0x519   :  { %v6751_v2 = vpack.c.bf16 %v6716_v61, %v6713_v59  ;;  %v13322_v4 = vpop.f32.mrb[135].mxu0 }
 0x51b   :  { %13348 = vmatmul.mubr.msk.bf16.vlgmr.msra.gmra.mrb[132].mxu1 %vm5710_vm1, %v6751_v2 }
 0x51c   :  { %13404 = vmatpush3.bf16.msra.mxu1 %v13743_v63  ;;  %13351 = vmatprep.mubr.msk.bf16.mxu1 %vm13849_vm0, %v13848_v0 }
 0x51d   :  { %13405 = vmatprep.subr.bf16.mxu1 %v13848_v0 }
 0x51e   :  { %v6721_v8 = vpop.f32.mrb[136].mxu0 }
 0x51f   :  { %v13325_v9 = vpop.f32.mrb[137].mxu0 }
 0x520   :  { %v6724_v10 = vpop.f32.mrb[138].mxu0  ;;  %13406 = vmatpush3.bf16.msra.mxu1 %v13744_v6 }
 0x521   :  { %v6752_v29 = vpack.c.bf16 %v6724_v10, %v6721_v8  ;;  %v13326_v12 = vpop.f32.mrb[139].mxu0  ;;  %13407 = vmatprep.subr.bf16.mxu1 %v13848_v0  ;;  %v13751_v8 = vld [vmem:[%s16281_s4 + $0x100] sm:$0xff]  }
 0x523   :  { %13352 = vmatmul.mubr.msk.bf16.gmra.mrb[136].mxu1 %vm5710_vm1, %v6752_v29 }
 0x524   :  { %13355 = vmatprep.mubr.msk.bf16.mxu1 %vm13849_vm0, %v13848_v0  ;;  %13408 = vmatpush3.bf16.msra.mxu1 %v13745_v11  ;;  %v13752_v11 = vld [vmem:[%s16281_s4 + $0x108] sm:$0xff]  }
 0x525   :  { %13409 = vmatprep.subr.bf16.mxu1 %v13848_v0 }
 0x526   :  { %v6729_v14 = vpop.f32.mrb[140].mxu0 }
 0x527   :  { %v13329_v48 = vpop.f32.mrb[141].mxu0 }
 0x528   :  { %v6732_v15 = vpop.f32.mrb[142].mxu0  ;;  %13410 = vmatpush3.bf16.msra.mxu1 %v13746_v13 }
 0x529   :  { %v6753_v16 = vpack.c.bf16 %v6732_v15, %v6729_v14  ;;  %v13330_v17 = vpop.f32.mrb[143].mxu0  ;;  %13467 = vmatprep.subr.bf16.mxu1 %v13848_v0  ;;  %v13753_v14 = vld [vmem:[%s16281_s4 + $0x110] sm:$0xff]  }
 0x52b   :  { %13356 = vmatmul.mubr.msk.bf16.gmra.mrb[140].mxu1 %vm5710_vm1, %v6753_v16  ;;  %v13754_v16 = vld [vmem:[%s16281_s4 + $0x118] sm:$0xff]  }
 0x52c   :  { %13359 = vmatprep.mubr.msk.bf16.mxu1 %vm13849_vm0, %v13848_v0 }
 0x52e   :  { %v6737_v5 = vpop.f32.mrb[144].mxu0 }
 0x52f   :  { %v13333_v19 = vpop.f32.mrb[145].mxu0 }
 0x530   :  { %v6740_v24 = vpop.f32.mrb[146].mxu0 }
 0x531   :  { %v6754_v20 = vpack.c.bf16 %v6740_v24, %v6737_v5  ;;  %v13334_v44 = vpop.f32.mrb[147].mxu0 }
 0x533   :  { %13360 = vmatmul.mubr.msk.bf16.gmra.mrb[144].mxu1 %vm5710_vm1, %v6754_v20 }
 0x534   :  { %13363 = vmatprep.mubr.msk.bf16.mxu1 %vm13849_vm0, %v13848_v0 }
 0x536   :  { %v6745_v21 = vpop.f32.mrb[148].mxu0 }
 0x537   :  { %v13337_v23 = vpop.f32.mrb[149].mxu0  ;;  %v6755_v27 = vpack.c.bf16 %v6745_v21, %v6745_v21 }
 0x538   :  { %v6748_v25 = vpop.f32.mrb[150].mxu0 }
 0x539   :  { %v13338_v1 = vpop.f32.mrb[151].mxu0 }
 0x53b   :  { %13364 = vmatmul.mubr.msk.bf16.gmra.mrb[148].mxu1 %vm5710_vm1, %v6755_v27 }
 0x53c   :  { %13411 = vmatprep.mubr.msk.bf16.mxu1 %vm13849_vm0, %v13848_v0 }
 0x53e   :  { %v6957_v28 = vpop.f32.mrb[152].mxu0 }
 0x53f   :  { %v13385_v30 = vpop.f32.mrb[153].mxu0 }
 0x540   :  { %v6960_v31 = vpop.f32.mrb[154].mxu0 }
 0x541   :  { %v6995_v33 = vpack.c.bf16 %v6960_v31, %v6957_v28  ;;  %v13386_v35 = vpop.f32.mrb[155].mxu0 }
 0x543   :  { %13412 = vmatmul.mubr.msk.bf16.vlgmr.msra.gmra.mrb[152].mxu1 %vm5710_vm1, %v6995_v33 }
 0x544   :  { %13468 = vmatpush3.bf16.msra.mxu1 %v13747_v22  ;;  %13415 = vmatprep.mubr.msk.bf16.mxu1 %vm13849_vm0, %v13848_v0 }
 0x545   :  { %13469 = vmatprep.subr.bf16.mxu1 %v13848_v0 }
 0x546   :  { %v6965_v36 = vpop.f32.mrb[156].mxu0 }
 0x547   :  { %v13389_v34 = vpop.f32.mrb[157].mxu0 }
 0x548   :  { %v6968_v37 = vpop.f32.mrb[158].mxu0  ;;  %13470 = vmatpush3.bf16.msra.mxu1 %v13748_v3 }
 0x549   :  { %v6996_v40 = vpack.c.bf16 %v6968_v37, %v6965_v36  ;;  %v13390_v41 = vpop.f32.mrb[159].mxu0  ;;  %13471 = vmatprep.subr.bf16.mxu1 %v13848_v0 }
 0x54b   :  { %13416 = vmatmul.mubr.msk.bf16.gmra.mrb[156].mxu1 %vm5710_vm1, %v6996_v40 }
 0x54c   :  { %13419 = vmatprep.mubr.msk.bf16.mxu1 %vm13849_vm0, %v13848_v0  ;;  %13472 = vmatpush3.bf16.msra.mxu1 %v13749_v39 }
 0x54d   :  { %13473 = vmatprep.subr.bf16.mxu1 %v13848_v0 }
 0x54e   :  { %v6973_v45 = vpop.f32.mrb[160].mxu0 }
 0x54f   :  { %v13393_v46 = vpop.f32.mrb[161].mxu0 }
 0x550   :  { %v6976_v47 = vpop.f32.mrb[162].mxu0  ;;  %13474 = vmatpush3.bf16.msra.mxu1 %v13750_v42 }
 0x551   :  { %v6997_v49 = vpack.c.bf16 %v6976_v47, %v6973_v45  ;;  %v13394_v50 = vpop.f32.mrb[163].mxu0  ;;  %13531 = vmatprep.subr.bf16.mxu1 %v13848_v0 }
 0x553   :  { %13420 = vmatmul.mubr.msk.bf16.gmra.mrb[160].mxu1 %vm5710_vm1, %v6997_v49 }
 0x554   :  { %13423 = vmatprep.mubr.msk.bf16.mxu1 %vm13849_vm0, %v13848_v0 }
 0x556   :  { %v6981_v52 = vpop.f32.mrb[164].mxu0 }
 0x557   :  { %v13397_v53 = vpop.f32.mrb[165].mxu0 }
 0x558   :  { %v6984_v54 = vpop.f32.mrb[166].mxu0 }
 0x559   :  { %v6998_v55 = vpack.c.bf16 %v6984_v54, %v6981_v52  ;;  %v13398_v57 = vpop.f32.mrb[167].mxu0 }
 0x55b   :  { %13424 = vmatmul.mubr.msk.bf16.gmra.mrb[164].mxu1 %vm5710_vm1, %v6998_v55 }
 0x55c   :  { %13427 = vmatprep.mubr.msk.bf16.mxu1 %vm13849_vm0, %v13848_v0 }
 0x55e   :  { %v6989_v58 = vpop.f32.mrb[168].mxu0 }
 0x55f   :  { %v13401_v59 = vpop.f32.mrb[169].mxu0  ;;  %v6999_v61 = vpack.c.bf16 %v6989_v58, %v6989_v58 }
 0x560   :  { %v6992_v60 = vpop.f32.mrb[170].mxu0 }
 0x561   :  { %v13402_v63 = vpop.f32.mrb[171].mxu0 }
 0x563   :  { %13428 = vmatmul.mubr.msk.bf16.gmra.mrb[168].mxu1 %vm5710_vm1, %v6999_v61 }
 0x564   :  { %13475 = vmatprep.mubr.msk.bf16.mxu1 %vm13849_vm0, %v13848_v0 }
 0x566   :  { %v7201_v2 = vpop.f32.mrb[172].mxu0 }
 0x567   :  { %v13449_v4 = vpop.f32.mrb[173].mxu0 }
 0x568   :  { %v7204_v6 = vpop.f32.mrb[174].mxu0 }
 0x569   :  { %v7239_v9 = vpack.c.bf16 %v7204_v6, %v7201_v2  ;;  %v13450_v10 = vpop.f32.mrb[175].mxu0 }
 0x56b   :  { %13476 = vmatmul.mubr.msk.bf16.vlgmr.msra.gmra.mrb[172].mxu1 %vm5710_vm1, %v7239_v9 }
 0x56c   :  { %13532 = vmatpush3.bf16.msra.mxu1 %v13751_v8  ;;  %13479 = vmatprep.mubr.msk.bf16.mxu1 %vm13849_vm0, %v13848_v0 }
 0x56d   :  { %13533 = vmatprep.subr.bf16.mxu1 %v13848_v0 }
 0x56e   :  { %v7209_v29 = vpop.f32.mrb[176].mxu0 }
 0x56f   :  { %v13453_v12 = vpop.f32.mrb[177].mxu0 }
 0x570   :  { %v7212_v13 = vpop.f32.mrb[178].mxu0  ;;  %13534 = vmatpush3.bf16.msra.mxu1 %v13752_v11 }
 0x571   :  { %v7240_v48 = vpack.c.bf16 %v7212_v13, %v7209_v29  ;;  %v13454_v15 = vpop.f32.mrb[179].mxu0  ;;  %13535 = vmatprep.subr.bf16.mxu1 %v13848_v0 }
 0x573   :  { %13480 = vmatmul.mubr.msk.bf16.gmra.mrb[176].mxu1 %vm5710_vm1, %v7240_v48 }
 0x574   :  { %13483 = vmatprep.mubr.msk.bf16.mxu1 %vm13849_vm0, %v13848_v0  ;;  %13536 = vmatpush3.bf16.msra.mxu1 %v13753_v14 }
 0x575   :  { %13537 = vmatprep.subr.bf16.mxu1 %v13848_v0 }
 0x576   :  { %v6106_v17 = vpop.f32.mrb[72].mxu1  ;;  %v7217_v5 = vpop.f32.mrb[180].mxu0 }
 0x577   :  { %v15968_v19 = vadd.f32 %v6106_v17, %v15685_v18  ;;  %v13157_v24 = vpop.f32.mrb[73].mxu1  ;;  %v13457_v20 = vpop.f32.mrb[181].mxu0 }
 0x578   :  { %v6109_v44 = vpop.f32.mrb[74].mxu1  ;;  %v7220_v21 = vpop.f32.mrb[182].mxu0  ;;  %13538 = vmatpush3.bf16.msra.mxu1 %v13754_v16 }
 0x579   :  { %v15971_v23 = vadd.f32 %v6109_v44, %v15691_v26  ;;  %v7241_v25 = vpack.c.bf16 %v7220_v21, %v7217_v5  ;;  %v13158_v27 = vpop.f32.mrb[75].mxu1  ;;  %v13458_v1 = vpop.f32.mrb[183].mxu0 }
 0x57b   :  { %13484 = vmatmul.mubr.msk.bf16.gmra.mrb[180].mxu1 %vm5710_vm1, %v7241_v25 }
 0x57c   :  { %13487 = vmatprep.mubr.msk.bf16.mxu1 %vm13849_vm0, %v13848_v0 }
 0x57e   :  { %v6114_v28 = vpop.f32.mrb[76].mxu1  ;;  %v7225_v30 = vpop.f32.mrb[184].mxu0 }
 0x57f   :  { %v15977_v18 = vadd.f32 %v6114_v28, %v15698_v32  ;;  %v13161_v31 = vpop.f32.mrb[77].mxu1  ;;  %v13461_v22 = vpop.f32.mrb[185].mxu0 }
 0x580   :  { %v6117_v33 = vpop.f32.mrb[78].mxu1  ;;  %v7228_v35 = vpop.f32.mrb[186].mxu0 }
 0x581   :  { %v15980_v26 = vadd.f32 %v6117_v33, %v15704_v38  ;;  %v7242_v3 = vpack.c.bf16 %v7228_v35, %v7225_v30  ;;  %v13162_v36 = vpop.f32.mrb[79].mxu1  ;;  %v13462_v34 = vpop.f32.mrb[187].mxu0 }
 0x583   :  { %13488 = vmatmul.mubr.msk.bf16.gmra.mrb[184].mxu1 %vm5710_vm1, %v7242_v3 }
 0x584   :  { %13491 = vmatprep.mubr.msk.bf16.mxu1 %vm13849_vm0, %v13848_v0 }
 0x586   :  { %v6122_v37 = vpop.f32.mrb[80].mxu1  ;;  %v7233_v39 = vpop.f32.mrb[188].mxu0 }
 0x587   :  { %v15986_v32 = vadd.f32 %v6122_v37, %v15711_v43  ;;  %v13165_v40 = vpop.f32.mrb[81].mxu1  ;;  %v13465_v41 = vpop.f32.mrb[189].mxu0  ;;  %v7243_v46 = vpack.c.bf16 %v7233_v39, %v7233_v39 }
 0x588   :  { %v6125_v42 = vpop.f32.mrb[82].mxu1  ;;  %v7236_v45 = vpop.f32.mrb[190].mxu0 }
 0x589   :  { %v15989_v38 = vadd.f32 %v6125_v42, %v15717_v51  ;;  %v13166_v47 = vpop.f32.mrb[83].mxu1  ;;  %v13466_v49 = vpop.f32.mrb[191].mxu0 }
 0x58b   :  { %13492 = vmatmul.mubr.msk.bf16.gmra.mrb[188].mxu1 %vm5710_vm1, %v7243_v46 }
 0x58c   :  { %13539 = vmatprep.mubr.msk.bf16.mxu1 %vm13849_vm0, %v13848_v0 }
 0x58e   :  { %v6130_v50 = vpop.f32.mrb[84].mxu1  ;;  %v7445_v52 = vpop.f32.mrb[192].mxu0 }
 0x58f   :  { %v6150_v43 = vadd.f32 %v6130_v50, %v15722_v56  ;;  %v13169_v53 = vpop.f32.mrb[85].mxu1  ;;  %v13513_v54 = vpop.f32.mrb[193].mxu0 }
 0x590   :  { %v6133_v55 = vpop.f32.mrb[86].mxu1  ;;  %v7448_v57 = vpop.f32.mrb[194].mxu0 }
 0x591   :  { %v6151_v58 = vadd.f32 %v6133_v55, %v15727_v62  ;;  %v7483_v51 = vpack.c.bf16 %v7448_v57, %v7445_v52  ;;  %v13170_v59 = vpop.f32.mrb[87].mxu1  ;;  %v13514_v60 = vpop.f32.mrb[195].mxu0 }
 0x593   :  { %13540 = vmatmul.mubr.msk.bf16.vlgmr.msra.gmra.mrb[192].mxu1 %vm5710_vm1, %v7483_v51 }
 0x594   :  { %13543 = vmatprep.mubr.msk.bf16.mxu1 %vm13849_vm0, %v13848_v0 }
 0x596   :  { %v6138_v61 = vpop.f32.mrb[88].mxu1  ;;  %v7453_v63 = vpop.f32.mrb[196].mxu0 }
 0x597   :  { %v6152_v2 = vadd.f32 %v6138_v61, %v15733_v7  ;;  %v13173_v4 = vpop.f32.mrb[89].mxu1  ;;  %v13517_v56 = vpop.f32.mrb[197].mxu0 }
 0x598   :  { %v6141_v6 = vpop.f32.mrb[90].mxu1  ;;  %v7456_v8 = vpop.f32.mrb[198].mxu0 }
 0x599   :  { %v7484_v9 = vpack.c.bf16 %v7456_v8, %v7453_v63  ;;  %v13174_v10 = vpop.f32.mrb[91].mxu1  ;;  %v13518_v11 = vpop.f32.mrb[199].mxu0 }
 0x59b   :  { %13544 = vmatmul.mubr.msk.bf16.gmra.mrb[196].mxu1 %vm5710_vm1, %v7484_v9 }
 0x59c   :  { %13547 = vmatprep.mubr.msk.bf16.mxu1 %vm13849_vm0, %v13848_v0 }
 0x59e   :  { %v6350_v62 = vpop.f32.mrb[92].mxu1  ;;  %v7461_v29 = vpop.f32.mrb[200].mxu0 }
 0x59f   :  { %v6388_v12 = vadd.f32 %v6350_v62, %v15968_v19  ;;  %v13221_v13 = vpop.f32.mrb[93].mxu1  ;;  %v13521_v14 = vpop.f32.mrb[201].mxu0 }
 0x5a0   :  { %v6353_v48 = vpop.f32.mrb[94].mxu1  ;;  %v7464_v7 = vpop.f32.mrb[202].mxu0 }
 0x5a1   :  { %v6389_v15 = vadd.f32 %v6353_v48, %v15971_v23  ;;  %v7485_v16 = vpack.c.bf16 %v7464_v7, %v7461_v29  ;;  %v13222_v17 = vpop.f32.mrb[95].mxu1  ;;  %v13522_v5 = vpop.f32.mrb[203].mxu0 }
 0x5a3   :  { %13548 = vmatmul.mubr.msk.bf16.gmra.mrb[200].mxu1 %vm5710_vm1, %v7485_v16 }
 0x5a4   :  { %13551 = vmatprep.mubr.msk.bf16.mxu1 %vm13849_vm0, %v13848_v0 }
 0x5a6   :  { %v6358_v24 = vpop.f32.mrb[96].mxu1  ;;  %v7469_v20 = vpop.f32.mrb[204].mxu0 }
 0x5a7   :  { %v6390_v44 = vadd.f32 %v6358_v24, %v15977_v18  ;;  %v13225_v21 = vpop.f32.mrb[97].mxu1  ;;  %v13525_v19 = vpop.f32.mrb[205].mxu0 }
 0x5a8   :  { %v6361_v25 = vpop.f32.mrb[98].mxu1  ;;  %v7472_v27 = vpop.f32.mrb[206].mxu0 }
 0x5a9   :  { %v6391_v1 = vadd.f32 %v6361_v25, %v15980_v26  ;;  %v7486_v28 = vpack.c.bf16 %v7472_v27, %v7469_v20  ;;  %v13226_v23 = vpop.f32.mrb[99].mxu1  ;;  %v13526_v30 = vpop.f32.mrb[207].mxu0 }
 0x5ab   :  { %13552 = vmatmul.mubr.msk.bf16.gmra.mrb[204].mxu1 %vm5710_vm1, %v7486_v28 }
 0x5ac   :  { %13555 = vmatprep.mubr.msk.bf16.mxu1 %vm13849_vm0, %v13848_v0 }
 0x5ae   :  { %v6366_v31 = vpop.f32.mrb[100].mxu1  ;;  %v7477_v22 = vpop.f32.mrb[208].mxu0 }
 0x5af   :  { %v6392_v33 = vadd.f32 %v6366_v31, %v15986_v32  ;;  %v13229_v35 = vpop.f32.mrb[101].mxu1  ;;  %v7487_v18 = vpack.c.bf16 %v7477_v22, %v7477_v22  ;;  %v13529_v3 = vpop.f32.mrb[209].mxu0 }
 0x5b0   :  { %v6369_v36 = vpop.f32.mrb[102].mxu1  ;;  %v7480_v34 = vpop.f32.mrb[210].mxu0 }
 0x5b1   :  { %v6393_v37 = vadd.f32 %v6369_v36, %v15989_v38  ;;  %v13230_v26 = vpop.f32.mrb[103].mxu1  ;;  %v13530_v39 = vpop.f32.mrb[211].mxu0 }
 0x5b3   :  { %13556 = vmatmul.mubr.msk.bf16.gmra.mrb[208].mxu1 %vm5710_vm1, %v7487_v18 }
 0x5b6   :  { %v6374_v40 = vpop.f32.mrb[104].mxu1 }
 0x5b7   :  { %v6394_v41 = vadd.f32 %v6374_v40, %v6150_v43  ;;  %v13233_v42 = vpop.f32.mrb[105].mxu1 }
 0x5b8   :  { %v6377_v45 = vpop.f32.mrb[106].mxu1 }
 0x5b9   :  { %v6395_v0 = vadd.f32 %v6377_v45, %v6151_v58  ;;  %v13234_v46 = vpop.f32.mrb[107].mxu1 }
 0x5be   :  { %v6382_v47 = vpop.f32.mrb[108].mxu1 }
 0x5bf   :  { %v6396_v49 = vadd.f32 %v6382_v47, %v6152_v2  ;;  %v13237_v32 = vpop.f32.mrb[109].mxu1 }
 0x5c0   :  { %v6385_v50 = vpop.f32.mrb[110].mxu1 }
 0x5c1   :  { %v13238_v52 = vpop.f32.mrb[111].mxu1 }
 0x5c6   :  { %v6594_v53 = vpop.f32.mrb[112].mxu1 }
 0x5c7   :  { %v6632_v54 = vadd.f32 %v6594_v53, %v6388_v12  ;;  %v13285_v55 = vpop.f32.mrb[113].mxu1 }
 0x5c8   :  { %v6597_v57 = vpop.f32.mrb[114].mxu1 }
 0x5c9   :  { %v6633_v38 = vadd.f32 %v6597_v57, %v6389_v15  ;;  %v13286_v51 = vpop.f32.mrb[115].mxu1 }
 0x5ce   :  { %v6602_v59 = vpop.f32.mrb[116].mxu1 }
 0x5cf   :  { %v6634_v60 = vadd.f32 %v6602_v59, %v6390_v44  ;;  %v13289_v61 = vpop.f32.mrb[117].mxu1 }
 0x5d0   :  { %v6605_v63 = vpop.f32.mrb[118].mxu1 }
 0x5d1   :  { %v6635_v43 = vadd.f32 %v6605_v63, %v6391_v1  ;;  %v13290_v4 = vpop.f32.mrb[119].mxu1 }
 0x5d6   :  { %v6610_v56 = vpop.f32.mrb[120].mxu1 }
 0x5d7   :  { %v6636_v58 = vadd.f32 %v6610_v56, %v6392_v33  ;;  %v13293_v6 = vpop.f32.mrb[121].mxu1 }
 0x5d8   :  { %v6613_v8 = vpop.f32.mrb[122].mxu1 }
 0x5d9   :  { %v6637_v2 = vadd.f32 %v6613_v8, %v6393_v37  ;;  %v13294_v9 = vpop.f32.mrb[123].mxu1 }
 0x5de   :  { %v6618_v10 = vpop.f32.mrb[124].mxu1 }
 0x5df   :  { %v6638_v11 = vadd.f32 %v6618_v10, %v6394_v41  ;;  %v13297_v62 = vpop.f32.mrb[125].mxu1 }
 0x5e0   :  { %v6621_v29 = vpop.f32.mrb[126].mxu1 }
 0x5e1   :  { %v6639_v12 = vadd.f32 %v6621_v29, %v6395_v0  ;;  %v13298_v13 = vpop.f32.mrb[127].mxu1 }
 0x5e6   :  { %v6626_v14 = vpop.f32.mrb[128].mxu1 }
 0x5e7   :  { %v6640_v48 = vadd.f32 %v6626_v14, %v6396_v49  ;;  %v13301_v7 = vpop.f32.mrb[129].mxu1 }
 0x5e8   :  { %v6629_v15 = vpop.f32.mrb[130].mxu1 }
 0x5e9   :  { %v13302_v16 = vpop.f32.mrb[131].mxu1 }
 0x5ee   :  { %v6838_v17 = vpop.f32.mrb[132].mxu1 }
 0x5ef   :  { %v6876_v5 = vadd.f32 %v6838_v17, %v6632_v54  ;;  %v13349_v24 = vpop.f32.mrb[133].mxu1 }
 0x5f0   :  { %v6841_v20 = vpop.f32.mrb[134].mxu1 }
 0x5f1   :  { %v6877_v44 = vadd.f32 %v6841_v20, %v6633_v38  ;;  %v13350_v21 = vpop.f32.mrb[135].mxu1 }
 0x5f6   :  { %v6846_v19 = vpop.f32.mrb[136].mxu1 }
 0x5f7   :  { %v6878_v25 = vadd.f32 %v6846_v19, %v6634_v60  ;;  %v13353_v27 = vpop.f32.mrb[137].mxu1 }
 0x5f8   :  { %v6849_v1 = vpop.f32.mrb[138].mxu1 }
 0x5f9   :  { %v6879_v28 = vadd.f32 %v6849_v1, %v6635_v43  ;;  %v13354_v23 = vpop.f32.mrb[139].mxu1 }
 0x5fe   :  { %v6854_v30 = vpop.f32.mrb[140].mxu1 }
 0x5ff   :  { %v6880_v31 = vadd.f32 %v6854_v30, %v6636_v58  ;;  %v13357_v22 = vpop.f32.mrb[141].mxu1 }
 0x600   :  { %v6857_v33 = vpop.f32.mrb[142].mxu1 }
 0x601   :  { %v6881_v35 = vadd.f32 %v6857_v33, %v6637_v2  ;;  %v13358_v18 = vpop.f32.mrb[143].mxu1 }
 0x606   :  { %v6862_v3 = vpop.f32.mrb[144].mxu1 }
 0x607   :  { %v6882_v36 = vadd.f32 %v6862_v3, %v6638_v11  ;;  %v13361_v34 = vpop.f32.mrb[145].mxu1 }
 0x608   :  { %v6865_v37 = vpop.f32.mrb[146].mxu1 }
 0x609   :  { %v6883_v26 = vadd.f32 %v6865_v37, %v6639_v12  ;;  %v13362_v39 = vpop.f32.mrb[147].mxu1 }
 0x60e   :  { %v6870_v40 = vpop.f32.mrb[148].mxu1 }
 0x60f   :  { %v6884_v41 = vadd.f32 %v6870_v40, %v6640_v48  ;;  %v13365_v42 = vpop.f32.mrb[149].mxu1  ;;  %v12461_v40 = vld [vmem:[%s16282_s5] ss:$0 sm:$0xff] }
 0x610   :  { %v6873_v45 = vpop.f32.mrb[150].mxu1 }
 0x611   :  { %v13366_v0 = vpop.f32.mrb[151].mxu1 }
 0x616   :  { %v7082_v46 = vpop.f32.mrb[152].mxu1 }
 0x617   :  { %v7120_v47 = vadd.f32 %v7082_v46, %v6876_v5  ;;  %v13413_v49 = vpop.f32.mrb[153].mxu1 }
 0x618   :  { %v7085_v32 = vpop.f32.mrb[154].mxu1 }
 0x619   :  { %v7121_v50 = vadd.f32 %v7085_v32, %v6877_v44  ;;  %v13414_v52 = vpop.f32.mrb[155].mxu1 }
 0x61e   :  { %v7090_v53 = vpop.f32.mrb[156].mxu1 }
 0x61f   :  { %v7122_v54 = vadd.f32 %v7090_v53, %v6878_v25  ;;  %v13417_v55 = vpop.f32.mrb[157].mxu1 }
 0x620   :  { %v7093_v57 = vpop.f32.mrb[158].mxu1 }
 0x621   :  { %v7123_v38 = vadd.f32 %v7093_v57, %v6879_v28  ;;  %v13418_v51 = vpop.f32.mrb[159].mxu1 }
 0x626   :  { %v7098_v59 = vpop.f32.mrb[160].mxu1 }
 0x627   :  { %v7124_v60 = vadd.f32 %v7098_v59, %v6880_v31  ;;  %v13421_v61 = vpop.f32.mrb[161].mxu1 }
 0x628   :  { %v7101_v63 = vpop.f32.mrb[162].mxu1 }
 0x629   :  { %v7125_v43 = vadd.f32 %v7101_v63, %v6881_v35  ;;  %v13422_v4 = vpop.f32.mrb[163].mxu1 }
 0x62e   :  { %v7106_v56 = vpop.f32.mrb[164].mxu1 }
 0x62f   :  { %v7126_v58 = vadd.f32 %v7106_v56, %v6882_v36  ;;  %v13425_v6 = vpop.f32.mrb[165].mxu1 }
 0x630   :  { %v7109_v8 = vpop.f32.mrb[166].mxu1 }
 0x631   :  { %v7127_v2 = vadd.f32 %v7109_v8, %v6883_v26  ;;  %v13426_v9 = vpop.f32.mrb[167].mxu1 }
 0x636   :  { %v7114_v10 = vpop.f32.mrb[168].mxu1 }
 0x637   :  { %v7128_v11 = vadd.f32 %v7114_v10, %v6884_v41  ;;  %v13429_v62 = vpop.f32.mrb[169].mxu1 }
 0x638   :  { %v7117_v29 = vpop.f32.mrb[170].mxu1 }
 0x639   :  { %v13430_v12 = vpop.f32.mrb[171].mxu1 }
 0x63e   :  { %v7326_v13 = vpop.f32.mrb[172].mxu1 }
 0x63f   :  { %v7364_v14 = vadd.f32 %v7326_v13, %v7120_v47  ;;  %v13477_v48 = vpop.f32.mrb[173].mxu1 }
 0x640   :  { %v7329_v7 = vpop.f32.mrb[174].mxu1 }
 0x641   :  { %v7365_v15 = vadd.f32 %v7329_v7, %v7121_v50  ;;  %v13478_v16 = vpop.f32.mrb[175].mxu1 }
 0x646   :  { %v7334_v17 = vpop.f32.mrb[176].mxu1 }
 0x647   :  { %v7366_v5 = vadd.f32 %v7334_v17, %v7122_v54  ;;  %v13481_v24 = vpop.f32.mrb[177].mxu1 }
 0x648   :  { %v7337_v20 = vpop.f32.mrb[178].mxu1 }
 0x649   :  { %v7367_v44 = vadd.f32 %v7337_v20, %v7123_v38  ;;  %v13482_v21 = vpop.f32.mrb[179].mxu1 }
 0x64e   :  { %v7342_v19 = vpop.f32.mrb[180].mxu1 }
 0x64f   :  { %v7368_v25 = vadd.f32 %v7342_v19, %v7124_v60  ;;  %v13485_v27 = vpop.f32.mrb[181].mxu1 }
 0x650   :  { %v7345_v1 = vpop.f32.mrb[182].mxu1 }
 0x651   :  { %v7369_v28 = vadd.f32 %v7345_v1, %v7125_v43  ;;  %v13486_v23 = vpop.f32.mrb[183].mxu1 }
 0x656   :  { %v7350_v30 = vpop.f32.mrb[184].mxu1 }
 0x657   :  { %v7370_v31 = vadd.f32 %v7350_v30, %v7126_v58  ;;  %v13489_v22 = vpop.f32.mrb[185].mxu1 }
 0x658   :  { %v7353_v33 = vpop.f32.mrb[186].mxu1 }
 0x659   :  { %v7371_v35 = vadd.f32 %v7353_v33, %v7127_v2  ;;  %v13490_v18 = vpop.f32.mrb[187].mxu1 }
 0x65e   :  { %v7358_v3 = vpop.f32.mrb[188].mxu1 }
 0x65f   :  { %v7372_v36 = vadd.f32 %v7358_v3, %v7128_v11  ;;  %v13493_v34 = vpop.f32.mrb[189].mxu1 }
 0x660   :  { %v7361_v37 = vpop.f32.mrb[190].mxu1 }
 0x661   :  { %v13494_v26 = vpop.f32.mrb[191].mxu1 }
 0x666   :  { %v7570_v39 = vpop.f32.mrb[192].mxu1 }
 0x667   :  { %v7608_v41 = vadd.f32 %v7570_v39, %v7364_v14  ;;  %v13541_v42 = vpop.f32.mrb[193].mxu1 }
 0x668   :  { %v7573_v45 = vpop.f32.mrb[194].mxu1 }
 0x669   :  { %v7624_v0 = vadd.f32 %v12461_v40, %v7608_v41  ;;  %v7609_v46 = vadd.f32 %v7573_v45, %v7365_v15  ;;  %v13542_v47 = vpop.f32.mrb[195].mxu1 }
 0x66b   :  { %v7633_v49 = vmax.f32 %v7624_v0, 0.0  ;;  %v7625_v32 = vadd.f32 %v12461_v40, %v7609_v46 }
 0x66d   :  { %v12604_v50 = vpack.c.bf16 %v7633_v49, %v7633_v49  ;;  %v7634_v52 = vmax.f32 %v7625_v32, 0.0 }
 0x66e   :  { %v7578_v53 = vpop.f32.mrb[196].mxu1 }
 0x66f   :  { %7680 = vst.msk [vmem:[#allocation3] sm:$0xf] %vm7679_vm2, %v12604_v50  ;;  %v12605_v54 = vpack.c.bf16 %v7634_v52, %v7634_v52  ;;  %v7610_v55 = vadd.f32 %v7578_v53, %v7366_v5  ;;  %v13545_v57 = vpop.f32.mrb[197].mxu1 }
 0x670   :  { %v7581_v38 = vpop.f32.mrb[198].mxu1 }
 0x671   :  { %7681 = vst.msk [vmem:[#allocation3 + $0x4] sm:$0xf] %vm7679_vm2, %v12605_v54  ;;  %v7626_v51 = vadd.f32 %v12461_v40, %v7610_v55  ;;  %v7611_v59 = vadd.f32 %v7581_v38, %v7367_v44  ;;  %v13546_v60 = vpop.f32.mrb[199].mxu1 }
 0x673   :  { %v7635_v61 = vmax.f32 %v7626_v51, 0.0  ;;  %v7627_v63 = vadd.f32 %v12461_v40, %v7611_v59 }
 0x675   :  { %v12606_v43 = vpack.c.bf16 %v7635_v61, %v7635_v61  ;;  %v7636_v4 = vmax.f32 %v7627_v63, 0.0 }
 0x676   :  { %v7586_v56 = vpop.f32.mrb[200].mxu1 }
 0x677   :  { %7682 = vst.msk [vmem:[#allocation3 + $0x8] sm:$0xf] %vm7679_vm2, %v12606_v43  ;;  %v12607_v58 = vpack.c.bf16 %v7636_v4, %v7636_v4  ;;  %v7612_v6 = vadd.f32 %v7586_v56, %v7368_v25  ;;  %v13549_v8 = vpop.f32.mrb[201].mxu1 }
 0x678   :  { %v7589_v2 = vpop.f32.mrb[202].mxu1 }
 0x679   :  { %7683 = vst.msk [vmem:[#allocation3 + $0xc] sm:$0xf] %vm7679_vm2, %v12607_v58  ;;  %v7628_v9 = vadd.f32 %v12461_v40, %v7612_v6  ;;  %v7613_v10 = vadd.f32 %v7589_v2, %v7369_v28  ;;  %v13550_v11 = vpop.f32.mrb[203].mxu1 }
 0x67b   :  { %v7637_v62 = vmax.f32 %v7628_v9, 0.0  ;;  %v7629_v29 = vadd.f32 %v12461_v40, %v7613_v10 }
 0x67d   :  { %v12608_v12 = vpack.c.bf16 %v7637_v62, %v7637_v62  ;;  %v7638_v13 = vmax.f32 %v7629_v29, 0.0 }
 0x67e   :  { %v7594_v14 = vpop.f32.mrb[204].mxu1 }
 0x67f   :  { %7684 = vst.msk [vmem:[#allocation3 + $0x10] sm:$0xf] %vm7679_vm2, %v12608_v12  ;;  %v12609_v48 = vpack.c.bf16 %v7638_v13, %v7638_v13  ;;  %v7614_v7 = vadd.f32 %v7594_v14, %v7370_v31  ;;  %v13553_v15 = vpop.f32.mrb[205].mxu1 }
 0x680   :  { %v7597_v16 = vpop.f32.mrb[206].mxu1 }
 0x681   :  { %7685 = vst.msk [vmem:[#allocation3 + $0x14] sm:$0xf] %vm7679_vm2, %v12609_v48  ;;  %v7630_v17 = vadd.f32 %v12461_v40, %v7614_v7  ;;  %v7615_v5 = vadd.f32 %v7597_v16, %v7371_v35  ;;  %v13554_v24 = vpop.f32.mrb[207].mxu1 }
 0x683   :  { %v7639_v20 = vmax.f32 %v7630_v17, 0.0  ;;  %v7631_v44 = vadd.f32 %v12461_v40, %v7615_v5 }
 0x685   :  { %v12610_v21 = vpack.c.bf16 %v7639_v20, %v7639_v20  ;;  %v7640_v19 = vmax.f32 %v7631_v44, 0.0 }
 0x686   :  { %v7602_v25 = vpop.f32.mrb[208].mxu1 }
 0x687   :  { %7686 = vst.msk [vmem:[#allocation3 + $0x18] sm:$0xf] %vm7679_vm2, %v12610_v21  ;;  %v12611_v27 = vpack.c.bf16 %v7640_v19, %v7640_v19  ;;  %v7616_v1 = vadd.f32 %v7602_v25, %v7372_v36  ;;  %v13557_v28 = vpop.f32.mrb[209].mxu1 }
 0x688   :  { %v7605_v23 = vpop.f32.mrb[210].mxu1 }
 0x689   :  { %7687 = vst.msk [vmem:[#allocation3 + $0x1c] sm:$0xf] %vm7679_vm2, %v12611_v27  ;;  %v7632_v30 = vadd.f32 %v12461_v40, %v7616_v1  ;;  %v13558_v31 = vpop.f32.mrb[211].mxu1 }
 0x68b   :  { %v7641_v22 = vmax.f32 %v7632_v30, 0.0 }
 0x68d   :  { %v12612_v33 = vpack.c.bf16 %v7641_v22, %v7641_v22 }
 0x68f   :  { %7688 = vst.msk [vmem:[#allocation3 + $0x20] sm:$0xf] %vm7679_vm2, %v12612_v33 }
 0x690   :  { %13830 = dma.done.wait [#allocation4], 73728 }
 0x691   :  { %13831 = vsyncadd [#allocation4], 4294893568  ;;  %v13850_v35 = vmov 0   ;;  %v7714_v18 = vld [vmem:[#allocation2 + $0x88] sm:$0xff]  ;;  %v7716_v3 = vld [vmem:[#allocation2 + $0x98] sm:$0xff] }
 0x692   :  { %7768 = vmatprep.mubr.bf16.mxu0 %v13850_v35  ;;  %7809 = vmatprep.mubr.bf16.mxu1 %v13850_v35  ;;  %v7713_v36 = vld [vmem:[#allocation2 + $0x80] sm:$0xff]  ;;  %v7715_v34 = vld [vmem:[#allocation2 + $0x90] sm:$0xff]  ;;  %v7718_v37 = vld [vmem:[#allocation2 + $0xa8] sm:$0xff] }
 0x693   :  { %7736 = vmatprep.subr.bf16.mxu0 %v7714_v18  ;;  %7777 = vmatprep.subr.bf16.mxu1 %v7716_v3  ;;  %v7720_v26 = vld [vmem:[#allocation2 + $0xb8] sm:$0xff]  ;;  %v7717_v39 = vld [vmem:[#allocation2 + $0xa0] sm:$0xff]  ;;  %v7719_v40 = vld [vmem:[#allocation2 + $0xb0] sm:$0xff] }
 0x694   :  { %7737 = vmatpush1.bf16.msra.mxu0 %v7713_v36  ;;  %7778 = vmatpush1.bf16.msra.mxu1 %v7715_v34  ;;  %v7722_v41 = vld [vmem:[#allocation2 + $0xc8] sm:$0xff]  ;;  %v7724_v42 = vld [vmem:[#allocation2 + $0xd8] sm:$0xff]  ;;  %v7721_v45 = vld [vmem:[#allocation2 + $0xc0] sm:$0xff] }
 0x695   :  { %7738 = vmatprep.subr.bf16.mxu0 %v7718_v37  ;;  %7779 = vmatprep.subr.bf16.mxu1 %v7720_v26  ;;  %v7723_v0 = vld [vmem:[#allocation2 + $0xd0] sm:$0xff]  ;;  %v7726_v46 = vld [vmem:[#allocation2 + $0xe8] sm:$0xff]  ;;  %v7728_v47 = vld [vmem:[#allocation2 + $0xf8] sm:$0xff] }
 0x696   :  { %v13755_v49 = vld [vmem:[#allocation3] ss:$0 sps:$4 sm:$0x22]   ;;  %v7727_v50 = vld [vmem:[#allocation2 + $0xf0] sm:$0xff]  ;;  %v7696_v52 = vld [vmem:[#allocation2 + $0x8] sm:$0xff] }
 0x697   :  { %v7725_v32 = vld [vmem:[#allocation2 + $0xe0] sm:$0xff]  ;;  %v7698_v53 = vld [vmem:[#allocation2 + $0x18] sm:$0xff]  ;;  %v7732_v54 = vrot.slane %v13755_v49, 1  ;;  %v7697_v57 = vld [vmem:[#allocation2 + $0x10] sm:$0xff] }
 0x698   :  { %7739 = vmatpush1.bf16.msra.mxu0 %v7717_v39  ;;  %7780 = vmatpush1.bf16.msra.mxu1 %v7719_v40  ;;  %v7695_v55 = vld [vmem:[#allocation2] sm:$0xff]  ;;  %v7700_v38 = vld [vmem:[#allocation2 + $0x28] sm:$0xff]  ;;  %v7702_v51 = vld [vmem:[#allocation2 + $0x38] sm:$0xff] }
 0x699   :  { %7740 = vmatprep.subr.bf16.mxu0 %v7722_v41  ;;  %7781 = vmatprep.subr.bf16.mxu1 %v7724_v42  ;;  %v7699_v59 = vld [vmem:[#allocation2 + $0x20] sm:$0xff]  ;;  %v7701_v60 = vld [vmem:[#allocation2 + $0x30] sm:$0xff]  ;;  %v7704_v61 = vld [vmem:[#allocation2 + $0x48] sm:$0xff] }
 0x69a   :  { %v7706_v63 = vld [vmem:[#allocation2 + $0x58] sm:$0xff]  ;;  %v7703_v43 = vld [vmem:[#allocation2 + $0x40] sm:$0xff]  ;;  %v7705_v4 = vld [vmem:[#allocation2 + $0x50] sm:$0xff] }
 0x69b   :  { %v7708_v56 = vld [vmem:[#allocation2 + $0x68] sm:$0xff]  ;;  %v7710_v58 = vld [vmem:[#allocation2 + $0x78] sm:$0xff]  ;;  %v7707_v6 = vld [vmem:[#allocation2 + $0x60] sm:$0xff] }
 0x69c   :  { %7741 = vmatpush1.bf16.msra.mxu0 %v7721_v45  ;;  %7782 = vmatpush1.bf16.msra.mxu1 %v7723_v0  ;;  %v7709_v8 = vld [vmem:[#allocation2 + $0x70] sm:$0xff]  ;;  %v7906_v2 = vld [vmem:[#allocation2 + $0x108] sm:$0xff]  ;;  %v7908_v9 = vld [vmem:[#allocation2 + $0x118] sm:$0xff] }
 0x69d   :  { %7742 = vmatprep.subr.bf16.mxu0 %v7726_v46  ;;  %7783 = vmatprep.subr.bf16.mxu1 %v7728_v47  ;;  %v7694_v10 = vld [vmem:[#allocation3] sm:$0x1]  ;;  %v7907_v62 = vld [vmem:[#allocation2 + $0x110] sm:$0xff]  ;;  %v7910_v29 = vld [vmem:[#allocation2 + $0x128] sm:$0xff] }
 0x69e   :  { %v7905_v11 = vld [vmem:[#allocation2 + $0x100] sm:$0xff]  ;;  %v7912_v12 = vld [vmem:[#allocation2 + $0x138] sm:$0xff]  ;;  %v7911_v14 = vld [vmem:[#allocation2 + $0x130] sm:$0xff] }
 0x69f   :  { %v7909_v13 = vld [vmem:[#allocation2 + $0x120] sm:$0xff]  ;;  %v7914_v48 = vld [vmem:[#allocation2 + $0x148] sm:$0xff]  ;;  %v7916_v7 = vld [vmem:[#allocation2 + $0x158] sm:$0xff] }
 0x6a0   :  { %7743 = vmatpush1.bf16.msra.mxu0 %v7725_v32  ;;  %7784 = vmatpush1.bf16.msra.mxu1 %v7727_v50  ;;  %v7913_v15 = vld [vmem:[#allocation2 + $0x140] sm:$0xff]  ;;  %v7915_v16 = vld [vmem:[#allocation2 + $0x150] sm:$0xff]  ;;  %v7918_v17 = vld [vmem:[#allocation2 + $0x168] sm:$0xff] }
 0x6a1   :  { %7821 = vmatprep.subr.bf16.mxu0 %v7696_v52  ;;  %7862 = vmatprep.subr.bf16.mxu1 %v7698_v53  ;;  %v7920_v5 = vld [vmem:[#allocation2 + $0x178] sm:$0xff]  ;;  %v13756_v24 = vld [vmem:[#allocation3] ss:$0 sps:$4 sm:$0x44]   ;;  %v7919_v44 = vld [vmem:[#allocation2 + $0x170] sm:$0xff] }
 0x6a2   :  { %v7917_v20 = vld [vmem:[#allocation2 + $0x160] sm:$0xff]  ;;  %v8017_v21 = vld [vmem:[#allocation2 + $0x188] sm:$0xff]  ;;  %v8019_v19 = vld [vmem:[#allocation2 + $0x198] sm:$0xff]  ;;  %v7924_v25 = vrot.slane %v13756_v24, 2 }
 0x6a3   :  { %12472 = vmatmul.mubr.msk.bf16.vlgmr.msra.gmra.mrb[212].mxu0 %vm5710_vm1, %v7732_v54  ;;  %12473 = vmatmul.mubr.msk.bf16.vlgmr.msra.gmra.mrb[212].mxu1 %vm5710_vm1, %v7732_v54  ;;  %v8016_v27 = vld [vmem:[#allocation2 + $0x180] sm:$0xff]  ;;  %v8018_v1 = vld [vmem:[#allocation2 + $0x190] sm:$0xff]  ;;  %v8021_v28 = vld [vmem:[#allocation2 + $0x1a8] sm:$0xff] }
 0x6a4   :  { %7822 = vmatpush1.bf16.msra.mxu0 %v7695_v55  ;;  %7863 = vmatpush1.bf16.msra.mxu1 %v7697_v57  ;;  %v8023_v23 = vld [vmem:[#allocation2 + $0x1b8] sm:$0xff]  ;;  %v8020_v30 = vld [vmem:[#allocation2 + $0x1a0] sm:$0xff]  ;;  %v8022_v31 = vld [vmem:[#allocation2 + $0x1b0] sm:$0xff] }
 0x6a5   :  { %7823 = vmatprep.subr.bf16.mxu0 %v7700_v38  ;;  %7864 = vmatprep.subr.bf16.mxu1 %v7702_v51  ;;  %v8025_v22 = vld [vmem:[#allocation2 + $0x1c8] sm:$0xff]  ;;  %v8027_v33 = vld [vmem:[#allocation2 + $0x1d8] sm:$0xff]  ;;  %v8024_v18 = vld [vmem:[#allocation2 + $0x1c0] sm:$0xff] }
 0x6a6   :  { %7853 = vmatprep.mubr.bf16.mxu0 %v13850_v35  ;;  %7894 = vmatprep.mubr.bf16.mxu1 %v13850_v35  ;;  %v8026_v3 = vld [vmem:[#allocation2 + $0x1d0] sm:$0xff]  ;;  %v8029_v36 = vld [vmem:[#allocation2 + $0x1e8] sm:$0xff]  ;;  %v8031_v34 = vld [vmem:[#allocation2 + $0x1f8] sm:$0xff] }
 0x6a7   :  { %v13757_v37 = vld [vmem:[#allocation3] ss:$0 sps:$4 sm:$0x88]   ;;  %v8030_v39 = vld [vmem:[#allocation2 + $0x1f0] sm:$0xff]  ;;  %v8128_v40 = vld [vmem:[#allocation2 + $0x208] sm:$0xff] }
 0x6a8   :  { %7824 = vmatpush1.bf16.msra.mxu0 %v7699_v59  ;;  %7865 = vmatpush1.bf16.msra.mxu1 %v7701_v60  ;;  %v8028_v26 = vld [vmem:[#allocation2 + $0x1e0] sm:$0xff]  ;;  %v8130_v41 = vld [vmem:[#allocation2 + $0x218] sm:$0xff]  ;;  %v8035_v42 = vrot.slane %v13757_v37, 3  ;;  %v8129_v0 = vld [vmem:[#allocation2 + $0x210] sm:$0xff] }
 0x6a9   :  { %7825 = vmatprep.subr.bf16.mxu0 %v7704_v61  ;;  %7866 = vmatprep.subr.bf16.mxu1 %v7706_v63  ;;  %v8127_v45 = vld [vmem:[#allocation2 + $0x200] sm:$0xff]  ;;  %v8132_v46 = vld [vmem:[#allocation2 + $0x228] sm:$0xff]  ;;  %v8134_v47 = vld [vmem:[#allocation2 + $0x238] sm:$0xff] }
 0x6aa   :  { %v8131_v49 = vld [vmem:[#allocation2 + $0x220] sm:$0xff]  ;;  %v8133_v32 = vld [vmem:[#allocation2 + $0x230] sm:$0xff]  ;;  %v8136_v50 = vld [vmem:[#allocation2 + $0x248] sm:$0xff] }
 0x6ab   :  { %v8138_v52 = vld [vmem:[#allocation2 + $0x258] sm:$0xff]  ;;  %v8135_v53 = vld [vmem:[#allocation2 + $0x240] sm:$0xff]  ;;  %v8137_v54 = vld [vmem:[#allocation2 + $0x250] sm:$0xff] }
 0x6ac   :  { %7826 = vmatpush1.bf16.msra.mxu0 %v7703_v43  ;;  %7867 = vmatpush1.bf16.msra.mxu1 %v7705_v4  ;;  %v8140_v55 = vld [vmem:[#allocation2 + $0x268] sm:$0xff]  ;;  %v8142_v57 = vld [vmem:[#allocation2 + $0x278] sm:$0xff]  ;;  %v8139_v38 = vld [vmem:[#allocation2 + $0x260] sm:$0xff] }
 0x6ad   :  { %7827 = vmatprep.subr.bf16.mxu0 %v7708_v56  ;;  %7868 = vmatprep.subr.bf16.mxu1 %v7710_v58  ;;  %v8141_v51 = vld [vmem:[#allocation2 + $0x270] sm:$0xff]  ;;  %v8235_v59 = vld [vmem:[#allocation2 + $0x288] sm:$0xff]  ;;  %v8237_v60 = vld [vmem:[#allocation2 + $0x298] sm:$0xff] }
 0x6ae   :  { %v8125_v61 = vld [vmem:[#allocation3 + $0x4] sm:$0x1]  ;;  %v8236_v43 = vld [vmem:[#allocation2 + $0x290] sm:$0xff]  ;;  %v8239_v4 = vld [vmem:[#allocation2 + $0x2a8] sm:$0xff] }
 0x6af   :  { %v8234_v63 = vld [vmem:[#allocation2 + $0x280] sm:$0xff]  ;;  %v8241_v56 = vld [vmem:[#allocation2 + $0x2b8] sm:$0xff] }
 0x6b0   :  { %7828 = vmatpush1.bf16.msra.mxu0 %v7707_v6  ;;  %7869 = vmatpush1.bf16.msra.mxu1 %v7709_v8  ;;  %v8238_v58 = vld [vmem:[#allocation2 + $0x2a0] sm:$0xff]  ;;  %v8240_v6 = vld [vmem:[#allocation2 + $0x2b0] sm:$0xff]  ;;  %v8243_v8 = vld [vmem:[#allocation2 + $0x2c8] sm:$0xff] }
 0x6b1   :  { %7928 = vmatprep.subr.bf16.mxu0 %v7906_v2  ;;  %7969 = vmatprep.subr.bf16.mxu1 %v7908_v9  ;;  %v8245_v2 = vld [vmem:[#allocation2 + $0x2d8] sm:$0xff]  ;;  %v8242_v9 = vld [vmem:[#allocation2 + $0x2c0] sm:$0xff] }
 0x6b2   :  { %v8349_v24 = vld [vmem:[#allocation2 + $0x320] sm:$0xff] }
 0x6b3   :  { %12474 = vmatmul.mubr.msk.bf16.vlgmr.msra.gmra.mrb[216].mxu0 %vm5710_vm1, %v7694_v10  ;;  %12475 = vmatmul.mubr.msk.bf16.vlgmr.msra.gmra.mrb[216].mxu1 %vm5710_vm1, %v7694_v10  ;;  %v8244_v10 = vld [vmem:[#allocation2 + $0x2d0] sm:$0xff]  ;;  %v8460_v37 = vld [vmem:[#allocation2 + $0x3a0] sm:$0xff] }
 0x6b4   :  { %7929 = vmatpush1.bf16.msra.mxu0 %v7905_v11  ;;  %7970 = vmatpush1.bf16.msra.mxu1 %v7907_v62  ;;  %v8247_v11 = vld [vmem:[#allocation2 + $0x2e8] sm:$0xff]  ;;  %v8249_v62 = vld [vmem:[#allocation2 + $0x2f8] sm:$0xff] }
 0x6b5   :  { %7930 = vmatprep.subr.bf16.mxu0 %v7910_v29  ;;  %7971 = vmatprep.subr.bf16.mxu1 %v7912_v12  ;;  %v13758_v29 = vld [vmem:[#allocation3 + $0x4] ss:$0 sps:$4 sm:$0x22]  }
 0x6b6   :  { %7960 = vmatprep.mubr.bf16.mxu0 %v13850_v35  ;;  %8001 = vmatprep.mubr.bf16.mxu1 %v13850_v35  ;;  %v8246_v12 = vld [vmem:[#allocation2 + $0x2e0] sm:$0xff] }
 0x6b8   :  { %7931 = vmatpush1.bf16.msra.mxu0 %v7909_v13  ;;  %7972 = vmatpush1.bf16.msra.mxu1 %v7911_v14  ;;  %v8248_v13 = vld [vmem:[#allocation2 + $0x2f0] sm:$0xff]  ;;  %v8346_v14 = vld [vmem:[#allocation2 + $0x308] sm:$0xff] }
 0x6b9   :  { %7932 = vmatprep.subr.bf16.mxu0 %v7914_v48  ;;  %7973 = vmatprep.subr.bf16.mxu1 %v7916_v7  ;;  %v8348_v48 = vld [vmem:[#allocation2 + $0x318] sm:$0xff]  ;;  %v8253_v7 = vrot.slane %v13758_v29, 1  ;;  %v8678_v29 = vld [vmem:[#allocation2 + $0x4a0] sm:$0xff] }
 0x6bc   :  { %7933 = vmatpush1.bf16.msra.mxu0 %v7913_v15  ;;  %7974 = vmatpush1.bf16.msra.mxu1 %v7915_v16  ;;  %v8345_v15 = vld [vmem:[#allocation2 + $0x300] sm:$0xff]  ;;  %v8347_v16 = vld [vmem:[#allocation2 + $0x310] sm:$0xff] }
 0x6bd   :  { %7934 = vmatprep.subr.bf16.mxu0 %v7918_v17  ;;  %7975 = vmatprep.subr.bf16.mxu1 %v7920_v5  ;;  %v8350_v17 = vld [vmem:[#allocation2 + $0x328] sm:$0xff]  ;;  %v8352_v5 = vld [vmem:[#allocation2 + $0x338] sm:$0xff] }
 0x6c0   :  { %7935 = vmatpush1.bf16.msra.mxu0 %v7917_v20  ;;  %7976 = vmatpush1.bf16.msra.mxu1 %v7919_v44  ;;  %v8351_v20 = vld [vmem:[#allocation2 + $0x330] sm:$0xff]  ;;  %v8354_v44 = vld [vmem:[#allocation2 + $0x348] sm:$0xff] }
 0x6c1   :  { %8039 = vmatprep.subr.bf16.mxu0 %v8017_v21  ;;  %8080 = vmatprep.subr.bf16.mxu1 %v8019_v19  ;;  %v8356_v21 = vld [vmem:[#allocation2 + $0x358] sm:$0xff]  ;;  %v8353_v19 = vld [vmem:[#allocation2 + $0x340] sm:$0xff] }
 0x6c3   :  { %12477 = vmatmul.mubr.msk.bf16.vlgmr.msra.gmra.mrb[220].mxu0 %vm5710_vm1, %v7924_v25  ;;  %12478 = vmatmul.mubr.msk.bf16.vlgmr.msra.gmra.mrb[220].mxu1 %vm5710_vm1, %v7924_v25  ;;  %v8355_v25 = vld [vmem:[#allocation2 + $0x350] sm:$0xff] }
 0x6c4   :  { %8040 = vmatpush1.bf16.msra.mxu0 %v8016_v27  ;;  %8081 = vmatpush1.bf16.msra.mxu1 %v8018_v1  ;;  %v8358_v27 = vld [vmem:[#allocation2 + $0x368] sm:$0xff]  ;;  %v8360_v1 = vld [vmem:[#allocation2 + $0x378] sm:$0xff] }
 0x6c5   :  { %8041 = vmatprep.subr.bf16.mxu0 %v8021_v28  ;;  %8082 = vmatprep.subr.bf16.mxu1 %v8023_v23  ;;  %v13759_v28 = vld [vmem:[#allocation3 + $0x4] ss:$0 sps:$4 sm:$0x44]  }
 0x6c6   :  { %8071 = vmatprep.mubr.bf16.mxu0 %v13850_v35  ;;  %8112 = vmatprep.mubr.bf16.mxu1 %v13850_v35  ;;  %v8357_v23 = vld [vmem:[#allocation2 + $0x360] sm:$0xff] }
 0x6c8   :  { %8042 = vmatpush1.bf16.msra.mxu0 %v8020_v30  ;;  %8083 = vmatpush1.bf16.msra.mxu1 %v8022_v31  ;;  %v8359_v30 = vld [vmem:[#allocation2 + $0x370] sm:$0xff]  ;;  %v8457_v31 = vld [vmem:[#allocation2 + $0x388] sm:$0xff] }
 0x6c9   :  { %8043 = vmatprep.subr.bf16.mxu0 %v8025_v22  ;;  %8084 = vmatprep.subr.bf16.mxu1 %v8027_v33  ;;  %v8459_v22 = vld [vmem:[#allocation2 + $0x398] sm:$0xff]  ;;  %v8364_v33 = vrot.slane %v13759_v28, 2  ;;  %v8789_v28 = vld [vmem:[#allocation2 + $0x520] sm:$0xff] }
 0x6cc   :  { %8044 = vmatpush1.bf16.msra.mxu0 %v8024_v18  ;;  %8085 = vmatpush1.bf16.msra.mxu1 %v8026_v3  ;;  %v8456_v18 = vld [vmem:[#allocation2 + $0x380] sm:$0xff]  ;;  %v8458_v3 = vld [vmem:[#allocation2 + $0x390] sm:$0xff] }
 0x6cd   :  { %8045 = vmatprep.subr.bf16.mxu0 %v8029_v36  ;;  %8086 = vmatprep.subr.bf16.mxu1 %v8031_v34  ;;  %v8461_v36 = vld [vmem:[#allocation2 + $0x3a8] sm:$0xff]  ;;  %v8463_v34 = vld [vmem:[#allocation2 + $0x3b8] sm:$0xff] }
 0x6d0   :  { %8046 = vmatpush1.bf16.msra.mxu0 %v8028_v26  ;;  %8087 = vmatpush1.bf16.msra.mxu1 %v8030_v39  ;;  %v8462_v26 = vld [vmem:[#allocation2 + $0x3b0] sm:$0xff]  ;;  %v8465_v39 = vld [vmem:[#allocation2 + $0x3c8] sm:$0xff] }
 0x6d1   :  { %8146 = vmatprep.subr.bf16.mxu0 %v8128_v40  ;;  %8187 = vmatprep.subr.bf16.mxu1 %v8130_v41  ;;  %v8467_v40 = vld [vmem:[#allocation2 + $0x3d8] sm:$0xff]  ;;  %v8464_v41 = vld [vmem:[#allocation2 + $0x3c0] sm:$0xff] }
 0x6d3   :  { %12480 = vmatmul.mubr.msk.bf16.vlgmr.msra.gmra.mrb[224].mxu0 %vm5710_vm1, %v8035_v42  ;;  %12481 = vmatmul.mubr.msk.bf16.vlgmr.msra.gmra.mrb[224].mxu1 %vm5710_vm1, %v8035_v42  ;;  %v8466_v42 = vld [vmem:[#allocation2 + $0x3d0] sm:$0xff] }
 0x6d4   :  { %8147 = vmatpush1.bf16.msra.mxu0 %v8127_v45  ;;  %8188 = vmatpush1.bf16.msra.mxu1 %v8129_v0  ;;  %v8469_v45 = vld [vmem:[#allocation2 + $0x3e8] sm:$0xff]  ;;  %v8471_v0 = vld [vmem:[#allocation2 + $0x3f8] sm:$0xff] }
 0x6d5   :  { %8148 = vmatprep.subr.bf16.mxu0 %v8132_v46  ;;  %8189 = vmatprep.subr.bf16.mxu1 %v8134_v47  ;;  %v13760_v46 = vld [vmem:[#allocation3 + $0x4] ss:$0 sps:$4 sm:$0x88]  }
 0x6d6   :  { %8178 = vmatprep.mubr.bf16.mxu0 %v13850_v35  ;;  %8219 = vmatprep.mubr.bf16.mxu1 %v13850_v35  ;;  %v8468_v47 = vld [vmem:[#allocation2 + $0x3e0] sm:$0xff] }
 0x6d8   :  { %8149 = vmatpush1.bf16.msra.mxu0 %v8131_v49  ;;  %8190 = vmatpush1.bf16.msra.mxu1 %v8133_v32  ;;  %v8470_v49 = vld [vmem:[#allocation2 + $0x3f0] sm:$0xff]  ;;  %v8568_v32 = vld [vmem:[#allocation2 + $0x408] sm:$0xff] }
 0x6d9   :  { %8150 = vmatprep.subr.bf16.mxu0 %v8136_v50  ;;  %8191 = vmatprep.subr.bf16.mxu1 %v8138_v52  ;;  %v8570_v50 = vld [vmem:[#allocation2 + $0x418] sm:$0xff]  ;;  %v8475_v52 = vrot.slane %v13760_v46, 3  ;;  %v8900_v46 = vld [vmem:[#allocation2 + $0x5a0] sm:$0xff] }
 0x6dc   :  { %8151 = vmatpush1.bf16.msra.mxu0 %v8135_v53  ;;  %8192 = vmatpush1.bf16.msra.mxu1 %v8137_v54  ;;  %v8567_v53 = vld [vmem:[#allocation2 + $0x400] sm:$0xff]  ;;  %v8569_v54 = vld [vmem:[#allocation2 + $0x410] sm:$0xff] }
 0x6dd   :  { %8152 = vmatprep.subr.bf16.mxu0 %v8140_v55  ;;  %8193 = vmatprep.subr.bf16.mxu1 %v8142_v57  ;;  %v8572_v55 = vld [vmem:[#allocation2 + $0x428] sm:$0xff]  ;;  %v8574_v57 = vld [vmem:[#allocation2 + $0x438] sm:$0xff] }
 0x6e0   :  { %8153 = vmatpush1.bf16.msra.mxu0 %v8139_v38  ;;  %8194 = vmatpush1.bf16.msra.mxu1 %v8141_v51  ;;  %v8571_v38 = vld [vmem:[#allocation2 + $0x420] sm:$0xff]  ;;  %v8573_v51 = vld [vmem:[#allocation2 + $0x430] sm:$0xff] }
 0x6e1   :  { %8257 = vmatprep.subr.bf16.mxu0 %v8235_v59  ;;  %8298 = vmatprep.subr.bf16.mxu1 %v8237_v60  ;;  %v8576_v59 = vld [vmem:[#allocation2 + $0x448] sm:$0xff]  ;;  %v8578_v60 = vld [vmem:[#allocation2 + $0x458] sm:$0xff] }
 0x6e3   :  { %12482 = vmatmul.mubr.msk.bf16.vlgmr.msra.gmra.mrb[228].mxu0 %vm5710_vm1, %v8125_v61  ;;  %12483 = vmatmul.mubr.msk.bf16.vlgmr.msra.gmra.mrb[228].mxu1 %vm5710_vm1, %v8125_v61  ;;  %v8575_v61 = vld [vmem:[#allocation2 + $0x440] sm:$0xff] }
 0x6e4   :  { %8258 = vmatpush1.bf16.msra.mxu0 %v8234_v63  ;;  %8299 = vmatpush1.bf16.msra.mxu1 %v8236_v43  ;;  %v8577_v63 = vld [vmem:[#allocation2 + $0x450] sm:$0xff]  ;;  %v8580_v43 = vld [vmem:[#allocation2 + $0x468] sm:$0xff] }
 0x6e5   :  { %8259 = vmatprep.subr.bf16.mxu0 %v8239_v4  ;;  %8300 = vmatprep.subr.bf16.mxu1 %v8241_v56  ;;  %v8582_v4 = vld [vmem:[#allocation2 + $0x478] sm:$0xff]  ;;  %v8579_v56 = vld [vmem:[#allocation2 + $0x460] sm:$0xff] }
 0x6e6   :  { %8289 = vmatprep.mubr.bf16.mxu0 %v13850_v35  ;;  %8330 = vmatprep.mubr.bf16.mxu1 %v13850_v35 }
 0x6e8   :  { %8260 = vmatpush1.bf16.msra.mxu0 %v8238_v58  ;;  %8301 = vmatpush1.bf16.msra.mxu1 %v8240_v6  ;;  %v8581_v58 = vld [vmem:[#allocation2 + $0x470] sm:$0xff]  ;;  %v8675_v6 = vld [vmem:[#allocation2 + $0x488] sm:$0xff] }
 0x6e9   :  { %8261 = vmatprep.subr.bf16.mxu0 %v8243_v8  ;;  %8302 = vmatprep.subr.bf16.mxu1 %v8245_v2  ;;  %v8677_v8 = vld [vmem:[#allocation2 + $0x498] sm:$0xff]  ;;  %v8565_v2 = vld [vmem:[#allocation3 + $0x8] sm:$0x1] }
 0x6ec   :  { %8262 = vmatpush1.bf16.msra.mxu0 %v8242_v9  ;;  %8303 = vmatpush1.bf16.msra.mxu1 %v8244_v10  ;;  %v8674_v9 = vld [vmem:[#allocation2 + $0x480] sm:$0xff]  ;;  %v8676_v10 = vld [vmem:[#allocation2 + $0x490] sm:$0xff] }
 0x6ed   :  { %8263 = vmatprep.subr.bf16.mxu0 %v8247_v11  ;;  %8304 = vmatprep.subr.bf16.mxu1 %v8249_v62  ;;  %v8679_v11 = vld [vmem:[#allocation2 + $0x4a8] sm:$0xff]  ;;  %v8681_v62 = vld [vmem:[#allocation2 + $0x4b8] sm:$0xff] }
 0x6f0   :  { %8264 = vmatpush1.bf16.msra.mxu0 %v8246_v12  ;;  %8305 = vmatpush1.bf16.msra.mxu1 %v8248_v13  ;;  %v8680_v12 = vld [vmem:[#allocation2 + $0x4b0] sm:$0xff]  ;;  %v8683_v13 = vld [vmem:[#allocation2 + $0x4c8] sm:$0xff] }
 0x6f1   :  { %8368 = vmatprep.subr.bf16.mxu0 %v8346_v14  ;;  %8409 = vmatprep.subr.bf16.mxu1 %v8348_v48  ;;  %v8685_v14 = vld [vmem:[#allocation2 + $0x4d8] sm:$0xff]  ;;  %v8682_v48 = vld [vmem:[#allocation2 + $0x4c0] sm:$0xff] }
 0x6f3   :  { %12485 = vmatmul.mubr.msk.bf16.vlgmr.msra.gmra.mrb[232].mxu0 %vm5710_vm1, %v8253_v7  ;;  %12486 = vmatmul.mubr.msk.bf16.vlgmr.msra.gmra.mrb[232].mxu1 %vm5710_vm1, %v8253_v7  ;;  %v8684_v7 = vld [vmem:[#allocation2 + $0x4d0] sm:$0xff] }
 0x6f4   :  { %8369 = vmatpush1.bf16.msra.mxu0 %v8345_v15  ;;  %8410 = vmatpush1.bf16.msra.mxu1 %v8347_v16  ;;  %v8687_v15 = vld [vmem:[#allocation2 + $0x4e8] sm:$0xff]  ;;  %v8689_v16 = vld [vmem:[#allocation2 + $0x4f8] sm:$0xff] }
 0x6f5   :  { %8370 = vmatprep.subr.bf16.mxu0 %v8350_v17  ;;  %8411 = vmatprep.subr.bf16.mxu1 %v8352_v5  ;;  %v13761_v17 = vld [vmem:[#allocation3 + $0x8] ss:$0 sps:$4 sm:$0x22]   ;;  %v8686_v5 = vld [vmem:[#allocation2 + $0x4e0] sm:$0xff] }
 0x6f6   :  { %8400 = vmatprep.mubr.bf16.mxu0 %v13850_v35  ;;  %8441 = vmatprep.mubr.bf16.mxu1 %v13850_v35 }
 0x6f8   :  { %8371 = vmatpush1.bf16.msra.mxu0 %v8349_v24  ;;  %8412 = vmatpush1.bf16.msra.mxu1 %v8351_v20  ;;  %v8688_v24 = vld [vmem:[#allocation2 + $0x4f0] sm:$0xff]  ;;  %v8786_v20 = vld [vmem:[#allocation2 + $0x508] sm:$0xff] }
 0x6f9   :  { %8372 = vmatprep.subr.bf16.mxu0 %v8354_v44  ;;  %8413 = vmatprep.subr.bf16.mxu1 %v8356_v21  ;;  %v8788_v44 = vld [vmem:[#allocation2 + $0x518] sm:$0xff]  ;;  %v8693_v21 = vrot.slane %v13761_v17, 1  ;;  %v9118_v17 = vld [vmem:[#allocation2 + $0x6a0] sm:$0xff] }
 0x6fc   :  { %8373 = vmatpush1.bf16.msra.mxu0 %v8353_v19  ;;  %8414 = vmatpush1.bf16.msra.mxu1 %v8355_v25  ;;  %v8785_v19 = vld [vmem:[#allocation2 + $0x500] sm:$0xff]  ;;  %v8787_v25 = vld [vmem:[#allocation2 + $0x510] sm:$0xff] }
 0x6fd   :  { %8374 = vmatprep.subr.bf16.mxu0 %v8358_v27  ;;  %8415 = vmatprep.subr.bf16.mxu1 %v8360_v1  ;;  %v8790_v27 = vld [vmem:[#allocation2 + $0x528] sm:$0xff]  ;;  %v8792_v1 = vld [vmem:[#allocation2 + $0x538] sm:$0xff] }
 0x700   :  { %8375 = vmatpush1.bf16.msra.mxu0 %v8357_v23  ;;  %8416 = vmatpush1.bf16.msra.mxu1 %v8359_v30  ;;  %v8791_v23 = vld [vmem:[#allocation2 + $0x530] sm:$0xff]  ;;  %v8794_v30 = vld [vmem:[#allocation2 + $0x548] sm:$0xff] }
 0x701   :  { %8479 = vmatprep.subr.bf16.mxu0 %v8457_v31  ;;  %8520 = vmatprep.subr.bf16.mxu1 %v8459_v22  ;;  %v8796_v31 = vld [vmem:[#allocation2 + $0x558] sm:$0xff]  ;;  %v8793_v22 = vld [vmem:[#allocation2 + $0x540] sm:$0xff] }
 0x703   :  { %12488 = vmatmul.mubr.msk.bf16.vlgmr.msra.gmra.mrb[236].mxu0 %vm5710_vm1, %v8364_v33  ;;  %12489 = vmatmul.mubr.msk.bf16.vlgmr.msra.gmra.mrb[236].mxu1 %vm5710_vm1, %v8364_v33  ;;  %v8795_v33 = vld [vmem:[#allocation2 + $0x550] sm:$0xff] }
 0x704   :  { %8480 = vmatpush1.bf16.msra.mxu0 %v8456_v18  ;;  %8521 = vmatpush1.bf16.msra.mxu1 %v8458_v3  ;;  %v8798_v18 = vld [vmem:[#allocation2 + $0x568] sm:$0xff]  ;;  %v8800_v3 = vld [vmem:[#allocation2 + $0x578] sm:$0xff] }
 0x705   :  { %8481 = vmatprep.subr.bf16.mxu0 %v8461_v36  ;;  %8522 = vmatprep.subr.bf16.mxu1 %v8463_v34  ;;  %v13762_v36 = vld [vmem:[#allocation3 + $0x8] ss:$0 sps:$4 sm:$0x44]   ;;  %v8797_v34 = vld [vmem:[#allocation2 + $0x560] sm:$0xff] }
 0x706   :  { %8511 = vmatprep.mubr.bf16.mxu0 %v13850_v35  ;;  %8552 = vmatprep.mubr.bf16.mxu1 %v13850_v35 }
 0x708   :  { %8482 = vmatpush1.bf16.msra.mxu0 %v8460_v37  ;;  %8523 = vmatpush1.bf16.msra.mxu1 %v8462_v26  ;;  %v8799_v37 = vld [vmem:[#allocation2 + $0x570] sm:$0xff]  ;;  %v8897_v26 = vld [vmem:[#allocation2 + $0x588] sm:$0xff] }
 0x709   :  { %8483 = vmatprep.subr.bf16.mxu0 %v8465_v39  ;;  %8524 = vmatprep.subr.bf16.mxu1 %v8467_v40  ;;  %v8899_v39 = vld [vmem:[#allocation2 + $0x598] sm:$0xff]  ;;  %v8804_v40 = vrot.slane %v13762_v36, 2  ;;  %v9229_v36 = vld [vmem:[#allocation2 + $0x720] sm:$0xff] }
 0x70c   :  { %8484 = vmatpush1.bf16.msra.mxu0 %v8464_v41  ;;  %8525 = vmatpush1.bf16.msra.mxu1 %v8466_v42  ;;  %v8896_v41 = vld [vmem:[#allocation2 + $0x580] sm:$0xff]  ;;  %v8898_v42 = vld [vmem:[#allocation2 + $0x590] sm:$0xff] }
 0x70d   :  { %8485 = vmatprep.subr.bf16.mxu0 %v8469_v45  ;;  %8526 = vmatprep.subr.bf16.mxu1 %v8471_v0  ;;  %v8901_v45 = vld [vmem:[#allocation2 + $0x5a8] sm:$0xff]  ;;  %v8903_v0 = vld [vmem:[#allocation2 + $0x5b8] sm:$0xff] }
 0x710   :  { %8486 = vmatpush1.bf16.msra.mxu0 %v8468_v47  ;;  %8527 = vmatpush1.bf16.msra.mxu1 %v8470_v49  ;;  %v8902_v47 = vld [vmem:[#allocation2 + $0x5b0] sm:$0xff]  ;;  %v8905_v49 = vld [vmem:[#allocation2 + $0x5c8] sm:$0xff] }
 0x711   :  { %8586 = vmatprep.subr.bf16.mxu0 %v8568_v32  ;;  %8627 = vmatprep.subr.bf16.mxu1 %v8570_v50  ;;  %v8907_v32 = vld [vmem:[#allocation2 + $0x5d8] sm:$0xff]  ;;  %v8904_v50 = vld [vmem:[#allocation2 + $0x5c0] sm:$0xff] }
 0x713   :  { %12491 = vmatmul.mubr.msk.bf16.vlgmr.msra.gmra.mrb[240].mxu0 %vm5710_vm1, %v8475_v52  ;;  %12492 = vmatmul.mubr.msk.bf16.vlgmr.msra.gmra.mrb[240].mxu1 %vm5710_vm1, %v8475_v52  ;;  %v8906_v52 = vld [vmem:[#allocation2 + $0x5d0] sm:$0xff] }
 0x714   :  { %8587 = vmatpush1.bf16.msra.mxu0 %v8567_v53  ;;  %8628 = vmatpush1.bf16.msra.mxu1 %v8569_v54  ;;  %v8909_v53 = vld [vmem:[#allocation2 + $0x5e8] sm:$0xff]  ;;  %v8911_v54 = vld [vmem:[#allocation2 + $0x5f8] sm:$0xff] }
 0x715   :  { %8588 = vmatprep.subr.bf16.mxu0 %v8572_v55  ;;  %8629 = vmatprep.subr.bf16.mxu1 %v8574_v57  ;;  %v13763_v55 = vld [vmem:[#allocation3 + $0x8] ss:$0 sps:$4 sm:$0x88]   ;;  %v8908_v57 = vld [vmem:[#allocation2 + $0x5e0] sm:$0xff] }
 0x716   :  { %8618 = vmatprep.mubr.bf16.mxu0 %v13850_v35  ;;  %8659 = vmatprep.mubr.bf16.mxu1 %v13850_v35 }
 0x718   :  { %8589 = vmatpush1.bf16.msra.mxu0 %v8571_v38  ;;  %8630 = vmatpush1.bf16.msra.mxu1 %v8573_v51  ;;  %v8910_v38 = vld [vmem:[#allocation2 + $0x5f0] sm:$0xff]  ;;  %v9008_v51 = vld [vmem:[#allocation2 + $0x608] sm:$0xff] }
 0x719   :  { %8590 = vmatprep.subr.bf16.mxu0 %v8576_v59  ;;  %8631 = vmatprep.subr.bf16.mxu1 %v8578_v60  ;;  %v9010_v59 = vld [vmem:[#allocation2 + $0x618] sm:$0xff]  ;;  %v8915_v60 = vrot.slane %v13763_v55, 3  ;;  %v9239_v55 = vld [vmem:[#allocation2 + $0x770] sm:$0xff] }
 0x71c   :  { %8591 = vmatpush1.bf16.msra.mxu0 %v8575_v61  ;;  %8632 = vmatpush1.bf16.msra.mxu1 %v8577_v63  ;;  %v9007_v61 = vld [vmem:[#allocation2 + $0x600] sm:$0xff]  ;;  %v9009_v63 = vld [vmem:[#allocation2 + $0x610] sm:$0xff] }
 0x71d   :  { %8592 = vmatprep.subr.bf16.mxu0 %v8580_v43  ;;  %8633 = vmatprep.subr.bf16.mxu1 %v8582_v4  ;;  %v9012_v43 = vld [vmem:[#allocation2 + $0x628] sm:$0xff]  ;;  %v9014_v4 = vld [vmem:[#allocation2 + $0x638] sm:$0xff] }
 0x720   :  { %8593 = vmatpush1.bf16.msra.mxu0 %v8579_v56  ;;  %8634 = vmatpush1.bf16.msra.mxu1 %v8581_v58  ;;  %v9011_v56 = vld [vmem:[#allocation2 + $0x620] sm:$0xff]  ;;  %v9013_v58 = vld [vmem:[#allocation2 + $0x630] sm:$0xff] }
 0x721   :  { %8697 = vmatprep.subr.bf16.mxu0 %v8675_v6  ;;  %8738 = vmatprep.subr.bf16.mxu1 %v8677_v8  ;;  %v9016_v6 = vld [vmem:[#allocation2 + $0x648] sm:$0xff]  ;;  %v9018_v8 = vld [vmem:[#allocation2 + $0x658] sm:$0xff] }
 0x723   :  { %12493 = vmatmul.mubr.msk.bf16.vlgmr.msra.gmra.mrb[244].mxu0 %vm5710_vm1, %v8565_v2  ;;  %12494 = vmatmul.mubr.msk.bf16.vlgmr.msra.gmra.mrb[244].mxu1 %vm5710_vm1, %v8565_v2  ;;  %v9015_v2 = vld [vmem:[#allocation2 + $0x640] sm:$0xff] }
 0x724   :  { %8698 = vmatpush1.bf16.msra.mxu0 %v8674_v9  ;;  %8739 = vmatpush1.bf16.msra.mxu1 %v8676_v10  ;;  %v9017_v9 = vld [vmem:[#allocation2 + $0x650] sm:$0xff]  ;;  %v9020_v10 = vld [vmem:[#allocation2 + $0x668] sm:$0xff] }
 0x725   :  { %8699 = vmatprep.subr.bf16.mxu0 %v8679_v11  ;;  %8740 = vmatprep.subr.bf16.mxu1 %v8681_v62  ;;  %v9022_v11 = vld [vmem:[#allocation2 + $0x678] sm:$0xff]  ;;  %v9019_v62 = vld [vmem:[#allocation2 + $0x660] sm:$0xff] }
 0x726   :  { %8729 = vmatprep.mubr.bf16.mxu0 %v13850_v35  ;;  %8770 = vmatprep.mubr.bf16.mxu1 %v13850_v35 }
 0x728   :  { %8700 = vmatpush1.bf16.msra.mxu0 %v8678_v29  ;;  %8741 = vmatpush1.bf16.msra.mxu1 %v8680_v12  ;;  %v9021_v29 = vld [vmem:[#allocation2 + $0x670] sm:$0xff]  ;;  %v9115_v12 = vld [vmem:[#allocation2 + $0x688] sm:$0xff] }
 0x729   :  { %8701 = vmatprep.subr.bf16.mxu0 %v8683_v13  ;;  %8742 = vmatprep.subr.bf16.mxu1 %v8685_v14  ;;  %v9117_v13 = vld [vmem:[#allocation2 + $0x698] sm:$0xff]  ;;  %v9005_v14 = vld [vmem:[#allocation3 + $0xc] sm:$0x1] }
 0x72c   :  { %8702 = vmatpush1.bf16.msra.mxu0 %v8682_v48  ;;  %8743 = vmatpush1.bf16.msra.mxu1 %v8684_v7  ;;  %v9114_v48 = vld [vmem:[#allocation2 + $0x680] sm:$0xff]  ;;  %v9116_v7 = vld [vmem:[#allocation2 + $0x690] sm:$0xff] }
 0x72d   :  { %8703 = vmatprep.subr.bf16.mxu0 %v8687_v15  ;;  %8744 = vmatprep.subr.bf16.mxu1 %v8689_v16  ;;  %v9119_v15 = vld [vmem:[#allocation2 + $0x6a8] sm:$0xff]  ;;  %v9121_v16 = vld [vmem:[#allocation2 + $0x6b8] sm:$0xff] }
 0x730   :  { %8704 = vmatpush1.bf16.msra.mxu0 %v8686_v5  ;;  %8745 = vmatpush1.bf16.msra.mxu1 %v8688_v24  ;;  %v9120_v5 = vld [vmem:[#allocation2 + $0x6b0] sm:$0xff]  ;;  %v9123_v24 = vld [vmem:[#allocation2 + $0x6c8] sm:$0xff] }
 0x731   :  { %8808 = vmatprep.subr.bf16.mxu0 %v8786_v20  ;;  %8849 = vmatprep.subr.bf16.mxu1 %v8788_v44  ;;  %v9125_v20 = vld [vmem:[#allocation2 + $0x6d8] sm:$0xff]  ;;  %v9122_v44 = vld [vmem:[#allocation2 + $0x6c0] sm:$0xff] }
 0x733   :  { %12496 = vmatmul.mubr.msk.bf16.vlgmr.msra.gmra.mrb[248].mxu0 %vm5710_vm1, %v8693_v21  ;;  %12497 = vmatmul.mubr.msk.bf16.vlgmr.msra.gmra.mrb[248].mxu1 %vm5710_vm1, %v8693_v21  ;;  %v9124_v21 = vld [vmem:[#allocation2 + $0x6d0] sm:$0xff] }
 0x734   :  { %8809 = vmatpush1.bf16.msra.mxu0 %v8785_v19  ;;  %8850 = vmatpush1.bf16.msra.mxu1 %v8787_v25  ;;  %v9127_v19 = vld [vmem:[#allocation2 + $0x6e8] sm:$0xff]  ;;  %v9129_v25 = vld [vmem:[#allocation2 + $0x6f8] sm:$0xff] }
 0x735   :  { %8810 = vmatprep.subr.bf16.mxu0 %v8790_v27  ;;  %8851 = vmatprep.subr.bf16.mxu1 %v8792_v1  ;;  %v13764_v27 = vld [vmem:[#allocation3 + $0xc] ss:$0 sps:$4 sm:$0x22]   ;;  %v9126_v1 = vld [vmem:[#allocation2 + $0x6e0] sm:$0xff] }
 0x736   :  { %8840 = vmatprep.mubr.bf16.mxu0 %v13850_v35  ;;  %8881 = vmatprep.mubr.bf16.mxu1 %v13850_v35 }
 0x738   :  { %8811 = vmatpush1.bf16.msra.mxu0 %v8789_v28  ;;  %8852 = vmatpush1.bf16.msra.mxu1 %v8791_v23  ;;  %v9128_v28 = vld [vmem:[#allocation2 + $0x6f0] sm:$0xff]  ;;  %v9226_v23 = vld [vmem:[#allocation2 + $0x708] sm:$0xff] }
 0x739   :  { %8812 = vmatprep.subr.bf16.mxu0 %v8794_v30  ;;  %8853 = vmatprep.subr.bf16.mxu1 %v8796_v31  ;;  %v9228_v30 = vld [vmem:[#allocation2 + $0x718] sm:$0xff]  ;;  %v9133_v31 = vrot.slane %v13764_v27, 1  ;;  %v9449_v27 = vld [vmem:[#allocation2 + $0x810] sm:$0xff] }
 0x73c   :  { %8813 = vmatpush1.bf16.msra.mxu0 %v8793_v22  ;;  %8854 = vmatpush1.bf16.msra.mxu1 %v8795_v33  ;;  %v9225_v22 = vld [vmem:[#allocation2 + $0x700] sm:$0xff]  ;;  %v9227_v33 = vld [vmem:[#allocation2 + $0x710] sm:$0xff] }
 0x73d   :  { %8814 = vmatprep.subr.bf16.mxu0 %v8798_v18  ;;  %8855 = vmatprep.subr.bf16.mxu1 %v8800_v3  ;;  %v9230_v18 = vld [vmem:[#allocation2 + $0x728] sm:$0xff]  ;;  %v9232_v3 = vld [vmem:[#allocation2 + $0x738] sm:$0xff] }
 0x740   :  { %8815 = vmatpush1.bf16.msra.mxu0 %v8797_v34  ;;  %8856 = vmatpush1.bf16.msra.mxu1 %v8799_v37  ;;  %v9231_v34 = vld [vmem:[#allocation2 + $0x730] sm:$0xff] }
 0x741   :  { %8919 = vmatprep.subr.bf16.mxu0 %v8897_v26  ;;  %8960 = vmatprep.subr.bf16.mxu1 %v8899_v39  ;;  %v9234_v39 = vld [vmem:[#allocation2 + $0x748] sm:$0xff] }
 0x743   :  { %12499 = vmatmul.mubr.msk.bf16.vlgmr.msra.gmra.mrb[252].mxu0 %vm5710_vm1, %v8804_v40  ;;  %12500 = vmatmul.mubr.msk.bf16.vlgmr.msra.gmra.mrb[252].mxu1 %vm5710_vm1, %v8804_v40  ;;  %v9236_v40 = vld [vmem:[#allocation2 + $0x758] sm:$0xff] }
 0x744   :  { %8920 = vmatpush1.bf16.msra.mxu0 %v8896_v41  ;;  %8961 = vmatpush1.bf16.msra.mxu1 %v8898_v42 }
 0x745   :  { %8921 = vmatprep.subr.bf16.mxu0 %v8901_v45  ;;  %8962 = vmatprep.subr.bf16.mxu1 %v8903_v0 }
 0x746   :  { %8951 = vmatprep.mubr.bf16.mxu0 %v13850_v35  ;;  %8992 = vmatprep.mubr.bf16.mxu1 %v13850_v35 }
 0x748   :  { %8922 = vmatpush1.bf16.msra.mxu0 %v8900_v46  ;;  %8963 = vmatpush1.bf16.msra.mxu1 %v8902_v47 }
 0x749   :  { %8923 = vmatprep.subr.bf16.mxu0 %v8905_v49  ;;  %8964 = vmatprep.subr.bf16.mxu1 %v8907_v32  ;;  %v9233_v49 = vld [vmem:[#allocation2 + $0x740] sm:$0xff]  ;;  %v9235_v32 = vld [vmem:[#allocation2 + $0x750] sm:$0xff] }
 0x74c   :  { %8924 = vmatpush1.bf16.msra.mxu0 %v8904_v50  ;;  %8965 = vmatpush1.bf16.msra.mxu1 %v8906_v52  ;;  %v9238_v50 = vld [vmem:[#allocation2 + $0x768] sm:$0xff]  ;;  %v9240_v52 = vld [vmem:[#allocation2 + $0x778] sm:$0xff] }
 0x74d   :  { %8925 = vmatprep.subr.bf16.mxu0 %v8909_v53  ;;  %8966 = vmatprep.subr.bf16.mxu1 %v8911_v54  ;;  %v13765_v53 = vld [vmem:[#allocation3 + $0xc] ss:$0 sps:$4 sm:$0x44]   ;;  %v9237_v54 = vld [vmem:[#allocation2 + $0x760] sm:$0xff] }
 0x750   :  { %8926 = vmatpush1.bf16.msra.mxu0 %v8908_v57  ;;  %8967 = vmatpush1.bf16.msra.mxu1 %v8910_v38  ;;  %v9337_v57 = vld [vmem:[#allocation2 + $0x788] sm:$0xff]  ;;  %v9339_v38 = vld [vmem:[#allocation2 + $0x798] sm:$0xff] }
 0x751   :  { %9026 = vmatprep.subr.bf16.mxu0 %v9008_v51  ;;  %9067 = vmatprep.subr.bf16.mxu1 %v9010_v59  ;;  %v9244_v51 = vrot.slane %v13765_v53, 2  ;;  %v9336_v59 = vld [vmem:[#allocation2 + $0x780] sm:$0xff]  ;;  %v9557_v53 = vld [vmem:[#allocation2 + $0x898] sm:$0xff] }
 0x753   :  { %12502 = vmatmul.mubr.msk.bf16.vlgmr.msra.gmra.mrb[0].mxu0 %vm5710_vm1, %v8915_v60  ;;  %12503 = vmatmul.mubr.msk.bf16.vlgmr.msra.gmra.mrb[0].mxu1 %vm5710_vm1, %v8915_v60  ;;  %v9338_v60 = vld [vmem:[#allocation2 + $0x790] sm:$0xff] }
 0x754   :  { %9027 = vmatpush1.bf16.msra.mxu0 %v9007_v61  ;;  %9068 = vmatpush1.bf16.msra.mxu1 %v9009_v63  ;;  %v9341_v61 = vld [vmem:[#allocation2 + $0x7a8] sm:$0xff]  ;;  %v9343_v63 = vld [vmem:[#allocation2 + $0x7b8] sm:$0xff] }
 0x755   :  { %9028 = vmatprep.subr.bf16.mxu0 %v9012_v43  ;;  %9069 = vmatprep.subr.bf16.mxu1 %v9014_v4  ;;  %v9340_v43 = vld [vmem:[#allocation2 + $0x7a0] sm:$0xff]  ;;  %v9342_v4 = vld [vmem:[#allocation2 + $0x7b0] sm:$0xff] }
 0x756   :  { %9058 = vmatprep.mubr.bf16.mxu0 %v13850_v35  ;;  %9099 = vmatprep.mubr.bf16.mxu1 %v13850_v35 }
 0x758   :  { %9029 = vmatpush1.bf16.msra.mxu0 %v9011_v56  ;;  %9070 = vmatpush1.bf16.msra.mxu1 %v9013_v58 }
 0x759   :  { %9030 = vmatprep.subr.bf16.mxu0 %v9016_v6  ;;  %9071 = vmatprep.subr.bf16.mxu1 %v9018_v8  ;;  %v9345_v6 = vld [vmem:[#allocation2 + $0x7c8] sm:$0xff]  ;;  %v9347_v8 = vld [vmem:[#allocation2 + $0x7d8] sm:$0xff] }
 0x75c   :  { %9031 = vmatpush1.bf16.msra.mxu0 %v9015_v2  ;;  %9072 = vmatpush1.bf16.msra.mxu1 %v9017_v9 }
 0x75d   :  { %9032 = vmatprep.subr.bf16.mxu0 %v9020_v10  ;;  %9073 = vmatprep.subr.bf16.mxu1 %v9022_v11 }
 0x760   :  { %9033 = vmatpush1.bf16.msra.mxu0 %v9019_v62  ;;  %9074 = vmatpush1.bf16.msra.mxu1 %v9021_v29 }
 0x761   :  { %9137 = vmatprep.subr.bf16.mxu0 %v9115_v12  ;;  %9178 = vmatprep.subr.bf16.mxu1 %v9117_v13 }
 0x763   :  { %12504 = vmatmul.mubr.msk.bf16.vlgmr.msra.gmra.mrb[4].mxu0 %vm5710_vm1, %v9005_v14  ;;  %12505 = vmatmul.mubr.msk.bf16.vlgmr.msra.gmra.mrb[4].mxu1 %vm5710_vm1, %v9005_v14 }
 0x764   :  { %9138 = vmatpush1.bf16.msra.mxu0 %v9114_v48  ;;  %9179 = vmatpush1.bf16.msra.mxu1 %v9116_v7  ;;  %v9344_v7 = vld [vmem:[#allocation2 + $0x7c0] sm:$0xff] }
 0x765   :  { %9139 = vmatprep.subr.bf16.mxu0 %v9119_v15  ;;  %9180 = vmatprep.subr.bf16.mxu1 %v9121_v16  ;;  %v9346_v15 = vld [vmem:[#allocation2 + $0x7d0] sm:$0xff]  ;;  %v9349_v16 = vld [vmem:[#allocation2 + $0x7e8] sm:$0xff] }
 0x766   :  { %9169 = vmatprep.mubr.bf16.mxu0 %v13850_v35  ;;  %9210 = vmatprep.mubr.bf16.mxu1 %v13850_v35 }
 0x768   :  { %9140 = vmatpush1.bf16.msra.mxu0 %v9118_v17  ;;  %9181 = vmatpush1.bf16.msra.mxu1 %v9120_v5  ;;  %v9351_v17 = vld [vmem:[#allocation2 + $0x7f8] sm:$0xff]  ;;  %v13766_v5 = vld [vmem:[#allocation3 + $0xc] ss:$0 sps:$4 sm:$0x88]  }
 0x769   :  { %9141 = vmatprep.subr.bf16.mxu0 %v9123_v24  ;;  %9182 = vmatprep.subr.bf16.mxu1 %v9125_v20  ;;  %v9348_v24 = vld [vmem:[#allocation2 + $0x7e0] sm:$0xff]  ;;  %v9350_v20 = vld [vmem:[#allocation2 + $0x7f0] sm:$0xff] }
 0x76c   :  { %9142 = vmatpush1.bf16.msra.mxu0 %v9122_v44  ;;  %9183 = vmatpush1.bf16.msra.mxu1 %v9124_v21  ;;  %v9448_v44 = vld [vmem:[#allocation2 + $0x808] sm:$0xff]  ;;  %v9450_v21 = vld [vmem:[#allocation2 + $0x818] sm:$0xff] }
 0x76d   :  { %9143 = vmatprep.subr.bf16.mxu0 %v9127_v19  ;;  %9184 = vmatprep.subr.bf16.mxu1 %v9129_v25  ;;  %v9355_v19 = vrot.slane %v13766_v5, 3  ;;  %v9447_v25 = vld [vmem:[#allocation2 + $0x800] sm:$0xff]  ;;  %v9668_v5 = vld [vmem:[#allocation2 + $0x918] sm:$0xff] }
 0x770   :  { %9144 = vmatpush1.bf16.msra.mxu0 %v9126_v1  ;;  %9185 = vmatpush1.bf16.msra.mxu1 %v9128_v28  ;;  %v9452_v1 = vld [vmem:[#allocation2 + $0x828] sm:$0xff]  ;;  %v9454_v28 = vld [vmem:[#allocation2 + $0x838] sm:$0xff] }
 0x771   :  { %9248 = vmatprep.subr.bf16.mxu0 %v9226_v23  ;;  %9289 = vmatprep.subr.bf16.mxu1 %v9228_v30  ;;  %v9451_v23 = vld [vmem:[#allocation2 + $0x820] sm:$0xff]  ;;  %v9453_v30 = vld [vmem:[#allocation2 + $0x830] sm:$0xff] }
 0x773   :  { %12507 = vmatmul.mubr.msk.bf16.vlgmr.msra.gmra.mrb[8].mxu0 %vm5710_vm1, %v9133_v31  ;;  %12508 = vmatmul.mubr.msk.bf16.vlgmr.msra.gmra.mrb[8].mxu1 %vm5710_vm1, %v9133_v31 }
 0x774   :  { %9249 = vmatpush1.bf16.msra.mxu0 %v9225_v22  ;;  %9290 = vmatpush1.bf16.msra.mxu1 %v9227_v33  ;;  %v9456_v33 = vld [vmem:[#allocation2 + $0x848] sm:$0xff] }
 0x775   :  { %9250 = vmatprep.subr.bf16.mxu0 %v9230_v18  ;;  %9291 = vmatprep.subr.bf16.mxu1 %v9232_v3  ;;  %v9458_v18 = vld [vmem:[#allocation2 + $0x858] sm:$0xff] }
 0x776   :  { %v7770_v37 = vpop.f32.mrb[212].mxu0  ;;  %v7811_v26 = vpop.f32.mrb[212].mxu1  ;;  %9280 = vmatprep.mubr.bf16.mxu0 %v13850_v35  ;;  %9321 = vmatprep.mubr.bf16.mxu1 %v13850_v35 }
 0x777   :  { %v7772_v41 = vpop.f32.mrb[213].mxu0  ;;  %v7813_v42 = vpop.f32.mrb[213].mxu1 }
 0x778   :  { %v7774_v45 = vpop.f32.mrb[214].mxu0  ;;  %v7815_v0 = vpop.f32.mrb[214].mxu1  ;;  %9251 = vmatpush1.bf16.msra.mxu0 %v9229_v36  ;;  %9292 = vmatpush1.bf16.msra.mxu1 %v9231_v34 }
 0x779   :  { %v7775_v46 = vpop.f32.mrb[215].mxu0  ;;  %v7816_v47 = vpop.f32.mrb[215].mxu1  ;;  %9252 = vmatprep.subr.bf16.mxu0 %v9234_v39  ;;  %9293 = vmatprep.subr.bf16.mxu1 %v9236_v40  ;;  %v9455_v0 = vld [vmem:[#allocation2 + $0x840] sm:$0xff] }
 0x77a   :  { %v9457_v46 = vld [vmem:[#allocation2 + $0x850] sm:$0xff]  ;;  %v9460_v47 = vld [vmem:[#allocation2 + $0x868] sm:$0xff] }
 0x77c   :  { %9253 = vmatpush1.bf16.msra.mxu0 %v9233_v49  ;;  %9294 = vmatpush1.bf16.msra.mxu1 %v9235_v32  ;;  %v9462_v49 = vld [vmem:[#allocation2 + $0x878] sm:$0xff]  ;;  %v9459_v32 = vld [vmem:[#allocation2 + $0x860] sm:$0xff] }
 0x77d   :  { %9254 = vmatprep.subr.bf16.mxu0 %v9238_v50  ;;  %9295 = vmatprep.subr.bf16.mxu1 %v9240_v52  ;;  %v9461_v50 = vld [vmem:[#allocation2 + $0x870] sm:$0xff]  ;;  %v9555_v52 = vld [vmem:[#allocation2 + $0x888] sm:$0xff] }
 0x780   :  { %9255 = vmatpush1.bf16.msra.mxu0 %v9237_v54  ;;  %9296 = vmatpush1.bf16.msra.mxu1 %v9239_v55  ;;  %v9445_v54 = vld [vmem:[#allocation3 + $0x10] sm:$0x1]  ;;  %v9554_v55 = vld [vmem:[#allocation2 + $0x880] sm:$0xff] }
 0x781   :  { %9359 = vmatprep.subr.bf16.mxu0 %v9337_v57  ;;  %9400 = vmatprep.subr.bf16.mxu1 %v9339_v38  ;;  %v9556_v57 = vld [vmem:[#allocation2 + $0x890] sm:$0xff]  ;;  %v9559_v38 = vld [vmem:[#allocation2 + $0x8a8] sm:$0xff] }
 0x783   :  { %12510 = vmatmul.mubr.msk.bf16.vlgmr.msra.gmra.mrb[12].mxu0 %vm5710_vm1, %v9244_v51  ;;  %12511 = vmatmul.mubr.msk.bf16.vlgmr.msra.gmra.mrb[12].mxu1 %vm5710_vm1, %v9244_v51  ;;  %v9561_v51 = vld [vmem:[#allocation2 + $0x8b8] sm:$0xff] }
 0x784   :  { %9360 = vmatpush1.bf16.msra.mxu0 %v9336_v59  ;;  %9401 = vmatpush1.bf16.msra.mxu1 %v9338_v60  ;;  %v9558_v59 = vld [vmem:[#allocation2 + $0x8a0] sm:$0xff]  ;;  %v9560_v60 = vld [vmem:[#allocation2 + $0x8b0] sm:$0xff] }
 0x785   :  { %9361 = vmatprep.subr.bf16.mxu0 %v9341_v61  ;;  %9402 = vmatprep.subr.bf16.mxu1 %v9343_v63 }
 0x786   :  { %v7855_v56 = vpop.f32.mrb[216].mxu0  ;;  %v7896_v58 = vpop.f32.mrb[216].mxu1  ;;  %9391 = vmatprep.mubr.bf16.mxu0 %v13850_v35  ;;  %9432 = vmatprep.mubr.bf16.mxu1 %v13850_v35 }
 0x787   :  { %v7856_v2 = vadd.f32 %v7855_v56, %v7770_v37  ;;  %v7897_v9 = vadd.f32 %v7896_v58, %v7811_v26  ;;  %v7857_v10 = vpop.f32.mrb[217].mxu0  ;;  %v7898_v11 = vpop.f32.mrb[217].mxu1 }
 0x788   :  { %v7858_v62 = vadd.f32 %v7857_v10, %v7772_v41  ;;  %v7899_v29 = vadd.f32 %v7898_v11, %v7813_v42  ;;  %v7859_v12 = vpop.f32.mrb[218].mxu0  ;;  %v7900_v13 = vpop.f32.mrb[218].mxu1  ;;  %9362 = vmatpush1.bf16.msra.mxu0 %v9340_v43  ;;  %9403 = vmatpush1.bf16.msra.mxu1 %v9342_v4  ;;  %v9563_v43 = vld [vmem:[#allocation2 + $0x8c8] sm:$0xff]  ;;  %v9565_v4 = vld [vmem:[#allocation2 + $0x8d8] sm:$0xff] }
 0x789   :  { %v7860_v14 = vpop.f32.mrb[219].mxu0  ;;  %v7901_v48 = vpop.f32.mrb[219].mxu1  ;;  %9363 = vmatprep.subr.bf16.mxu0 %v9345_v6  ;;  %9404 = vmatprep.subr.bf16.mxu1 %v9347_v8  ;;  %v9562_v12 = vld [vmem:[#allocation2 + $0x8c0] sm:$0xff]  ;;  %v9564_v13 = vld [vmem:[#allocation2 + $0x8d0] sm:$0xff] }
 0x78a   :  { %v9567_v14 = vld [vmem:[#allocation2 + $0x8e8] sm:$0xff]  ;;  %v9569_v48 = vld [vmem:[#allocation2 + $0x8f8] sm:$0xff] }
 0x78c   :  { %9364 = vmatpush1.bf16.msra.mxu0 %v9344_v7  ;;  %9405 = vmatpush1.bf16.msra.mxu1 %v9346_v15  ;;  %v13767_v7 = vld [vmem:[#allocation3 + $0x10] ss:$0 sps:$4 sm:$0x22]   ;;  %v9566_v15 = vld [vmem:[#allocation2 + $0x8e0] sm:$0xff] }
 0x78d   :  { %9365 = vmatprep.subr.bf16.mxu0 %v9349_v16  ;;  %9406 = vmatprep.subr.bf16.mxu1 %v9351_v17  ;;  %v9568_v16 = vld [vmem:[#allocation2 + $0x8f0] sm:$0xff]  ;;  %v9666_v17 = vld [vmem:[#allocation2 + $0x908] sm:$0xff] }
 0x790   :  { %9366 = vmatpush1.bf16.msra.mxu0 %v9348_v24  ;;  %9407 = vmatpush1.bf16.msra.mxu1 %v9350_v20  ;;  %v9573_v24 = vrot.slane %v13767_v7, 1  ;;  %v9665_v20 = vld [vmem:[#allocation2 + $0x900] sm:$0xff]  ;;  %v9888_v7 = vld [vmem:[#allocation2 + $0xa08] sm:$0xff] }
 0x791   :  { %9466 = vmatprep.subr.bf16.mxu0 %v9448_v44  ;;  %9507 = vmatprep.subr.bf16.mxu1 %v9450_v21  ;;  %v9667_v44 = vld [vmem:[#allocation2 + $0x910] sm:$0xff]  ;;  %v9670_v21 = vld [vmem:[#allocation2 + $0x928] sm:$0xff] }
 0x793   :  { %12513 = vmatmul.mubr.msk.bf16.vlgmr.msra.gmra.mrb[16].mxu0 %vm5710_vm1, %v9355_v19  ;;  %12514 = vmatmul.mubr.msk.bf16.vlgmr.msra.gmra.mrb[16].mxu1 %vm5710_vm1, %v9355_v19  ;;  %v9672_v19 = vld [vmem:[#allocation2 + $0x938] sm:$0xff] }
 0x794   :  { %9467 = vmatpush1.bf16.msra.mxu0 %v9447_v25  ;;  %9508 = vmatpush1.bf16.msra.mxu1 %v9449_v27  ;;  %v9669_v25 = vld [vmem:[#allocation2 + $0x920] sm:$0xff]  ;;  %v9671_v27 = vld [vmem:[#allocation2 + $0x930] sm:$0xff] }
 0x795   :  { %9468 = vmatprep.subr.bf16.mxu0 %v9452_v1  ;;  %9509 = vmatprep.subr.bf16.mxu1 %v9454_v28 }
 0x796   :  { %v7962_v31 = vpop.f32.mrb[220].mxu0  ;;  %v8003_v22 = vpop.f32.mrb[220].mxu1  ;;  %9498 = vmatprep.mubr.bf16.mxu0 %v13850_v35  ;;  %9539 = vmatprep.mubr.bf16.mxu1 %v13850_v35 }
 0x797   :  { %v8010_v3 = vadd.f32 %v7962_v31, %v7856_v2  ;;  %v8012_v36 = vadd.f32 %v8003_v22, %v7897_v9  ;;  %v7964_v34 = vpop.f32.mrb[221].mxu0  ;;  %v8005_v37 = vpop.f32.mrb[221].mxu1 }
 0x798   :  { %v8011_v26 = vadd.f32 %v7964_v34, %v7858_v62  ;;  %v8013_v39 = vadd.f32 %v8005_v37, %v7899_v29  ;;  %v7966_v40 = vpop.f32.mrb[222].mxu0  ;;  %v8007_v41 = vpop.f32.mrb[222].mxu1  ;;  %9469 = vmatpush1.bf16.msra.mxu0 %v9451_v23  ;;  %9510 = vmatpush1.bf16.msra.mxu1 %v9453_v30  ;;  %v9674_v23 = vld [vmem:[#allocation2 + $0x948] sm:$0xff]  ;;  %v9676_v30 = vld [vmem:[#allocation2 + $0x958] sm:$0xff] }
 0x799   :  { %v7967_v42 = vpop.f32.mrb[223].mxu0  ;;  %v8008_v45 = vpop.f32.mrb[223].mxu1  ;;  %9470 = vmatprep.subr.bf16.mxu0 %v9456_v33  ;;  %9511 = vmatprep.subr.bf16.mxu1 %v9458_v18  ;;  %v9673_v40 = vld [vmem:[#allocation2 + $0x940] sm:$0xff]  ;;  %v9675_v41 = vld [vmem:[#allocation2 + $0x950] sm:$0xff] }
 0x79a   :  { %v9678_v42 = vld [vmem:[#allocation2 + $0x968] sm:$0xff]  ;;  %v9680_v45 = vld [vmem:[#allocation2 + $0x978] sm:$0xff] }
 0x79c   :  { %9471 = vmatpush1.bf16.msra.mxu0 %v9455_v0  ;;  %9512 = vmatpush1.bf16.msra.mxu1 %v9457_v46  ;;  %v13768_v0 = vld [vmem:[#allocation3 + $0x10] ss:$0 sps:$4 sm:$0x44]   ;;  %v9677_v46 = vld [vmem:[#allocation2 + $0x960] sm:$0xff] }
 0x79d   :  { %9472 = vmatprep.subr.bf16.mxu0 %v9460_v47  ;;  %9513 = vmatprep.subr.bf16.mxu1 %v9462_v49  ;;  %v9679_v47 = vld [vmem:[#allocation2 + $0x970] sm:$0xff]  ;;  %v9777_v49 = vld [vmem:[#allocation2 + $0x988] sm:$0xff] }
 0x7a0   :  { %9473 = vmatpush1.bf16.msra.mxu0 %v9459_v32  ;;  %9514 = vmatpush1.bf16.msra.mxu1 %v9461_v50  ;;  %v9779_v32 = vld [vmem:[#allocation2 + $0x998] sm:$0xff]  ;;  %v9684_v50 = vrot.slane %v13768_v0, 2 }
 0x7a1   :  { %9577 = vmatprep.subr.bf16.mxu0 %v9555_v52  ;;  %9618 = vmatprep.subr.bf16.mxu1 %v9557_v53  ;;  %v9776_v52 = vld [vmem:[#allocation2 + $0x980] sm:$0xff]  ;;  %v9778_v53 = vld [vmem:[#allocation2 + $0x990] sm:$0xff]  ;;  %v9997_v0 = vld [vmem:[#allocation2 + $0xa98] sm:$0xff] }
 0x7a3   :  { %12515 = vmatmul.mubr.msk.bf16.vlgmr.msra.gmra.mrb[20].mxu0 %vm5710_vm1, %v9445_v54  ;;  %12516 = vmatmul.mubr.msk.bf16.vlgmr.msra.gmra.mrb[20].mxu1 %vm5710_vm1, %v9445_v54  ;;  %v9781_v54 = vld [vmem:[#allocation2 + $0x9a8] sm:$0xff] }
 0x7a4   :  { %9578 = vmatpush1.bf16.msra.mxu0 %v9554_v55  ;;  %9619 = vmatpush1.bf16.msra.mxu1 %v9556_v57  ;;  %v9783_v55 = vld [vmem:[#allocation2 + $0x9b8] sm:$0xff]  ;;  %v9780_v57 = vld [vmem:[#allocation2 + $0x9a0] sm:$0xff] }
 0x7a5   :  { %9579 = vmatprep.subr.bf16.mxu0 %v9559_v38  ;;  %9620 = vmatprep.subr.bf16.mxu1 %v9561_v51  ;;  %v9782_v38 = vld [vmem:[#allocation2 + $0x9b0] sm:$0xff] }
 0x7a6   :  { %v8073_v61 = vpop.f32.mrb[224].mxu0  ;;  %v8114_v63 = vpop.f32.mrb[224].mxu1  ;;  %9609 = vmatprep.mubr.bf16.mxu0 %v13850_v35  ;;  %9650 = vmatprep.mubr.bf16.mxu1 %v13850_v35 }
 0x7a7   :  { %v8121_v56 = vadd.f32 %v8073_v61, %v8010_v3  ;;  %v8123_v58 = vadd.f32 %v8114_v63, %v8012_v36  ;;  %v8075_v6 = vpop.f32.mrb[225].mxu0  ;;  %v8116_v8 = vpop.f32.mrb[225].mxu1  ;;  %v9787_v61 = vld [vmem:[#allocation2 + $0x9d8] sm:$0xff] }
 0x7a8   :  { %v8122_v2 = vadd.f32 %v8075_v6, %v8011_v26  ;;  %v8124_v9 = vadd.f32 %v8116_v8, %v8013_v39  ;;  %v8077_v10 = vpop.f32.mrb[226].mxu0  ;;  %v8118_v11 = vpop.f32.mrb[226].mxu1  ;;  %9580 = vmatpush1.bf16.msra.mxu0 %v9558_v59  ;;  %9621 = vmatpush1.bf16.msra.mxu1 %v9560_v60  ;;  %v9785_v60 = vld [vmem:[#allocation2 + $0x9c8] sm:$0xff] }
 0x7a9   :  { %v8078_v62 = vpop.f32.mrb[227].mxu0  ;;  %v8119_v29 = vpop.f32.mrb[227].mxu1  ;;  %9581 = vmatprep.subr.bf16.mxu0 %v9563_v43  ;;  %9622 = vmatprep.subr.bf16.mxu1 %v9565_v4  ;;  %v9784_v11 = vld [vmem:[#allocation2 + $0x9c0] sm:$0xff] }
 0x7aa   :  { %v9786_v62 = vld [vmem:[#allocation2 + $0x9d0] sm:$0xff]  ;;  %v9789_v29 = vld [vmem:[#allocation2 + $0x9e8] sm:$0xff] }
 0x7ac   :  { %9582 = vmatpush1.bf16.msra.mxu0 %v9562_v12  ;;  %9623 = vmatpush1.bf16.msra.mxu1 %v9564_v13  ;;  %v9791_v12 = vld [vmem:[#allocation2 + $0x9f8] sm:$0xff]  ;;  %v13769_v13 = vld [vmem:[#allocation3 + $0x10] ss:$0 sps:$4 sm:$0x88]  }
 0x7ad   :  { %9583 = vmatprep.subr.bf16.mxu0 %v9567_v14  ;;  %9624 = vmatprep.subr.bf16.mxu1 %v9569_v48  ;;  %v9788_v14 = vld [vmem:[#allocation2 + $0x9e0] sm:$0xff]  ;;  %v9790_v48 = vld [vmem:[#allocation2 + $0x9f0] sm:$0xff] }
 0x7b0   :  { %9584 = vmatpush1.bf16.msra.mxu0 %v9566_v15  ;;  %9625 = vmatpush1.bf16.msra.mxu1 %v9568_v16  ;;  %v9890_v15 = vld [vmem:[#allocation2 + $0xa18] sm:$0xff]  ;;  %v9795_v16 = vrot.slane %v13769_v13, 3 }
 0x7b1   :  { %9688 = vmatprep.subr.bf16.mxu0 %v9666_v17  ;;  %9729 = vmatprep.subr.bf16.mxu1 %v9668_v5  ;;  %v9887_v17 = vld [vmem:[#allocation2 + $0xa00] sm:$0xff]  ;;  %v9889_v5 = vld [vmem:[#allocation2 + $0xa10] sm:$0xff]  ;;  %v10108_v13 = vld [vmem:[#allocation2 + $0xb18] sm:$0xff] }
 0x7b3   :  { %12518 = vmatmul.mubr.msk.bf16.vlgmr.msra.gmra.mrb[24].mxu0 %vm5710_vm1, %v9573_v24  ;;  %12519 = vmatmul.mubr.msk.bf16.vlgmr.msra.gmra.mrb[24].mxu1 %vm5710_vm1, %v9573_v24  ;;  %v9892_v24 = vld [vmem:[#allocation2 + $0xa28] sm:$0xff] }
 0x7b4   :  { %9689 = vmatpush1.bf16.msra.mxu0 %v9665_v20  ;;  %9730 = vmatpush1.bf16.msra.mxu1 %v9667_v44  ;;  %v9894_v20 = vld [vmem:[#allocation2 + $0xa38] sm:$0xff]  ;;  %v9891_v44 = vld [vmem:[#allocation2 + $0xa20] sm:$0xff] }
 0x7b5   :  { %9690 = vmatprep.subr.bf16.mxu0 %v9670_v21  ;;  %9731 = vmatprep.subr.bf16.mxu1 %v9672_v19  ;;  %v9893_v21 = vld [vmem:[#allocation2 + $0xa30] sm:$0xff] }
 0x7b6   :  { %v8180_v1 = vpop.f32.mrb[228].mxu0  ;;  %v8221_v28 = vpop.f32.mrb[228].mxu1  ;;  %9720 = vmatprep.mubr.bf16.mxu0 %v13850_v35  ;;  %9761 = vmatprep.mubr.bf16.mxu1 %v13850_v35 }
 0x7b7   :  { %v8228_v31 = vadd.f32 %v8180_v1, %v8121_v56  ;;  %v8230_v22 = vadd.f32 %v8221_v28, %v8123_v58  ;;  %v8182_v33 = vpop.f32.mrb[229].mxu0  ;;  %v8223_v18 = vpop.f32.mrb[229].mxu1  ;;  %v9898_v1 = vld [vmem:[#allocation2 + $0xa58] sm:$0xff] }
 0x7b8   :  { %v8229_v3 = vadd.f32 %v8182_v33, %v8122_v2  ;;  %v8231_v36 = vadd.f32 %v8223_v18, %v8124_v9  ;;  %v8184_v34 = vpop.f32.mrb[230].mxu0  ;;  %v8225_v37 = vpop.f32.mrb[230].mxu1  ;;  %9691 = vmatpush1.bf16.msra.mxu0 %v9669_v25  ;;  %9732 = vmatpush1.bf16.msra.mxu1 %v9671_v27  ;;  %v9896_v27 = vld [vmem:[#allocation2 + $0xa48] sm:$0xff] }
 0x7b9   :  { %v8185_v26 = vpop.f32.mrb[231].mxu0  ;;  %v8226_v39 = vpop.f32.mrb[231].mxu1  ;;  %9692 = vmatprep.subr.bf16.mxu0 %v9674_v23  ;;  %9733 = vmatprep.subr.bf16.mxu1 %v9676_v30  ;;  %v9895_v37 = vld [vmem:[#allocation2 + $0xa40] sm:$0xff] }
 0x7ba   :  { %v9897_v26 = vld [vmem:[#allocation2 + $0xa50] sm:$0xff]  ;;  %v9900_v39 = vld [vmem:[#allocation2 + $0xa68] sm:$0xff] }
 0x7bc   :  { %9693 = vmatpush1.bf16.msra.mxu0 %v9673_v40  ;;  %9734 = vmatpush1.bf16.msra.mxu1 %v9675_v41  ;;  %v9902_v40 = vld [vmem:[#allocation2 + $0xa78] sm:$0xff]  ;;  %v9899_v41 = vld [vmem:[#allocation2 + $0xa60] sm:$0xff] }
 0x7bd   :  { %9694 = vmatprep.subr.bf16.mxu0 %v9678_v42  ;;  %9735 = vmatprep.subr.bf16.mxu1 %v9680_v45  ;;  %v9901_v42 = vld [vmem:[#allocation2 + $0xa70] sm:$0xff]  ;;  %v9995_v45 = vld [vmem:[#allocation2 + $0xa88] sm:$0xff] }
 0x7c0   :  { %9695 = vmatpush1.bf16.msra.mxu0 %v9677_v46  ;;  %9736 = vmatpush1.bf16.msra.mxu1 %v9679_v47  ;;  %v9885_v46 = vld [vmem:[#allocation3 + $0x14] sm:$0x1]  ;;  %v9994_v47 = vld [vmem:[#allocation2 + $0xa80] sm:$0xff] }
 0x7c1   :  { %9799 = vmatprep.subr.bf16.mxu0 %v9777_v49  ;;  %9840 = vmatprep.subr.bf16.mxu1 %v9779_v32  ;;  %v9996_v49 = vld [vmem:[#allocation2 + $0xa90] sm:$0xff]  ;;  %v9999_v32 = vld [vmem:[#allocation2 + $0xaa8] sm:$0xff] }
 0x7c3   :  { %12521 = vmatmul.mubr.msk.bf16.vlgmr.msra.gmra.mrb[28].mxu0 %vm5710_vm1, %v9684_v50  ;;  %12522 = vmatmul.mubr.msk.bf16.vlgmr.msra.gmra.mrb[28].mxu1 %vm5710_vm1, %v9684_v50  ;;  %v10001_v50 = vld [vmem:[#allocation2 + $0xab8] sm:$0xff] }
 0x7c4   :  { %9800 = vmatpush1.bf16.msra.mxu0 %v9776_v52  ;;  %9841 = vmatpush1.bf16.msra.mxu1 %v9778_v53  ;;  %v9998_v52 = vld [vmem:[#allocation2 + $0xaa0] sm:$0xff]  ;;  %v10000_v53 = vld [vmem:[#allocation2 + $0xab0] sm:$0xff] }
 0x7c5   :  { %9801 = vmatprep.subr.bf16.mxu0 %v9781_v54  ;;  %9842 = vmatprep.subr.bf16.mxu1 %v9783_v55 }
 0x7c6   :  { %v8291_v51 = vpop.f32.mrb[232].mxu0  ;;  %v8332_v59 = vpop.f32.mrb[232].mxu1  ;;  %9831 = vmatprep.mubr.bf16.mxu0 %v13850_v35  ;;  %9872 = vmatprep.mubr.bf16.mxu1 %v13850_v35 }
 0x7c7   :  { %v8339_v63 = vadd.f32 %v8291_v51, %v8228_v31  ;;  %v8341_v43 = vadd.f32 %v8332_v59, %v8230_v22  ;;  %v8293_v4 = vpop.f32.mrb[233].mxu0  ;;  %v8334_v56 = vpop.f32.mrb[233].mxu1 }
 0x7c8   :  { %v8340_v58 = vadd.f32 %v8293_v4, %v8229_v3  ;;  %v8342_v6 = vadd.f32 %v8334_v56, %v8231_v36  ;;  %v8295_v8 = vpop.f32.mrb[234].mxu0  ;;  %v8336_v2 = vpop.f32.mrb[234].mxu1  ;;  %9802 = vmatpush1.bf16.msra.mxu0 %v9780_v57  ;;  %9843 = vmatpush1.bf16.msra.mxu1 %v9782_v38  ;;  %v10003_v57 = vld [vmem:[#allocation2 + $0xac8] sm:$0xff]  ;;  %v10005_v38 = vld [vmem:[#allocation2 + $0xad8] sm:$0xff] }
 0x7c9   :  { %v8296_v9 = vpop.f32.mrb[235].mxu0  ;;  %v8337_v10 = vpop.f32.mrb[235].mxu1  ;;  %9803 = vmatprep.subr.bf16.mxu0 %v9785_v60  ;;  %9844 = vmatprep.subr.bf16.mxu1 %v9787_v61  ;;  %v10002_v8 = vld [vmem:[#allocation2 + $0xac0] sm:$0xff]  ;;  %v10004_v2 = vld [vmem:[#allocation2 + $0xad0] sm:$0xff] }
 0x7ca   :  { %v10007_v9 = vld [vmem:[#allocation2 + $0xae8] sm:$0xff]  ;;  %v10009_v10 = vld [vmem:[#allocation2 + $0xaf8] sm:$0xff] }
 0x7cc   :  { %9804 = vmatpush1.bf16.msra.mxu0 %v9784_v11  ;;  %9845 = vmatpush1.bf16.msra.mxu1 %v9786_v62  ;;  %v13770_v11 = vld [vmem:[#allocation3 + $0x14] ss:$0 sps:$4 sm:$0x22]   ;;  %v10006_v62 = vld [vmem:[#allocation2 + $0xae0] sm:$0xff] }
 0x7cd   :  { %9805 = vmatprep.subr.bf16.mxu0 %v9789_v29  ;;  %9846 = vmatprep.subr.bf16.mxu1 %v9791_v12  ;;  %v10008_v29 = vld [vmem:[#allocation2 + $0xaf0] sm:$0xff]  ;;  %v10106_v12 = vld [vmem:[#allocation2 + $0xb08] sm:$0xff] }
 0x7d0   :  { %9806 = vmatpush1.bf16.msra.mxu0 %v9788_v14  ;;  %9847 = vmatpush1.bf16.msra.mxu1 %v9790_v48  ;;  %v10013_v14 = vrot.slane %v13770_v11, 1  ;;  %v10105_v48 = vld [vmem:[#allocation2 + $0xb00] sm:$0xff]  ;;  %v10328_v11 = vld [vmem:[#allocation2 + $0xc08] sm:$0xff] }
 0x7d1   :  { %9906 = vmatprep.subr.bf16.mxu0 %v9888_v7  ;;  %9947 = vmatprep.subr.bf16.mxu1 %v9890_v15  ;;  %v10107_v7 = vld [vmem:[#allocation2 + $0xb10] sm:$0xff]  ;;  %v10110_v15 = vld [vmem:[#allocation2 + $0xb28] sm:$0xff] }
 0x7d3   :  { %12524 = vmatmul.mubr.msk.bf16.vlgmr.msra.gmra.mrb[32].mxu0 %vm5710_vm1, %v9795_v16  ;;  %12525 = vmatmul.mubr.msk.bf16.vlgmr.msra.gmra.mrb[32].mxu1 %vm5710_vm1, %v9795_v16  ;;  %v10112_v16 = vld [vmem:[#allocation2 + $0xb38] sm:$0xff] }
 0x7d4   :  { %9907 = vmatpush1.bf16.msra.mxu0 %v9887_v17  ;;  %9948 = vmatpush1.bf16.msra.mxu1 %v9889_v5  ;;  %v10109_v17 = vld [vmem:[#allocation2 + $0xb20] sm:$0xff]  ;;  %v10111_v5 = vld [vmem:[#allocation2 + $0xb30] sm:$0xff] }
 0x7d5   :  { %9908 = vmatprep.subr.bf16.mxu0 %v9892_v24  ;;  %9949 = vmatprep.subr.bf16.mxu1 %v9894_v20 }
 0x7d6   :  { %v8402_v19 = vpop.f32.mrb[236].mxu0  ;;  %v8443_v25 = vpop.f32.mrb[236].mxu1  ;;  %9938 = vmatprep.mubr.bf16.mxu0 %v13850_v35  ;;  %9979 = vmatprep.mubr.bf16.mxu1 %v13850_v35 }
 0x7d7   :  { %v8450_v28 = vadd.f32 %v8402_v19, %v8339_v63  ;;  %v8452_v23 = vadd.f32 %v8443_v25, %v8341_v43  ;;  %v8404_v30 = vpop.f32.mrb[237].mxu0  ;;  %v8445_v31 = vpop.f32.mrb[237].mxu1 }
 0x7d8   :  { %v8451_v22 = vadd.f32 %v8404_v30, %v8340_v58  ;;  %v8453_v33 = vadd.f32 %v8445_v31, %v8342_v6  ;;  %v8406_v18 = vpop.f32.mrb[238].mxu0  ;;  %v8447_v3 = vpop.f32.mrb[238].mxu1  ;;  %9909 = vmatpush1.bf16.msra.mxu0 %v9891_v44  ;;  %9950 = vmatpush1.bf16.msra.mxu1 %v9893_v21  ;;  %v10114_v44 = vld [vmem:[#allocation2 + $0xb48] sm:$0xff]  ;;  %v10116_v21 = vld [vmem:[#allocation2 + $0xb58] sm:$0xff] }
 0x7d9   :  { %v8407_v36 = vpop.f32.mrb[239].mxu0  ;;  %v8448_v34 = vpop.f32.mrb[239].mxu1  ;;  %9910 = vmatprep.subr.bf16.mxu0 %v9896_v27  ;;  %9951 = vmatprep.subr.bf16.mxu1 %v9898_v1  ;;  %v10113_v18 = vld [vmem:[#allocation2 + $0xb40] sm:$0xff]  ;;  %v10115_v3 = vld [vmem:[#allocation2 + $0xb50] sm:$0xff] }
 0x7da   :  { %v10118_v36 = vld [vmem:[#allocation2 + $0xb68] sm:$0xff]  ;;  %v10120_v34 = vld [vmem:[#allocation2 + $0xb78] sm:$0xff] }
 0x7dc   :  { %9911 = vmatpush1.bf16.msra.mxu0 %v9895_v37  ;;  %9952 = vmatpush1.bf16.msra.mxu1 %v9897_v26  ;;  %v13771_v37 = vld [vmem:[#allocation3 + $0x14] ss:$0 sps:$4 sm:$0x44]   ;;  %v10117_v26 = vld [vmem:[#allocation2 + $0xb60] sm:$0xff] }
 0x7dd   :  { %9912 = vmatprep.subr.bf16.mxu0 %v9900_v39  ;;  %9953 = vmatprep.subr.bf16.mxu1 %v9902_v40  ;;  %v10119_v39 = vld [vmem:[#allocation2 + $0xb70] sm:$0xff]  ;;  %v10217_v40 = vld [vmem:[#allocation2 + $0xb88] sm:$0xff] }
 0x7e0   :  { %9913 = vmatpush1.bf16.msra.mxu0 %v9899_v41  ;;  %9954 = vmatpush1.bf16.msra.mxu1 %v9901_v42  ;;  %v10219_v41 = vld [vmem:[#allocation2 + $0xb98] sm:$0xff]  ;;  %v10124_v42 = vrot.slane %v13771_v37, 2 }
 0x7e1   :  { %10017 = vmatprep.subr.bf16.mxu0 %v9995_v45  ;;  %10058 = vmatprep.subr.bf16.mxu1 %v9997_v0  ;;  %v10216_v45 = vld [vmem:[#allocation2 + $0xb80] sm:$0xff]  ;;  %v10218_v0 = vld [vmem:[#allocation2 + $0xb90] sm:$0xff]  ;;  %v10437_v37 = vld [vmem:[#allocation2 + $0xc98] sm:$0xff] }
 0x7e3   :  { %12526 = vmatmul.mubr.msk.bf16.vlgmr.msra.gmra.mrb[36].mxu0 %vm5710_vm1, %v9885_v46  ;;  %12527 = vmatmul.mubr.msk.bf16.vlgmr.msra.gmra.mrb[36].mxu1 %vm5710_vm1, %v9885_v46  ;;  %v10221_v46 = vld [vmem:[#allocation2 + $0xba8] sm:$0xff] }
 0x7e4   :  { %10018 = vmatpush1.bf16.msra.mxu0 %v9994_v47  ;;  %10059 = vmatpush1.bf16.msra.mxu1 %v9996_v49  ;;  %v10223_v47 = vld [vmem:[#allocation2 + $0xbb8] sm:$0xff]  ;;  %v10220_v49 = vld [vmem:[#allocation2 + $0xba0] sm:$0xff] }
 0x7e5   :  { %10019 = vmatprep.subr.bf16.mxu0 %v9999_v32  ;;  %10060 = vmatprep.subr.bf16.mxu1 %v10001_v50  ;;  %v10222_v32 = vld [vmem:[#allocation2 + $0xbb0] sm:$0xff] }
 0x7e6   :  { %v8513_v54 = vpop.f32.mrb[240].mxu0  ;;  %v8554_v55 = vpop.f32.mrb[240].mxu1  ;;  %10049 = vmatprep.mubr.bf16.mxu0 %v13850_v35  ;;  %10090 = vmatprep.mubr.bf16.mxu1 %v13850_v35 }
 0x7e7   :  { %v8561_v51 = vadd.f32 %v8513_v54, %v8450_v28  ;;  %v8563_v59 = vadd.f32 %v8554_v55, %v8452_v23  ;;  %v8515_v60 = vpop.f32.mrb[241].mxu0  ;;  %v8556_v61 = vpop.f32.mrb[241].mxu1  ;;  %v10227_v54 = vld [vmem:[#allocation2 + $0xbd8] sm:$0xff] }
 0x7e8   :  { %v8562_v63 = vadd.f32 %v8515_v60, %v8451_v22  ;;  %v8564_v43 = vadd.f32 %v8556_v61, %v8453_v33  ;;  %v8517_v4 = vpop.f32.mrb[242].mxu0  ;;  %v8558_v56 = vpop.f32.mrb[242].mxu1  ;;  %10020 = vmatpush1.bf16.msra.mxu0 %v9998_v52  ;;  %10061 = vmatpush1.bf16.msra.mxu1 %v10000_v53  ;;  %v10225_v53 = vld [vmem:[#allocation2 + $0xbc8] sm:$0xff] }
 0x7e9   :  { %v8518_v58 = vpop.f32.mrb[243].mxu0  ;;  %v8559_v6 = vpop.f32.mrb[243].mxu1  ;;  %10021 = vmatprep.subr.bf16.mxu0 %v10003_v57  ;;  %10062 = vmatprep.subr.bf16.mxu1 %v10005_v38  ;;  %v10224_v56 = vld [vmem:[#allocation2 + $0xbc0] sm:$0xff] }
 0x7ea   :  { %v10226_v58 = vld [vmem:[#allocation2 + $0xbd0] sm:$0xff]  ;;  %v10229_v6 = vld [vmem:[#allocation2 + $0xbe8] sm:$0xff] }
 0x7ec   :  { %10022 = vmatpush1.bf16.msra.mxu0 %v10002_v8  ;;  %10063 = vmatpush1.bf16.msra.mxu1 %v10004_v2  ;;  %v10231_v8 = vld [vmem:[#allocation2 + $0xbf8] sm:$0xff]  ;;  %v13772_v2 = vld [vmem:[#allocation3 + $0x14] ss:$0 sps:$4 sm:$0x88]  }
 0x7ed   :  { %10023 = vmatprep.subr.bf16.mxu0 %v10007_v9  ;;  %10064 = vmatprep.subr.bf16.mxu1 %v10009_v10  ;;  %v10228_v9 = vld [vmem:[#allocation2 + $0xbe0] sm:$0xff]  ;;  %v10230_v10 = vld [vmem:[#allocation2 + $0xbf0] sm:$0xff] }
 0x7f0   :  { %10024 = vmatpush1.bf16.msra.mxu0 %v10006_v62  ;;  %10065 = vmatpush1.bf16.msra.mxu1 %v10008_v29  ;;  %v10330_v62 = vld [vmem:[#allocation2 + $0xc18] sm:$0xff]  ;;  %v10235_v29 = vrot.slane %v13772_v2, 3 }
 0x7f1   :  { %10128 = vmatprep.subr.bf16.mxu0 %v10106_v12  ;;  %10169 = vmatprep.subr.bf16.mxu1 %v10108_v13  ;;  %v10327_v12 = vld [vmem:[#allocation2 + $0xc00] sm:$0xff]  ;;  %v10329_v13 = vld [vmem:[#allocation2 + $0xc10] sm:$0xff]  ;;  %v10548_v2 = vld [vmem:[#allocation2 + $0xd18] sm:$0xff] }
 0x7f3   :  { %12529 = vmatmul.mubr.msk.bf16.vlgmr.msra.gmra.mrb[40].mxu0 %vm5710_vm1, %v10013_v14  ;;  %12530 = vmatmul.mubr.msk.bf16.vlgmr.msra.gmra.mrb[40].mxu1 %vm5710_vm1, %v10013_v14  ;;  %v10332_v14 = vld [vmem:[#allocation2 + $0xc28] sm:$0xff] }
 0x7f4   :  { %10129 = vmatpush1.bf16.msra.mxu0 %v10105_v48  ;;  %10170 = vmatpush1.bf16.msra.mxu1 %v10107_v7  ;;  %v10334_v48 = vld [vmem:[#allocation2 + $0xc38] sm:$0xff]  ;;  %v10331_v7 = vld [vmem:[#allocation2 + $0xc20] sm:$0xff] }
 0x7f5   :  { %10130 = vmatprep.subr.bf16.mxu0 %v10110_v15  ;;  %10171 = vmatprep.subr.bf16.mxu1 %v10112_v16  ;;  %v10333_v15 = vld [vmem:[#allocation2 + $0xc30] sm:$0xff] }
 0x7f6   :  { %v8620_v24 = vpop.f32.mrb[244].mxu0  ;;  %v8661_v20 = vpop.f32.mrb[244].mxu1  ;;  %10160 = vmatprep.mubr.bf16.mxu0 %v13850_v35  ;;  %10201 = vmatprep.mubr.bf16.mxu1 %v13850_v35 }
 0x7f7   :  { %v8668_v19 = vadd.f32 %v8620_v24, %v8561_v51  ;;  %v8670_v25 = vadd.f32 %v8661_v20, %v8563_v59  ;;  %v8622_v27 = vpop.f32.mrb[245].mxu0  ;;  %v8663_v1 = vpop.f32.mrb[245].mxu1  ;;  %v10338_v24 = vld [vmem:[#allocation2 + $0xc58] sm:$0xff] }
 0x7f8   :  { %v8669_v28 = vadd.f32 %v8622_v27, %v8562_v63  ;;  %v8671_v23 = vadd.f32 %v8663_v1, %v8564_v43  ;;  %v8624_v30 = vpop.f32.mrb[246].mxu0  ;;  %v8665_v31 = vpop.f32.mrb[246].mxu1  ;;  %10131 = vmatpush1.bf16.msra.mxu0 %v10109_v17  ;;  %10172 = vmatpush1.bf16.msra.mxu1 %v10111_v5  ;;  %v10336_v5 = vld [vmem:[#allocation2 + $0xc48] sm:$0xff] }
 0x7f9   :  { %v8625_v22 = vpop.f32.mrb[247].mxu0  ;;  %v8666_v33 = vpop.f32.mrb[247].mxu1  ;;  %10132 = vmatprep.subr.bf16.mxu0 %v10114_v44  ;;  %10173 = vmatprep.subr.bf16.mxu1 %v10116_v21  ;;  %v10335_v31 = vld [vmem:[#allocation2 + $0xc40] sm:$0xff] }
 0x7fa   :  { %v10337_v22 = vld [vmem:[#allocation2 + $0xc50] sm:$0xff]  ;;  %v10340_v33 = vld [vmem:[#allocation2 + $0xc68] sm:$0xff] }
 0x7fc   :  { %10133 = vmatpush1.bf16.msra.mxu0 %v10113_v18  ;;  %10174 = vmatpush1.bf16.msra.mxu1 %v10115_v3  ;;  %v10342_v18 = vld [vmem:[#allocation2 + $0xc78] sm:$0xff]  ;;  %v10339_v3 = vld [vmem:[#allocation2 + $0xc60] sm:$0xff] }
 0x7fd   :  { %10134 = vmatprep.subr.bf16.mxu0 %v10118_v36  ;;  %10175 = vmatprep.subr.bf16.mxu1 %v10120_v34  ;;  %v10341_v36 = vld [vmem:[#allocation2 + $0xc70] sm:$0xff]  ;;  %v10435_v34 = vld [vmem:[#allocation2 + $0xc88] sm:$0xff] }
 0x800   :  { %10135 = vmatpush1.bf16.msra.mxu0 %v10117_v26  ;;  %10176 = vmatpush1.bf16.msra.mxu1 %v10119_v39  ;;  %v10325_v26 = vld [vmem:[#allocation3 + $0x18] sm:$0x1]  ;;  %v10434_v39 = vld [vmem:[#allocation2 + $0xc80] sm:$0xff] }
 0x801   :  { %10239 = vmatprep.subr.bf16.mxu0 %v10217_v40  ;;  %10280 = vmatprep.subr.bf16.mxu1 %v10219_v41  ;;  %v10436_v40 = vld [vmem:[#allocation2 + $0xc90] sm:$0xff]  ;;  %v10439_v41 = vld [vmem:[#allocation2 + $0xca8] sm:$0xff] }
 0x803   :  { %12532 = vmatmul.mubr.msk.bf16.vlgmr.msra.gmra.mrb[44].mxu0 %vm5710_vm1, %v10124_v42  ;;  %12533 = vmatmul.mubr.msk.bf16.vlgmr.msra.gmra.mrb[44].mxu1 %vm5710_vm1, %v10124_v42  ;;  %v10441_v42 = vld [vmem:[#allocation2 + $0xcb8] sm:$0xff] }
 0x804   :  { %10240 = vmatpush1.bf16.msra.mxu0 %v10216_v45  ;;  %10281 = vmatpush1.bf16.msra.mxu1 %v10218_v0  ;;  %v10438_v45 = vld [vmem:[#allocation2 + $0xca0] sm:$0xff]  ;;  %v10440_v0 = vld [vmem:[#allocation2 + $0xcb0] sm:$0xff] }
 0x805   :  { %10241 = vmatprep.subr.bf16.mxu0 %v10221_v46  ;;  %10282 = vmatprep.subr.bf16.mxu1 %v10223_v47 }
 0x806   :  { %v8731_v50 = vpop.f32.mrb[248].mxu0  ;;  %v8772_v52 = vpop.f32.mrb[248].mxu1  ;;  %10271 = vmatprep.mubr.bf16.mxu0 %v13850_v35  ;;  %10312 = vmatprep.mubr.bf16.mxu1 %v13850_v35 }
 0x807   :  { %v8779_v55 = vadd.f32 %v8731_v50, %v8668_v19  ;;  %v8781_v57 = vadd.f32 %v8772_v52, %v8670_v25  ;;  %v8733_v38 = vpop.f32.mrb[249].mxu0  ;;  %v8774_v51 = vpop.f32.mrb[249].mxu1 }
 0x808   :  { %v8780_v59 = vadd.f32 %v8733_v38, %v8669_v28  ;;  %v8782_v60 = vadd.f32 %v8774_v51, %v8671_v23  ;;  %v8735_v61 = vpop.f32.mrb[250].mxu0  ;;  %v8776_v63 = vpop.f32.mrb[250].mxu1  ;;  %10242 = vmatpush1.bf16.msra.mxu0 %v10220_v49  ;;  %10283 = vmatpush1.bf16.msra.mxu1 %v10222_v32  ;;  %v10443_v49 = vld [vmem:[#allocation2 + $0xcc8] sm:$0xff]  ;;  %v10445_v32 = vld [vmem:[#allocation2 + $0xcd8] sm:$0xff] }
 0x809   :  { %v8736_v43 = vpop.f32.mrb[251].mxu0  ;;  %v8777_v4 = vpop.f32.mrb[251].mxu1  ;;  %10243 = vmatprep.subr.bf16.mxu0 %v10225_v53  ;;  %10284 = vmatprep.subr.bf16.mxu1 %v10227_v54  ;;  %v10442_v61 = vld [vmem:[#allocation2 + $0xcc0] sm:$0xff]  ;;  %v10444_v63 = vld [vmem:[#allocation2 + $0xcd0] sm:$0xff] }
 0x80a   :  { %v10447_v43 = vld [vmem:[#allocation2 + $0xce8] sm:$0xff]  ;;  %v10449_v4 = vld [vmem:[#allocation2 + $0xcf8] sm:$0xff] }
 0x80c   :  { %10244 = vmatpush1.bf16.msra.mxu0 %v10224_v56  ;;  %10285 = vmatpush1.bf16.msra.mxu1 %v10226_v58  ;;  %v13773_v56 = vld [vmem:[#allocation3 + $0x18] ss:$0 sps:$4 sm:$0x22]   ;;  %v10446_v58 = vld [vmem:[#allocation2 + $0xce0] sm:$0xff] }
 0x80d   :  { %10245 = vmatprep.subr.bf16.mxu0 %v10229_v6  ;;  %10286 = vmatprep.subr.bf16.mxu1 %v10231_v8  ;;  %v10448_v6 = vld [vmem:[#allocation2 + $0xcf0] sm:$0xff]  ;;  %v10546_v8 = vld [vmem:[#allocation2 + $0xd08] sm:$0xff] }
 0x810   :  { %10246 = vmatpush1.bf16.msra.mxu0 %v10228_v9  ;;  %10287 = vmatpush1.bf16.msra.mxu1 %v10230_v10  ;;  %v10453_v9 = vrot.slane %v13773_v56, 1  ;;  %v10545_v10 = vld [vmem:[#allocation2 + $0xd00] sm:$0xff]  ;;  %v10768_v56 = vld [vmem:[#allocation2 + $0xe08] sm:$0xff] }
 0x811   :  { %10346 = vmatprep.subr.bf16.mxu0 %v10328_v11  ;;  %10387 = vmatprep.subr.bf16.mxu1 %v10330_v62  ;;  %v10547_v11 = vld [vmem:[#allocation2 + $0xd10] sm:$0xff]  ;;  %v10550_v62 = vld [vmem:[#allocation2 + $0xd28] sm:$0xff] }
 0x813   :  { %12535 = vmatmul.mubr.msk.bf16.vlgmr.msra.gmra.mrb[48].mxu0 %vm5710_vm1, %v10235_v29  ;;  %12536 = vmatmul.mubr.msk.bf16.vlgmr.msra.gmra.mrb[48].mxu1 %vm5710_vm1, %v10235_v29  ;;  %v10552_v29 = vld [vmem:[#allocation2 + $0xd38] sm:$0xff] }
 0x814   :  { %10347 = vmatpush1.bf16.msra.mxu0 %v10327_v12  ;;  %10388 = vmatpush1.bf16.msra.mxu1 %v10329_v13  ;;  %v10549_v12 = vld [vmem:[#allocation2 + $0xd20] sm:$0xff]  ;;  %v10551_v13 = vld [vmem:[#allocation2 + $0xd30] sm:$0xff] }
 0x815   :  { %10348 = vmatprep.subr.bf16.mxu0 %v10332_v14  ;;  %10389 = vmatprep.subr.bf16.mxu1 %v10334_v48 }
 0x816   :  { %v8842_v16 = vpop.f32.mrb[252].mxu0  ;;  %v8883_v17 = vpop.f32.mrb[252].mxu1  ;;  %10378 = vmatprep.mubr.bf16.mxu0 %v13850_v35  ;;  %10419 = vmatprep.mubr.bf16.mxu1 %v13850_v35 }
 0x817   :  { %v8890_v20 = vadd.f32 %v8842_v16, %v8779_v55  ;;  %v8892_v44 = vadd.f32 %v8883_v17, %v8781_v57  ;;  %v8844_v21 = vpop.f32.mrb[253].mxu0  ;;  %v8885_v19 = vpop.f32.mrb[253].mxu1 }
 0x818   :  { %v8891_v25 = vadd.f32 %v8844_v21, %v8780_v59  ;;  %v8893_v27 = vadd.f32 %v8885_v19, %v8782_v60  ;;  %v8846_v1 = vpop.f32.mrb[254].mxu0  ;;  %v8887_v28 = vpop.f32.mrb[254].mxu1  ;;  %10349 = vmatpush1.bf16.msra.mxu0 %v10331_v7  ;;  %10390 = vmatpush1.bf16.msra.mxu1 %v10333_v15  ;;  %v10554_v7 = vld [vmem:[#allocation2 + $0xd48] sm:$0xff]  ;;  %v10556_v15 = vld [vmem:[#allocation2 + $0xd58] sm:$0xff] }
 0x819   :  { %v8847_v23 = vpop.f32.mrb[255].mxu0  ;;  %v8888_v30 = vpop.f32.mrb[255].mxu1  ;;  %10350 = vmatprep.subr.bf16.mxu0 %v10336_v5  ;;  %10391 = vmatprep.subr.bf16.mxu1 %v10338_v24  ;;  %v10553_v1 = vld [vmem:[#allocation2 + $0xd40] sm:$0xff]  ;;  %v10555_v28 = vld [vmem:[#allocation2 + $0xd50] sm:$0xff] }
 0x81a   :  { %v10558_v23 = vld [vmem:[#allocation2 + $0xd68] sm:$0xff]  ;;  %v10560_v30 = vld [vmem:[#allocation2 + $0xd78] sm:$0xff] }
 0x81c   :  { %10351 = vmatpush1.bf16.msra.mxu0 %v10335_v31  ;;  %10392 = vmatpush1.bf16.msra.mxu1 %v10337_v22  ;;  %v13774_v31 = vld [vmem:[#allocation3 + $0x18] ss:$0 sps:$4 sm:$0x44]   ;;  %v10557_v22 = vld [vmem:[#allocation2 + $0xd60] sm:$0xff] }
 0x81d   :  { %10352 = vmatprep.subr.bf16.mxu0 %v10340_v33  ;;  %10393 = vmatprep.subr.bf16.mxu1 %v10342_v18  ;;  %v10559_v33 = vld [vmem:[#allocation2 + $0xd70] sm:$0xff]  ;;  %v10657_v18 = vld [vmem:[#allocation2 + $0xd88] sm:$0xff] }
 0x820   :  { %10353 = vmatpush1.bf16.msra.mxu0 %v10339_v3  ;;  %10394 = vmatpush1.bf16.msra.mxu1 %v10341_v36  ;;  %v10659_v3 = vld [vmem:[#allocation2 + $0xd98] sm:$0xff]  ;;  %v10564_v36 = vrot.slane %v13774_v31, 2 }
 0x821   :  { %10457 = vmatprep.subr.bf16.mxu0 %v10435_v34  ;;  %10498 = vmatprep.subr.bf16.mxu1 %v10437_v37  ;;  %v10656_v34 = vld [vmem:[#allocation2 + $0xd80] sm:$0xff]  ;;  %v10658_v37 = vld [vmem:[#allocation2 + $0xd90] sm:$0xff]  ;;  %v10877_v31 = vld [vmem:[#allocation2 + $0xe98] sm:$0xff] }
 0x823   :  { %12537 = vmatmul.mubr.msk.bf16.vlgmr.msra.gmra.mrb[52].mxu0 %vm5710_vm1, %v10325_v26  ;;  %12538 = vmatmul.mubr.msk.bf16.vlgmr.msra.gmra.mrb[52].mxu1 %vm5710_vm1, %v10325_v26  ;;  %v10661_v26 = vld [vmem:[#allocation2 + $0xda8] sm:$0xff] }
 0x824   :  { %10458 = vmatpush1.bf16.msra.mxu0 %v10434_v39  ;;  %10499 = vmatpush1.bf16.msra.mxu1 %v10436_v40  ;;  %v10663_v39 = vld [vmem:[#allocation2 + $0xdb8] sm:$0xff]  ;;  %v10660_v40 = vld [vmem:[#allocation2 + $0xda0] sm:$0xff] }
 0x825   :  { %10459 = vmatprep.subr.bf16.mxu0 %v10439_v41  ;;  %10500 = vmatprep.subr.bf16.mxu1 %v10441_v42  ;;  %v10662_v41 = vld [vmem:[#allocation2 + $0xdb0] sm:$0xff] }
 0x826   :  { %v8953_v46 = vpop.f32.mrb[0].mxu0  ;;  %v8994_v47 = vpop.f32.mrb[0].mxu1  ;;  %10489 = vmatprep.mubr.bf16.mxu0 %v13850_v35  ;;  %10530 = vmatprep.mubr.bf16.mxu1 %v13850_v35 }
 0x827   :  { %v9001_v50 = vadd.f32 %v8953_v46, %v8890_v20  ;;  %v9003_v52 = vadd.f32 %v8994_v47, %v8892_v44  ;;  %v8955_v53 = vpop.f32.mrb[1].mxu0  ;;  %v8996_v54 = vpop.f32.mrb[1].mxu1  ;;  %v10667_v46 = vld [vmem:[#allocation2 + $0xdd8] sm:$0xff] }
 0x828   :  { %v9002_v55 = vadd.f32 %v8955_v53, %v8891_v25  ;;  %v9004_v57 = vadd.f32 %v8996_v54, %v8893_v27  ;;  %v8957_v38 = vpop.f32.mrb[2].mxu0  ;;  %v8998_v51 = vpop.f32.mrb[2].mxu1  ;;  %10460 = vmatpush1.bf16.msra.mxu0 %v10438_v45  ;;  %10501 = vmatpush1.bf16.msra.mxu1 %v10440_v0  ;;  %v10665_v0 = vld [vmem:[#allocation2 + $0xdc8] sm:$0xff] }
 0x829   :  { %v8958_v59 = vpop.f32.mrb[3].mxu0  ;;  %v8999_v60 = vpop.f32.mrb[3].mxu1  ;;  %10461 = vmatprep.subr.bf16.mxu0 %v10443_v49  ;;  %10502 = vmatprep.subr.bf16.mxu1 %v10445_v32  ;;  %v10664_v51 = vld [vmem:[#allocation2 + $0xdc0] sm:$0xff] }
 0x82a   :  { %v10666_v59 = vld [vmem:[#allocation2 + $0xdd0] sm:$0xff]  ;;  %v10669_v60 = vld [vmem:[#allocation2 + $0xde8] sm:$0xff] }
 0x82c   :  { %10462 = vmatpush1.bf16.msra.mxu0 %v10442_v61  ;;  %10503 = vmatpush1.bf16.msra.mxu1 %v10444_v63  ;;  %v10671_v61 = vld [vmem:[#allocation2 + $0xdf8] sm:$0xff] }
 0x82d   :  { %10463 = vmatprep.subr.bf16.mxu0 %v10447_v43  ;;  %10504 = vmatprep.subr.bf16.mxu1 %v10449_v4  ;;  %v13775_v63 = vld [vmem:[#allocation3 + $0x18] ss:$0 sps:$4 sm:$0x88]   ;;  %v10668_v43 = vld [vmem:[#allocation2 + $0xde0] sm:$0xff]  ;;  %v10670_v4 = vld [vmem:[#allocation2 + $0xdf0] sm:$0xff] }
 0x830   :  { %10464 = vmatpush1.bf16.msra.mxu0 %v10446_v58  ;;  %10505 = vmatpush1.bf16.msra.mxu1 %v10448_v6  ;;  %v10770_v58 = vld [vmem:[#allocation2 + $0xe18] sm:$0xff]  ;;  %v10675_v6 = vrot.slane %v13775_v63, 3 }
 0x831   :  { %10568 = vmatprep.subr.bf16.mxu0 %v10546_v8  ;;  %10609 = vmatprep.subr.bf16.mxu1 %v10548_v2  ;;  %v10767_v8 = vld [vmem:[#allocation2 + $0xe00] sm:$0xff]  ;;  %v10769_v2 = vld [vmem:[#allocation2 + $0xe10] sm:$0xff]  ;;  %v10988_v63 = vld [vmem:[#allocation2 + $0xf18] sm:$0xff] }
 0x833   :  { %12540 = vmatmul.mubr.msk.bf16.vlgmr.msra.gmra.mrb[56].mxu0 %vm5710_vm1, %v10453_v9  ;;  %12541 = vmatmul.mubr.msk.bf16.vlgmr.msra.gmra.mrb[56].mxu1 %vm5710_vm1, %v10453_v9  ;;  %v10772_v9 = vld [vmem:[#allocation2 + $0xe28] sm:$0xff] }
 0x834   :  { %10569 = vmatpush1.bf16.msra.mxu0 %v10545_v10  ;;  %10610 = vmatpush1.bf16.msra.mxu1 %v10547_v11  ;;  %v10774_v10 = vld [vmem:[#allocation2 + $0xe38] sm:$0xff]  ;;  %v10771_v11 = vld [vmem:[#allocation2 + $0xe20] sm:$0xff] }
 0x835   :  { %10570 = vmatprep.subr.bf16.mxu0 %v10550_v62  ;;  %10611 = vmatprep.subr.bf16.mxu1 %v10552_v29  ;;  %v10773_v62 = vld [vmem:[#allocation2 + $0xe30] sm:$0xff] }
 0x836   :  { %v9060_v14 = vpop.f32.mrb[4].mxu0  ;;  %v9101_v48 = vpop.f32.mrb[4].mxu1  ;;  %10600 = vmatprep.mubr.bf16.mxu0 %v13850_v35  ;;  %10641 = vmatprep.mubr.bf16.mxu1 %v13850_v35 }
 0x837   :  { %v9108_v16 = vadd.f32 %v9060_v14, %v9001_v50  ;;  %v9110_v17 = vadd.f32 %v9101_v48, %v9003_v52  ;;  %v9062_v5 = vpop.f32.mrb[5].mxu0  ;;  %v9103_v24 = vpop.f32.mrb[5].mxu1  ;;  %v10778_v14 = vld [vmem:[#allocation2 + $0xe58] sm:$0xff] }
 0x838   :  { %v9109_v20 = vadd.f32 %v9062_v5, %v9002_v55  ;;  %v9111_v44 = vadd.f32 %v9103_v24, %v9004_v57  ;;  %v9064_v21 = vpop.f32.mrb[6].mxu0  ;;  %v9105_v19 = vpop.f32.mrb[6].mxu1  ;;  %10571 = vmatpush1.bf16.msra.mxu0 %v10549_v12  ;;  %10612 = vmatpush1.bf16.msra.mxu1 %v10551_v13  ;;  %v10776_v13 = vld [vmem:[#allocation2 + $0xe48] sm:$0xff] }
 0x839   :  { %v9065_v25 = vpop.f32.mrb[7].mxu0  ;;  %v9106_v27 = vpop.f32.mrb[7].mxu1  ;;  %10572 = vmatprep.subr.bf16.mxu0 %v10554_v7  ;;  %10613 = vmatprep.subr.bf16.mxu1 %v10556_v15  ;;  %v10775_v19 = vld [vmem:[#allocation2 + $0xe40] sm:$0xff] }
 0x83a   :  { %v10777_v25 = vld [vmem:[#allocation2 + $0xe50] sm:$0xff]  ;;  %v10780_v27 = vld [vmem:[#allocation2 + $0xe68] sm:$0xff] }
 0x83c   :  { %10573 = vmatpush1.bf16.msra.mxu0 %v10553_v1  ;;  %10614 = vmatpush1.bf16.msra.mxu1 %v10555_v28  ;;  %v10782_v1 = vld [vmem:[#allocation2 + $0xe78] sm:$0xff]  ;;  %v10779_v28 = vld [vmem:[#allocation2 + $0xe60] sm:$0xff] }
 0x83d   :  { %10574 = vmatprep.subr.bf16.mxu0 %v10558_v23  ;;  %10615 = vmatprep.subr.bf16.mxu1 %v10560_v30  ;;  %v10781_v23 = vld [vmem:[#allocation2 + $0xe70] sm:$0xff]  ;;  %v10875_v30 = vld [vmem:[#allocation2 + $0xe88] sm:$0xff] }
 0x840   :  { %10575 = vmatpush1.bf16.msra.mxu0 %v10557_v22  ;;  %10616 = vmatpush1.bf16.msra.mxu1 %v10559_v33  ;;  %v10765_v22 = vld [vmem:[#allocation3 + $0x1c] sm:$0x1]  ;;  %v10874_v33 = vld [vmem:[#allocation2 + $0xe80] sm:$0xff] }
 0x841   :  { %10679 = vmatprep.subr.bf16.mxu0 %v10657_v18  ;;  %10720 = vmatprep.subr.bf16.mxu1 %v10659_v3  ;;  %v10876_v18 = vld [vmem:[#allocation2 + $0xe90] sm:$0xff]  ;;  %v10879_v3 = vld [vmem:[#allocation2 + $0xea8] sm:$0xff] }
 0x843   :  { %12543 = vmatmul.mubr.msk.bf16.vlgmr.msra.gmra.mrb[60].mxu0 %vm5710_vm1, %v10564_v36  ;;  %12544 = vmatmul.mubr.msk.bf16.vlgmr.msra.gmra.mrb[60].mxu1 %vm5710_vm1, %v10564_v36  ;;  %v10881_v36 = vld [vmem:[#allocation2 + $0xeb8] sm:$0xff] }
 0x844   :  { %10680 = vmatpush1.bf16.msra.mxu0 %v10656_v34  ;;  %10721 = vmatpush1.bf16.msra.mxu1 %v10658_v37  ;;  %v10878_v34 = vld [vmem:[#allocation2 + $0xea0] sm:$0xff]  ;;  %v10880_v37 = vld [vmem:[#allocation2 + $0xeb0] sm:$0xff] }
 0x845   :  { %10681 = vmatprep.subr.bf16.mxu0 %v10661_v26  ;;  %10722 = vmatprep.subr.bf16.mxu1 %v10663_v39 }
 0x846   :  { %v9171_v42 = vpop.f32.mrb[8].mxu0  ;;  %v9212_v45 = vpop.f32.mrb[8].mxu1  ;;  %10711 = vmatprep.mubr.bf16.mxu0 %v13850_v35  ;;  %10752 = vmatprep.mubr.bf16.mxu1 %v13850_v35 }
 0x847   :  { %v9219_v47 = vadd.f32 %v9171_v42, %v9108_v16  ;;  %v9221_v49 = vadd.f32 %v9212_v45, %v9110_v17  ;;  %v9173_v32 = vpop.f32.mrb[9].mxu0  ;;  %v9214_v50 = vpop.f32.mrb[9].mxu1 }
 0x848   :  { %v9220_v52 = vadd.f32 %v9173_v32, %v9109_v20  ;;  %v9222_v53 = vadd.f32 %v9214_v50, %v9111_v44  ;;  %v9175_v54 = vpop.f32.mrb[10].mxu0  ;;  %v9216_v55 = vpop.f32.mrb[10].mxu1  ;;  %10682 = vmatpush1.bf16.msra.mxu0 %v10660_v40  ;;  %10723 = vmatpush1.bf16.msra.mxu1 %v10662_v41  ;;  %v10883_v40 = vld [vmem:[#allocation2 + $0xec8] sm:$0xff]  ;;  %v10885_v41 = vld [vmem:[#allocation2 + $0xed8] sm:$0xff] }
 0x849   :  { %v9176_v57 = vpop.f32.mrb[11].mxu0  ;;  %v9217_v38 = vpop.f32.mrb[11].mxu1  ;;  %10683 = vmatprep.subr.bf16.mxu0 %v10665_v0  ;;  %10724 = vmatprep.subr.bf16.mxu1 %v10667_v46  ;;  %v10882_v54 = vld [vmem:[#allocation2 + $0xec0] sm:$0xff]  ;;  %v10884_v55 = vld [vmem:[#allocation2 + $0xed0] sm:$0xff] }
 0x84a   :  { %v10887_v57 = vld [vmem:[#allocation2 + $0xee8] sm:$0xff]  ;;  %v10889_v38 = vld [vmem:[#allocation2 + $0xef8] sm:$0xff] }
 0x84c   :  { %10684 = vmatpush1.bf16.msra.mxu0 %v10664_v51  ;;  %10725 = vmatpush1.bf16.msra.mxu1 %v10666_v59  ;;  %v13776_v51 = vld [vmem:[#allocation3 + $0x1c] ss:$0 sps:$4 sm:$0x22]   ;;  %v10886_v59 = vld [vmem:[#allocation2 + $0xee0] sm:$0xff] }
 0x84d   :  { %10685 = vmatprep.subr.bf16.mxu0 %v10669_v60  ;;  %10726 = vmatprep.subr.bf16.mxu1 %v10671_v61  ;;  %v10888_v60 = vld [vmem:[#allocation2 + $0xef0] sm:$0xff]  ;;  %v10986_v61 = vld [vmem:[#allocation2 + $0xf08] sm:$0xff] }
 0x850   :  { %10686 = vmatpush1.bf16.msra.mxu0 %v10668_v43  ;;  %10727 = vmatpush1.bf16.msra.mxu1 %v10670_v4  ;;  %v10893_v43 = vrot.slane %v13776_v51, 1  ;;  %v10985_v4 = vld [vmem:[#allocation2 + $0xf00] sm:$0xff]  ;;  %v11208_v51 = vld [vmem:[#allocation2 + $0x1008] sm:$0xff] }
 0x851   :  { %10786 = vmatprep.subr.bf16.mxu0 %v10768_v56  ;;  %10827 = vmatprep.subr.bf16.mxu1 %v10770_v58  ;;  %v10987_v56 = vld [vmem:[#allocation2 + $0xf10] sm:$0xff]  ;;  %v10990_v58 = vld [vmem:[#allocation2 + $0xf28] sm:$0xff] }
 0x853   :  { %12546 = vmatmul.mubr.msk.bf16.vlgmr.msra.gmra.mrb[64].mxu0 %vm5710_vm1, %v10675_v6  ;;  %12547 = vmatmul.mubr.msk.bf16.vlgmr.msra.gmra.mrb[64].mxu1 %vm5710_vm1, %v10675_v6  ;;  %v10992_v6 = vld [vmem:[#allocation2 + $0xf38] sm:$0xff] }
 0x854   :  { %10787 = vmatpush1.bf16.msra.mxu0 %v10767_v8  ;;  %10828 = vmatpush1.bf16.msra.mxu1 %v10769_v2  ;;  %v10989_v8 = vld [vmem:[#allocation2 + $0xf20] sm:$0xff]  ;;  %v10991_v2 = vld [vmem:[#allocation2 + $0xf30] sm:$0xff] }
 0x855   :  { %10788 = vmatprep.subr.bf16.mxu0 %v10772_v9  ;;  %10829 = vmatprep.subr.bf16.mxu1 %v10774_v10 }
 0x856   :  { %v9282_v29 = vpop.f32.mrb[12].mxu0  ;;  %v9323_v12 = vpop.f32.mrb[12].mxu1  ;;  %10818 = vmatprep.mubr.bf16.mxu0 %v13850_v35  ;;  %10859 = vmatprep.mubr.bf16.mxu1 %v13850_v35 }
 0x857   :  { %v9330_v48 = vadd.f32 %v9282_v29, %v9219_v47  ;;  %v9332_v7 = vadd.f32 %v9323_v12, %v9221_v49  ;;  %v9284_v15 = vpop.f32.mrb[13].mxu0  ;;  %v9325_v16 = vpop.f32.mrb[13].mxu1 }
 0x858   :  { %v9331_v17 = vadd.f32 %v9284_v15, %v9220_v52  ;;  %v9333_v5 = vadd.f32 %v9325_v16, %v9222_v53  ;;  %v9286_v24 = vpop.f32.mrb[14].mxu0  ;;  %v9327_v20 = vpop.f32.mrb[14].mxu1  ;;  %10789 = vmatpush1.bf16.msra.mxu0 %v10771_v11  ;;  %10830 = vmatpush1.bf16.msra.mxu1 %v10773_v62  ;;  %v10994_v11 = vld [vmem:[#allocation2 + $0xf48] sm:$0xff]  ;;  %v10996_v62 = vld [vmem:[#allocation2 + $0xf58] sm:$0xff] }
 0x859   :  { %v9287_v44 = vpop.f32.mrb[15].mxu0  ;;  %v9328_v21 = vpop.f32.mrb[15].mxu1  ;;  %10790 = vmatprep.subr.bf16.mxu0 %v10776_v13  ;;  %10831 = vmatprep.subr.bf16.mxu1 %v10778_v14  ;;  %v10993_v24 = vld [vmem:[#allocation2 + $0xf40] sm:$0xff]  ;;  %v10995_v20 = vld [vmem:[#allocation2 + $0xf50] sm:$0xff] }
 0x85a   :  { %v10998_v44 = vld [vmem:[#allocation2 + $0xf68] sm:$0xff]  ;;  %v11000_v21 = vld [vmem:[#allocation2 + $0xf78] sm:$0xff] }
 0x85c   :  { %10791 = vmatpush1.bf16.msra.mxu0 %v10775_v19  ;;  %10832 = vmatpush1.bf16.msra.mxu1 %v10777_v25  ;;  %v13777_v19 = vld [vmem:[#allocation3 + $0x1c] ss:$0 sps:$4 sm:$0x44]   ;;  %v10997_v25 = vld [vmem:[#allocation2 + $0xf60] sm:$0xff] }
 0x85d   :  { %10792 = vmatprep.subr.bf16.mxu0 %v10780_v27  ;;  %10833 = vmatprep.subr.bf16.mxu1 %v10782_v1  ;;  %v10999_v27 = vld [vmem:[#allocation2 + $0xf70] sm:$0xff]  ;;  %v11097_v1 = vld [vmem:[#allocation2 + $0xf88] sm:$0xff] }
 0x860   :  { %10793 = vmatpush1.bf16.msra.mxu0 %v10779_v28  ;;  %10834 = vmatpush1.bf16.msra.mxu1 %v10781_v23  ;;  %v11099_v28 = vld [vmem:[#allocation2 + $0xf98] sm:$0xff]  ;;  %v11004_v23 = vrot.slane %v13777_v19, 2 }
 0x861   :  { %10897 = vmatprep.subr.bf16.mxu0 %v10875_v30  ;;  %10938 = vmatprep.subr.bf16.mxu1 %v10877_v31  ;;  %v11096_v30 = vld [vmem:[#allocation2 + $0xf80] sm:$0xff]  ;;  %v11098_v31 = vld [vmem:[#allocation2 + $0xf90] sm:$0xff]  ;;  %v11317_v19 = vld [vmem:[#allocation2 + $0x1098] sm:$0xff] }
 0x863   :  { %12548 = vmatmul.mubr.msk.bf16.vlgmr.msra.gmra.mrb[68].mxu0 %vm5710_vm1, %v10765_v22  ;;  %12549 = vmatmul.mubr.msk.bf16.vlgmr.msra.gmra.mrb[68].mxu1 %vm5710_vm1, %v10765_v22  ;;  %v11101_v22 = vld [vmem:[#allocation2 + $0xfa8] sm:$0xff] }
 0x864   :  { %10898 = vmatpush1.bf16.msra.mxu0 %v10874_v33  ;;  %10939 = vmatpush1.bf16.msra.mxu1 %v10876_v18  ;;  %v11103_v33 = vld [vmem:[#allocation2 + $0xfb8] sm:$0xff]  ;;  %v11100_v18 = vld [vmem:[#allocation2 + $0xfa0] sm:$0xff] }
 0x865   :  { %10899 = vmatprep.subr.bf16.mxu0 %v10879_v3  ;;  %10940 = vmatprep.subr.bf16.mxu1 %v10881_v36  ;;  %v11102_v3 = vld [vmem:[#allocation2 + $0xfb0] sm:$0xff] }
 0x866   :  { %v9393_v26 = vpop.f32.mrb[16].mxu0  ;;  %v9434_v39 = vpop.f32.mrb[16].mxu1  ;;  %10929 = vmatprep.mubr.bf16.mxu0 %v13850_v35  ;;  %10970 = vmatprep.mubr.bf16.mxu1 %v13850_v35 }
 0x867   :  { %v9441_v42 = vadd.f32 %v9393_v26, %v9330_v48  ;;  %v9443_v45 = vadd.f32 %v9434_v39, %v9332_v7  ;;  %v9395_v0 = vpop.f32.mrb[17].mxu0  ;;  %v9436_v46 = vpop.f32.mrb[17].mxu1  ;;  %v11107_v26 = vld [vmem:[#allocation2 + $0xfd8] sm:$0xff] }
 0x868   :  { %v9442_v47 = vadd.f32 %v9395_v0, %v9331_v17  ;;  %v9444_v49 = vadd.f32 %v9436_v46, %v9333_v5  ;;  %v9397_v32 = vpop.f32.mrb[18].mxu0  ;;  %v9438_v50 = vpop.f32.mrb[18].mxu1  ;;  %10900 = vmatpush1.bf16.msra.mxu0 %v10878_v34  ;;  %10941 = vmatpush1.bf16.msra.mxu1 %v10880_v37  ;;  %v11105_v37 = vld [vmem:[#allocation2 + $0xfc8] sm:$0xff] }
 0x869   :  { %v9398_v52 = vpop.f32.mrb[19].mxu0  ;;  %v9439_v53 = vpop.f32.mrb[19].mxu1  ;;  %10901 = vmatprep.subr.bf16.mxu0 %v10883_v40  ;;  %10942 = vmatprep.subr.bf16.mxu1 %v10885_v41  ;;  %v11104_v50 = vld [vmem:[#allocation2 + $0xfc0] sm:$0xff] }
 0x86a   :  { %v11106_v52 = vld [vmem:[#allocation2 + $0xfd0] sm:$0xff]  ;;  %v11109_v53 = vld [vmem:[#allocation2 + $0xfe8] sm:$0xff] }
 0x86c   :  { %10902 = vmatpush1.bf16.msra.mxu0 %v10882_v54  ;;  %10943 = vmatpush1.bf16.msra.mxu1 %v10884_v55  ;;  %v11111_v54 = vld [vmem:[#allocation2 + $0xff8] sm:$0xff] }
 0x86d   :  { %10903 = vmatprep.subr.bf16.mxu0 %v10887_v57  ;;  %10944 = vmatprep.subr.bf16.mxu1 %v10889_v38  ;;  %v13778_v55 = vld [vmem:[#allocation3 + $0x1c] ss:$0 sps:$4 sm:$0x88]   ;;  %v11108_v57 = vld [vmem:[#allocation2 + $0xfe0] sm:$0xff]  ;;  %v11110_v38 = vld [vmem:[#allocation2 + $0xff0] sm:$0xff] }
 0x870   :  { %10904 = vmatpush1.bf16.msra.mxu0 %v10886_v59  ;;  %10945 = vmatpush1.bf16.msra.mxu1 %v10888_v60  ;;  %v11210_v59 = vld [vmem:[#allocation2 + $0x1018] sm:$0xff]  ;;  %v11115_v60 = vrot.slane %v13778_v55, 3 }
 0x871   :  { %11008 = vmatprep.subr.bf16.mxu0 %v10986_v61  ;;  %11049 = vmatprep.subr.bf16.mxu1 %v10988_v63  ;;  %v11207_v61 = vld [vmem:[#allocation2 + $0x1000] sm:$0xff]  ;;  %v11209_v63 = vld [vmem:[#allocation2 + $0x1010] sm:$0xff]  ;;  %v11428_v55 = vld [vmem:[#allocation2 + $0x1118] sm:$0xff] }
 0x873   :  { %12551 = vmatmul.mubr.msk.bf16.vlgmr.msra.gmra.mrb[72].mxu0 %vm5710_vm1, %v10893_v43  ;;  %12552 = vmatmul.mubr.msk.bf16.vlgmr.msra.gmra.mrb[72].mxu1 %vm5710_vm1, %v10893_v43  ;;  %v11212_v43 = vld [vmem:[#allocation2 + $0x1028] sm:$0xff] }
 0x874   :  { %11009 = vmatpush1.bf16.msra.mxu0 %v10985_v4  ;;  %11050 = vmatpush1.bf16.msra.mxu1 %v10987_v56  ;;  %v11214_v4 = vld [vmem:[#allocation2 + $0x1038] sm:$0xff]  ;;  %v11211_v56 = vld [vmem:[#allocation2 + $0x1020] sm:$0xff] }
 0x875   :  { %11010 = vmatprep.subr.bf16.mxu0 %v10990_v58  ;;  %11051 = vmatprep.subr.bf16.mxu1 %v10992_v6  ;;  %v11213_v58 = vld [vmem:[#allocation2 + $0x1030] sm:$0xff] }
 0x876   :  { %v9500_v9 = vpop.f32.mrb[20].mxu0  ;;  %v9541_v10 = vpop.f32.mrb[20].mxu1  ;;  %11040 = vmatprep.mubr.bf16.mxu0 %v13850_v35  ;;  %11081 = vmatprep.mubr.bf16.mxu1 %v13850_v35 }
 0x877   :  { %v9548_v29 = vadd.f32 %v9500_v9, %v9441_v42  ;;  %v9550_v12 = vadd.f32 %v9541_v10, %v9443_v45  ;;  %v9502_v13 = vpop.f32.mrb[21].mxu0  ;;  %v9543_v14 = vpop.f32.mrb[21].mxu1  ;;  %v11218_v9 = vld [vmem:[#allocation2 + $0x1058] sm:$0xff] }
 0x878   :  { %v9549_v48 = vadd.f32 %v9502_v13, %v9442_v47  ;;  %v9551_v7 = vadd.f32 %v9543_v14, %v9444_v49  ;;  %v9504_v15 = vpop.f32.mrb[22].mxu0  ;;  %v9545_v16 = vpop.f32.mrb[22].mxu1  ;;  %11011 = vmatpush1.bf16.msra.mxu0 %v10989_v8  ;;  %11052 = vmatpush1.bf16.msra.mxu1 %v10991_v2  ;;  %v11216_v2 = vld [vmem:[#allocation2 + $0x1048] sm:$0xff] }
 0x879   :  { %v9505_v17 = vpop.f32.mrb[23].mxu0  ;;  %v9546_v5 = vpop.f32.mrb[23].mxu1  ;;  %11012 = vmatprep.subr.bf16.mxu0 %v10994_v11  ;;  %11053 = vmatprep.subr.bf16.mxu1 %v10996_v62  ;;  %v11215_v16 = vld [vmem:[#allocation2 + $0x1040] sm:$0xff] }
 0x87a   :  { %v11217_v17 = vld [vmem:[#allocation2 + $0x1050] sm:$0xff]  ;;  %v11220_v5 = vld [vmem:[#allocation2 + $0x1068] sm:$0xff] }
 0x87c   :  { %11013 = vmatpush1.bf16.msra.mxu0 %v10993_v24  ;;  %11054 = vmatpush1.bf16.msra.mxu1 %v10995_v20  ;;  %v11222_v24 = vld [vmem:[#allocation2 + $0x1078] sm:$0xff]  ;;  %v11219_v20 = vld [vmem:[#allocation2 + $0x1060] sm:$0xff] }
 0x87d   :  { %11014 = vmatprep.subr.bf16.mxu0 %v10998_v44  ;;  %11055 = vmatprep.subr.bf16.mxu1 %v11000_v21  ;;  %v11221_v44 = vld [vmem:[#allocation2 + $0x1070] sm:$0xff]  ;;  %v11315_v21 = vld [vmem:[#allocation2 + $0x1088] sm:$0xff] }
 0x880   :  { %11015 = vmatpush1.bf16.msra.mxu0 %v10997_v25  ;;  %11056 = vmatpush1.bf16.msra.mxu1 %v10999_v27  ;;  %v11205_v25 = vld [vmem:[#allocation3 + $0x20] sm:$0x1] }
 0x881   :  { %11119 = vmatprep.subr.bf16.mxu0 %v11097_v1  ;;  %11160 = vmatprep.subr.bf16.mxu1 %v11099_v28  ;;  %v11314_v27 = vld [vmem:[#allocation2 + $0x1080] sm:$0xff]  ;;  %v11316_v1 = vld [vmem:[#allocation2 + $0x1090] sm:$0xff]  ;;  %v11319_v28 = vld [vmem:[#allocation2 + $0x10a8] sm:$0xff] }
 0x883   :  { %12554 = vmatmul.mubr.msk.bf16.vlgmr.msra.gmra.mrb[76].mxu0 %vm5710_vm1, %v11004_v23  ;;  %12555 = vmatmul.mubr.msk.bf16.vlgmr.msra.gmra.mrb[76].mxu1 %vm5710_vm1, %v11004_v23  ;;  %v11321_v23 = vld [vmem:[#allocation2 + $0x10b8] sm:$0xff] }
 0x884   :  { %11120 = vmatpush1.bf16.msra.mxu0 %v11096_v30  ;;  %11161 = vmatpush1.bf16.msra.mxu1 %v11098_v31  ;;  %v11318_v30 = vld [vmem:[#allocation2 + $0x10a0] sm:$0xff]  ;;  %v11320_v31 = vld [vmem:[#allocation2 + $0x10b0] sm:$0xff] }
 0x885   :  { %11121 = vmatprep.subr.bf16.mxu0 %v11101_v22  ;;  %11162 = vmatprep.subr.bf16.mxu1 %v11103_v33 }
 0x886   :  { %v9611_v36 = vpop.f32.mrb[24].mxu0  ;;  %v9652_v34 = vpop.f32.mrb[24].mxu1  ;;  %11151 = vmatprep.mubr.bf16.mxu0 %v13850_v35  ;;  %11192 = vmatprep.mubr.bf16.mxu1 %v13850_v35 }
 0x887   :  { %v9659_v39 = vadd.f32 %v9611_v36, %v9548_v29  ;;  %v9661_v40 = vadd.f32 %v9652_v34, %v9550_v12  ;;  %v9613_v41 = vpop.f32.mrb[25].mxu0  ;;  %v9654_v42 = vpop.f32.mrb[25].mxu1 }
 0x888   :  { %v9660_v45 = vadd.f32 %v9613_v41, %v9549_v48  ;;  %v9662_v0 = vadd.f32 %v9654_v42, %v9551_v7  ;;  %v9615_v46 = vpop.f32.mrb[26].mxu0  ;;  %v9656_v47 = vpop.f32.mrb[26].mxu1  ;;  %11122 = vmatpush1.bf16.msra.mxu0 %v11100_v18  ;;  %11163 = vmatpush1.bf16.msra.mxu1 %v11102_v3  ;;  %v11323_v18 = vld [vmem:[#allocation2 + $0x10c8] sm:$0xff]  ;;  %v11325_v3 = vld [vmem:[#allocation2 + $0x10d8] sm:$0xff] }
 0x889   :  { %v9616_v49 = vpop.f32.mrb[27].mxu0  ;;  %v9657_v32 = vpop.f32.mrb[27].mxu1  ;;  %11123 = vmatprep.subr.bf16.mxu0 %v11105_v37  ;;  %11164 = vmatprep.subr.bf16.mxu1 %v11107_v26  ;;  %v11322_v46 = vld [vmem:[#allocation2 + $0x10c0] sm:$0xff]  ;;  %v11324_v47 = vld [vmem:[#allocation2 + $0x10d0] sm:$0xff] }
 0x88a   :  { %v11327_v49 = vld [vmem:[#allocation2 + $0x10e8] sm:$0xff]  ;;  %v11329_v32 = vld [vmem:[#allocation2 + $0x10f8] sm:$0xff] }
 0x88c   :  { %11124 = vmatpush1.bf16.msra.mxu0 %v11104_v50  ;;  %11165 = vmatpush1.bf16.msra.mxu1 %v11106_v52  ;;  %v13779_v50 = vld [vmem:[#allocation3 + $0x20] ss:$0 sps:$4 sm:$0x22]  }
 0x88d   :  { %11125 = vmatprep.subr.bf16.mxu0 %v11109_v53  ;;  %11166 = vmatprep.subr.bf16.mxu1 %v11111_v54  ;;  %v11326_v52 = vld [vmem:[#allocation2 + $0x10e0] sm:$0xff]  ;;  %v11328_v53 = vld [vmem:[#allocation2 + $0x10f0] sm:$0xff]  ;;  %v11426_v54 = vld [vmem:[#allocation2 + $0x1108] sm:$0xff] }
 0x890   :  { %11126 = vmatpush1.bf16.msra.mxu0 %v11108_v57  ;;  %11167 = vmatpush1.bf16.msra.mxu1 %v11110_v38  ;;  %v11333_v57 = vrot.slane %v13779_v50, 1  ;;  %v11425_v38 = vld [vmem:[#allocation2 + $0x1100] sm:$0xff] }
 0x891   :  { %11226 = vmatprep.subr.bf16.mxu0 %v11208_v51  ;;  %11267 = vmatprep.subr.bf16.mxu1 %v11210_v59  ;;  %v11427_v51 = vld [vmem:[#allocation2 + $0x1110] sm:$0xff]  ;;  %v11430_v59 = vld [vmem:[#allocation2 + $0x1128] sm:$0xff] }
 0x893   :  { %12557 = vmatmul.mubr.msk.bf16.vlgmr.msra.gmra.mrb[80].mxu0 %vm5710_vm1, %v11115_v60  ;;  %12558 = vmatmul.mubr.msk.bf16.vlgmr.msra.gmra.mrb[80].mxu1 %vm5710_vm1, %v11115_v60  ;;  %v11432_v60 = vld [vmem:[#allocation2 + $0x1138] sm:$0xff] }
 0x894   :  { %11227 = vmatpush1.bf16.msra.mxu0 %v11207_v61  ;;  %11268 = vmatpush1.bf16.msra.mxu1 %v11209_v63  ;;  %v11429_v61 = vld [vmem:[#allocation2 + $0x1120] sm:$0xff]  ;;  %v11431_v63 = vld [vmem:[#allocation2 + $0x1130] sm:$0xff] }
 0x895   :  { %11228 = vmatprep.subr.bf16.mxu0 %v11212_v43  ;;  %11269 = vmatprep.subr.bf16.mxu1 %v11214_v4 }
 0x896   :  { %v9722_v6 = vpop.f32.mrb[28].mxu0  ;;  %v9763_v8 = vpop.f32.mrb[28].mxu1  ;;  %11258 = vmatprep.mubr.bf16.mxu0 %v13850_v35  ;;  %11299 = vmatprep.mubr.bf16.mxu1 %v13850_v35 }
 0x897   :  { %v9770_v10 = vadd.f32 %v9722_v6, %v9659_v39  ;;  %v9772_v11 = vadd.f32 %v9763_v8, %v9661_v40  ;;  %v9724_v62 = vpop.f32.mrb[29].mxu0  ;;  %v9765_v29 = vpop.f32.mrb[29].mxu1 }
 0x898   :  { %v9771_v12 = vadd.f32 %v9724_v62, %v9660_v45  ;;  %v9773_v13 = vadd.f32 %v9765_v29, %v9662_v0  ;;  %v9726_v14 = vpop.f32.mrb[30].mxu0  ;;  %v9767_v48 = vpop.f32.mrb[30].mxu1  ;;  %11229 = vmatpush1.bf16.msra.mxu0 %v11211_v56  ;;  %11270 = vmatpush1.bf16.msra.mxu1 %v11213_v58  ;;  %v11434_v56 = vld [vmem:[#allocation2 + $0x1148] sm:$0xff]  ;;  %v11436_v58 = vld [vmem:[#allocation2 + $0x1158] sm:$0xff] }
 0x899   :  { %v9727_v7 = vpop.f32.mrb[31].mxu0  ;;  %v9768_v15 = vpop.f32.mrb[31].mxu1  ;;  %11230 = vmatprep.subr.bf16.mxu0 %v11216_v2  ;;  %11271 = vmatprep.subr.bf16.mxu1 %v11218_v9  ;;  %v11433_v14 = vld [vmem:[#allocation2 + $0x1140] sm:$0xff]  ;;  %v11435_v48 = vld [vmem:[#allocation2 + $0x1150] sm:$0xff] }
 0x89a   :  { %v11438_v7 = vld [vmem:[#allocation2 + $0x1168] sm:$0xff]  ;;  %v11440_v15 = vld [vmem:[#allocation2 + $0x1178] sm:$0xff] }
 0x89c   :  { %11231 = vmatpush1.bf16.msra.mxu0 %v11215_v16  ;;  %11272 = vmatpush1.bf16.msra.mxu1 %v11217_v17  ;;  %v13780_v16 = vld [vmem:[#allocation3 + $0x20] ss:$0 sps:$4 sm:$0x44]  }
 0x89d   :  { %11232 = vmatprep.subr.bf16.mxu0 %v11220_v5  ;;  %11273 = vmatprep.subr.bf16.mxu1 %v11222_v24  ;;  %v11437_v17 = vld [vmem:[#allocation2 + $0x1160] sm:$0xff]  ;;  %v11439_v5 = vld [vmem:[#allocation2 + $0x1170] sm:$0xff]  ;;  %v11537_v24 = vld [vmem:[#allocation2 + $0x1188] sm:$0xff] }
 0x8a0   :  { %11233 = vmatpush1.bf16.msra.mxu0 %v11219_v20  ;;  %11274 = vmatpush1.bf16.msra.mxu1 %v11221_v44  ;;  %v11539_v20 = vld [vmem:[#allocation2 + $0x1198] sm:$0xff]  ;;  %v11444_v44 = vrot.slane %v13780_v16, 2 }
 0x8a1   :  { %11337 = vmatprep.subr.bf16.mxu0 %v11315_v21  ;;  %11378 = vmatprep.subr.bf16.mxu1 %v11317_v19  ;;  %v11536_v21 = vld [vmem:[#allocation2 + $0x1180] sm:$0xff]  ;;  %v11538_v19 = vld [vmem:[#allocation2 + $0x1190] sm:$0xff] }
 0x8a3   :  { %12559 = vmatmul.mubr.msk.bf16.vlgmr.msra.gmra.mrb[84].mxu0 %vm5710_vm1, %v11205_v25  ;;  %12560 = vmatmul.mubr.msk.bf16.vlgmr.msra.gmra.mrb[84].mxu1 %vm5710_vm1, %v11205_v25  ;;  %v11541_v25 = vld [vmem:[#allocation2 + $0x11a8] sm:$0xff] }
 0x8a4   :  { %11338 = vmatpush1.bf16.msra.mxu0 %v11314_v27  ;;  %11379 = vmatpush1.bf16.msra.mxu1 %v11316_v1  ;;  %v11543_v27 = vld [vmem:[#allocation2 + $0x11b8] sm:$0xff]  ;;  %v11540_v1 = vld [vmem:[#allocation2 + $0x11a0] sm:$0xff] }
 0x8a5   :  { %11339 = vmatprep.subr.bf16.mxu0 %v11319_v28  ;;  %11380 = vmatprep.subr.bf16.mxu1 %v11321_v23  ;;  %v11542_v28 = vld [vmem:[#allocation2 + $0x11b0] sm:$0xff] }
 0x8a6   :  { %v9833_v22 = vpop.f32.mrb[32].mxu0  ;;  %v9874_v33 = vpop.f32.mrb[32].mxu1  ;;  %11369 = vmatprep.mubr.bf16.mxu0 %v13850_v35  ;;  %11410 = vmatprep.mubr.bf16.mxu1 %v13850_v35 }
 0x8a7   :  { %v9881_v36 = vadd.f32 %v9833_v22, %v9770_v10  ;;  %v9883_v34 = vadd.f32 %v9874_v33, %v9772_v11  ;;  %v9835_v37 = vpop.f32.mrb[33].mxu0  ;;  %v9876_v26 = vpop.f32.mrb[33].mxu1  ;;  %v11547_v22 = vld [vmem:[#allocation2 + $0x11d8] sm:$0xff] }
 0x8a8   :  { %v9882_v39 = vadd.f32 %v9835_v37, %v9771_v12  ;;  %v9884_v40 = vadd.f32 %v9876_v26, %v9773_v13  ;;  %v9837_v41 = vpop.f32.mrb[34].mxu0  ;;  %v9878_v42 = vpop.f32.mrb[34].mxu1  ;;  %11340 = vmatpush1.bf16.msra.mxu0 %v11318_v30  ;;  %11381 = vmatpush1.bf16.msra.mxu1 %v11320_v31  ;;  %v11545_v31 = vld [vmem:[#allocation2 + $0x11c8] sm:$0xff] }
 0x8a9   :  { %v9838_v45 = vpop.f32.mrb[35].mxu0  ;;  %v9879_v0 = vpop.f32.mrb[35].mxu1  ;;  %11341 = vmatprep.subr.bf16.mxu0 %v11323_v18  ;;  %11382 = vmatprep.subr.bf16.mxu1 %v11325_v3  ;;  %v11544_v42 = vld [vmem:[#allocation2 + $0x11c0] sm:$0xff] }
 0x8aa   :  { %v11546_v45 = vld [vmem:[#allocation2 + $0x11d0] sm:$0xff]  ;;  %v11549_v0 = vld [vmem:[#allocation2 + $0x11e8] sm:$0xff] }
 0x8ac   :  { %11342 = vmatpush1.bf16.msra.mxu0 %v11322_v46  ;;  %11383 = vmatpush1.bf16.msra.mxu1 %v11324_v47  ;;  %v11551_v46 = vld [vmem:[#allocation2 + $0x11f8] sm:$0xff]  ;;  %v13781_v47 = vld [vmem:[#allocation3 + $0x20] ss:$0 sps:$4 sm:$0x88]  }
 0x8ad   :  { %11343 = vmatprep.subr.bf16.mxu0 %v11327_v49  ;;  %11384 = vmatprep.subr.bf16.mxu1 %v11329_v32  ;;  %v11550_v49 = vld [vmem:[#allocation2 + $0x11f0] sm:$0xff]  ;;  %v11555_v32 = vrot.slane %v13781_v47, 3 }
 0x8b0   :  { %11344 = vmatpush1.bf16.msra.mxu0 %v11326_v52  ;;  %11385 = vmatpush1.bf16.msra.mxu1 %v11328_v53 }
 0x8b1   :  { %11448 = vmatprep.subr.bf16.mxu0 %v11426_v54  ;;  %11489 = vmatprep.subr.bf16.mxu1 %v11428_v55 }
 0x8b3   :  { %12562 = vmatmul.mubr.msk.bf16.vlgmr.msra.gmra.mrb[88].mxu0 %vm5710_vm1, %v11333_v57  ;;  %12563 = vmatmul.mubr.msk.bf16.vlgmr.msra.gmra.mrb[88].mxu1 %vm5710_vm1, %v11333_v57 }
 0x8b4   :  { %11449 = vmatpush1.bf16.msra.mxu0 %v11425_v38  ;;  %11490 = vmatpush1.bf16.msra.mxu1 %v11427_v51 }
 0x8b5   :  { %11450 = vmatprep.subr.bf16.mxu0 %v11430_v59  ;;  %11491 = vmatprep.subr.bf16.mxu1 %v11432_v60 }
 0x8b6   :  { %v9940_v43 = vpop.f32.mrb[36].mxu0  ;;  %v9981_v4 = vpop.f32.mrb[36].mxu1  ;;  %11480 = vmatprep.mubr.bf16.mxu0 %v13850_v35  ;;  %11521 = vmatprep.mubr.bf16.mxu1 %v13850_v35 }
 0x8b7   :  { %v9988_v6 = vadd.f32 %v9940_v43, %v9881_v36  ;;  %v9990_v8 = vadd.f32 %v9981_v4, %v9883_v34  ;;  %v9942_v2 = vpop.f32.mrb[37].mxu0  ;;  %v9983_v9 = vpop.f32.mrb[37].mxu1 }
 0x8b8   :  { %v9989_v10 = vadd.f32 %v9942_v2, %v9882_v39  ;;  %v9991_v11 = vadd.f32 %v9983_v9, %v9884_v40  ;;  %v9944_v62 = vpop.f32.mrb[38].mxu0  ;;  %v9985_v29 = vpop.f32.mrb[38].mxu1  ;;  %11451 = vmatpush1.bf16.msra.mxu0 %v11429_v61  ;;  %11492 = vmatpush1.bf16.msra.mxu1 %v11431_v63 }
 0x8b9   :  { %v9945_v12 = vpop.f32.mrb[39].mxu0  ;;  %v9986_v13 = vpop.f32.mrb[39].mxu1  ;;  %11452 = vmatprep.subr.bf16.mxu0 %v11434_v56  ;;  %11493 = vmatprep.subr.bf16.mxu1 %v11436_v58 }
 0x8bc   :  { %11453 = vmatpush1.bf16.msra.mxu0 %v11433_v14  ;;  %11494 = vmatpush1.bf16.msra.mxu1 %v11435_v48 }
 0x8bd   :  { %11454 = vmatprep.subr.bf16.mxu0 %v11438_v7  ;;  %11495 = vmatprep.subr.bf16.mxu1 %v11440_v15 }
 0x8c0   :  { %11455 = vmatpush1.bf16.msra.mxu0 %v11437_v17  ;;  %11496 = vmatpush1.bf16.msra.mxu1 %v11439_v5 }
 0x8c1   :  { %11559 = vmatprep.subr.bf16.mxu0 %v11537_v24  ;;  %11600 = vmatprep.subr.bf16.mxu1 %v11539_v20 }
 0x8c3   :  { %12565 = vmatmul.mubr.msk.bf16.vlgmr.msra.gmra.mrb[92].mxu0 %vm5710_vm1, %v11444_v44  ;;  %12566 = vmatmul.mubr.msk.bf16.vlgmr.msra.gmra.mrb[92].mxu1 %vm5710_vm1, %v11444_v44 }
 0x8c4   :  { %11560 = vmatpush1.bf16.msra.mxu0 %v11536_v21  ;;  %11601 = vmatpush1.bf16.msra.mxu1 %v11538_v19 }
 0x8c5   :  { %11561 = vmatprep.subr.bf16.mxu0 %v11541_v25  ;;  %11602 = vmatprep.subr.bf16.mxu1 %v11543_v27 }
 0x8c6   :  { %v10051_v23 = vpop.f32.mrb[40].mxu0  ;;  %v10092_v30 = vpop.f32.mrb[40].mxu1  ;;  %11591 = vmatprep.mubr.bf16.mxu0 %v13850_v35  ;;  %11632 = vmatprep.mubr.bf16.mxu1 %v13850_v35  ;;  %v11548_v35 = vld [vmem:[#allocation2 + $0x11e0] sm:$0xff] }
 0x8c7   :  { %v10099_v33 = vadd.f32 %v10051_v23, %v9988_v6  ;;  %v10101_v18 = vadd.f32 %v10092_v30, %v9990_v8  ;;  %v10053_v3 = vpop.f32.mrb[41].mxu0  ;;  %v10094_v36 = vpop.f32.mrb[41].mxu1 }
 0x8c8   :  { %v10100_v34 = vadd.f32 %v10053_v3, %v9989_v10  ;;  %v10102_v37 = vadd.f32 %v10094_v36, %v9991_v11  ;;  %v10055_v26 = vpop.f32.mrb[42].mxu0  ;;  %v10096_v39 = vpop.f32.mrb[42].mxu1  ;;  %11562 = vmatpush1.bf16.msra.mxu0 %v11540_v1  ;;  %11603 = vmatpush1.bf16.msra.mxu1 %v11542_v28  ;;  %v13782_v3 = vld [vmem:[%s16285_s8 + $0x40] sm:$0xff]  }
 0x8c9   :  { %v10056_v40 = vpop.f32.mrb[43].mxu0  ;;  %v10097_v41 = vpop.f32.mrb[43].mxu1  ;;  %11563 = vmatprep.subr.bf16.mxu0 %v11545_v31  ;;  %11604 = vmatprep.subr.bf16.mxu1 %v11547_v22  ;;  %v13783_v36 = vld [vmem:[%s16285_s8 + $0xc0] sm:$0xff]   ;;  %v13786_v26 = vld [vmem:[%s16285_s8 + $0x48] sm:$0xff]  }
 0x8ca   :  { %v13787_v39 = vld [vmem:[%s16285_s8 + $0xc8] sm:$0xff]  }
 0x8cb   :  { %v13788_v40 = vld [vmem:[%s16285_s8 + $0x8] sm:$0xff]  }
 0x8cc   :  { %11564 = vmatpush1.bf16.msra.mxu0 %v11544_v42  ;;  %11605 = vmatpush1.bf16.msra.mxu1 %v11546_v45  ;;  %v13789_v41 = vld [vmem:[%s16285_s8 + $0x88] sm:$0xff]  }
 0x8cd   :  { %11565 = vmatprep.subr.bf16.mxu0 %v11549_v0  ;;  %11606 = vmatprep.subr.bf16.mxu1 %v11551_v46 }
 0x8d0   :  { %11566 = vmatpush1.bf16.msra.mxu0 %v11548_v35  ;;  %11607 = vmatpush1.bf16.msra.mxu1 %v11550_v49  ;;  %v13790_v49 = vld [vmem:[%s16285_s8 + $0x50] sm:$0xff]  }
 0x8d1   :  { %12939 = vmatprep.subr.bf16.mxu0 %v13782_v3  ;;  %12961 = vmatprep.subr.bf16.mxu1 %v13783_v36 }
 0x8d3   :  { %12568 = vmatmul.mubr.msk.bf16.vlgmr.msra.gmra.mrb[96].mxu0 %vm5710_vm1, %v11555_v32  ;;  %12569 = vmatmul.mubr.msk.bf16.vlgmr.msra.gmra.mrb[96].mxu1 %vm5710_vm1, %v11555_v32  ;;  %v13791_v32 = vld [vmem:[%s16285_s8 + $0xd0] sm:$0xff]  }
 0x8d6   :  { %v10162_v50 = vpop.f32.mrb[44].mxu0  ;;  %v10203_v52 = vpop.f32.mrb[44].mxu1 }
 0x8d7   :  { %v10210_v53 = vadd.f32 %v10162_v50, %v10099_v33  ;;  %v10212_v54 = vadd.f32 %v10203_v52, %v10101_v18  ;;  %v10164_v55 = vpop.f32.mrb[45].mxu0  ;;  %v10205_v57 = vpop.f32.mrb[45].mxu1 }
 0x8d8   :  { %v10211_v38 = vadd.f32 %v10164_v55, %v10100_v34  ;;  %v10213_v51 = vadd.f32 %v10205_v57, %v10102_v37  ;;  %v10166_v59 = vpop.f32.mrb[46].mxu0  ;;  %v10207_v60 = vpop.f32.mrb[46].mxu1  ;;  %v13784_v34 = vld [vmem:[%s16285_s8] sm:$0xff]   ;;  %v13792_v55 = vld [vmem:[%s16285_s8 + $0x10] sm:$0xff]  }
 0x8d9   :  { %v10167_v61 = vpop.f32.mrb[47].mxu0  ;;  %v10208_v63 = vpop.f32.mrb[47].mxu1  ;;  %v13785_v37 = vld [vmem:[%s16285_s8 + $0x80] sm:$0xff]   ;;  %12940 = vmatpush3.bf16.msra.mxu0 %v13784_v34  ;;  %v13793_v57 = vld [vmem:[%s16285_s8 + $0x90] sm:$0xff]   ;;  %v13794_v59 = vld [vmem:[%s16285_s8 + $0x58] sm:$0xff]  }
 0x8da   :  { %12962 = vmatpush3.bf16.msra.mxu1 %v13785_v37  ;;  %12941 = vmatprep.subr.bf16.mxu0 %v13786_v26  ;;  %v13795_v60 = vld [vmem:[%s16285_s8 + $0xd8] sm:$0xff]  }
 0x8db   :  { %12963 = vmatprep.subr.bf16.mxu1 %v13787_v39  ;;  %v13796_v61 = vld [vmem:[%s16285_s8 + $0x18] sm:$0xff]  }
 0x8dc   :  { %v13797_v63 = vld [vmem:[%s16285_s8 + $0x98] sm:$0xff]  }
 0x8dd   :  { %12942 = vmatpush3.bf16.msra.mxu0 %v13788_v40 }
 0x8de   :  { %12964 = vmatpush3.bf16.msra.mxu1 %v13789_v41  ;;  %12943 = vmatprep.subr.bf16.mxu0 %v13790_v49 }
 0x8df   :  { %12965 = vmatprep.subr.bf16.mxu1 %v13791_v32 }
 0x8e1   :  { %12944 = vmatpush3.bf16.msra.mxu0 %v13792_v55 }
 0x8e2   :  { %12966 = vmatpush3.bf16.msra.mxu1 %v13793_v57  ;;  %12945 = vmatprep.subr.bf16.mxu0 %v13794_v59 }
 0x8e3   :  { %12967 = vmatprep.subr.bf16.mxu1 %v13795_v60 }
 0x8e5   :  { %12946 = vmatpush3.bf16.msra.mxu0 %v13796_v61 }
 0x8e6   :  { %v10273_v43 = vpop.f32.mrb[48].mxu0  ;;  %v10314_v4 = vpop.f32.mrb[48].mxu1  ;;  %12968 = vmatpush3.bf16.msra.mxu1 %v13797_v63 }
 0x8e7   :  { %v10321_v56 = vadd.f32 %v10273_v43, %v10210_v53  ;;  %v10323_v58 = vadd.f32 %v10314_v4, %v10212_v54  ;;  %v10275_v6 = vpop.f32.mrb[49].mxu0  ;;  %v10316_v8 = vpop.f32.mrb[49].mxu1  ;;  %v13798_v43 = vld [vmem:[%s16285_s8 + $0x60] sm:$0xff]  }
 0x8e8   :  { %v10322_v2 = vadd.f32 %v10275_v6, %v10211_v38  ;;  %v10324_v9 = vadd.f32 %v10316_v8, %v10213_v51  ;;  %v10277_v10 = vpop.f32.mrb[50].mxu0  ;;  %v10318_v11 = vpop.f32.mrb[50].mxu1  ;;  %v13799_v4 = vld [vmem:[%s16285_s8 + $0xe0] sm:$0xff]   ;;  %12947 = vmatprep.subr.bf16.mxu0 %v13798_v43  ;;  %v13802_v6 = vld [vmem:[%s16285_s8 + $0x68] sm:$0xff]  }
 0x8e9   :  { %v10278_v62 = vpop.f32.mrb[51].mxu0  ;;  %v10319_v29 = vpop.f32.mrb[51].mxu1  ;;  %12969 = vmatprep.subr.bf16.mxu1 %v13799_v4  ;;  %v13803_v8 = vld [vmem:[%s16285_s8 + $0xe8] sm:$0xff]  }
 0x8f6   :  { %v10380_v12 = vpop.f32.mrb[52].mxu0  ;;  %v10421_v13 = vpop.f32.mrb[52].mxu1 }
 0x8f7   :  { %v10428_v14 = vadd.f32 %v10380_v12, %v10321_v56  ;;  %v10430_v48 = vadd.f32 %v10421_v13, %v10323_v58  ;;  %v10382_v7 = vpop.f32.mrb[53].mxu0  ;;  %v10423_v15 = vpop.f32.mrb[53].mxu1  ;;  %v13800_v56 = vld [vmem:[%s16285_s8 + $0x20] sm:$0xff]  }
 0x8f8   :  { %v10429_v16 = vadd.f32 %v10382_v7, %v10322_v2  ;;  %v10431_v17 = vadd.f32 %v10423_v15, %v10324_v9  ;;  %v10384_v5 = vpop.f32.mrb[54].mxu0  ;;  %v10425_v24 = vpop.f32.mrb[54].mxu1  ;;  %v13801_v58 = vld [vmem:[%s16285_s8 + $0xa0] sm:$0xff]   ;;  %12948 = vmatpush3.bf16.msra.mxu0 %v13800_v56  ;;  %v13804_v2 = vld [vmem:[%s16285_s8 + $0x28] sm:$0xff]  }
 0x8f9   :  { %v10385_v20 = vpop.f32.mrb[55].mxu0  ;;  %v10426_v44 = vpop.f32.mrb[55].mxu1  ;;  %12970 = vmatpush3.bf16.msra.mxu1 %v13801_v58  ;;  %12949 = vmatprep.subr.bf16.mxu0 %v13802_v6  ;;  %v13805_v9 = vld [vmem:[%s16285_s8 + $0xa8] sm:$0xff]   ;;  %v13808_v5 = vld [vmem:[%s16285_s8 + $0x30] sm:$0xff]  }
 0x8fa   :  { %12971 = vmatprep.subr.bf16.mxu1 %v13803_v8  ;;  %v13809_v24 = vld [vmem:[%s16285_s8 + $0xb0] sm:$0xff]  }
 0x8fc   :  { %12950 = vmatpush3.bf16.msra.mxu0 %v13804_v2 }
 0x8fd   :  { %12972 = vmatpush3.bf16.msra.mxu1 %v13805_v9 }
 0x906   :  { %v10491_v21 = vpop.f32.mrb[56].mxu0  ;;  %v10532_v19 = vpop.f32.mrb[56].mxu1 }
 0x907   :  { %v10539_v25 = vadd.f32 %v10491_v21, %v10428_v14  ;;  %v10541_v27 = vadd.f32 %v10532_v19, %v10430_v48  ;;  %v10493_v1 = vpop.f32.mrb[57].mxu0  ;;  %v10534_v28 = vpop.f32.mrb[57].mxu1  ;;  %v13806_v14 = vld [vmem:[%s16285_s8 + $0x70] sm:$0xff]   ;;  %v13810_v21 = vld [vmem:[%s16285_s8 + $0x78] sm:$0xff]  }
 0x908   :  { %v10540_v23 = vadd.f32 %v10493_v1, %v10429_v16  ;;  %v10542_v30 = vadd.f32 %v10534_v28, %v10431_v17  ;;  %v10495_v31 = vpop.f32.mrb[58].mxu0  ;;  %v10536_v22 = vpop.f32.mrb[58].mxu1  ;;  %v13807_v48 = vld [vmem:[%s16285_s8 + $0xf0] sm:$0xff]   ;;  %12951 = vmatprep.subr.bf16.mxu0 %v13806_v14  ;;  %v13811_v19 = vld [vmem:[%s16285_s8 + $0xf8] sm:$0xff]  }
 0x909   :  { %v10496_v33 = vpop.f32.mrb[59].mxu0  ;;  %v10537_v18 = vpop.f32.mrb[59].mxu1  ;;  %12973 = vmatprep.subr.bf16.mxu1 %v13807_v48  ;;  %12952 = vmatpush3.bf16.msra.mxu0 %v13808_v5 }
 0x90a   :  { %12974 = vmatpush3.bf16.msra.mxu1 %v13809_v24  ;;  %12953 = vmatprep.subr.bf16.mxu0 %v13810_v21 }
 0x90b   :  { %12975 = vmatprep.subr.bf16.mxu1 %v13811_v19 }
 0x916   :  { %v10602_v42 = vpop.f32.mrb[60].mxu0  ;;  %v10643_v45 = vpop.f32.mrb[60].mxu1 }
 0x917   :  { %v10650_v0 = vadd.f32 %v10602_v42, %v10539_v25  ;;  %v10652_v46 = vadd.f32 %v10643_v45, %v10541_v27  ;;  %v10604_v47 = vpop.f32.mrb[61].mxu0  ;;  %v10645_v35 = vpop.f32.mrb[61].mxu1  ;;  %v13812_v25 = vld [vmem:[%s16285_s8 + $0x38] sm:$0xff]  }
 0x918   :  { %v10651_v50 = vadd.f32 %v10604_v47, %v10540_v23  ;;  %v10653_v52 = vadd.f32 %v10645_v35, %v10542_v30  ;;  %v10606_v53 = vpop.f32.mrb[62].mxu0  ;;  %v10647_v54 = vpop.f32.mrb[62].mxu1  ;;  %v13813_v27 = vld [vmem:[%s16285_s8 + $0xb8] sm:$0xff]   ;;  %12954 = vmatpush3.bf16.msra.mxu0 %v13812_v25 }
 0x919   :  { %v10607_v38 = vpop.f32.mrb[63].mxu0  ;;  %v10648_v51 = vpop.f32.mrb[63].mxu1  ;;  %12976 = vmatpush3.bf16.msra.mxu1 %v13813_v27 }
 0x926   :  { %v10713_v10 = vpop.f32.mrb[64].mxu0  ;;  %v10754_v11 = vpop.f32.mrb[64].mxu1 }
 0x927   :  { %v10761_v62 = vadd.f32 %v10713_v10, %v10650_v0  ;;  %v10763_v29 = vadd.f32 %v10754_v11, %v10652_v46  ;;  %v10715_v12 = vpop.f32.mrb[65].mxu0  ;;  %v10756_v13 = vpop.f32.mrb[65].mxu1 }
 0x928   :  { %v10762_v7 = vadd.f32 %v10715_v12, %v10651_v50  ;;  %v10764_v15 = vadd.f32 %v10756_v13, %v10653_v52  ;;  %v10717_v16 = vpop.f32.mrb[66].mxu0  ;;  %v10758_v17 = vpop.f32.mrb[66].mxu1 }
 0x929   :  { %v10718_v20 = vpop.f32.mrb[67].mxu0  ;;  %v10759_v44 = vpop.f32.mrb[67].mxu1 }
 0x936   :  { %v10820_v1 = vpop.f32.mrb[68].mxu0  ;;  %v10861_v28 = vpop.f32.mrb[68].mxu1 }
 0x937   :  { %v10868_v23 = vadd.f32 %v10820_v1, %v10761_v62  ;;  %v10870_v30 = vadd.f32 %v10861_v28, %v10763_v29  ;;  %v10822_v31 = vpop.f32.mrb[69].mxu0  ;;  %v10863_v22 = vpop.f32.mrb[69].mxu1 }
 0x938   :  { %v10869_v33 = vadd.f32 %v10822_v31, %v10762_v7  ;;  %v10871_v18 = vadd.f32 %v10863_v22, %v10764_v15  ;;  %v10824_v3 = vpop.f32.mrb[70].mxu0  ;;  %v10865_v36 = vpop.f32.mrb[70].mxu1 }
 0x939   :  { %v10825_v34 = vpop.f32.mrb[71].mxu0  ;;  %v10866_v37 = vpop.f32.mrb[71].mxu1 }
 0x946   :  { %v10931_v26 = vpop.f32.mrb[72].mxu0  ;;  %v10972_v39 = vpop.f32.mrb[72].mxu1 }
 0x947   :  { %v10979_v40 = vadd.f32 %v10931_v26, %v10868_v23  ;;  %v10981_v41 = vadd.f32 %v10972_v39, %v10870_v30  ;;  %v10933_v42 = vpop.f32.mrb[73].mxu0  ;;  %v10974_v45 = vpop.f32.mrb[73].mxu1 }
 0x948   :  { %v10980_v0 = vadd.f32 %v10933_v42, %v10869_v33  ;;  %v10982_v46 = vadd.f32 %v10974_v45, %v10871_v18  ;;  %v10935_v47 = vpop.f32.mrb[74].mxu0  ;;  %v10976_v35 = vpop.f32.mrb[74].mxu1 }
 0x949   :  { %v10936_v49 = vpop.f32.mrb[75].mxu0  ;;  %v10977_v32 = vpop.f32.mrb[75].mxu1  ;;  %v11647_v47 = vlaneseq }
 0x94b   :  { %v11648_v35 = vshrl.u32 %v11647_v47, 7 }
 0x94d   :  { %v11649_v49 = vsub.s32 0, %v11648_v35  ;;  %v11657_v32 = vsub.s32 2, %v11648_v35 }
 0x956   :  { %v11042_v50 = vpop.f32.mrb[76].mxu0  ;;  %v11083_v52 = vpop.f32.mrb[76].mxu1 }
 0x957   :  { %v11090_v53 = vadd.f32 %v11042_v50, %v10979_v40  ;;  %v11092_v54 = vadd.f32 %v11083_v52, %v10981_v41  ;;  %v11044_v55 = vpop.f32.mrb[77].mxu0  ;;  %v11085_v57 = vpop.f32.mrb[77].mxu1  ;;  %v11645_v50 = vld [vmem:[%s16284_s7] sm:$0xf]  ;;  %v11653_v52 = vsub.s32 1, %v11648_v35 }
 0x958   :  { %v11091_v38 = vadd.f32 %v11044_v55, %v10980_v0  ;;  %v11093_v51 = vadd.f32 %v11085_v57, %v10982_v46  ;;  %v11046_v59 = vpop.f32.mrb[78].mxu0  ;;  %v11087_v60 = vpop.f32.mrb[78].mxu1  ;;  %v11658_v55 = vrot.slane %v11645_v50, %v11657_v32 }
 0x959   :  { %v11047_v61 = vpop.f32.mrb[79].mxu0  ;;  %v11088_v63 = vpop.f32.mrb[79].mxu1 }
 0x966   :  { %v11153_v43 = vpop.f32.mrb[80].mxu0  ;;  %v11194_v4 = vpop.f32.mrb[80].mxu1 }
 0x967   :  { %v11201_v56 = vadd.f32 %v11153_v43, %v11090_v53  ;;  %v11203_v58 = vadd.f32 %v11194_v4, %v11092_v54  ;;  %v11155_v6 = vpop.f32.mrb[81].mxu0  ;;  %v11196_v8 = vpop.f32.mrb[81].mxu1  ;;  %v11661_v53 = vsub.s32 3, %v11648_v35  ;;  %v11650_v54 = vrot.slane %v11645_v50, %v11649_v49 }
 0x968   :  { %v11202_v2 = vadd.f32 %v11155_v6, %v11091_v38  ;;  %v11204_v9 = vadd.f32 %v11196_v8, %v11093_v51  ;;  %v11157_v10 = vpop.f32.mrb[82].mxu0  ;;  %v11198_v11 = vpop.f32.mrb[82].mxu1  ;;  %v11654_v51 = vrot.slane %v11645_v50, %v11653_v52 }
 0x969   :  { %v11158_v62 = vpop.f32.mrb[83].mxu0  ;;  %v11199_v29 = vpop.f32.mrb[83].mxu1  ;;  %v11662_v59 = vrot.slane %v11645_v50, %v11661_v53 }
 0x976   :  { %v11260_v12 = vpop.f32.mrb[84].mxu0  ;;  %v11301_v13 = vpop.f32.mrb[84].mxu1 }
 0x977   :  { %v11308_v14 = vadd.f32 %v11260_v12, %v11201_v56  ;;  %v11310_v48 = vadd.f32 %v11301_v13, %v11203_v58  ;;  %v11262_v7 = vpop.f32.mrb[85].mxu0  ;;  %v11303_v15 = vpop.f32.mrb[85].mxu1 }
 0x978   :  { %v11309_v16 = vadd.f32 %v11262_v7, %v11202_v2  ;;  %v11311_v17 = vadd.f32 %v11303_v15, %v11204_v9  ;;  %v11264_v5 = vpop.f32.mrb[86].mxu0  ;;  %v11305_v24 = vpop.f32.mrb[86].mxu1 }
 0x979   :  { %v11265_v20 = vpop.f32.mrb[87].mxu0  ;;  %v11306_v44 = vpop.f32.mrb[87].mxu1  ;;  %v12570_v24 = vld [vmem:[%s16286_s9] ss:$0 sm:$0xff] }
 0x986   :  { %v11371_v21 = vpop.f32.mrb[88].mxu0  ;;  %v11412_v19 = vpop.f32.mrb[88].mxu1 }
 0x987   :  { %v11419_v25 = vadd.f32 %v11371_v21, %v11308_v14  ;;  %v11421_v27 = vadd.f32 %v11412_v19, %v11310_v48  ;;  %v11373_v1 = vpop.f32.mrb[89].mxu0  ;;  %v11414_v28 = vpop.f32.mrb[89].mxu1 }
 0x988   :  { %v11420_v23 = vadd.f32 %v11373_v1, %v11309_v16  ;;  %v11422_v30 = vadd.f32 %v11414_v28, %v11311_v17  ;;  %v11375_v31 = vpop.f32.mrb[90].mxu0  ;;  %v11416_v22 = vpop.f32.mrb[90].mxu1 }
 0x989   :  { %v11376_v33 = vpop.f32.mrb[91].mxu0  ;;  %v11417_v18 = vpop.f32.mrb[91].mxu1 }
 0x996   :  { %v11482_v3 = vpop.f32.mrb[92].mxu0  ;;  %v11523_v36 = vpop.f32.mrb[92].mxu1 }
 0x997   :  { %v11530_v34 = vadd.f32 %v11482_v3, %v11419_v25  ;;  %v11532_v37 = vadd.f32 %v11523_v36, %v11421_v27  ;;  %v11484_v26 = vpop.f32.mrb[93].mxu0  ;;  %v11525_v39 = vpop.f32.mrb[93].mxu1 }
 0x998   :  { %v11531_v40 = vadd.f32 %v11484_v26, %v11420_v23  ;;  %v11533_v41 = vadd.f32 %v11525_v39, %v11422_v30  ;;  %v11486_v42 = vpop.f32.mrb[94].mxu0  ;;  %v11527_v45 = vpop.f32.mrb[94].mxu1 }
 0x999   :  { %v11487_v0 = vpop.f32.mrb[95].mxu0  ;;  %v11528_v46 = vpop.f32.mrb[95].mxu1 }
 0x9a6   :  { %v11593_v57 = vpop.f32.mrb[96].mxu0  ;;  %v11634_v38 = vpop.f32.mrb[96].mxu1 }
 0x9a7   :  { %v11641_v60 = vadd.f32 %v11593_v57, %v11530_v34  ;;  %v11643_v61 = vadd.f32 %v11634_v38, %v11532_v37  ;;  %v11595_v63 = vpop.f32.mrb[97].mxu0  ;;  %v11636_v43 = vpop.f32.mrb[97].mxu1 }
 0x9a8   :  { %v11642_v4 = vadd.f32 %v11595_v63, %v11531_v40  ;;  %v11644_v56 = vadd.f32 %v11636_v43, %v11533_v41  ;;  %v11597_v58 = vpop.f32.mrb[98].mxu0  ;;  %v11638_v6 = vpop.f32.mrb[98].mxu1 }
 0x9a9   :  { %v11667_v8 = vadd.f32 %v11650_v54, %v11641_v60  ;;  %v11669_v2 = vadd.f32 %v11658_v55, %v11643_v61  ;;  %v11598_v9 = vpop.f32.mrb[99].mxu0  ;;  %v11639_v10 = vpop.f32.mrb[99].mxu1 }
 0x9aa   :  { %v11668_v11 = vadd.f32 %v11654_v51, %v11642_v4  ;;  %v11670_v62 = vadd.f32 %v11662_v59, %v11644_v56 }
 0x9ab   :  { %v11671_v29 = vmax.f32 %v11667_v8, 0.0  ;;  %v11673_v12 = vmax.f32 %v11669_v2, 0.0 }
 0x9ac   :  { %v11672_v13 = vmax.f32 %v11668_v11, 0.0  ;;  %v11674_v14 = vmax.f32 %v11670_v62, 0.0 }
 0x9ad   :  { %v11675_v15 = vpack.c.bf16 %v11671_v29, %v11671_v29  ;;  %v11677_v16 = vpack.c.bf16 %v11673_v12, %v11673_v12 }
 0x9ae   :  { %v11676_v48 = vpack.c.bf16 %v11672_v13, %v11672_v13  ;;  %v11678_v7 = vpack.c.bf16 %v11674_v14, %v11674_v14 }
 0x9b0   :  { %11974 = vmatprep.mubr.bf16.mxu0 %v11676_v48  ;;  %12014 = vmatprep.mubr.bf16.mxu1 %v11678_v7 }
 0x9b1   :  { %11975 = vmatmul.mubr.bf16.vlgmr.msra.gmra.mrb[100].mxu0 %v11675_v15  ;;  %12015 = vmatmul.mubr.bf16.vlgmr.msra.gmra.mrb[100].mxu1 %v11677_v16 }
 0xa84   :  { %v12955_v17 = vpop.f32.mrb[100].mxu0  ;;  %v12977_v5 = vpop.f32.mrb[100].mxu1 }
 0xa85   :  { %v12956_v20 = vpop.f32.mrb[101].mxu0  ;;  %v12978_v44 = vpop.f32.mrb[101].mxu1 }
 0xa86   :  { %v12957_v21 = vadd.f32 %v12956_v20, %v12955_v17  ;;  %v12979_v19 = vadd.f32 %v12978_v44, %v12977_v5  ;;  %v12958_v25 = vpop.f32.mrb[102].mxu0  ;;  %v12980_v27 = vpop.f32.mrb[102].mxu1 }
 0xa87   :  { %v12959_v1 = vpop.f32.mrb[103].mxu0  ;;  %v12981_v28 = vpop.f32.mrb[103].mxu1 }
 0xa88   :  { %v11977_v23 = vadd.f32 %v12957_v21, %v12570_v24 }
 0xa8a   :  { %v12017_v30 = vadd.f32 %v12979_v19, %v11977_v23 }
 0xa8c   :  { %v12022_v31 = vmax.f32 %v12017_v30, 0.0 }
 0xa8e   :  { %12023 = vst [vmem:[%s16287_s10] sm:$0x3] %v12022_v31 }
 0xa8f   :  { %12028 = vsyncmov [#allocation4] }
 0xa92   :  { %s12029_s29 = vpop.sfrf %12028 }
 0xa93   :  { %p12603_p2 = scmp.ne.s32.totalorder %s12029_s29, 0 }
 0xa95   :  { %12033 = shalt.err (%p12603_p2)  }

</bundles_post_ra>
